<compile_context>
chip_gen: v7x
topology: tpu7x:2x2x1
jax: 0.10.0
libtpu: 0.0.40
codegen_flags: <defaults>
</compile_context>

<pallas_src>
import jax
import jax.numpy as jnp
from jax import lax
from jax.experimental import pallas as pl
from jax.experimental.pallas import tpu as pltpu


# ----------------------------------------------------------------------------
# Fused kernel: encoder -> dec init -> decoder+attention -> vocab scoring
# ----------------------------------------------------------------------------
def chatbot_kernel(x_ref, mask2_ref, attb_ref, y_ref, gold_ref, tmask_ref,
                   wih_fb_ref, b_fb_ref, whh_fb_ref,
                   winit_ref, watt_f_ref, watt_b_ref,
                   wih_y_ref, b_d_ref, wrec_ref, wcomb_ref, wv_ref,
                   out_ref,
                   gx_ref, encf_ref, encb_ref, gy_ref, comb_ref):
    L, B, E = x_ref.shape
    Tt = y_ref.shape[0]
    H = watt_f_ref.shape[1]
    H2, H3, H4, H8 = 2 * H, 3 * H, 4 * H, 8 * H
    V = wv_ref.shape[1]
    f32 = jnp.float32

    # ---- loop-carried weights loaded once ((in, out) layout, fused in wrapper)
    whh_fb = whh_fb_ref[...]      # (2H, 8H) block-diagonal fwd|bwd recurrent
    wrec = wrec_ref[...]          # (2H, 4H) decoder [o_prev ; h] recurrent
    wcomb = wcomb_ref[...]        # (3H, H)  combined-output projection

    # ---- hoisted input-to-hidden matmuls (one big matmul per weight) ----
    x2 = x_ref[...].reshape(L * B, E)
    gx_ref[...] = (jnp.dot(x2, wih_fb_ref[...], preferred_element_type=f32)
                   + b_fb_ref[...]).reshape(L, B, H8)
    y2 = y_ref[...].reshape(Tt * B, E)
    gy_ref[...] = (jnp.dot(y2, wih_y_ref[...], preferred_element_type=f32)
                   + b_d_ref[...]).reshape(Tt, B, H4)

    # ---- bidirectional encoder: fwd+bwd fused into ONE matmul per step ----
    def enc_body(t, carry):
        h_fb, c_f, c_b = carry                       # (B,2H), (B,H), (B,H)
        tb = L - 1 - t
        g = gx_ref[t] + jnp.dot(h_fb, whh_fb, preferred_element_type=f32)  # (B,8H)
        sg = jax.nn.sigmoid(g)                       # full-width once
        gf = jnp.tanh(g[:, H2:H3])                   # fwd g-gate
        gb = jnp.tanh(g[:, 6 * H:7 * H])             # bwd g-gate
        c_f_new = sg[:, H:H2] * c_f + sg[:, 0:H] * gf
        c_b_new = sg[:, 5 * H:6 * H] * c_b + sg[:, H4:5 * H] * gb
        h_f_new = sg[:, H3:H4] * jnp.tanh(c_f_new)
        h_b_new = sg[:, 7 * H:H8] * jnp.tanh(c_b_new)

        m2 = mask2_ref[t] != 0.0                     # (B,2H): [valid@t | valid@tb]
        m_f = m2[:, 0:H]
        m_b = m2[:, H:H2]
        encf_ref[t] = jnp.where(m_f, h_f_new, 0.0)   # pad positions -> 0 (pad_packed)
        encb_ref[tb] = jnp.where(m_b, h_b_new, 0.0)

        h_fb = jnp.where(m2, jnp.concatenate([h_f_new, h_b_new], axis=1), h_fb)
        c_f = jnp.where(m_f, c_f_new, c_f)
        c_b = jnp.where(m_b, c_b_new, c_b)
        return h_fb, c_f, c_b

    zH = jnp.zeros((B, H), f32)
    h_fb, c_f, c_b = lax.fori_loop(0, L, enc_body,
                                   (jnp.zeros((B, H2), f32), zH, zH),
                                   unroll=True)

    # ---- decoder init: ONE fused matmul over [h_f | h_b | c_f | c_b] ----
    hc = jnp.concatenate([h_fb, c_f, c_b], axis=1)                    # (B,4H)
    init = jnp.dot(hc, winit_ref[...], preferred_element_type=f32)    # (B,2H)
    h0 = init[:, 0:H]
    c0 = init[:, H:H2]

    # ---- attention projection of encoder states (one-time, time-major) ----
    enc_f = encf_ref[...]                                             # (L,B,H)
    enc_b = encb_ref[...]
    proj = (jnp.dot(enc_f.reshape(L * B, H), watt_f_ref[...],
                    preferred_element_type=f32)
            + jnp.dot(enc_b.reshape(L * B, H), watt_b_ref[...],
                      preferred_element_type=f32)).reshape(L, B, H)
    attb = attb_ref[...]                                              # (L,B,1) 0/-1e30

    # ---- decoder LSTMCell + Luong attention: ONE recurrent matmul / step ----
    def dec_body(t, carry):
        h, c, o_prev = carry
        oh = jnp.concatenate([o_prev, h], axis=1)                     # (B,2H)
        g = gy_ref[t] + jnp.dot(oh, wrec, preferred_element_type=f32)  # (B,4H)
        sg = jax.nn.sigmoid(g)
        gg = jnp.tanh(g[:, H2:H3])
        c_new = sg[:, H:H2] * c + sg[:, 0:H] * gg
        h_new = sg[:, H3:H4] * jnp.tanh(c_new)

        # attention scores + masked softmax over source positions (axis 0)
        e = jnp.sum(proj * h_new[None, :, :], axis=2, keepdims=True) + attb  # (L,B,1)
        e_max = jnp.max(e, axis=0, keepdims=True)
        p = jnp.exp(e - e_max)
        inv = pl.reciprocal(jnp.sum(p, axis=0, keepdims=True), approx=True)
        alpha = p * inv
        a_f = jnp.sum(alpha * enc_f, axis=0)                          # (B,H)
        a_b = jnp.sum(alpha * enc_b, axis=0)                          # (B,H)

        u = jnp.concatenate([a_f, a_b, h_new], axis=1)                # (B,3H)
        o_t = jnp.tanh(jnp.dot(u, wcomb, preferred_element_type=f32))  # (B,H)
        # TODO(synk): nn.Dropout applied as identity (eval mode); train-mode RNG not reproduced.
        comb_ref[t] = o_t
        return h_new, c_new, o_t

    lax.fori_loop(0, Tt, dec_body, (h0, c0, jnp.zeros((B, H), f32)),
                  unroll=True)

    # ---- vocab projection + log_softmax + gold gather + masked sum ----
    logits = jnp.dot(comb_ref[...].reshape(Tt * B, H), wv_ref[...],
                     preferred_element_type=f32).reshape(Tt, B, V)
    mx = jnp.max(logits, axis=-1, keepdims=True)
    logz = mx + jnp.log(jnp.sum(jnp.exp(logits - mx), axis=-1, keepdims=True))
    iota = lax.broadcasted_iota(jnp.int32, (Tt, B, V), 2)
    onehot = (iota == gold_ref[...]).astype(f32)
    gold_lp = jnp.sum(onehot * logits, axis=-1, keepdims=True)        # (Tt,B,1)
    lp = (gold_lp - logz) * tmask_ref[...]
    out_ref[...] = jnp.sum(lp, axis=0)                                # (B,1)


# ----------------------------------------------------------------------------
# Parameters (deterministic, synthetic). Weights pre-transposed/fused (in, out).
# ----------------------------------------------------------------------------
def init_params(key, vocab_size, embed_size, hidden_size, pad_id):
    V, E, H = vocab_size, embed_size, hidden_size
    ks = jax.random.split(key, 16)
    f32 = jnp.float32

    def u(k, shape):
        return jax.random.uniform(k, shape, f32, -0.1, 0.1)

    # torch-layout weights (out, in); biases b_ih+b_hh folded to one per cell
    w_ih_f = u(ks[2], (4 * H, E)); w_hh_f = u(ks[3], (4 * H, H)); b_f = u(ks[4], (1, 4 * H))
    w_ih_b = u(ks[5], (4 * H, E)); w_hh_b = u(ks[13], (4 * H, H)); b_b = u(ks[14], (1, 4 * H))
    w_dec_ih = u(ks[6], (4 * H, E + H))   # LSTMCell W_ih over [Y_t ; o_prev]
    w_dec_hh = u(ks[7], (4 * H, H)); b_dec = u(ks[8], (1, 4 * H))
    w_hproj = u(ks[9], (H, 2 * H)); w_cproj = u(ks[10], (H, 2 * H))
    w_att = u(ks[11], (H, 2 * H)); w_comb = u(ks[12], (H, 3 * H))
    w_vocab = u(ks[15], (V, H))

    # encoder: fused input weight (E,8H) and block-diagonal recurrent (2H,8H)
    Zh4 = jnp.zeros((H, 4 * H), f32)
    enc_whh_fb_t = jnp.concatenate([
        jnp.concatenate([w_hh_f.T, Zh4], axis=1),
        jnp.concatenate([Zh4, w_hh_b.T], axis=1)], axis=0)            # (2H,8H)

    # decoder init: torch.cat((backward, forward)) folded into row order; h/c fused
    Zhh = jnp.zeros((H, H), f32)
    Wh_t, Wc_t = w_hproj.T, w_cproj.T                                 # (2H,H)
    dec_init_w = jnp.concatenate([
        jnp.concatenate([Wh_t[H:], Zhh], axis=1),    # rows for h_f
        jnp.concatenate([Wh_t[:H], Zhh], axis=1),    # rows for h_b
        jnp.concatenate([Zhh, Wc_t[H:]], axis=1),    # rows for c_f
        jnp.concatenate([Zhh, Wc_t[:H]], axis=1)],   # rows for c_b
        axis=0)                                                       # (4H,2H)

    return dict(
        src_embed=u(ks[0], (V, E)).at[pad_id].set(0.0),
        tgt_embed=u(ks[1], (V, E)).at[pad_id].set(0.0),
        enc_wih_fb_t=jnp.concatenate([w_ih_f.T, w_ih_b.T], axis=1),   # (E,8H)
        enc_b_fb=jnp.concatenate([b_f, b_b], axis=1),                 # (1,8H)
        enc_whh_fb_t=enc_whh_fb_t,                                    # (2H,8H)
        dec_init_w=dec_init_w,                                        # (4H,2H)
        att_proj_f_t=w_att.T[:H],                                     # (H,H)
        att_proj_b_t=w_att.T[H:],                                     # (H,H)
        dec_wih_y_t=w_dec_ih[:, :E].T,                                # (E,4H)
        dec_b=b_dec,                                                  # (1,4H)
        dec_rec_t=jnp.concatenate([w_dec_ih[:, E:].T, w_dec_hh.T], axis=0),  # (2H,4H)
        comb_t=w_comb.T,                                              # (3H,H)
        vocab_proj_t=w_vocab.T,                                       # (H,V)
    )


# ----------------------------------------------------------------------------
# Forward pass (ChatBot.forward semantics)
# ----------------------------------------------------------------------------
def chatbot_forward(params, source_ids, source_lengths, target_ids, pad_id=0):
    L, B = source_ids.shape
    Tg = target_ids.shape[0]
    Tt = Tg - 1
    H = params['att_proj_f_t'].shape[0]

    # --- glue: embedding gathers + masks (pre-broadcast, hoisted out of kernel)
    src_emb = jnp.take(params['src_embed'], source_ids, axis=0)             # (L,B,E)
    valid = (jnp.arange(L)[:, None] < source_lengths[None, :]
             ).astype(jnp.float32)[..., None]                               # (L,B,1)
    validH = jnp.broadcast_to(valid, (L, B, H))
    mask2 = jnp.concatenate([validH, validH[::-1]], axis=-1)                # (L,B,2H)
    attbias = (1.0 - valid) * jnp.float32(-1e30)                            # (L,B,1)
    y_emb = jnp.take(params['tgt_embed'], target_ids[:-1], axis=0)          # (Tt,B,E)
    gold = target_ids[1:][..., None].astype(jnp.int32)                      # (Tt,B,1)
    tmask = (target_ids[1:] != pad_id).astype(jnp.float32)[..., None]       # (Tt,B,1)

    inputs = [
        src_emb, mask2, attbias, y_emb, gold, tmask,
        params['enc_wih_fb_t'], params['enc_b_fb'], params['enc_whh_fb_t'],
        params['dec_init_w'], params['att_proj_f_t'], params['att_proj_b_t'],
        params['dec_wih_y_t'], params['dec_b'], params['dec_rec_t'],
        params['comb_t'], params['vocab_proj_t'],
    ]

    in_specs = [pl.BlockSpec(tuple(x.shape), lambda i, nd=x.ndim: (0,) * nd)
                for x in inputs]
    out_spec = pl.BlockSpec((B, 1), lambda i: (0, 0))
    out_shape = jax.ShapeDtypeStruct((B, 1), jnp.float32)
    scratch = [
        pltpu.VMEM((L, B, 8 * H), jnp.float32),   # fused fwd|bwd hoisted gates
        pltpu.VMEM((L, B, H), jnp.float32),       # encoder hidden fwd
        pltpu.VMEM((L, B, H), jnp.float32),       # encoder hidden bwd
        pltpu.VMEM((Tt, B, 4 * H), jnp.float32),  # decoder hoisted input gates
        pltpu.VMEM((Tt, B, H), jnp.float32),      # combined outputs
    ]

    scores = pl.pallas_call(
        chatbot_kernel,
        grid=(1,),
        in_specs=in_specs,
        out_specs=out_spec,
        out_shape=out_shape,
        scratch_shapes=scratch,
        compiler_params=pltpu.CompilerParams(dimension_semantics=("arbitrary",)),
    )(*inputs)
    return scores[:, 0]                                                     # (B,)


# ----------------------------------------------------------------------------
if __name__ == "__main__":
    PAD, BOS, EOS = 0, 1, 2
    V, E, H = 128, 32, 32        # vocab, embed_size, hidden_size
    B, L, Tg = 8, 8, 8           # batch, max src len, max tgt len (incl. <s>/</s>)

    key = jax.random.PRNGKey(0)
    pkey, skey, tkey = jax.random.split(key, 3)
    params = init_params(pkey, V, E, H, PAD)

    # sources sorted longest -> shortest (as ChatBot.forward assumes)
    source_lengths = jnp.array([8, 8, 7, 6, 5, 4, 3, 2], dtype=jnp.int32)
    src = jax.random.randint(skey, (L, B), 3, V, dtype=jnp.int32)
    src = jnp.where(jnp.arange(L)[:, None] < source_lengths[None, :], src, PAD)

    tgt_lengths = jnp.array([8, 6, 7, 4, 5, 8, 3, 6], dtype=jnp.int32)
    tgt = jax.random.randint(tkey, (Tg, B), 3, V, dtype=jnp.int32)
    tgt = tgt.at[0].set(BOS)
    tgt = jnp.where(jnp.arange(Tg)[:, None] == (tgt_lengths - 1)[None, :], EOS, tgt)
    tgt = jnp.where(jnp.arange(Tg)[:, None] < tgt_lengths[None, :], tgt, PAD)

    scores = chatbot_forward(params, src, source_lengths, tgt, pad_id=PAD)
    scores = jax.block_until_ready(scores)

    assert scores.shape == (B,), scores.shape
    assert bool(jnp.all(jnp.isfinite(scores)))
    print("KERNEL_OK")
</pallas_src>

<mosaic_0001>
module attributes {stable_mosaic.version = 11 : i64} {
  func.func @chatbot_kernel(%arg0: i32, %arg1: memref<8x8x32xf32, #tpu.memory_space<vmem>>, %arg2: memref<8x8x64xf32, #tpu.memory_space<vmem>>, %arg3: memref<8x8x1xf32, #tpu.memory_space<vmem>>, %arg4: memref<7x8x32xf32, #tpu.memory_space<vmem>>, %arg5: memref<7x8x1xi32, #tpu.memory_space<vmem>>, %arg6: memref<7x8x1xf32, #tpu.memory_space<vmem>>, %arg7: memref<32x256xf32, #tpu.memory_space<vmem>>, %arg8: memref<1x256xf32, #tpu.memory_space<vmem>>, %arg9: memref<64x256xf32, #tpu.memory_space<vmem>>, %arg10: memref<128x64xf32, #tpu.memory_space<vmem>>, %arg11: memref<32x32xf32, #tpu.memory_space<vmem>>, %arg12: memref<32x32xf32, #tpu.memory_space<vmem>>, %arg13: memref<32x128xf32, #tpu.memory_space<vmem>>, %arg14: memref<1x128xf32, #tpu.memory_space<vmem>>, %arg15: memref<64x128xf32, #tpu.memory_space<vmem>>, %arg16: memref<96x32xf32, #tpu.memory_space<vmem>>, %arg17: memref<32x128xf32, #tpu.memory_space<vmem>>, %arg18: memref<8x1xf32, #tpu.memory_space<vmem>>, %arg19: memref<8x8x256xf32, #tpu.memory_space<vmem>>, %arg20: memref<8x8x32xf32, #tpu.memory_space<vmem>>, %arg21: memref<8x8x32xf32, #tpu.memory_space<vmem>>, %arg22: memref<7x8x128xf32, #tpu.memory_space<vmem>>, %arg23: memref<7x8x32xf32, #tpu.memory_space<vmem>>) attributes {dimension_semantics = [#tpu.dimension_semantics<arbitrary>], iteration_bounds = array<i64: 1>, scalar_prefetch = 0 : i64, scratch_operands = 5 : i64, tpu.core_type = #tpu.core_type<tc>, window_params = [{pipeline_mode = #tpu.pipeline_mode<synchronous>, transform_indices = @transform_0, window_bounds = array<i64: 8, 8, 32>}, {pipeline_mode = #tpu.pipeline_mode<synchronous>, transform_indices = @transform_1, window_bounds = array<i64: 8, 8, 64>}, {pipeline_mode = #tpu.pipeline_mode<synchronous>, transform_indices = @transform_2, window_bounds = array<i64: 8, 8, 1>}, {pipeline_mode = #tpu.pipeline_mode<synchronous>, transform_indices = @transform_3, window_bounds = array<i64: 7, 8, 32>}, {pipeline_mode = #tpu.pipeline_mode<synchronous>, transform_indices = @transform_4, window_bounds = array<i64: 7, 8, 1>}, {pipeline_mode = #tpu.pipeline_mode<synchronous>, transform_indices = @transform_5, window_bounds = array<i64: 7, 8, 1>}, {pipeline_mode = #tpu.pipeline_mode<synchronous>, transform_indices = @transform_6, window_bounds = array<i64: 32, 256>}, {pipeline_mode = #tpu.pipeline_mode<synchronous>, transform_indices = @transform_7, window_bounds = array<i64: 1, 256>}, {pipeline_mode = #tpu.pipeline_mode<synchronous>, transform_indices = @transform_8, window_bounds = array<i64: 64, 256>}, {pipeline_mode = #tpu.pipeline_mode<synchronous>, transform_indices = @transform_9, window_bounds = array<i64: 128, 64>}, {pipeline_mode = #tpu.pipeline_mode<synchronous>, transform_indices = @transform_10, window_bounds = array<i64: 32, 32>}, {pipeline_mode = #tpu.pipeline_mode<synchronous>, transform_indices = @transform_11, window_bounds = array<i64: 32, 32>}, {pipeline_mode = #tpu.pipeline_mode<synchronous>, transform_indices = @transform_12, window_bounds = array<i64: 32, 128>}, {pipeline_mode = #tpu.pipeline_mode<synchronous>, transform_indices = @transform_13, window_bounds = array<i64: 1, 128>}, {pipeline_mode = #tpu.pipeline_mode<synchronous>, transform_indices = @transform_14, window_bounds = array<i64: 64, 128>}, {pipeline_mode = #tpu.pipeline_mode<synchronous>, transform_indices = @transform_15, window_bounds = array<i64: 96, 32>}, {pipeline_mode = #tpu.pipeline_mode<synchronous>, transform_indices = @transform_16, window_bounds = array<i64: 32, 128>}, {pipeline_mode = #tpu.pipeline_mode<synchronous>, transform_indices = @transform_17, window_bounds = array<i64: 8, 1>}]} {
    %c0 = arith.constant 0 : index
    %c0_0 = arith.constant 0 : index
    %0 = vector.load %arg9[%c0, %c0_0] : memref<64x256xf32, #tpu.memory_space<vmem>>, vector<64x256xf32>
    %c0_1 = arith.constant 0 : index
    %c0_2 = arith.constant 0 : index
    %1 = vector.load %arg15[%c0_1, %c0_2] : memref<64x128xf32, #tpu.memory_space<vmem>>, vector<64x128xf32>
    %c0_3 = arith.constant 0 : index
    %c0_4 = arith.constant 0 : index
    %2 = vector.load %arg16[%c0_3, %c0_4] : memref<96x32xf32, #tpu.memory_space<vmem>>, vector<96x32xf32>
    %c0_5 = arith.constant 0 : index
    %c0_6 = arith.constant 0 : index
    %c0_7 = arith.constant 0 : index
    %3 = vector.load %arg1[%c0_5, %c0_6, %c0_7] : memref<8x8x32xf32, #tpu.memory_space<vmem>>, vector<8x8x32xf32>
    %4 = vector.shape_cast %3 : vector<8x8x32xf32> to vector<64x32xf32>
    %c0_8 = arith.constant 0 : index
    %c0_9 = arith.constant 0 : index
    %5 = vector.load %arg7[%c0_8, %c0_9] : memref<32x256xf32, #tpu.memory_space<vmem>>, vector<32x256xf32>
    %cst = arith.constant dense<0.000000e+00> : vector<64x256xf32>
    %6 = tpu.matmul %4, %5, %cst {dimension_numbers = #tpu.dot_dimension_numbers<[1], [0], [0], [1], [0, 0, 1, 1], [], []>} : vector<64x32xf32>, vector<32x256xf32>, vector<64x256xf32> -> vector<64x256xf32>
    %c0_10 = arith.constant 0 : index
    %c0_11 = arith.constant 0 : index
    %7 = vector.load %arg8[%c0_10, %c0_11] : memref<1x256xf32, #tpu.memory_space<vmem>>, vector<1x256xf32>
    %8 = vector.broadcast %7 : vector<1x256xf32> to vector<64x256xf32>
    %9 = arith.addf %6, %8 : vector<64x256xf32>
    %10 = vector.shape_cast %9 : vector<64x256xf32> to vector<8x8x256xf32>
    %c0_12 = arith.constant 0 : index
    %c0_13 = arith.constant 0 : index
    %c0_14 = arith.constant 0 : index
    %11 = vector.load %arg19[%c0_12, %c0_13, %c0_14] : memref<8x8x256xf32, #tpu.memory_space<vmem>>, vector<8x8x256xf32>
    tpu.vector_store %arg19[%c0_12, %c0_13, %c0_14], %10 {strides = array<i32>} : memref<8x8x256xf32, #tpu.memory_space<vmem>>, vector<8x8x256xf32>,
    %c0_15 = arith.constant 0 : index
    %c0_16 = arith.constant 0 : index
    %c0_17 = arith.constant 0 : index
    %12 = vector.load %arg4[%c0_15, %c0_16, %c0_17] : memref<7x8x32xf32, #tpu.memory_space<vmem>>, vector<7x8x32xf32>
    %13 = vector.shape_cast %12 : vector<7x8x32xf32> to vector<56x32xf32>
    %c0_18 = arith.constant 0 : index
    %c0_19 = arith.constant 0 : index
    %14 = vector.load %arg13[%c0_18, %c0_19] : memref<32x128xf32, #tpu.memory_space<vmem>>, vector<32x128xf32>
    %cst_20 = arith.constant dense<0.000000e+00> : vector<56x128xf32>
    %15 = tpu.matmul %13, %14, %cst_20 {dimension_numbers = #tpu.dot_dimension_numbers<[1], [0], [0], [1], [0, 0, 1, 1], [], []>} : vector<56x32xf32>, vector<32x128xf32>, vector<56x128xf32> -> vector<56x128xf32>
    %c0_21 = arith.constant 0 : index
    %c0_22 = arith.constant 0 : index
    %16 = vector.load %arg14[%c0_21, %c0_22] : memref<1x128xf32, #tpu.memory_space<vmem>>, vector<1x128xf32>
    %17 = vector.broadcast %16 : vector<1x128xf32> to vector<56x128xf32>
    %18 = arith.addf %15, %17 : vector<56x128xf32>
    %19 = vector.shape_cast %18 : vector<56x128xf32> to vector<7x8x128xf32>
    %c0_23 = arith.constant 0 : index
    %c0_24 = arith.constant 0 : index
    %c0_25 = arith.constant 0 : index
    %20 = vector.load %arg22[%c0_23, %c0_24, %c0_25] : memref<7x8x128xf32, #tpu.memory_space<vmem>>, vector<7x8x128xf32>
    tpu.vector_store %arg22[%c0_23, %c0_24, %c0_25], %19 {strides = array<i32>} : memref<7x8x128xf32, #tpu.memory_space<vmem>>, vector<7x8x128xf32>,
    %cst_26 = arith.constant 0.000000e+00 : f32
    %21 = vector.broadcast %cst_26 : f32 to vector<8x32xf32>
    %cst_27 = arith.constant 0.000000e+00 : f32
    %22 = vector.broadcast %cst_27 : f32 to vector<8x64xf32>
    %c0_i32 = arith.constant 0 : i32
    %c7_i32 = arith.constant 7 : i32
    %23 = arith.subi %c7_i32, %c0_i32 : i32
    %24 = arith.index_cast %c0_i32 : i32 to index
    %c0_28 = arith.constant 0 : index
    %c0_29 = arith.constant 0 : index
    %25 = vector.load %arg19[%24, %c0_28, %c0_29] : memref<8x8x256xf32, #tpu.memory_space<vmem>>, vector<1x8x256xf32>
    %26 = vector.shape_cast %25 : vector<1x8x256xf32> to vector<8x256xf32>
    %cst_30 = arith.constant dense<0.000000e+00> : vector<8x256xf32>
    %27 = tpu.matmul %22, %0, %cst_30 {dimension_numbers = #tpu.dot_dimension_numbers<[1], [0], [0], [1], [0, 0, 1, 1], [], []>} : vector<8x64xf32>, vector<64x256xf32>, vector<8x256xf32> -> vector<8x256xf32>
    %28 = arith.addf %26, %27 : vector<8x256xf32>
    %29 = arith.negf %28 : vector<8x256xf32>
    %30 = math.exp %29 : vector<8x256xf32>
    %cst_31 = arith.constant 1.000000e+00 : f32
    %31 = vector.broadcast %cst_31 : f32 to vector<8x256xf32>
    %32 = arith.addf %31, %30 : vector<8x256xf32>
    %33 = arith.divf %31, %32 : vector<8x256xf32>
    %34 = vector.extract_strided_slice %28 {offsets = [0, 64], sizes = [8, 32], strides = [1, 1]} : vector<8x256xf32> to vector<8x32xf32>
    %35 = math.tanh %34 : vector<8x32xf32>
    %36 = vector.extract_strided_slice %28 {offsets = [0, 192], sizes = [8, 32], strides = [1, 1]} : vector<8x256xf32> to vector<8x32xf32>
    %37 = math.tanh %36 : vector<8x32xf32>
    %38 = vector.extract_strided_slice %33 {offsets = [0, 32], sizes = [8, 32], strides = [1, 1]} : vector<8x256xf32> to vector<8x32xf32>
    %39 = arith.mulf %38, %21 : vector<8x32xf32>
    %40 = vector.extract_strided_slice %33 {offsets = [0, 0], sizes = [8, 32], strides = [1, 1]} : vector<8x256xf32> to vector<8x32xf32>
    %41 = arith.mulf %40, %35 : vector<8x32xf32>
    %42 = arith.addf %39, %41 : vector<8x32xf32>
    %43 = vector.extract_strided_slice %33 {offsets = [0, 160], sizes = [8, 32], strides = [1, 1]} : vector<8x256xf32> to vector<8x32xf32>
    %44 = arith.mulf %43, %21 : vector<8x32xf32>
    %45 = vector.extract_strided_slice %33 {offsets = [0, 128], sizes = [8, 32], strides = [1, 1]} : vector<8x256xf32> to vector<8x32xf32>
    %46 = arith.mulf %45, %37 : vector<8x32xf32>
    %47 = arith.addf %44, %46 : vector<8x32xf32>
    %48 = vector.extract_strided_slice %33 {offsets = [0, 96], sizes = [8, 32], strides = [1, 1]} : vector<8x256xf32> to vector<8x32xf32>
    %49 = math.tanh %42 : vector<8x32xf32>
    %50 = arith.mulf %48, %49 : vector<8x32xf32>
    %51 = vector.extract_strided_slice %33 {offsets = [0, 224], sizes = [8, 32], strides = [1, 1]} : vector<8x256xf32> to vector<8x32xf32>
    %52 = math.tanh %47 : vector<8x32xf32>
    %53 = arith.mulf %51, %52 : vector<8x32xf32>
    %54 = arith.index_cast %c0_i32 : i32 to index
    %c0_32 = arith.constant 0 : index
    %c0_33 = arith.constant 0 : index
    %55 = vector.load %arg2[%54, %c0_32, %c0_33] : memref<8x8x64xf32, #tpu.memory_space<vmem>>, vector<1x8x64xf32>
    %56 = vector.shape_cast %55 : vector<1x8x64xf32> to vector<8x64xf32>
    %cst_34 = arith.constant 0.000000e+00 : f32
    %57 = vector.broadcast %cst_34 : f32 to vector<8x64xf32>
    %58 = arith.cmpf one, %56, %57 : vector<8x64xf32>
    %59 = vector.extract_strided_slice %58 {offsets = [0, 0], sizes = [8, 32], strides = [1, 1]} : vector<8x64xi1> to vector<8x32xi1>
    %60 = vector.extract_strided_slice %58 {offsets = [0, 32], sizes = [8, 32], strides = [1, 1]} : vector<8x64xi1> to vector<8x32xi1>
    %cst_35 = arith.constant 0.000000e+00 : f32
    %61 = vector.broadcast %cst_35 : f32 to vector<8x32xf32>
    %62 = arith.select %59, %50, %61 : vector<8x32xi1>, vector<8x32xf32>
    %63 = arith.index_cast %c0_i32 : i32 to index
    %c0_36 = arith.constant 0 : index
    %c0_37 = arith.constant 0 : index
    %64 = vector.load %arg20[%63, %c0_36, %c0_37] : memref<8x8x32xf32, #tpu.memory_space<vmem>>, vector<1x8x32xf32>
    %65 = vector.shape_cast %64 : vector<1x8x32xf32> to vector<8x32xf32>
    %66 = vector.shape_cast %62 : vector<8x32xf32> to vector<1x8x32xf32>
    tpu.vector_store %arg20[%63, %c0_36, %c0_37], %66 {strides = array<i32>} : memref<8x8x32xf32, #tpu.memory_space<vmem>>, vector<1x8x32xf32>,
    %cst_38 = arith.constant 0.000000e+00 : f32
    %67 = vector.broadcast %cst_38 : f32 to vector<8x32xf32>
    %68 = arith.select %60, %53, %67 : vector<8x32xi1>, vector<8x32xf32>
    %69 = arith.index_cast %23 : i32 to index
    %c0_39 = arith.constant 0 : index
    %c0_40 = arith.constant 0 : index
    %70 = vector.load %arg21[%69, %c0_39, %c0_40] : memref<8x8x32xf32, #tpu.memory_space<vmem>>, vector<1x8x32xf32>
    %71 = vector.shape_cast %70 : vector<1x8x32xf32> to vector<8x32xf32>
    %72 = vector.shape_cast %68 : vector<8x32xf32> to vector<1x8x32xf32>
    tpu.vector_store %arg21[%69, %c0_39, %c0_40], %72 {strides = array<i32>} : memref<8x8x32xf32, #tpu.memory_space<vmem>>, vector<1x8x32xf32>,
    %73 = tpu.concatenate %50, %53 in 1 : vector<8x32xf32>, vector<8x32xf32> -> vector<8x64xf32>
    %74 = arith.select %58, %73, %22 : vector<8x64xi1>, vector<8x64xf32>
    %75 = arith.select %59, %42, %21 : vector<8x32xi1>, vector<8x32xf32>
    %76 = arith.select %60, %47, %21 : vector<8x32xi1>, vector<8x32xf32>
    %c1_i32 = arith.constant 1 : i32
    %c7_i32_41 = arith.constant 7 : i32
    %77 = arith.subi %c7_i32_41, %c1_i32 : i32
    %78 = arith.index_cast %c1_i32 : i32 to index
    %c0_42 = arith.constant 0 : index
    %c0_43 = arith.constant 0 : index
    %79 = vector.load %arg19[%78, %c0_42, %c0_43] : memref<8x8x256xf32, #tpu.memory_space<vmem>>, vector<1x8x256xf32>
    %80 = vector.shape_cast %79 : vector<1x8x256xf32> to vector<8x256xf32>
    %cst_44 = arith.constant dense<0.000000e+00> : vector<8x256xf32>
    %81 = tpu.matmul %74, %0, %cst_44 {dimension_numbers = #tpu.dot_dimension_numbers<[1], [0], [0], [1], [0, 0, 1, 1], [], []>} : vector<8x64xf32>, vector<64x256xf32>, vector<8x256xf32> -> vector<8x256xf32>
    %82 = arith.addf %80, %81 : vector<8x256xf32>
    %83 = arith.negf %82 : vector<8x256xf32>
    %84 = math.exp %83 : vector<8x256xf32>
    %cst_45 = arith.constant 1.000000e+00 : f32
    %85 = vector.broadcast %cst_45 : f32 to vector<8x256xf32>
    %86 = arith.addf %85, %84 : vector<8x256xf32>
    %87 = arith.divf %85, %86 : vector<8x256xf32>
    %88 = vector.extract_strided_slice %82 {offsets = [0, 64], sizes = [8, 32], strides = [1, 1]} : vector<8x256xf32> to vector<8x32xf32>
    %89 = math.tanh %88 : vector<8x32xf32>
    %90 = vector.extract_strided_slice %82 {offsets = [0, 192], sizes = [8, 32], strides = [1, 1]} : vector<8x256xf32> to vector<8x32xf32>
    %91 = math.tanh %90 : vector<8x32xf32>
    %92 = vector.extract_strided_slice %87 {offsets = [0, 32], sizes = [8, 32], strides = [1, 1]} : vector<8x256xf32> to vector<8x32xf32>
    %93 = arith.mulf %92, %75 : vector<8x32xf32>
    %94 = vector.extract_strided_slice %87 {offsets = [0, 0], sizes = [8, 32], strides = [1, 1]} : vector<8x256xf32> to vector<8x32xf32>
    %95 = arith.mulf %94, %89 : vector<8x32xf32>
    %96 = arith.addf %93, %95 : vector<8x32xf32>
    %97 = vector.extract_strided_slice %87 {offsets = [0, 160], sizes = [8, 32], strides = [1, 1]} : vector<8x256xf32> to vector<8x32xf32>
    %98 = arith.mulf %97, %76 : vector<8x32xf32>
    %99 = vector.extract_strided_slice %87 {offsets = [0, 128], sizes = [8, 32], strides = [1, 1]} : vector<8x256xf32> to vector<8x32xf32>
    %100 = arith.mulf %99, %91 : vector<8x32xf32>
    %101 = arith.addf %98, %100 : vector<8x32xf32>
    %102 = vector.extract_strided_slice %87 {offsets = [0, 96], sizes = [8, 32], strides = [1, 1]} : vector<8x256xf32> to vector<8x32xf32>
    %103 = math.tanh %96 : vector<8x32xf32>
    %104 = arith.mulf %102, %103 : vector<8x32xf32>
    %105 = vector.extract_strided_slice %87 {offsets = [0, 224], sizes = [8, 32], strides = [1, 1]} : vector<8x256xf32> to vector<8x32xf32>
    %106 = math.tanh %101 : vector<8x32xf32>
    %107 = arith.mulf %105, %106 : vector<8x32xf32>
    %108 = arith.index_cast %c1_i32 : i32 to index
    %c0_46 = arith.constant 0 : index
    %c0_47 = arith.constant 0 : index
    %109 = vector.load %arg2[%108, %c0_46, %c0_47] : memref<8x8x64xf32, #tpu.memory_space<vmem>>, vector<1x8x64xf32>
    %110 = vector.shape_cast %109 : vector<1x8x64xf32> to vector<8x64xf32>
    %cst_48 = arith.constant 0.000000e+00 : f32
    %111 = vector.broadcast %cst_48 : f32 to vector<8x64xf32>
    %112 = arith.cmpf one, %110, %111 : vector<8x64xf32>
    %113 = vector.extract_strided_slice %112 {offsets = [0, 0], sizes = [8, 32], strides = [1, 1]} : vector<8x64xi1> to vector<8x32xi1>
    %114 = vector.extract_strided_slice %112 {offsets = [0, 32], sizes = [8, 32], strides = [1, 1]} : vector<8x64xi1> to vector<8x32xi1>
    %cst_49 = arith.constant 0.000000e+00 : f32
    %115 = vector.broadcast %cst_49 : f32 to vector<8x32xf32>
    %116 = arith.select %113, %104, %115 : vector<8x32xi1>, vector<8x32xf32>
    %117 = arith.index_cast %c1_i32 : i32 to index
    %c0_50 = arith.constant 0 : index
    %c0_51 = arith.constant 0 : index
    %118 = vector.load %arg20[%117, %c0_50, %c0_51] : memref<8x8x32xf32, #tpu.memory_space<vmem>>, vector<1x8x32xf32>
    %119 = vector.shape_cast %118 : vector<1x8x32xf32> to vector<8x32xf32>
    %120 = vector.shape_cast %116 : vector<8x32xf32> to vector<1x8x32xf32>
    tpu.vector_store %arg20[%117, %c0_50, %c0_51], %120 {strides = array<i32>} : memref<8x8x32xf32, #tpu.memory_space<vmem>>, vector<1x8x32xf32>,
    %cst_52 = arith.constant 0.000000e+00 : f32
    %121 = vector.broadcast %cst_52 : f32 to vector<8x32xf32>
    %122 = arith.select %114, %107, %121 : vector<8x32xi1>, vector<8x32xf32>
    %123 = arith.index_cast %77 : i32 to index
    %c0_53 = arith.constant 0 : index
    %c0_54 = arith.constant 0 : index
    %124 = vector.load %arg21[%123, %c0_53, %c0_54] : memref<8x8x32xf32, #tpu.memory_space<vmem>>, vector<1x8x32xf32>
    %125 = vector.shape_cast %124 : vector<1x8x32xf32> to vector<8x32xf32>
    %126 = vector.shape_cast %122 : vector<8x32xf32> to vector<1x8x32xf32>
    tpu.vector_store %arg21[%123, %c0_53, %c0_54], %126 {strides = array<i32>} : memref<8x8x32xf32, #tpu.memory_space<vmem>>, vector<1x8x32xf32>,
    %127 = tpu.concatenate %104, %107 in 1 : vector<8x32xf32>, vector<8x32xf32> -> vector<8x64xf32>
    %128 = arith.select %112, %127, %74 : vector<8x64xi1>, vector<8x64xf32>
    %129 = arith.select %113, %96, %75 : vector<8x32xi1>, vector<8x32xf32>
    %130 = arith.select %114, %101, %76 : vector<8x32xi1>, vector<8x32xf32>
    %c2_i32 = arith.constant 2 : i32
    %c7_i32_55 = arith.constant 7 : i32
    %131 = arith.subi %c7_i32_55, %c2_i32 : i32
    %132 = arith.index_cast %c2_i32 : i32 to index
    %c0_56 = arith.constant 0 : index
    %c0_57 = arith.constant 0 : index
    %133 = vector.load %arg19[%132, %c0_56, %c0_57] : memref<8x8x256xf32, #tpu.memory_space<vmem>>, vector<1x8x256xf32>
    %134 = vector.shape_cast %133 : vector<1x8x256xf32> to vector<8x256xf32>
    %cst_58 = arith.constant dense<0.000000e+00> : vector<8x256xf32>
    %135 = tpu.matmul %128, %0, %cst_58 {dimension_numbers = #tpu.dot_dimension_numbers<[1], [0], [0], [1], [0, 0, 1, 1], [], []>} : vector<8x64xf32>, vector<64x256xf32>, vector<8x256xf32> -> vector<8x256xf32>
    %136 = arith.addf %134, %135 : vector<8x256xf32>
    %137 = arith.negf %136 : vector<8x256xf32>
    %138 = math.exp %137 : vector<8x256xf32>
    %cst_59 = arith.constant 1.000000e+00 : f32
    %139 = vector.broadcast %cst_59 : f32 to vector<8x256xf32>
    %140 = arith.addf %139, %138 : vector<8x256xf32>
    %141 = arith.divf %139, %140 : vector<8x256xf32>
    %142 = vector.extract_strided_slice %136 {offsets = [0, 64], sizes = [8, 32], strides = [1, 1]} : vector<8x256xf32> to vector<8x32xf32>
    %143 = math.tanh %142 : vector<8x32xf32>
    %144 = vector.extract_strided_slice %136 {offsets = [0, 192], sizes = [8, 32], strides = [1, 1]} : vector<8x256xf32> to vector<8x32xf32>
    %145 = math.tanh %144 : vector<8x32xf32>
    %146 = vector.extract_strided_slice %141 {offsets = [0, 32], sizes = [8, 32], strides = [1, 1]} : vector<8x256xf32> to vector<8x32xf32>
    %147 = arith.mulf %146, %129 : vector<8x32xf32>
    %148 = vector.extract_strided_slice %141 {offsets = [0, 0], sizes = [8, 32], strides = [1, 1]} : vector<8x256xf32> to vector<8x32xf32>
    %149 = arith.mulf %148, %143 : vector<8x32xf32>
    %150 = arith.addf %147, %149 : vector<8x32xf32>
    %151 = vector.extract_strided_slice %141 {offsets = [0, 160], sizes = [8, 32], strides = [1, 1]} : vector<8x256xf32> to vector<8x32xf32>
    %152 = arith.mulf %151, %130 : vector<8x32xf32>
    %153 = vector.extract_strided_slice %141 {offsets = [0, 128], sizes = [8, 32], strides = [1, 1]} : vector<8x256xf32> to vector<8x32xf32>
    %154 = arith.mulf %153, %145 : vector<8x32xf32>
    %155 = arith.addf %152, %154 : vector<8x32xf32>
    %156 = vector.extract_strided_slice %141 {offsets = [0, 96], sizes = [8, 32], strides = [1, 1]} : vector<8x256xf32> to vector<8x32xf32>
    %157 = math.tanh %150 : vector<8x32xf32>
    %158 = arith.mulf %156, %157 : vector<8x32xf32>
    %159 = vector.extract_strided_slice %141 {offsets = [0, 224], sizes = [8, 32], strides = [1, 1]} : vector<8x256xf32> to vector<8x32xf32>
    %160 = math.tanh %155 : vector<8x32xf32>
    %161 = arith.mulf %159, %160 : vector<8x32xf32>
    %162 = arith.index_cast %c2_i32 : i32 to index
    %c0_60 = arith.constant 0 : index
    %c0_61 = arith.constant 0 : index
    %163 = vector.load %arg2[%162, %c0_60, %c0_61] : memref<8x8x64xf32, #tpu.memory_space<vmem>>, vector<1x8x64xf32>
    %164 = vector.shape_cast %163 : vector<1x8x64xf32> to vector<8x64xf32>
    %cst_62 = arith.constant 0.000000e+00 : f32
    %165 = vector.broadcast %cst_62 : f32 to vector<8x64xf32>
    %166 = arith.cmpf one, %164, %165 : vector<8x64xf32>
    %167 = vector.extract_strided_slice %166 {offsets = [0, 0], sizes = [8, 32], strides = [1, 1]} : vector<8x64xi1> to vector<8x32xi1>
    %168 = vector.extract_strided_slice %166 {offsets = [0, 32], sizes = [8, 32], strides = [1, 1]} : vector<8x64xi1> to vector<8x32xi1>
    %cst_63 = arith.constant 0.000000e+00 : f32
    %169 = vector.broadcast %cst_63 : f32 to vector<8x32xf32>
    %170 = arith.select %167, %158, %169 : vector<8x32xi1>, vector<8x32xf32>
    %171 = arith.index_cast %c2_i32 : i32 to index
    %c0_64 = arith.constant 0 : index
    %c0_65 = arith.constant 0 : index
    %172 = vector.load %arg20[%171, %c0_64, %c0_65] : memref<8x8x32xf32, #tpu.memory_space<vmem>>, vector<1x8x32xf32>
    %173 = vector.shape_cast %172 : vector<1x8x32xf32> to vector<8x32xf32>
    %174 = vector.shape_cast %170 : vector<8x32xf32> to vector<1x8x32xf32>
    tpu.vector_store %arg20[%171, %c0_64, %c0_65], %174 {strides = array<i32>} : memref<8x8x32xf32, #tpu.memory_space<vmem>>, vector<1x8x32xf32>,
    %cst_66 = arith.constant 0.000000e+00 : f32
    %175 = vector.broadcast %cst_66 : f32 to vector<8x32xf32>
    %176 = arith.select %168, %161, %175 : vector<8x32xi1>, vector<8x32xf32>
    %177 = arith.index_cast %131 : i32 to index
    %c0_67 = arith.constant 0 : index
    %c0_68 = arith.constant 0 : index
    %178 = vector.load %arg21[%177, %c0_67, %c0_68] : memref<8x8x32xf32, #tpu.memory_space<vmem>>, vector<1x8x32xf32>
    %179 = vector.shape_cast %178 : vector<1x8x32xf32> to vector<8x32xf32>
    %180 = vector.shape_cast %176 : vector<8x32xf32> to vector<1x8x32xf32>
    tpu.vector_store %arg21[%177, %c0_67, %c0_68], %180 {strides = array<i32>} : memref<8x8x32xf32, #tpu.memory_space<vmem>>, vector<1x8x32xf32>,
    %181 = tpu.concatenate %158, %161 in 1 : vector<8x32xf32>, vector<8x32xf32> -> vector<8x64xf32>
    %182 = arith.select %166, %181, %128 : vector<8x64xi1>, vector<8x64xf32>
    %183 = arith.select %167, %150, %129 : vector<8x32xi1>, vector<8x32xf32>
    %184 = arith.select %168, %155, %130 : vector<8x32xi1>, vector<8x32xf32>
    %c3_i32 = arith.constant 3 : i32
    %c7_i32_69 = arith.constant 7 : i32
    %185 = arith.subi %c7_i32_69, %c3_i32 : i32
    %186 = arith.index_cast %c3_i32 : i32 to index
    %c0_70 = arith.constant 0 : index
    %c0_71 = arith.constant 0 : index
    %187 = vector.load %arg19[%186, %c0_70, %c0_71] : memref<8x8x256xf32, #tpu.memory_space<vmem>>, vector<1x8x256xf32>
    %188 = vector.shape_cast %187 : vector<1x8x256xf32> to vector<8x256xf32>
    %cst_72 = arith.constant dense<0.000000e+00> : vector<8x256xf32>
    %189 = tpu.matmul %182, %0, %cst_72 {dimension_numbers = #tpu.dot_dimension_numbers<[1], [0], [0], [1], [0, 0, 1, 1], [], []>} : vector<8x64xf32>, vector<64x256xf32>, vector<8x256xf32> -> vector<8x256xf32>
    %190 = arith.addf %188, %189 : vector<8x256xf32>
    %191 = arith.negf %190 : vector<8x256xf32>
    %192 = math.exp %191 : vector<8x256xf32>
    %cst_73 = arith.constant 1.000000e+00 : f32
    %193 = vector.broadcast %cst_73 : f32 to vector<8x256xf32>
    %194 = arith.addf %193, %192 : vector<8x256xf32>
    %195 = arith.divf %193, %194 : vector<8x256xf32>
    %196 = vector.extract_strided_slice %190 {offsets = [0, 64], sizes = [8, 32], strides = [1, 1]} : vector<8x256xf32> to vector<8x32xf32>
    %197 = math.tanh %196 : vector<8x32xf32>
    %198 = vector.extract_strided_slice %190 {offsets = [0, 192], sizes = [8, 32], strides = [1, 1]} : vector<8x256xf32> to vector<8x32xf32>
    %199 = math.tanh %198 : vector<8x32xf32>
    %200 = vector.extract_strided_slice %195 {offsets = [0, 32], sizes = [8, 32], strides = [1, 1]} : vector<8x256xf32> to vector<8x32xf32>
    %201 = arith.mulf %200, %183 : vector<8x32xf32>
    %202 = vector.extract_strided_slice %195 {offsets = [0, 0], sizes = [8, 32], strides = [1, 1]} : vector<8x256xf32> to vector<8x32xf32>
    %203 = arith.mulf %202, %197 : vector<8x32xf32>
    %204 = arith.addf %201, %203 : vector<8x32xf32>
    %205 = vector.extract_strided_slice %195 {offsets = [0, 160], sizes = [8, 32], strides = [1, 1]} : vector<8x256xf32> to vector<8x32xf32>
    %206 = arith.mulf %205, %184 : vector<8x32xf32>
    %207 = vector.extract_strided_slice %195 {offsets = [0, 128], sizes = [8, 32], strides = [1, 1]} : vector<8x256xf32> to vector<8x32xf32>
    %208 = arith.mulf %207, %199 : vector<8x32xf32>
    %209 = arith.addf %206, %208 : vector<8x32xf32>
    %210 = vector.extract_strided_slice %195 {offsets = [0, 96], sizes = [8, 32], strides = [1, 1]} : vector<8x256xf32> to vector<8x32xf32>
    %211 = math.tanh %204 : vector<8x32xf32>
    %212 = arith.mulf %210, %211 : vector<8x32xf32>
    %213 = vector.extract_strided_slice %195 {offsets = [0, 224], sizes = [8, 32], strides = [1, 1]} : vector<8x256xf32> to vector<8x32xf32>
    %214 = math.tanh %209 : vector<8x32xf32>
    %215 = arith.mulf %213, %214 : vector<8x32xf32>
    %216 = arith.index_cast %c3_i32 : i32 to index
    %c0_74 = arith.constant 0 : index
    %c0_75 = arith.constant 0 : index
    %217 = vector.load %arg2[%216, %c0_74, %c0_75] : memref<8x8x64xf32, #tpu.memory_space<vmem>>, vector<1x8x64xf32>
    %218 = vector.shape_cast %217 : vector<1x8x64xf32> to vector<8x64xf32>
    %cst_76 = arith.constant 0.000000e+00 : f32
    %219 = vector.broadcast %cst_76 : f32 to vector<8x64xf32>
    %220 = arith.cmpf one, %218, %219 : vector<8x64xf32>
    %221 = vector.extract_strided_slice %220 {offsets = [0, 0], sizes = [8, 32], strides = [1, 1]} : vector<8x64xi1> to vector<8x32xi1>
    %222 = vector.extract_strided_slice %220 {offsets = [0, 32], sizes = [8, 32], strides = [1, 1]} : vector<8x64xi1> to vector<8x32xi1>
    %cst_77 = arith.constant 0.000000e+00 : f32
    %223 = vector.broadcast %cst_77 : f32 to vector<8x32xf32>
    %224 = arith.select %221, %212, %223 : vector<8x32xi1>, vector<8x32xf32>
    %225 = arith.index_cast %c3_i32 : i32 to index
    %c0_78 = arith.constant 0 : index
    %c0_79 = arith.constant 0 : index
    %226 = vector.load %arg20[%225, %c0_78, %c0_79] : memref<8x8x32xf32, #tpu.memory_space<vmem>>, vector<1x8x32xf32>
    %227 = vector.shape_cast %226 : vector<1x8x32xf32> to vector<8x32xf32>
    %228 = vector.shape_cast %224 : vector<8x32xf32> to vector<1x8x32xf32>
    tpu.vector_store %arg20[%225, %c0_78, %c0_79], %228 {strides = array<i32>} : memref<8x8x32xf32, #tpu.memory_space<vmem>>, vector<1x8x32xf32>,
    %cst_80 = arith.constant 0.000000e+00 : f32
    %229 = vector.broadcast %cst_80 : f32 to vector<8x32xf32>
    %230 = arith.select %222, %215, %229 : vector<8x32xi1>, vector<8x32xf32>
    %231 = arith.index_cast %185 : i32 to index
    %c0_81 = arith.constant 0 : index
    %c0_82 = arith.constant 0 : index
    %232 = vector.load %arg21[%231, %c0_81, %c0_82] : memref<8x8x32xf32, #tpu.memory_space<vmem>>, vector<1x8x32xf32>
    %233 = vector.shape_cast %232 : vector<1x8x32xf32> to vector<8x32xf32>
    %234 = vector.shape_cast %230 : vector<8x32xf32> to vector<1x8x32xf32>
    tpu.vector_store %arg21[%231, %c0_81, %c0_82], %234 {strides = array<i32>} : memref<8x8x32xf32, #tpu.memory_space<vmem>>, vector<1x8x32xf32>,
    %235 = tpu.concatenate %212, %215 in 1 : vector<8x32xf32>, vector<8x32xf32> -> vector<8x64xf32>
    %236 = arith.select %220, %235, %182 : vector<8x64xi1>, vector<8x64xf32>
    %237 = arith.select %221, %204, %183 : vector<8x32xi1>, vector<8x32xf32>
    %238 = arith.select %222, %209, %184 : vector<8x32xi1>, vector<8x32xf32>
    %c4_i32 = arith.constant 4 : i32
    %c7_i32_83 = arith.constant 7 : i32
    %239 = arith.subi %c7_i32_83, %c4_i32 : i32
    %240 = arith.index_cast %c4_i32 : i32 to index
    %c0_84 = arith.constant 0 : index
    %c0_85 = arith.constant 0 : index
    %241 = vector.load %arg19[%240, %c0_84, %c0_85] : memref<8x8x256xf32, #tpu.memory_space<vmem>>, vector<1x8x256xf32>
    %242 = vector.shape_cast %241 : vector<1x8x256xf32> to vector<8x256xf32>
    %cst_86 = arith.constant dense<0.000000e+00> : vector<8x256xf32>
    %243 = tpu.matmul %236, %0, %cst_86 {dimension_numbers = #tpu.dot_dimension_numbers<[1], [0], [0], [1], [0, 0, 1, 1], [], []>} : vector<8x64xf32>, vector<64x256xf32>, vector<8x256xf32> -> vector<8x256xf32>
    %244 = arith.addf %242, %243 : vector<8x256xf32>
    %245 = arith.negf %244 : vector<8x256xf32>
    %246 = math.exp %245 : vector<8x256xf32>
    %cst_87 = arith.constant 1.000000e+00 : f32
    %247 = vector.broadcast %cst_87 : f32 to vector<8x256xf32>
    %248 = arith.addf %247, %246 : vector<8x256xf32>
    %249 = arith.divf %247, %248 : vector<8x256xf32>
    %250 = vector.extract_strided_slice %244 {offsets = [0, 64], sizes = [8, 32], strides = [1, 1]} : vector<8x256xf32> to vector<8x32xf32>
    %251 = math.tanh %250 : vector<8x32xf32>
    %252 = vector.extract_strided_slice %244 {offsets = [0, 192], sizes = [8, 32], strides = [1, 1]} : vector<8x256xf32> to vector<8x32xf32>
    %253 = math.tanh %252 : vector<8x32xf32>
    %254 = vector.extract_strided_slice %249 {offsets = [0, 32], sizes = [8, 32], strides = [1, 1]} : vector<8x256xf32> to vector<8x32xf32>
    %255 = arith.mulf %254, %237 : vector<8x32xf32>
    %256 = vector.extract_strided_slice %249 {offsets = [0, 0], sizes = [8, 32], strides = [1, 1]} : vector<8x256xf32> to vector<8x32xf32>
    %257 = arith.mulf %256, %251 : vector<8x32xf32>
    %258 = arith.addf %255, %257 : vector<8x32xf32>
    %259 = vector.extract_strided_slice %249 {offsets = [0, 160], sizes = [8, 32], strides = [1, 1]} : vector<8x256xf32> to vector<8x32xf32>
    %260 = arith.mulf %259, %238 : vector<8x32xf32>
    %261 = vector.extract_strided_slice %249 {offsets = [0, 128], sizes = [8, 32], strides = [1, 1]} : vector<8x256xf32> to vector<8x32xf32>
    %262 = arith.mulf %261, %253 : vector<8x32xf32>
    %263 = arith.addf %260, %262 : vector<8x32xf32>
    %264 = vector.extract_strided_slice %249 {offsets = [0, 96], sizes = [8, 32], strides = [1, 1]} : vector<8x256xf32> to vector<8x32xf32>
    %265 = math.tanh %258 : vector<8x32xf32>
    %266 = arith.mulf %264, %265 : vector<8x32xf32>
    %267 = vector.extract_strided_slice %249 {offsets = [0, 224], sizes = [8, 32], strides = [1, 1]} : vector<8x256xf32> to vector<8x32xf32>
    %268 = math.tanh %263 : vector<8x32xf32>
    %269 = arith.mulf %267, %268 : vector<8x32xf32>
    %270 = arith.index_cast %c4_i32 : i32 to index
    %c0_88 = arith.constant 0 : index
    %c0_89 = arith.constant 0 : index
    %271 = vector.load %arg2[%270, %c0_88, %c0_89] : memref<8x8x64xf32, #tpu.memory_space<vmem>>, vector<1x8x64xf32>
    %272 = vector.shape_cast %271 : vector<1x8x64xf32> to vector<8x64xf32>
    %cst_90 = arith.constant 0.000000e+00 : f32
    %273 = vector.broadcast %cst_90 : f32 to vector<8x64xf32>
    %274 = arith.cmpf one, %272, %273 : vector<8x64xf32>
    %275 = vector.extract_strided_slice %274 {offsets = [0, 0], sizes = [8, 32], strides = [1, 1]} : vector<8x64xi1> to vector<8x32xi1>
    %276 = vector.extract_strided_slice %274 {offsets = [0, 32], sizes = [8, 32], strides = [1, 1]} : vector<8x64xi1> to vector<8x32xi1>
    %cst_91 = arith.constant 0.000000e+00 : f32
    %277 = vector.broadcast %cst_91 : f32 to vector<8x32xf32>
    %278 = arith.select %275, %266, %277 : vector<8x32xi1>, vector<8x32xf32>
    %279 = arith.index_cast %c4_i32 : i32 to index
    %c0_92 = arith.constant 0 : index
    %c0_93 = arith.constant 0 : index
    %280 = vector.load %arg20[%279, %c0_92, %c0_93] : memref<8x8x32xf32, #tpu.memory_space<vmem>>, vector<1x8x32xf32>
    %281 = vector.shape_cast %280 : vector<1x8x32xf32> to vector<8x32xf32>
    %282 = vector.shape_cast %278 : vector<8x32xf32> to vector<1x8x32xf32>
    tpu.vector_store %arg20[%279, %c0_92, %c0_93], %282 {strides = array<i32>} : memref<8x8x32xf32, #tpu.memory_space<vmem>>, vector<1x8x32xf32>,
    %cst_94 = arith.constant 0.000000e+00 : f32
    %283 = vector.broadcast %cst_94 : f32 to vector<8x32xf32>
    %284 = arith.select %276, %269, %283 : vector<8x32xi1>, vector<8x32xf32>
    %285 = arith.index_cast %239 : i32 to index
    %c0_95 = arith.constant 0 : index
    %c0_96 = arith.constant 0 : index
    %286 = vector.load %arg21[%285, %c0_95, %c0_96] : memref<8x8x32xf32, #tpu.memory_space<vmem>>, vector<1x8x32xf32>
    %287 = vector.shape_cast %286 : vector<1x8x32xf32> to vector<8x32xf32>
    %288 = vector.shape_cast %284 : vector<8x32xf32> to vector<1x8x32xf32>
    tpu.vector_store %arg21[%285, %c0_95, %c0_96], %288 {strides = array<i32>} : memref<8x8x32xf32, #tpu.memory_space<vmem>>, vector<1x8x32xf32>,
    %289 = tpu.concatenate %266, %269 in 1 : vector<8x32xf32>, vector<8x32xf32> -> vector<8x64xf32>
    %290 = arith.select %274, %289, %236 : vector<8x64xi1>, vector<8x64xf32>
    %291 = arith.select %275, %258, %237 : vector<8x32xi1>, vector<8x32xf32>
    %292 = arith.select %276, %263, %238 : vector<8x32xi1>, vector<8x32xf32>
    %c5_i32 = arith.constant 5 : i32
    %c7_i32_97 = arith.constant 7 : i32
    %293 = arith.subi %c7_i32_97, %c5_i32 : i32
    %294 = arith.index_cast %c5_i32 : i32 to index
    %c0_98 = arith.constant 0 : index
    %c0_99 = arith.constant 0 : index
    %295 = vector.load %arg19[%294, %c0_98, %c0_99] : memref<8x8x256xf32, #tpu.memory_space<vmem>>, vector<1x8x256xf32>
    %296 = vector.shape_cast %295 : vector<1x8x256xf32> to vector<8x256xf32>
    %cst_100 = arith.constant dense<0.000000e+00> : vector<8x256xf32>
    %297 = tpu.matmul %290, %0, %cst_100 {dimension_numbers = #tpu.dot_dimension_numbers<[1], [0], [0], [1], [0, 0, 1, 1], [], []>} : vector<8x64xf32>, vector<64x256xf32>, vector<8x256xf32> -> vector<8x256xf32>
    %298 = arith.addf %296, %297 : vector<8x256xf32>
    %299 = arith.negf %298 : vector<8x256xf32>
    %300 = math.exp %299 : vector<8x256xf32>
    %cst_101 = arith.constant 1.000000e+00 : f32
    %301 = vector.broadcast %cst_101 : f32 to vector<8x256xf32>
    %302 = arith.addf %301, %300 : vector<8x256xf32>
    %303 = arith.divf %301, %302 : vector<8x256xf32>
    %304 = vector.extract_strided_slice %298 {offsets = [0, 64], sizes = [8, 32], strides = [1, 1]} : vector<8x256xf32> to vector<8x32xf32>
    %305 = math.tanh %304 : vector<8x32xf32>
    %306 = vector.extract_strided_slice %298 {offsets = [0, 192], sizes = [8, 32], strides = [1, 1]} : vector<8x256xf32> to vector<8x32xf32>
    %307 = math.tanh %306 : vector<8x32xf32>
    %308 = vector.extract_strided_slice %303 {offsets = [0, 32], sizes = [8, 32], strides = [1, 1]} : vector<8x256xf32> to vector<8x32xf32>
    %309 = arith.mulf %308, %291 : vector<8x32xf32>
    %310 = vector.extract_strided_slice %303 {offsets = [0, 0], sizes = [8, 32], strides = [1, 1]} : vector<8x256xf32> to vector<8x32xf32>
    %311 = arith.mulf %310, %305 : vector<8x32xf32>
    %312 = arith.addf %309, %311 : vector<8x32xf32>
    %313 = vector.extract_strided_slice %303 {offsets = [0, 160], sizes = [8, 32], strides = [1, 1]} : vector<8x256xf32> to vector<8x32xf32>
    %314 = arith.mulf %313, %292 : vector<8x32xf32>
    %315 = vector.extract_strided_slice %303 {offsets = [0, 128], sizes = [8, 32], strides = [1, 1]} : vector<8x256xf32> to vector<8x32xf32>
    %316 = arith.mulf %315, %307 : vector<8x32xf32>
    %317 = arith.addf %314, %316 : vector<8x32xf32>
    %318 = vector.extract_strided_slice %303 {offsets = [0, 96], sizes = [8, 32], strides = [1, 1]} : vector<8x256xf32> to vector<8x32xf32>
    %319 = math.tanh %312 : vector<8x32xf32>
    %320 = arith.mulf %318, %319 : vector<8x32xf32>
    %321 = vector.extract_strided_slice %303 {offsets = [0, 224], sizes = [8, 32], strides = [1, 1]} : vector<8x256xf32> to vector<8x32xf32>
    %322 = math.tanh %317 : vector<8x32xf32>
    %323 = arith.mulf %321, %322 : vector<8x32xf32>
    %324 = arith.index_cast %c5_i32 : i32 to index
    %c0_102 = arith.constant 0 : index
    %c0_103 = arith.constant 0 : index
    %325 = vector.load %arg2[%324, %c0_102, %c0_103] : memref<8x8x64xf32, #tpu.memory_space<vmem>>, vector<1x8x64xf32>
    %326 = vector.shape_cast %325 : vector<1x8x64xf32> to vector<8x64xf32>
    %cst_104 = arith.constant 0.000000e+00 : f32
    %327 = vector.broadcast %cst_104 : f32 to vector<8x64xf32>
    %328 = arith.cmpf one, %326, %327 : vector<8x64xf32>
    %329 = vector.extract_strided_slice %328 {offsets = [0, 0], sizes = [8, 32], strides = [1, 1]} : vector<8x64xi1> to vector<8x32xi1>
    %330 = vector.extract_strided_slice %328 {offsets = [0, 32], sizes = [8, 32], strides = [1, 1]} : vector<8x64xi1> to vector<8x32xi1>
    %cst_105 = arith.constant 0.000000e+00 : f32
    %331 = vector.broadcast %cst_105 : f32 to vector<8x32xf32>
    %332 = arith.select %329, %320, %331 : vector<8x32xi1>, vector<8x32xf32>
    %333 = arith.index_cast %c5_i32 : i32 to index
    %c0_106 = arith.constant 0 : index
    %c0_107 = arith.constant 0 : index
    %334 = vector.load %arg20[%333, %c0_106, %c0_107] : memref<8x8x32xf32, #tpu.memory_space<vmem>>, vector<1x8x32xf32>
    %335 = vector.shape_cast %334 : vector<1x8x32xf32> to vector<8x32xf32>
    %336 = vector.shape_cast %332 : vector<8x32xf32> to vector<1x8x32xf32>
    tpu.vector_store %arg20[%333, %c0_106, %c0_107], %336 {strides = array<i32>} : memref<8x8x32xf32, #tpu.memory_space<vmem>>, vector<1x8x32xf32>,
    %cst_108 = arith.constant 0.000000e+00 : f32
    %337 = vector.broadcast %cst_108 : f32 to vector<8x32xf32>
    %338 = arith.select %330, %323, %337 : vector<8x32xi1>, vector<8x32xf32>
    %339 = arith.index_cast %293 : i32 to index
    %c0_109 = arith.constant 0 : index
    %c0_110 = arith.constant 0 : index
    %340 = vector.load %arg21[%339, %c0_109, %c0_110] : memref<8x8x32xf32, #tpu.memory_space<vmem>>, vector<1x8x32xf32>
    %341 = vector.shape_cast %340 : vector<1x8x32xf32> to vector<8x32xf32>
    %342 = vector.shape_cast %338 : vector<8x32xf32> to vector<1x8x32xf32>
    tpu.vector_store %arg21[%339, %c0_109, %c0_110], %342 {strides = array<i32>} : memref<8x8x32xf32, #tpu.memory_space<vmem>>, vector<1x8x32xf32>,
    %343 = tpu.concatenate %320, %323 in 1 : vector<8x32xf32>, vector<8x32xf32> -> vector<8x64xf32>
    %344 = arith.select %328, %343, %290 : vector<8x64xi1>, vector<8x64xf32>
    %345 = arith.select %329, %312, %291 : vector<8x32xi1>, vector<8x32xf32>
    %346 = arith.select %330, %317, %292 : vector<8x32xi1>, vector<8x32xf32>
    %c6_i32 = arith.constant 6 : i32
    %c7_i32_111 = arith.constant 7 : i32
    %347 = arith.subi %c7_i32_111, %c6_i32 : i32
    %348 = arith.index_cast %c6_i32 : i32 to index
    %c0_112 = arith.constant 0 : index
    %c0_113 = arith.constant 0 : index
    %349 = vector.load %arg19[%348, %c0_112, %c0_113] : memref<8x8x256xf32, #tpu.memory_space<vmem>>, vector<1x8x256xf32>
    %350 = vector.shape_cast %349 : vector<1x8x256xf32> to vector<8x256xf32>
    %cst_114 = arith.constant dense<0.000000e+00> : vector<8x256xf32>
    %351 = tpu.matmul %344, %0, %cst_114 {dimension_numbers = #tpu.dot_dimension_numbers<[1], [0], [0], [1], [0, 0, 1, 1], [], []>} : vector<8x64xf32>, vector<64x256xf32>, vector<8x256xf32> -> vector<8x256xf32>
    %352 = arith.addf %350, %351 : vector<8x256xf32>
    %353 = arith.negf %352 : vector<8x256xf32>
    %354 = math.exp %353 : vector<8x256xf32>
    %cst_115 = arith.constant 1.000000e+00 : f32
    %355 = vector.broadcast %cst_115 : f32 to vector<8x256xf32>
    %356 = arith.addf %355, %354 : vector<8x256xf32>
    %357 = arith.divf %355, %356 : vector<8x256xf32>
    %358 = vector.extract_strided_slice %352 {offsets = [0, 64], sizes = [8, 32], strides = [1, 1]} : vector<8x256xf32> to vector<8x32xf32>
    %359 = math.tanh %358 : vector<8x32xf32>
    %360 = vector.extract_strided_slice %352 {offsets = [0, 192], sizes = [8, 32], strides = [1, 1]} : vector<8x256xf32> to vector<8x32xf32>
    %361 = math.tanh %360 : vector<8x32xf32>
    %362 = vector.extract_strided_slice %357 {offsets = [0, 32], sizes = [8, 32], strides = [1, 1]} : vector<8x256xf32> to vector<8x32xf32>
    %363 = arith.mulf %362, %345 : vector<8x32xf32>
    %364 = vector.extract_strided_slice %357 {offsets = [0, 0], sizes = [8, 32], strides = [1, 1]} : vector<8x256xf32> to vector<8x32xf32>
    %365 = arith.mulf %364, %359 : vector<8x32xf32>
    %366 = arith.addf %363, %365 : vector<8x32xf32>
    %367 = vector.extract_strided_slice %357 {offsets = [0, 160], sizes = [8, 32], strides = [1, 1]} : vector<8x256xf32> to vector<8x32xf32>
    %368 = arith.mulf %367, %346 : vector<8x32xf32>
    %369 = vector.extract_strided_slice %357 {offsets = [0, 128], sizes = [8, 32], strides = [1, 1]} : vector<8x256xf32> to vector<8x32xf32>
    %370 = arith.mulf %369, %361 : vector<8x32xf32>
    %371 = arith.addf %368, %370 : vector<8x32xf32>
    %372 = vector.extract_strided_slice %357 {offsets = [0, 96], sizes = [8, 32], strides = [1, 1]} : vector<8x256xf32> to vector<8x32xf32>
    %373 = math.tanh %366 : vector<8x32xf32>
    %374 = arith.mulf %372, %373 : vector<8x32xf32>
    %375 = vector.extract_strided_slice %357 {offsets = [0, 224], sizes = [8, 32], strides = [1, 1]} : vector<8x256xf32> to vector<8x32xf32>
    %376 = math.tanh %371 : vector<8x32xf32>
    %377 = arith.mulf %375, %376 : vector<8x32xf32>
    %378 = arith.index_cast %c6_i32 : i32 to index
    %c0_116 = arith.constant 0 : index
    %c0_117 = arith.constant 0 : index
    %379 = vector.load %arg2[%378, %c0_116, %c0_117] : memref<8x8x64xf32, #tpu.memory_space<vmem>>, vector<1x8x64xf32>
    %380 = vector.shape_cast %379 : vector<1x8x64xf32> to vector<8x64xf32>
    %cst_118 = arith.constant 0.000000e+00 : f32
    %381 = vector.broadcast %cst_118 : f32 to vector<8x64xf32>
    %382 = arith.cmpf one, %380, %381 : vector<8x64xf32>
    %383 = vector.extract_strided_slice %382 {offsets = [0, 0], sizes = [8, 32], strides = [1, 1]} : vector<8x64xi1> to vector<8x32xi1>
    %384 = vector.extract_strided_slice %382 {offsets = [0, 32], sizes = [8, 32], strides = [1, 1]} : vector<8x64xi1> to vector<8x32xi1>
    %cst_119 = arith.constant 0.000000e+00 : f32
    %385 = vector.broadcast %cst_119 : f32 to vector<8x32xf32>
    %386 = arith.select %383, %374, %385 : vector<8x32xi1>, vector<8x32xf32>
    %387 = arith.index_cast %c6_i32 : i32 to index
    %c0_120 = arith.constant 0 : index
    %c0_121 = arith.constant 0 : index
    %388 = vector.load %arg20[%387, %c0_120, %c0_121] : memref<8x8x32xf32, #tpu.memory_space<vmem>>, vector<1x8x32xf32>
    %389 = vector.shape_cast %388 : vector<1x8x32xf32> to vector<8x32xf32>
    %390 = vector.shape_cast %386 : vector<8x32xf32> to vector<1x8x32xf32>
    tpu.vector_store %arg20[%387, %c0_120, %c0_121], %390 {strides = array<i32>} : memref<8x8x32xf32, #tpu.memory_space<vmem>>, vector<1x8x32xf32>,
    %cst_122 = arith.constant 0.000000e+00 : f32
    %391 = vector.broadcast %cst_122 : f32 to vector<8x32xf32>
    %392 = arith.select %384, %377, %391 : vector<8x32xi1>, vector<8x32xf32>
    %393 = arith.index_cast %347 : i32 to index
    %c0_123 = arith.constant 0 : index
    %c0_124 = arith.constant 0 : index
    %394 = vector.load %arg21[%393, %c0_123, %c0_124] : memref<8x8x32xf32, #tpu.memory_space<vmem>>, vector<1x8x32xf32>
    %395 = vector.shape_cast %394 : vector<1x8x32xf32> to vector<8x32xf32>
    %396 = vector.shape_cast %392 : vector<8x32xf32> to vector<1x8x32xf32>
    tpu.vector_store %arg21[%393, %c0_123, %c0_124], %396 {strides = array<i32>} : memref<8x8x32xf32, #tpu.memory_space<vmem>>, vector<1x8x32xf32>,
    %397 = tpu.concatenate %374, %377 in 1 : vector<8x32xf32>, vector<8x32xf32> -> vector<8x64xf32>
    %398 = arith.select %382, %397, %344 : vector<8x64xi1>, vector<8x64xf32>
    %399 = arith.select %383, %366, %345 : vector<8x32xi1>, vector<8x32xf32>
    %400 = arith.select %384, %371, %346 : vector<8x32xi1>, vector<8x32xf32>
    %c7_i32_125 = arith.constant 7 : i32
    %c7_i32_126 = arith.constant 7 : i32
    %401 = arith.subi %c7_i32_126, %c7_i32_125 : i32
    %402 = arith.index_cast %c7_i32_125 : i32 to index
    %c0_127 = arith.constant 0 : index
    %c0_128 = arith.constant 0 : index
    %403 = vector.load %arg19[%402, %c0_127, %c0_128] : memref<8x8x256xf32, #tpu.memory_space<vmem>>, vector<1x8x256xf32>
    %404 = vector.shape_cast %403 : vector<1x8x256xf32> to vector<8x256xf32>
    %cst_129 = arith.constant dense<0.000000e+00> : vector<8x256xf32>
    %405 = tpu.matmul %398, %0, %cst_129 {dimension_numbers = #tpu.dot_dimension_numbers<[1], [0], [0], [1], [0, 0, 1, 1], [], []>} : vector<8x64xf32>, vector<64x256xf32>, vector<8x256xf32> -> vector<8x256xf32>
    %406 = arith.addf %404, %405 : vector<8x256xf32>
    %407 = arith.negf %406 : vector<8x256xf32>
    %408 = math.exp %407 : vector<8x256xf32>
    %cst_130 = arith.constant 1.000000e+00 : f32
    %409 = vector.broadcast %cst_130 : f32 to vector<8x256xf32>
    %410 = arith.addf %409, %408 : vector<8x256xf32>
    %411 = arith.divf %409, %410 : vector<8x256xf32>
    %412 = vector.extract_strided_slice %406 {offsets = [0, 64], sizes = [8, 32], strides = [1, 1]} : vector<8x256xf32> to vector<8x32xf32>
    %413 = math.tanh %412 : vector<8x32xf32>
    %414 = vector.extract_strided_slice %406 {offsets = [0, 192], sizes = [8, 32], strides = [1, 1]} : vector<8x256xf32> to vector<8x32xf32>
    %415 = math.tanh %414 : vector<8x32xf32>
    %416 = vector.extract_strided_slice %411 {offsets = [0, 32], sizes = [8, 32], strides = [1, 1]} : vector<8x256xf32> to vector<8x32xf32>
    %417 = arith.mulf %416, %399 : vector<8x32xf32>
    %418 = vector.extract_strided_slice %411 {offsets = [0, 0], sizes = [8, 32], strides = [1, 1]} : vector<8x256xf32> to vector<8x32xf32>
    %419 = arith.mulf %418, %413 : vector<8x32xf32>
    %420 = arith.addf %417, %419 : vector<8x32xf32>
    %421 = vector.extract_strided_slice %411 {offsets = [0, 160], sizes = [8, 32], strides = [1, 1]} : vector<8x256xf32> to vector<8x32xf32>
    %422 = arith.mulf %421, %400 : vector<8x32xf32>
    %423 = vector.extract_strided_slice %411 {offsets = [0, 128], sizes = [8, 32], strides = [1, 1]} : vector<8x256xf32> to vector<8x32xf32>
    %424 = arith.mulf %423, %415 : vector<8x32xf32>
    %425 = arith.addf %422, %424 : vector<8x32xf32>
    %426 = vector.extract_strided_slice %411 {offsets = [0, 96], sizes = [8, 32], strides = [1, 1]} : vector<8x256xf32> to vector<8x32xf32>
    %427 = math.tanh %420 : vector<8x32xf32>
    %428 = arith.mulf %426, %427 : vector<8x32xf32>
    %429 = vector.extract_strided_slice %411 {offsets = [0, 224], sizes = [8, 32], strides = [1, 1]} : vector<8x256xf32> to vector<8x32xf32>
    %430 = math.tanh %425 : vector<8x32xf32>
    %431 = arith.mulf %429, %430 : vector<8x32xf32>
    %432 = arith.index_cast %c7_i32_125 : i32 to index
    %c0_131 = arith.constant 0 : index
    %c0_132 = arith.constant 0 : index
    %433 = vector.load %arg2[%432, %c0_131, %c0_132] : memref<8x8x64xf32, #tpu.memory_space<vmem>>, vector<1x8x64xf32>
    %434 = vector.shape_cast %433 : vector<1x8x64xf32> to vector<8x64xf32>
    %cst_133 = arith.constant 0.000000e+00 : f32
    %435 = vector.broadcast %cst_133 : f32 to vector<8x64xf32>
    %436 = arith.cmpf one, %434, %435 : vector<8x64xf32>
    %437 = vector.extract_strided_slice %436 {offsets = [0, 0], sizes = [8, 32], strides = [1, 1]} : vector<8x64xi1> to vector<8x32xi1>
    %438 = vector.extract_strided_slice %436 {offsets = [0, 32], sizes = [8, 32], strides = [1, 1]} : vector<8x64xi1> to vector<8x32xi1>
    %cst_134 = arith.constant 0.000000e+00 : f32
    %439 = vector.broadcast %cst_134 : f32 to vector<8x32xf32>
    %440 = arith.select %437, %428, %439 : vector<8x32xi1>, vector<8x32xf32>
    %441 = arith.index_cast %c7_i32_125 : i32 to index
    %c0_135 = arith.constant 0 : index
    %c0_136 = arith.constant 0 : index
    %442 = vector.load %arg20[%441, %c0_135, %c0_136] : memref<8x8x32xf32, #tpu.memory_space<vmem>>, vector<1x8x32xf32>
    %443 = vector.shape_cast %442 : vector<1x8x32xf32> to vector<8x32xf32>
    %444 = vector.shape_cast %440 : vector<8x32xf32> to vector<1x8x32xf32>
    tpu.vector_store %arg20[%441, %c0_135, %c0_136], %444 {strides = array<i32>} : memref<8x8x32xf32, #tpu.memory_space<vmem>>, vector<1x8x32xf32>,
    %cst_137 = arith.constant 0.000000e+00 : f32
    %445 = vector.broadcast %cst_137 : f32 to vector<8x32xf32>
    %446 = arith.select %438, %431, %445 : vector<8x32xi1>, vector<8x32xf32>
    %447 = arith.index_cast %401 : i32 to index
    %c0_138 = arith.constant 0 : index
    %c0_139 = arith.constant 0 : index
    %448 = vector.load %arg21[%447, %c0_138, %c0_139] : memref<8x8x32xf32, #tpu.memory_space<vmem>>, vector<1x8x32xf32>
    %449 = vector.shape_cast %448 : vector<1x8x32xf32> to vector<8x32xf32>
    %450 = vector.shape_cast %446 : vector<8x32xf32> to vector<1x8x32xf32>
    tpu.vector_store %arg21[%447, %c0_138, %c0_139], %450 {strides = array<i32>} : memref<8x8x32xf32, #tpu.memory_space<vmem>>, vector<1x8x32xf32>,
    %451 = tpu.concatenate %428, %431 in 1 : vector<8x32xf32>, vector<8x32xf32> -> vector<8x64xf32>
    %452 = arith.select %436, %451, %398 : vector<8x64xi1>, vector<8x64xf32>
    %453 = arith.select %437, %420, %399 : vector<8x32xi1>, vector<8x32xf32>
    %454 = arith.select %438, %425, %400 : vector<8x32xi1>, vector<8x32xf32>
    %c8_i32 = arith.constant 8 : i32
    %455 = tpu.concatenate %452, %453, %454 in 1 : vector<8x64xf32>, vector<8x32xf32>, vector<8x32xf32> -> vector<8x128xf32>
    %c0_140 = arith.constant 0 : index
    %c0_141 = arith.constant 0 : index
    %456 = vector.load %arg10[%c0_140, %c0_141] : memref<128x64xf32, #tpu.memory_space<vmem>>, vector<128x64xf32>
    %cst_142 = arith.constant dense<0.000000e+00> : vector<8x64xf32>
    %457 = tpu.matmul %455, %456, %cst_142 {dimension_numbers = #tpu.dot_dimension_numbers<[1], [0], [0], [1], [0, 0, 1, 1], [], []>} : vector<8x128xf32>, vector<128x64xf32>, vector<8x64xf32> -> vector<8x64xf32>
    %458 = vector.extract_strided_slice %457 {offsets = [0, 0], sizes = [8, 32], strides = [1, 1]} : vector<8x64xf32> to vector<8x32xf32>
    %459 = vector.extract_strided_slice %457 {offsets = [0, 32], sizes = [8, 32], strides = [1, 1]} : vector<8x64xf32> to vector<8x32xf32>
    %c0_143 = arith.constant 0 : index
    %c0_144 = arith.constant 0 : index
    %c0_145 = arith.constant 0 : index
    %460 = vector.load %arg20[%c0_143, %c0_144, %c0_145] : memref<8x8x32xf32, #tpu.memory_space<vmem>>, vector<8x8x32xf32>
    %c0_146 = arith.constant 0 : index
    %c0_147 = arith.constant 0 : index
    %c0_148 = arith.constant 0 : index
    %461 = vector.load %arg21[%c0_146, %c0_147, %c0_148] : memref<8x8x32xf32, #tpu.memory_space<vmem>>, vector<8x8x32xf32>
    %462 = vector.shape_cast %460 : vector<8x8x32xf32> to vector<64x32xf32>
    %c0_149 = arith.constant 0 : index
    %c0_150 = arith.constant 0 : index
    %463 = vector.load %arg11[%c0_149, %c0_150] : memref<32x32xf32, #tpu.memory_space<vmem>>, vector<32x32xf32>
    %cst_151 = arith.constant dense<0.000000e+00> : vector<64x32xf32>
    %464 = tpu.matmul %462, %463, %cst_151 {dimension_numbers = #tpu.dot_dimension_numbers<[1], [0], [0], [1], [0, 0, 1, 1], [], []>} : vector<64x32xf32>, vector<32x32xf32>, vector<64x32xf32> -> vector<64x32xf32>
    %465 = vector.shape_cast %461 : vector<8x8x32xf32> to vector<64x32xf32>
    %c0_152 = arith.constant 0 : index
    %c0_153 = arith.constant 0 : index
    %466 = vector.load %arg12[%c0_152, %c0_153] : memref<32x32xf32, #tpu.memory_space<vmem>>, vector<32x32xf32>
    %cst_154 = arith.constant dense<0.000000e+00> : vector<64x32xf32>
    %467 = tpu.matmul %465, %466, %cst_154 {dimension_numbers = #tpu.dot_dimension_numbers<[1], [0], [0], [1], [0, 0, 1, 1], [], []>} : vector<64x32xf32>, vector<32x32xf32>, vector<64x32xf32> -> vector<64x32xf32>
    %468 = arith.addf %464, %467 : vector<64x32xf32>
    %469 = vector.shape_cast %468 : vector<64x32xf32> to vector<8x8x32xf32>
    %c0_155 = arith.constant 0 : index
    %c0_156 = arith.constant 0 : index
    %c0_157 = arith.constant 0 : index
    %470 = vector.load %arg3[%c0_155, %c0_156, %c0_157] : memref<8x8x1xf32, #tpu.memory_space<vmem>>, vector<8x8x1xf32>
    %cst_158 = arith.constant 0.000000e+00 : f32
    %471 = vector.broadcast %cst_158 : f32 to vector<8x32xf32>
    %c0_i32_159 = arith.constant 0 : i32
    %472 = tpu.concatenate %471, %458 in 1 : vector<8x32xf32>, vector<8x32xf32> -> vector<8x64xf32>
    %473 = arith.index_cast %c0_i32_159 : i32 to index
    %c0_160 = arith.constant 0 : index
    %c0_161 = arith.constant 0 : index
    %474 = vector.load %arg22[%473, %c0_160, %c0_161] : memref<7x8x128xf32, #tpu.memory_space<vmem>>, vector<1x8x128xf32>
    %475 = vector.shape_cast %474 : vector<1x8x128xf32> to vector<8x128xf32>
    %cst_162 = arith.constant dense<0.000000e+00> : vector<8x128xf32>
    %476 = tpu.matmul %472, %1, %cst_162 {dimension_numbers = #tpu.dot_dimension_numbers<[1], [0], [0], [1], [0, 0, 1, 1], [], []>} : vector<8x64xf32>, vector<64x128xf32>, vector<8x128xf32> -> vector<8x128xf32>
    %477 = arith.addf %475, %476 : vector<8x128xf32>
    %478 = arith.negf %477 : vector<8x128xf32>
    %479 = math.exp %478 : vector<8x128xf32>
    %cst_163 = arith.constant 1.000000e+00 : f32
    %480 = vector.broadcast %cst_163 : f32 to vector<8x128xf32>
    %481 = arith.addf %480, %479 : vector<8x128xf32>
    %482 = arith.divf %480, %481 : vector<8x128xf32>
    %483 = vector.extract_strided_slice %477 {offsets = [0, 64], sizes = [8, 32], strides = [1, 1]} : vector<8x128xf32> to vector<8x32xf32>
    %484 = math.tanh %483 : vector<8x32xf32>
    %485 = vector.extract_strided_slice %482 {offsets = [0, 32], sizes = [8, 32], strides = [1, 1]} : vector<8x128xf32> to vector<8x32xf32>
    %486 = arith.mulf %485, %459 : vector<8x32xf32>
    %487 = vector.extract_strided_slice %482 {offsets = [0, 0], sizes = [8, 32], strides = [1, 1]} : vector<8x128xf32> to vector<8x32xf32>
    %488 = arith.mulf %487, %484 : vector<8x32xf32>
    %489 = arith.addf %486, %488 : vector<8x32xf32>
    %490 = vector.extract_strided_slice %482 {offsets = [0, 96], sizes = [8, 32], strides = [1, 1]} : vector<8x128xf32> to vector<8x32xf32>
    %491 = math.tanh %489 : vector<8x32xf32>
    %492 = arith.mulf %490, %491 : vector<8x32xf32>
    %493 = vector.shape_cast %492 : vector<8x32xf32> to vector<1x8x32xf32>
    %494 = vector.broadcast %493 : vector<1x8x32xf32> to vector<8x8x32xf32>
    %495 = arith.mulf %469, %494 : vector<8x8x32xf32>
    %cst_164 = arith.constant dense<0.000000e+00> : vector<8x8xf32>
    %496 = vector.multi_reduction <add>, %495, %cst_164 [2] : vector<8x8x32xf32> to vector<8x8xf32>
    %497 = vector.shape_cast %496 : vector<8x8xf32> to vector<8x8x1xf32>
    %498 = arith.addf %497, %470 : vector<8x8x1xf32>
    %cst_165 = arith.constant dense<0xFF800000> : vector<8x1xf32>
    %499 = vector.multi_reduction <maximumf>, %498, %cst_165 [0] : vector<8x8x1xf32> to vector<8x1xf32>
    %500 = vector.shape_cast %499 : vector<8x1xf32> to vector<1x8x1xf32>
    %501 = vector.broadcast %500 : vector<1x8x1xf32> to vector<8x8x1xf32>
    %502 = arith.subf %498, %501 : vector<8x8x1xf32>
    %503 = math.exp %502 : vector<8x8x1xf32>
    %cst_166 = arith.constant dense<0.000000e+00> : vector<8x1xf32>
    %504 = vector.multi_reduction <add>, %503, %cst_166 [0] : vector<8x8x1xf32> to vector<8x1xf32>
    %505 = vector.shape_cast %504 : vector<8x1xf32> to vector<1x8x1xf32>
    %506 = tpu.reciprocal %505 {approx = true} : vector<1x8x1xf32> -> vector<1x8x1xf32>
    %507 = vector.broadcast %506 : vector<1x8x1xf32> to vector<8x8x1xf32>
    %508 = arith.mulf %503, %507 : vector<8x8x1xf32>
    %509 = vector.broadcast %508 : vector<8x8x1xf32> to vector<8x8x32xf32>
    %510 = arith.mulf %509, %460 : vector<8x8x32xf32>
    %cst_167 = arith.constant dense<0.000000e+00> : vector<8x32xf32>
    %511 = vector.multi_reduction <add>, %510, %cst_167 [0] : vector<8x8x32xf32> to vector<8x32xf32>
    %512 = vector.broadcast %508 : vector<8x8x1xf32> to vector<8x8x32xf32>
    %513 = arith.mulf %512, %461 : vector<8x8x32xf32>
    %cst_168 = arith.constant dense<0.000000e+00> : vector<8x32xf32>
    %514 = vector.multi_reduction <add>, %513, %cst_168 [0] : vector<8x8x32xf32> to vector<8x32xf32>
    %515 = tpu.concatenate %511, %514, %492 in 1 : vector<8x32xf32>, vector<8x32xf32>, vector<8x32xf32> -> vector<8x96xf32>
    %cst_169 = arith.constant dense<0.000000e+00> : vector<8x32xf32>
    %516 = tpu.matmul %515, %2, %cst_169 {dimension_numbers = #tpu.dot_dimension_numbers<[1], [0], [0], [1], [0, 0, 1, 1], [], []>} : vector<8x96xf32>, vector<96x32xf32>, vector<8x32xf32> -> vector<8x32xf32>
    %517 = math.tanh %516 : vector<8x32xf32>
    %518 = arith.index_cast %c0_i32_159 : i32 to index
    %c0_170 = arith.constant 0 : index
    %c0_171 = arith.constant 0 : index
    %519 = vector.load %arg23[%518, %c0_170, %c0_171] : memref<7x8x32xf32, #tpu.memory_space<vmem>>, vector<1x8x32xf32>
    %520 = vector.shape_cast %519 : vector<1x8x32xf32> to vector<8x32xf32>
    %521 = vector.shape_cast %517 : vector<8x32xf32> to vector<1x8x32xf32>
    tpu.vector_store %arg23[%518, %c0_170, %c0_171], %521 {strides = array<i32>} : memref<7x8x32xf32, #tpu.memory_space<vmem>>, vector<1x8x32xf32>,
    %c1_i32_172 = arith.constant 1 : i32
    %522 = tpu.concatenate %517, %492 in 1 : vector<8x32xf32>, vector<8x32xf32> -> vector<8x64xf32>
    %523 = arith.index_cast %c1_i32_172 : i32 to index
    %c0_173 = arith.constant 0 : index
    %c0_174 = arith.constant 0 : index
    %524 = vector.load %arg22[%523, %c0_173, %c0_174] : memref<7x8x128xf32, #tpu.memory_space<vmem>>, vector<1x8x128xf32>
    %525 = vector.shape_cast %524 : vector<1x8x128xf32> to vector<8x128xf32>
    %cst_175 = arith.constant dense<0.000000e+00> : vector<8x128xf32>
    %526 = tpu.matmul %522, %1, %cst_175 {dimension_numbers = #tpu.dot_dimension_numbers<[1], [0], [0], [1], [0, 0, 1, 1], [], []>} : vector<8x64xf32>, vector<64x128xf32>, vector<8x128xf32> -> vector<8x128xf32>
    %527 = arith.addf %525, %526 : vector<8x128xf32>
    %528 = arith.negf %527 : vector<8x128xf32>
    %529 = math.exp %528 : vector<8x128xf32>
    %cst_176 = arith.constant 1.000000e+00 : f32
    %530 = vector.broadcast %cst_176 : f32 to vector<8x128xf32>
    %531 = arith.addf %530, %529 : vector<8x128xf32>
    %532 = arith.divf %530, %531 : vector<8x128xf32>
    %533 = vector.extract_strided_slice %527 {offsets = [0, 64], sizes = [8, 32], strides = [1, 1]} : vector<8x128xf32> to vector<8x32xf32>
    %534 = math.tanh %533 : vector<8x32xf32>
    %535 = vector.extract_strided_slice %532 {offsets = [0, 32], sizes = [8, 32], strides = [1, 1]} : vector<8x128xf32> to vector<8x32xf32>
    %536 = arith.mulf %535, %489 : vector<8x32xf32>
    %537 = vector.extract_strided_slice %532 {offsets = [0, 0], sizes = [8, 32], strides = [1, 1]} : vector<8x128xf32> to vector<8x32xf32>
    %538 = arith.mulf %537, %534 : vector<8x32xf32>
    %539 = arith.addf %536, %538 : vector<8x32xf32>
    %540 = vector.extract_strided_slice %532 {offsets = [0, 96], sizes = [8, 32], strides = [1, 1]} : vector<8x128xf32> to vector<8x32xf32>
    %541 = math.tanh %539 : vector<8x32xf32>
    %542 = arith.mulf %540, %541 : vector<8x32xf32>
    %543 = vector.shape_cast %542 : vector<8x32xf32> to vector<1x8x32xf32>
    %544 = vector.broadcast %543 : vector<1x8x32xf32> to vector<8x8x32xf32>
    %545 = arith.mulf %469, %544 : vector<8x8x32xf32>
    %cst_177 = arith.constant dense<0.000000e+00> : vector<8x8xf32>
    %546 = vector.multi_reduction <add>, %545, %cst_177 [2] : vector<8x8x32xf32> to vector<8x8xf32>
    %547 = vector.shape_cast %546 : vector<8x8xf32> to vector<8x8x1xf32>
    %548 = arith.addf %547, %470 : vector<8x8x1xf32>
    %cst_178 = arith.constant dense<0xFF800000> : vector<8x1xf32>
    %549 = vector.multi_reduction <maximumf>, %548, %cst_178 [0] : vector<8x8x1xf32> to vector<8x1xf32>
    %550 = vector.shape_cast %549 : vector<8x1xf32> to vector<1x8x1xf32>
    %551 = vector.broadcast %550 : vector<1x8x1xf32> to vector<8x8x1xf32>
    %552 = arith.subf %548, %551 : vector<8x8x1xf32>
    %553 = math.exp %552 : vector<8x8x1xf32>
    %cst_179 = arith.constant dense<0.000000e+00> : vector<8x1xf32>
    %554 = vector.multi_reduction <add>, %553, %cst_179 [0] : vector<8x8x1xf32> to vector<8x1xf32>
    %555 = vector.shape_cast %554 : vector<8x1xf32> to vector<1x8x1xf32>
    %556 = tpu.reciprocal %555 {approx = true} : vector<1x8x1xf32> -> vector<1x8x1xf32>
    %557 = vector.broadcast %556 : vector<1x8x1xf32> to vector<8x8x1xf32>
    %558 = arith.mulf %553, %557 : vector<8x8x1xf32>
    %559 = vector.broadcast %558 : vector<8x8x1xf32> to vector<8x8x32xf32>
    %560 = arith.mulf %559, %460 : vector<8x8x32xf32>
    %cst_180 = arith.constant dense<0.000000e+00> : vector<8x32xf32>
    %561 = vector.multi_reduction <add>, %560, %cst_180 [0] : vector<8x8x32xf32> to vector<8x32xf32>
    %562 = vector.broadcast %558 : vector<8x8x1xf32> to vector<8x8x32xf32>
    %563 = arith.mulf %562, %461 : vector<8x8x32xf32>
    %cst_181 = arith.constant dense<0.000000e+00> : vector<8x32xf32>
    %564 = vector.multi_reduction <add>, %563, %cst_181 [0] : vector<8x8x32xf32> to vector<8x32xf32>
    %565 = tpu.concatenate %561, %564, %542 in 1 : vector<8x32xf32>, vector<8x32xf32>, vector<8x32xf32> -> vector<8x96xf32>
    %cst_182 = arith.constant dense<0.000000e+00> : vector<8x32xf32>
    %566 = tpu.matmul %565, %2, %cst_182 {dimension_numbers = #tpu.dot_dimension_numbers<[1], [0], [0], [1], [0, 0, 1, 1], [], []>} : vector<8x96xf32>, vector<96x32xf32>, vector<8x32xf32> -> vector<8x32xf32>
    %567 = math.tanh %566 : vector<8x32xf32>
    %568 = arith.index_cast %c1_i32_172 : i32 to index
    %c0_183 = arith.constant 0 : index
    %c0_184 = arith.constant 0 : index
    %569 = vector.load %arg23[%568, %c0_183, %c0_184] : memref<7x8x32xf32, #tpu.memory_space<vmem>>, vector<1x8x32xf32>
    %570 = vector.shape_cast %569 : vector<1x8x32xf32> to vector<8x32xf32>
    %571 = vector.shape_cast %567 : vector<8x32xf32> to vector<1x8x32xf32>
    tpu.vector_store %arg23[%568, %c0_183, %c0_184], %571 {strides = array<i32>} : memref<7x8x32xf32, #tpu.memory_space<vmem>>, vector<1x8x32xf32>,
    %c2_i32_185 = arith.constant 2 : i32
    %572 = tpu.concatenate %567, %542 in 1 : vector<8x32xf32>, vector<8x32xf32> -> vector<8x64xf32>
    %573 = arith.index_cast %c2_i32_185 : i32 to index
    %c0_186 = arith.constant 0 : index
    %c0_187 = arith.constant 0 : index
    %574 = vector.load %arg22[%573, %c0_186, %c0_187] : memref<7x8x128xf32, #tpu.memory_space<vmem>>, vector<1x8x128xf32>
    %575 = vector.shape_cast %574 : vector<1x8x128xf32> to vector<8x128xf32>
    %cst_188 = arith.constant dense<0.000000e+00> : vector<8x128xf32>
    %576 = tpu.matmul %572, %1, %cst_188 {dimension_numbers = #tpu.dot_dimension_numbers<[1], [0], [0], [1], [0, 0, 1, 1], [], []>} : vector<8x64xf32>, vector<64x128xf32>, vector<8x128xf32> -> vector<8x128xf32>
    %577 = arith.addf %575, %576 : vector<8x128xf32>
    %578 = arith.negf %577 : vector<8x128xf32>
    %579 = math.exp %578 : vector<8x128xf32>
    %cst_189 = arith.constant 1.000000e+00 : f32
    %580 = vector.broadcast %cst_189 : f32 to vector<8x128xf32>
    %581 = arith.addf %580, %579 : vector<8x128xf32>
    %582 = arith.divf %580, %581 : vector<8x128xf32>
    %583 = vector.extract_strided_slice %577 {offsets = [0, 64], sizes = [8, 32], strides = [1, 1]} : vector<8x128xf32> to vector<8x32xf32>
    %584 = math.tanh %583 : vector<8x32xf32>
    %585 = vector.extract_strided_slice %582 {offsets = [0, 32], sizes = [8, 32], strides = [1, 1]} : vector<8x128xf32> to vector<8x32xf32>
    %586 = arith.mulf %585, %539 : vector<8x32xf32>
    %587 = vector.extract_strided_slice %582 {offsets = [0, 0], sizes = [8, 32], strides = [1, 1]} : vector<8x128xf32> to vector<8x32xf32>
    %588 = arith.mulf %587, %584 : vector<8x32xf32>
    %589 = arith.addf %586, %588 : vector<8x32xf32>
    %590 = vector.extract_strided_slice %582 {offsets = [0, 96], sizes = [8, 32], strides = [1, 1]} : vector<8x128xf32> to vector<8x32xf32>
    %591 = math.tanh %589 : vector<8x32xf32>
    %592 = arith.mulf %590, %591 : vector<8x32xf32>
    %593 = vector.shape_cast %592 : vector<8x32xf32> to vector<1x8x32xf32>
    %594 = vector.broadcast %593 : vector<1x8x32xf32> to vector<8x8x32xf32>
    %595 = arith.mulf %469, %594 : vector<8x8x32xf32>
    %cst_190 = arith.constant dense<0.000000e+00> : vector<8x8xf32>
    %596 = vector.multi_reduction <add>, %595, %cst_190 [2] : vector<8x8x32xf32> to vector<8x8xf32>
    %597 = vector.shape_cast %596 : vector<8x8xf32> to vector<8x8x1xf32>
    %598 = arith.addf %597, %470 : vector<8x8x1xf32>
    %cst_191 = arith.constant dense<0xFF800000> : vector<8x1xf32>
    %599 = vector.multi_reduction <maximumf>, %598, %cst_191 [0] : vector<8x8x1xf32> to vector<8x1xf32>
    %600 = vector.shape_cast %599 : vector<8x1xf32> to vector<1x8x1xf32>
    %601 = vector.broadcast %600 : vector<1x8x1xf32> to vector<8x8x1xf32>
    %602 = arith.subf %598, %601 : vector<8x8x1xf32>
    %603 = math.exp %602 : vector<8x8x1xf32>
    %cst_192 = arith.constant dense<0.000000e+00> : vector<8x1xf32>
    %604 = vector.multi_reduction <add>, %603, %cst_192 [0] : vector<8x8x1xf32> to vector<8x1xf32>
    %605 = vector.shape_cast %604 : vector<8x1xf32> to vector<1x8x1xf32>
    %606 = tpu.reciprocal %605 {approx = true} : vector<1x8x1xf32> -> vector<1x8x1xf32>
    %607 = vector.broadcast %606 : vector<1x8x1xf32> to vector<8x8x1xf32>
    %608 = arith.mulf %603, %607 : vector<8x8x1xf32>
    %609 = vector.broadcast %608 : vector<8x8x1xf32> to vector<8x8x32xf32>
    %610 = arith.mulf %609, %460 : vector<8x8x32xf32>
    %cst_193 = arith.constant dense<0.000000e+00> : vector<8x32xf32>
    %611 = vector.multi_reduction <add>, %610, %cst_193 [0] : vector<8x8x32xf32> to vector<8x32xf32>
    %612 = vector.broadcast %608 : vector<8x8x1xf32> to vector<8x8x32xf32>
    %613 = arith.mulf %612, %461 : vector<8x8x32xf32>
    %cst_194 = arith.constant dense<0.000000e+00> : vector<8x32xf32>
    %614 = vector.multi_reduction <add>, %613, %cst_194 [0] : vector<8x8x32xf32> to vector<8x32xf32>
    %615 = tpu.concatenate %611, %614, %592 in 1 : vector<8x32xf32>, vector<8x32xf32>, vector<8x32xf32> -> vector<8x96xf32>
    %cst_195 = arith.constant dense<0.000000e+00> : vector<8x32xf32>
    %616 = tpu.matmul %615, %2, %cst_195 {dimension_numbers = #tpu.dot_dimension_numbers<[1], [0], [0], [1], [0, 0, 1, 1], [], []>} : vector<8x96xf32>, vector<96x32xf32>, vector<8x32xf32> -> vector<8x32xf32>
    %617 = math.tanh %616 : vector<8x32xf32>
    %618 = arith.index_cast %c2_i32_185 : i32 to index
    %c0_196 = arith.constant 0 : index
    %c0_197 = arith.constant 0 : index
    %619 = vector.load %arg23[%618, %c0_196, %c0_197] : memref<7x8x32xf32, #tpu.memory_space<vmem>>, vector<1x8x32xf32>
    %620 = vector.shape_cast %619 : vector<1x8x32xf32> to vector<8x32xf32>
    %621 = vector.shape_cast %617 : vector<8x32xf32> to vector<1x8x32xf32>
    tpu.vector_store %arg23[%618, %c0_196, %c0_197], %621 {strides = array<i32>} : memref<7x8x32xf32, #tpu.memory_space<vmem>>, vector<1x8x32xf32>,
    %c3_i32_198 = arith.constant 3 : i32
    %622 = tpu.concatenate %617, %592 in 1 : vector<8x32xf32>, vector<8x32xf32> -> vector<8x64xf32>
    %623 = arith.index_cast %c3_i32_198 : i32 to index
    %c0_199 = arith.constant 0 : index
    %c0_200 = arith.constant 0 : index
    %624 = vector.load %arg22[%623, %c0_199, %c0_200] : memref<7x8x128xf32, #tpu.memory_space<vmem>>, vector<1x8x128xf32>
    %625 = vector.shape_cast %624 : vector<1x8x128xf32> to vector<8x128xf32>
    %cst_201 = arith.constant dense<0.000000e+00> : vector<8x128xf32>
    %626 = tpu.matmul %622, %1, %cst_201 {dimension_numbers = #tpu.dot_dimension_numbers<[1], [0], [0], [1], [0, 0, 1, 1], [], []>} : vector<8x64xf32>, vector<64x128xf32>, vector<8x128xf32> -> vector<8x128xf32>
    %627 = arith.addf %625, %626 : vector<8x128xf32>
    %628 = arith.negf %627 : vector<8x128xf32>
    %629 = math.exp %628 : vector<8x128xf32>
    %cst_202 = arith.constant 1.000000e+00 : f32
    %630 = vector.broadcast %cst_202 : f32 to vector<8x128xf32>
    %631 = arith.addf %630, %629 : vector<8x128xf32>
    %632 = arith.divf %630, %631 : vector<8x128xf32>
    %633 = vector.extract_strided_slice %627 {offsets = [0, 64], sizes = [8, 32], strides = [1, 1]} : vector<8x128xf32> to vector<8x32xf32>
    %634 = math.tanh %633 : vector<8x32xf32>
    %635 = vector.extract_strided_slice %632 {offsets = [0, 32], sizes = [8, 32], strides = [1, 1]} : vector<8x128xf32> to vector<8x32xf32>
    %636 = arith.mulf %635, %589 : vector<8x32xf32>
    %637 = vector.extract_strided_slice %632 {offsets = [0, 0], sizes = [8, 32], strides = [1, 1]} : vector<8x128xf32> to vector<8x32xf32>
    %638 = arith.mulf %637, %634 : vector<8x32xf32>
    %639 = arith.addf %636, %638 : vector<8x32xf32>
    %640 = vector.extract_strided_slice %632 {offsets = [0, 96], sizes = [8, 32], strides = [1, 1]} : vector<8x128xf32> to vector<8x32xf32>
    %641 = math.tanh %639 : vector<8x32xf32>
    %642 = arith.mulf %640, %641 : vector<8x32xf32>
    %643 = vector.shape_cast %642 : vector<8x32xf32> to vector<1x8x32xf32>
    %644 = vector.broadcast %643 : vector<1x8x32xf32> to vector<8x8x32xf32>
    %645 = arith.mulf %469, %644 : vector<8x8x32xf32>
    %cst_203 = arith.constant dense<0.000000e+00> : vector<8x8xf32>
    %646 = vector.multi_reduction <add>, %645, %cst_203 [2] : vector<8x8x32xf32> to vector<8x8xf32>
    %647 = vector.shape_cast %646 : vector<8x8xf32> to vector<8x8x1xf32>
    %648 = arith.addf %647, %470 : vector<8x8x1xf32>
    %cst_204 = arith.constant dense<0xFF800000> : vector<8x1xf32>
    %649 = vector.multi_reduction <maximumf>, %648, %cst_204 [0] : vector<8x8x1xf32> to vector<8x1xf32>
    %650 = vector.shape_cast %649 : vector<8x1xf32> to vector<1x8x1xf32>
    %651 = vector.broadcast %650 : vector<1x8x1xf32> to vector<8x8x1xf32>
    %652 = arith.subf %648, %651 : vector<8x8x1xf32>
    %653 = math.exp %652 : vector<8x8x1xf32>
    %cst_205 = arith.constant dense<0.000000e+00> : vector<8x1xf32>
    %654 = vector.multi_reduction <add>, %653, %cst_205 [0] : vector<8x8x1xf32> to vector<8x1xf32>
    %655 = vector.shape_cast %654 : vector<8x1xf32> to vector<1x8x1xf32>
    %656 = tpu.reciprocal %655 {approx = true} : vector<1x8x1xf32> -> vector<1x8x1xf32>
    %657 = vector.broadcast %656 : vector<1x8x1xf32> to vector<8x8x1xf32>
    %658 = arith.mulf %653, %657 : vector<8x8x1xf32>
    %659 = vector.broadcast %658 : vector<8x8x1xf32> to vector<8x8x32xf32>
    %660 = arith.mulf %659, %460 : vector<8x8x32xf32>
    %cst_206 = arith.constant dense<0.000000e+00> : vector<8x32xf32>
    %661 = vector.multi_reduction <add>, %660, %cst_206 [0] : vector<8x8x32xf32> to vector<8x32xf32>
    %662 = vector.broadcast %658 : vector<8x8x1xf32> to vector<8x8x32xf32>
    %663 = arith.mulf %662, %461 : vector<8x8x32xf32>
    %cst_207 = arith.constant dense<0.000000e+00> : vector<8x32xf32>
    %664 = vector.multi_reduction <add>, %663, %cst_207 [0] : vector<8x8x32xf32> to vector<8x32xf32>
    %665 = tpu.concatenate %661, %664, %642 in 1 : vector<8x32xf32>, vector<8x32xf32>, vector<8x32xf32> -> vector<8x96xf32>
    %cst_208 = arith.constant dense<0.000000e+00> : vector<8x32xf32>
    %666 = tpu.matmul %665, %2, %cst_208 {dimension_numbers = #tpu.dot_dimension_numbers<[1], [0], [0], [1], [0, 0, 1, 1], [], []>} : vector<8x96xf32>, vector<96x32xf32>, vector<8x32xf32> -> vector<8x32xf32>
    %667 = math.tanh %666 : vector<8x32xf32>
    %668 = arith.index_cast %c3_i32_198 : i32 to index
    %c0_209 = arith.constant 0 : index
    %c0_210 = arith.constant 0 : index
    %669 = vector.load %arg23[%668, %c0_209, %c0_210] : memref<7x8x32xf32, #tpu.memory_space<vmem>>, vector<1x8x32xf32>
    %670 = vector.shape_cast %669 : vector<1x8x32xf32> to vector<8x32xf32>
    %671 = vector.shape_cast %667 : vector<8x32xf32> to vector<1x8x32xf32>
    tpu.vector_store %arg23[%668, %c0_209, %c0_210], %671 {strides = array<i32>} : memref<7x8x32xf32, #tpu.memory_space<vmem>>, vector<1x8x32xf32>,
    %c4_i32_211 = arith.constant 4 : i32
    %672 = tpu.concatenate %667, %642 in 1 : vector<8x32xf32>, vector<8x32xf32> -> vector<8x64xf32>
    %673 = arith.index_cast %c4_i32_211 : i32 to index
    %c0_212 = arith.constant 0 : index
    %c0_213 = arith.constant 0 : index
    %674 = vector.load %arg22[%673, %c0_212, %c0_213] : memref<7x8x128xf32, #tpu.memory_space<vmem>>, vector<1x8x128xf32>
    %675 = vector.shape_cast %674 : vector<1x8x128xf32> to vector<8x128xf32>
    %cst_214 = arith.constant dense<0.000000e+00> : vector<8x128xf32>
    %676 = tpu.matmul %672, %1, %cst_214 {dimension_numbers = #tpu.dot_dimension_numbers<[1], [0], [0], [1], [0, 0, 1, 1], [], []>} : vector<8x64xf32>, vector<64x128xf32>, vector<8x128xf32> -> vector<8x128xf32>
    %677 = arith.addf %675, %676 : vector<8x128xf32>
    %678 = arith.negf %677 : vector<8x128xf32>
    %679 = math.exp %678 : vector<8x128xf32>
    %cst_215 = arith.constant 1.000000e+00 : f32
    %680 = vector.broadcast %cst_215 : f32 to vector<8x128xf32>
    %681 = arith.addf %680, %679 : vector<8x128xf32>
    %682 = arith.divf %680, %681 : vector<8x128xf32>
    %683 = vector.extract_strided_slice %677 {offsets = [0, 64], sizes = [8, 32], strides = [1, 1]} : vector<8x128xf32> to vector<8x32xf32>
    %684 = math.tanh %683 : vector<8x32xf32>
    %685 = vector.extract_strided_slice %682 {offsets = [0, 32], sizes = [8, 32], strides = [1, 1]} : vector<8x128xf32> to vector<8x32xf32>
    %686 = arith.mulf %685, %639 : vector<8x32xf32>
    %687 = vector.extract_strided_slice %682 {offsets = [0, 0], sizes = [8, 32], strides = [1, 1]} : vector<8x128xf32> to vector<8x32xf32>
    %688 = arith.mulf %687, %684 : vector<8x32xf32>
    %689 = arith.addf %686, %688 : vector<8x32xf32>
    %690 = vector.extract_strided_slice %682 {offsets = [0, 96], sizes = [8, 32], strides = [1, 1]} : vector<8x128xf32> to vector<8x32xf32>
    %691 = math.tanh %689 : vector<8x32xf32>
    %692 = arith.mulf %690, %691 : vector<8x32xf32>
    %693 = vector.shape_cast %692 : vector<8x32xf32> to vector<1x8x32xf32>
    %694 = vector.broadcast %693 : vector<1x8x32xf32> to vector<8x8x32xf32>
    %695 = arith.mulf %469, %694 : vector<8x8x32xf32>
    %cst_216 = arith.constant dense<0.000000e+00> : vector<8x8xf32>
    %696 = vector.multi_reduction <add>, %695, %cst_216 [2] : vector<8x8x32xf32> to vector<8x8xf32>
    %697 = vector.shape_cast %696 : vector<8x8xf32> to vector<8x8x1xf32>
    %698 = arith.addf %697, %470 : vector<8x8x1xf32>
    %cst_217 = arith.constant dense<0xFF800000> : vector<8x1xf32>
    %699 = vector.multi_reduction <maximumf>, %698, %cst_217 [0] : vector<8x8x1xf32> to vector<8x1xf32>
    %700 = vector.shape_cast %699 : vector<8x1xf32> to vector<1x8x1xf32>
    %701 = vector.broadcast %700 : vector<1x8x1xf32> to vector<8x8x1xf32>
    %702 = arith.subf %698, %701 : vector<8x8x1xf32>
    %703 = math.exp %702 : vector<8x8x1xf32>
    %cst_218 = arith.constant dense<0.000000e+00> : vector<8x1xf32>
    %704 = vector.multi_reduction <add>, %703, %cst_218 [0] : vector<8x8x1xf32> to vector<8x1xf32>
    %705 = vector.shape_cast %704 : vector<8x1xf32> to vector<1x8x1xf32>
    %706 = tpu.reciprocal %705 {approx = true} : vector<1x8x1xf32> -> vector<1x8x1xf32>
    %707 = vector.broadcast %706 : vector<1x8x1xf32> to vector<8x8x1xf32>
    %708 = arith.mulf %703, %707 : vector<8x8x1xf32>
    %709 = vector.broadcast %708 : vector<8x8x1xf32> to vector<8x8x32xf32>
    %710 = arith.mulf %709, %460 : vector<8x8x32xf32>
    %cst_219 = arith.constant dense<0.000000e+00> : vector<8x32xf32>
    %711 = vector.multi_reduction <add>, %710, %cst_219 [0] : vector<8x8x32xf32> to vector<8x32xf32>
    %712 = vector.broadcast %708 : vector<8x8x1xf32> to vector<8x8x32xf32>
    %713 = arith.mulf %712, %461 : vector<8x8x32xf32>
    %cst_220 = arith.constant dense<0.000000e+00> : vector<8x32xf32>
    %714 = vector.multi_reduction <add>, %713, %cst_220 [0] : vector<8x8x32xf32> to vector<8x32xf32>
    %715 = tpu.concatenate %711, %714, %692 in 1 : vector<8x32xf32>, vector<8x32xf32>, vector<8x32xf32> -> vector<8x96xf32>
    %cst_221 = arith.constant dense<0.000000e+00> : vector<8x32xf32>
    %716 = tpu.matmul %715, %2, %cst_221 {dimension_numbers = #tpu.dot_dimension_numbers<[1], [0], [0], [1], [0, 0, 1, 1], [], []>} : vector<8x96xf32>, vector<96x32xf32>, vector<8x32xf32> -> vector<8x32xf32>
    %717 = math.tanh %716 : vector<8x32xf32>
    %718 = arith.index_cast %c4_i32_211 : i32 to index
    %c0_222 = arith.constant 0 : index
    %c0_223 = arith.constant 0 : index
    %719 = vector.load %arg23[%718, %c0_222, %c0_223] : memref<7x8x32xf32, #tpu.memory_space<vmem>>, vector<1x8x32xf32>
    %720 = vector.shape_cast %719 : vector<1x8x32xf32> to vector<8x32xf32>
    %721 = vector.shape_cast %717 : vector<8x32xf32> to vector<1x8x32xf32>
    tpu.vector_store %arg23[%718, %c0_222, %c0_223], %721 {strides = array<i32>} : memref<7x8x32xf32, #tpu.memory_space<vmem>>, vector<1x8x32xf32>,
    %c5_i32_224 = arith.constant 5 : i32
    %722 = tpu.concatenate %717, %692 in 1 : vector<8x32xf32>, vector<8x32xf32> -> vector<8x64xf32>
    %723 = arith.index_cast %c5_i32_224 : i32 to index
    %c0_225 = arith.constant 0 : index
    %c0_226 = arith.constant 0 : index
    %724 = vector.load %arg22[%723, %c0_225, %c0_226] : memref<7x8x128xf32, #tpu.memory_space<vmem>>, vector<1x8x128xf32>
    %725 = vector.shape_cast %724 : vector<1x8x128xf32> to vector<8x128xf32>
    %cst_227 = arith.constant dense<0.000000e+00> : vector<8x128xf32>
    %726 = tpu.matmul %722, %1, %cst_227 {dimension_numbers = #tpu.dot_dimension_numbers<[1], [0], [0], [1], [0, 0, 1, 1], [], []>} : vector<8x64xf32>, vector<64x128xf32>, vector<8x128xf32> -> vector<8x128xf32>
    %727 = arith.addf %725, %726 : vector<8x128xf32>
    %728 = arith.negf %727 : vector<8x128xf32>
    %729 = math.exp %728 : vector<8x128xf32>
    %cst_228 = arith.constant 1.000000e+00 : f32
    %730 = vector.broadcast %cst_228 : f32 to vector<8x128xf32>
    %731 = arith.addf %730, %729 : vector<8x128xf32>
    %732 = arith.divf %730, %731 : vector<8x128xf32>
    %733 = vector.extract_strided_slice %727 {offsets = [0, 64], sizes = [8, 32], strides = [1, 1]} : vector<8x128xf32> to vector<8x32xf32>
    %734 = math.tanh %733 : vector<8x32xf32>
    %735 = vector.extract_strided_slice %732 {offsets = [0, 32], sizes = [8, 32], strides = [1, 1]} : vector<8x128xf32> to vector<8x32xf32>
    %736 = arith.mulf %735, %689 : vector<8x32xf32>
    %737 = vector.extract_strided_slice %732 {offsets = [0, 0], sizes = [8, 32], strides = [1, 1]} : vector<8x128xf32> to vector<8x32xf32>
    %738 = arith.mulf %737, %734 : vector<8x32xf32>
    %739 = arith.addf %736, %738 : vector<8x32xf32>
    %740 = vector.extract_strided_slice %732 {offsets = [0, 96], sizes = [8, 32], strides = [1, 1]} : vector<8x128xf32> to vector<8x32xf32>
    %741 = math.tanh %739 : vector<8x32xf32>
    %742 = arith.mulf %740, %741 : vector<8x32xf32>
    %743 = vector.shape_cast %742 : vector<8x32xf32> to vector<1x8x32xf32>
    %744 = vector.broadcast %743 : vector<1x8x32xf32> to vector<8x8x32xf32>
    %745 = arith.mulf %469, %744 : vector<8x8x32xf32>
    %cst_229 = arith.constant dense<0.000000e+00> : vector<8x8xf32>
    %746 = vector.multi_reduction <add>, %745, %cst_229 [2] : vector<8x8x32xf32> to vector<8x8xf32>
    %747 = vector.shape_cast %746 : vector<8x8xf32> to vector<8x8x1xf32>
    %748 = arith.addf %747, %470 : vector<8x8x1xf32>
    %cst_230 = arith.constant dense<0xFF800000> : vector<8x1xf32>
    %749 = vector.multi_reduction <maximumf>, %748, %cst_230 [0] : vector<8x8x1xf32> to vector<8x1xf32>
    %750 = vector.shape_cast %749 : vector<8x1xf32> to vector<1x8x1xf32>
    %751 = vector.broadcast %750 : vector<1x8x1xf32> to vector<8x8x1xf32>
    %752 = arith.subf %748, %751 : vector<8x8x1xf32>
    %753 = math.exp %752 : vector<8x8x1xf32>
    %cst_231 = arith.constant dense<0.000000e+00> : vector<8x1xf32>
    %754 = vector.multi_reduction <add>, %753, %cst_231 [0] : vector<8x8x1xf32> to vector<8x1xf32>
    %755 = vector.shape_cast %754 : vector<8x1xf32> to vector<1x8x1xf32>
    %756 = tpu.reciprocal %755 {approx = true} : vector<1x8x1xf32> -> vector<1x8x1xf32>
    %757 = vector.broadcast %756 : vector<1x8x1xf32> to vector<8x8x1xf32>
    %758 = arith.mulf %753, %757 : vector<8x8x1xf32>
    %759 = vector.broadcast %758 : vector<8x8x1xf32> to vector<8x8x32xf32>
    %760 = arith.mulf %759, %460 : vector<8x8x32xf32>
    %cst_232 = arith.constant dense<0.000000e+00> : vector<8x32xf32>
    %761 = vector.multi_reduction <add>, %760, %cst_232 [0] : vector<8x8x32xf32> to vector<8x32xf32>
    %762 = vector.broadcast %758 : vector<8x8x1xf32> to vector<8x8x32xf32>
    %763 = arith.mulf %762, %461 : vector<8x8x32xf32>
    %cst_233 = arith.constant dense<0.000000e+00> : vector<8x32xf32>
    %764 = vector.multi_reduction <add>, %763, %cst_233 [0] : vector<8x8x32xf32> to vector<8x32xf32>
    %765 = tpu.concatenate %761, %764, %742 in 1 : vector<8x32xf32>, vector<8x32xf32>, vector<8x32xf32> -> vector<8x96xf32>
    %cst_234 = arith.constant dense<0.000000e+00> : vector<8x32xf32>
    %766 = tpu.matmul %765, %2, %cst_234 {dimension_numbers = #tpu.dot_dimension_numbers<[1], [0], [0], [1], [0, 0, 1, 1], [], []>} : vector<8x96xf32>, vector<96x32xf32>, vector<8x32xf32> -> vector<8x32xf32>
    %767 = math.tanh %766 : vector<8x32xf32>
    %768 = arith.index_cast %c5_i32_224 : i32 to index
    %c0_235 = arith.constant 0 : index
    %c0_236 = arith.constant 0 : index
    %769 = vector.load %arg23[%768, %c0_235, %c0_236] : memref<7x8x32xf32, #tpu.memory_space<vmem>>, vector<1x8x32xf32>
    %770 = vector.shape_cast %769 : vector<1x8x32xf32> to vector<8x32xf32>
    %771 = vector.shape_cast %767 : vector<8x32xf32> to vector<1x8x32xf32>
    tpu.vector_store %arg23[%768, %c0_235, %c0_236], %771 {strides = array<i32>} : memref<7x8x32xf32, #tpu.memory_space<vmem>>, vector<1x8x32xf32>,
    %c6_i32_237 = arith.constant 6 : i32
    %772 = tpu.concatenate %767, %742 in 1 : vector<8x32xf32>, vector<8x32xf32> -> vector<8x64xf32>
    %773 = arith.index_cast %c6_i32_237 : i32 to index
    %c0_238 = arith.constant 0 : index
    %c0_239 = arith.constant 0 : index
    %774 = vector.load %arg22[%773, %c0_238, %c0_239] : memref<7x8x128xf32, #tpu.memory_space<vmem>>, vector<1x8x128xf32>
    %775 = vector.shape_cast %774 : vector<1x8x128xf32> to vector<8x128xf32>
    %cst_240 = arith.constant dense<0.000000e+00> : vector<8x128xf32>
    %776 = tpu.matmul %772, %1, %cst_240 {dimension_numbers = #tpu.dot_dimension_numbers<[1], [0], [0], [1], [0, 0, 1, 1], [], []>} : vector<8x64xf32>, vector<64x128xf32>, vector<8x128xf32> -> vector<8x128xf32>
    %777 = arith.addf %775, %776 : vector<8x128xf32>
    %778 = arith.negf %777 : vector<8x128xf32>
    %779 = math.exp %778 : vector<8x128xf32>
    %cst_241 = arith.constant 1.000000e+00 : f32
    %780 = vector.broadcast %cst_241 : f32 to vector<8x128xf32>
    %781 = arith.addf %780, %779 : vector<8x128xf32>
    %782 = arith.divf %780, %781 : vector<8x128xf32>
    %783 = vector.extract_strided_slice %777 {offsets = [0, 64], sizes = [8, 32], strides = [1, 1]} : vector<8x128xf32> to vector<8x32xf32>
    %784 = math.tanh %783 : vector<8x32xf32>
    %785 = vector.extract_strided_slice %782 {offsets = [0, 32], sizes = [8, 32], strides = [1, 1]} : vector<8x128xf32> to vector<8x32xf32>
    %786 = arith.mulf %785, %739 : vector<8x32xf32>
    %787 = vector.extract_strided_slice %782 {offsets = [0, 0], sizes = [8, 32], strides = [1, 1]} : vector<8x128xf32> to vector<8x32xf32>
    %788 = arith.mulf %787, %784 : vector<8x32xf32>
    %789 = arith.addf %786, %788 : vector<8x32xf32>
    %790 = vector.extract_strided_slice %782 {offsets = [0, 96], sizes = [8, 32], strides = [1, 1]} : vector<8x128xf32> to vector<8x32xf32>
    %791 = math.tanh %789 : vector<8x32xf32>
    %792 = arith.mulf %790, %791 : vector<8x32xf32>
    %793 = vector.shape_cast %792 : vector<8x32xf32> to vector<1x8x32xf32>
    %794 = vector.broadcast %793 : vector<1x8x32xf32> to vector<8x8x32xf32>
    %795 = arith.mulf %469, %794 : vector<8x8x32xf32>
    %cst_242 = arith.constant dense<0.000000e+00> : vector<8x8xf32>
    %796 = vector.multi_reduction <add>, %795, %cst_242 [2] : vector<8x8x32xf32> to vector<8x8xf32>
    %797 = vector.shape_cast %796 : vector<8x8xf32> to vector<8x8x1xf32>
    %798 = arith.addf %797, %470 : vector<8x8x1xf32>
    %cst_243 = arith.constant dense<0xFF800000> : vector<8x1xf32>
    %799 = vector.multi_reduction <maximumf>, %798, %cst_243 [0] : vector<8x8x1xf32> to vector<8x1xf32>
    %800 = vector.shape_cast %799 : vector<8x1xf32> to vector<1x8x1xf32>
    %801 = vector.broadcast %800 : vector<1x8x1xf32> to vector<8x8x1xf32>
    %802 = arith.subf %798, %801 : vector<8x8x1xf32>
    %803 = math.exp %802 : vector<8x8x1xf32>
    %cst_244 = arith.constant dense<0.000000e+00> : vector<8x1xf32>
    %804 = vector.multi_reduction <add>, %803, %cst_244 [0] : vector<8x8x1xf32> to vector<8x1xf32>
    %805 = vector.shape_cast %804 : vector<8x1xf32> to vector<1x8x1xf32>
    %806 = tpu.reciprocal %805 {approx = true} : vector<1x8x1xf32> -> vector<1x8x1xf32>
    %807 = vector.broadcast %806 : vector<1x8x1xf32> to vector<8x8x1xf32>
    %808 = arith.mulf %803, %807 : vector<8x8x1xf32>
    %809 = vector.broadcast %808 : vector<8x8x1xf32> to vector<8x8x32xf32>
    %810 = arith.mulf %809, %460 : vector<8x8x32xf32>
    %cst_245 = arith.constant dense<0.000000e+00> : vector<8x32xf32>
    %811 = vector.multi_reduction <add>, %810, %cst_245 [0] : vector<8x8x32xf32> to vector<8x32xf32>
    %812 = vector.broadcast %808 : vector<8x8x1xf32> to vector<8x8x32xf32>
    %813 = arith.mulf %812, %461 : vector<8x8x32xf32>
    %cst_246 = arith.constant dense<0.000000e+00> : vector<8x32xf32>
    %814 = vector.multi_reduction <add>, %813, %cst_246 [0] : vector<8x8x32xf32> to vector<8x32xf32>
    %815 = tpu.concatenate %811, %814, %792 in 1 : vector<8x32xf32>, vector<8x32xf32>, vector<8x32xf32> -> vector<8x96xf32>
    %cst_247 = arith.constant dense<0.000000e+00> : vector<8x32xf32>
    %816 = tpu.matmul %815, %2, %cst_247 {dimension_numbers = #tpu.dot_dimension_numbers<[1], [0], [0], [1], [0, 0, 1, 1], [], []>} : vector<8x96xf32>, vector<96x32xf32>, vector<8x32xf32> -> vector<8x32xf32>
    %817 = math.tanh %816 : vector<8x32xf32>
    %818 = arith.index_cast %c6_i32_237 : i32 to index
    %c0_248 = arith.constant 0 : index
    %c0_249 = arith.constant 0 : index
    %819 = vector.load %arg23[%818, %c0_248, %c0_249] : memref<7x8x32xf32, #tpu.memory_space<vmem>>, vector<1x8x32xf32>
    %820 = vector.shape_cast %819 : vector<1x8x32xf32> to vector<8x32xf32>
    %821 = vector.shape_cast %817 : vector<8x32xf32> to vector<1x8x32xf32>
    tpu.vector_store %arg23[%818, %c0_248, %c0_249], %821 {strides = array<i32>} : memref<7x8x32xf32, #tpu.memory_space<vmem>>, vector<1x8x32xf32>,
    %c7_i32_250 = arith.constant 7 : i32
    %c0_251 = arith.constant 0 : index
    %c0_252 = arith.constant 0 : index
    %c0_253 = arith.constant 0 : index
    %822 = vector.load %arg23[%c0_251, %c0_252, %c0_253] : memref<7x8x32xf32, #tpu.memory_space<vmem>>, vector<7x8x32xf32>
    %823 = vector.shape_cast %822 : vector<7x8x32xf32> to vector<56x32xf32>
    %c0_254 = arith.constant 0 : index
    %c0_255 = arith.constant 0 : index
    %824 = vector.load %arg17[%c0_254, %c0_255] : memref<32x128xf32, #tpu.memory_space<vmem>>, vector<32x128xf32>
    %cst_256 = arith.constant dense<0.000000e+00> : vector<56x128xf32>
    %825 = tpu.matmul %823, %824, %cst_256 {dimension_numbers = #tpu.dot_dimension_numbers<[1], [0], [0], [1], [0, 0, 1, 1], [], []>} : vector<56x32xf32>, vector<32x128xf32>, vector<56x128xf32> -> vector<56x128xf32>
    %826 = vector.shape_cast %825 : vector<56x128xf32> to vector<7x8x128xf32>
    %cst_257 = arith.constant dense<0xFF800000> : vector<7x8xf32>
    %827 = vector.multi_reduction <maximumf>, %826, %cst_257 [2] : vector<7x8x128xf32> to vector<7x8xf32>
    %828 = vector.shape_cast %827 : vector<7x8xf32> to vector<7x8x1xf32>
    %829 = vector.broadcast %828 : vector<7x8x1xf32> to vector<7x8x128xf32>
    %830 = arith.subf %826, %829 : vector<7x8x128xf32>
    %831 = math.exp %830 : vector<7x8x128xf32>
    %cst_258 = arith.constant dense<0.000000e+00> : vector<7x8xf32>
    %832 = vector.multi_reduction <add>, %831, %cst_258 [2] : vector<7x8x128xf32> to vector<7x8xf32>
    %833 = vector.shape_cast %832 : vector<7x8xf32> to vector<7x8x1xf32>
    %834 = math.log %833 : vector<7x8x1xf32>
    %835 = arith.addf %828, %834 : vector<7x8x1xf32>
    %836 = tpu.iota {dimensions = array<i32: 2>} : vector<7x8x128xi32>
    %c0_259 = arith.constant 0 : index
    %c0_260 = arith.constant 0 : index
    %c0_261 = arith.constant 0 : index
    %837 = vector.load %arg5[%c0_259, %c0_260, %c0_261] : memref<7x8x1xi32, #tpu.memory_space<vmem>>, vector<7x8x1xi32>
    %838 = vector.broadcast %837 : vector<7x8x1xi32> to vector<7x8x128xi32>
    %839 = arith.cmpi eq, %836, %838 : vector<7x8x128xi32>
    %840 = arith.extui %839 : vector<7x8x128xi1> to vector<7x8x128xi32>
    %841 = arith.sitofp %840 : vector<7x8x128xi32> to vector<7x8x128xf32>
    %842 = arith.mulf %841, %826 : vector<7x8x128xf32>
    %cst_262 = arith.constant dense<0.000000e+00> : vector<7x8xf32>
    %843 = vector.multi_reduction <add>, %842, %cst_262 [2] : vector<7x8x128xf32> to vector<7x8xf32>
    %844 = vector.shape_cast %843 : vector<7x8xf32> to vector<7x8x1xf32>
    %845 = arith.subf %844, %835 : vector<7x8x1xf32>
    %c0_263 = arith.constant 0 : index
    %c0_264 = arith.constant 0 : index
    %c0_265 = arith.constant 0 : index
    %846 = vector.load %arg6[%c0_263, %c0_264, %c0_265] : memref<7x8x1xf32, #tpu.memory_space<vmem>>, vector<7x8x1xf32>
    %847 = arith.mulf %845, %846 : vector<7x8x1xf32>
    %cst_266 = arith.constant dense<0.000000e+00> : vector<8x1xf32>
    %848 = vector.multi_reduction <add>, %847, %cst_266 [0] : vector<7x8x1xf32> to vector<8x1xf32>
    %c0_267 = arith.constant 0 : index
    %c0_268 = arith.constant 0 : index
    %849 = vector.load %arg18[%c0_267, %c0_268] : memref<8x1xf32, #tpu.memory_space<vmem>>, vector<8x1xf32>
    tpu.vector_store %arg18[%c0_267, %c0_268], %848 {strides = array<i32>} : memref<8x1xf32, #tpu.memory_space<vmem>>, vector<8x1xf32>,
    return
  }
  func.func @transform_0(%arg0: i32) -> (i32, i32, i32) {
    %c0_i32 = arith.constant 0 : i32
    %c0_i32_0 = arith.constant 0 : i32
    %c0_i32_1 = arith.constant 0 : i32
    %c0_i32_2 = arith.constant 0 : i32
    return %c0_i32, %c0_i32_0, %c0_i32_1 : i32, i32, i32
  }
  func.func @transform_1(%arg0: i32) -> (i32, i32, i32) {
    %c0_i32 = arith.constant 0 : i32
    %c0_i32_0 = arith.constant 0 : i32
    %c0_i32_1 = arith.constant 0 : i32
    %c0_i32_2 = arith.constant 0 : i32
    return %c0_i32, %c0_i32_0, %c0_i32_1 : i32, i32, i32
  }
  func.func @transform_2(%arg0: i32) -> (i32, i32, i32) {
    %c0_i32 = arith.constant 0 : i32
    %c0_i32_0 = arith.constant 0 : i32
    %c0_i32_1 = arith.constant 0 : i32
    %c0_i32_2 = arith.constant 0 : i32
    return %c0_i32, %c0_i32_0, %c0_i32_1 : i32, i32, i32
  }
  func.func @transform_3(%arg0: i32) -> (i32, i32, i32) {
    %c0_i32 = arith.constant 0 : i32
    %c0_i32_0 = arith.constant 0 : i32
    %c0_i32_1 = arith.constant 0 : i32
    %c0_i32_2 = arith.constant 0 : i32
    return %c0_i32, %c0_i32_0, %c0_i32_1 : i32, i32, i32
  }
  func.func @transform_4(%arg0: i32) -> (i32, i32, i32) {
    %c0_i32 = arith.constant 0 : i32
    %c0_i32_0 = arith.constant 0 : i32
    %c0_i32_1 = arith.constant 0 : i32
    %c0_i32_2 = arith.constant 0 : i32
    return %c0_i32, %c0_i32_0, %c0_i32_1 : i32, i32, i32
  }
  func.func @transform_5(%arg0: i32) -> (i32, i32, i32) {
    %c0_i32 = arith.constant 0 : i32
    %c0_i32_0 = arith.constant 0 : i32
    %c0_i32_1 = arith.constant 0 : i32
    %c0_i32_2 = arith.constant 0 : i32
    return %c0_i32, %c0_i32_0, %c0_i32_1 : i32, i32, i32
  }
  func.func @transform_6(%arg0: i32) -> (i32, i32) {
    %c0_i32 = arith.constant 0 : i32
    %c0_i32_0 = arith.constant 0 : i32
    %c0_i32_1 = arith.constant 0 : i32
    return %c0_i32, %c0_i32_0 : i32, i32
  }
  func.func @transform_7(%arg0: i32) -> (i32, i32) {
    %c0_i32 = arith.constant 0 : i32
    %c0_i32_0 = arith.constant 0 : i32
    %c0_i32_1 = arith.constant 0 : i32
    return %c0_i32, %c0_i32_0 : i32, i32
  }
  func.func @transform_8(%arg0: i32) -> (i32, i32) {
    %c0_i32 = arith.constant 0 : i32
    %c0_i32_0 = arith.constant 0 : i32
    %c0_i32_1 = arith.constant 0 : i32
    return %c0_i32, %c0_i32_0 : i32, i32
  }
  func.func @transform_9(%arg0: i32) -> (i32, i32) {
    %c0_i32 = arith.constant 0 : i32
    %c0_i32_0 = arith.constant 0 : i32
    %c0_i32_1 = arith.constant 0 : i32
    return %c0_i32, %c0_i32_0 : i32, i32
  }
  func.func @transform_10(%arg0: i32) -> (i32, i32) {
    %c0_i32 = arith.constant 0 : i32
    %c0_i32_0 = arith.constant 0 : i32
    %c0_i32_1 = arith.constant 0 : i32
    return %c0_i32, %c0_i32_0 : i32, i32
  }
  func.func @transform_11(%arg0: i32) -> (i32, i32) {
    %c0_i32 = arith.constant 0 : i32
    %c0_i32_0 = arith.constant 0 : i32
    %c0_i32_1 = arith.constant 0 : i32
    return %c0_i32, %c0_i32_0 : i32, i32
  }
  func.func @transform_12(%arg0: i32) -> (i32, i32) {
    %c0_i32 = arith.constant 0 : i32
    %c0_i32_0 = arith.constant 0 : i32
    %c0_i32_1 = arith.constant 0 : i32
    return %c0_i32, %c0_i32_0 : i32, i32
  }
  func.func @transform_13(%arg0: i32) -> (i32, i32) {
    %c0_i32 = arith.constant 0 : i32
    %c0_i32_0 = arith.constant 0 : i32
    %c0_i32_1 = arith.constant 0 : i32
    return %c0_i32, %c0_i32_0 : i32, i32
  }
  func.func @transform_14(%arg0: i32) -> (i32, i32) {
    %c0_i32 = arith.constant 0 : i32
    %c0_i32_0 = arith.constant 0 : i32
    %c0_i32_1 = arith.constant 0 : i32
    return %c0_i32, %c0_i32_0 : i32, i32
  }
  func.func @transform_15(%arg0: i32) -> (i32, i32) {
    %c0_i32 = arith.constant 0 : i32
    %c0_i32_0 = arith.constant 0 : i32
    %c0_i32_1 = arith.constant 0 : i32
    return %c0_i32, %c0_i32_0 : i32, i32
  }
  func.func @transform_16(%arg0: i32) -> (i32, i32) {
    %c0_i32 = arith.constant 0 : i32
    %c0_i32_0 = arith.constant 0 : i32
    %c0_i32_1 = arith.constant 0 : i32
    return %c0_i32, %c0_i32_0 : i32, i32
  }
  func.func @transform_17(%arg0: i32) -> (i32, i32) {
    %c0_i32 = arith.constant 0 : i32
    %c0_i32_0 = arith.constant 0 : i32
    %c0_i32_1 = arith.constant 0 : i32
    return %c0_i32, %c0_i32_0 : i32, i32
  }
}

</mosaic_0001>

<bundles_post_ra>
// kernel: tpu_custom_call.1
= control target key start
LH: loop header
LB: loop body
LE: loop exit
PB: predicated region body
PF: predicated region fallthrough
CT: control target
= control target key end

     0   :  { %s8988_s0 = inlined_call_operand.vmem [shape: f32[8,8,32], index: 0, kind: input, shape index: {}]   ;;  %s8989_s1 = inlined_call_operand.vmem [shape: f32[8,8,64], index: 1, kind: input, shape index: {}]   ;;  %s8990_s2 = inlined_call_operand.vmem [shape: f32[8,8,1], index: 2, kind: input, shape index: {}]   ;;  %s8991_s3 = inlined_call_operand.vmem [shape: f32[7,8,32], index: 3, kind: input, shape index: {}]   ;;  %s8992_s4 = inlined_call_operand.vmem [shape: s32[7,8,1], index: 4, kind: input, shape index: {}]   ;;  %s8993_s5 = inlined_call_operand.vmem [shape: f32[7,8,1], index: 5, kind: input, shape index: {}]   ;;  %s8994_s6 = inlined_call_operand.vmem [shape: f32[32,256], index: 6, kind: input, shape index: {}]   ;;  %s8995_s7 = inlined_call_operand.vmem [shape: f32[1,256], index: 7, kind: input, shape index: {}]   ;;  %s8996_s8 = inlined_call_operand.vmem [shape: f32[64,256], index: 8, kind: input, shape index: {}]   ;;  %s8997_s9 = inlined_call_operand.vmem [shape: f32[128,64], index: 9, kind: input, shape index: {}]   ;;  %s8998_s10 = inlined_call_operand.vmem [shape: f32[32,32], index: 10, kind: input, shape index: {}]   ;;  %s8999_s11 = inlined_call_operand.hbm [shape: f32[32,32], index: 11, kind: input, shape index: {}]   ;;  %s9000_s12 = inlined_call_operand.hbm [shape: f32[32,128], index: 12, kind: input, shape index: {}]   ;;  %s9001_s13 = inlined_call_operand.vmem [shape: f32[1,128], index: 13, kind: input, shape index: {}]   ;;  %s9002_s14 = inlined_call_operand.vmem [shape: f32[64,128], index: 14, kind: input, shape index: {}]   ;;  %s9003_s15 = inlined_call_operand.vmem [shape: f32[96,32], index: 15, kind: input, shape index: {}]   ;;  %s9004_s16 = inlined_call_operand.vmem [shape: f32[32,128], index: 16, kind: input, shape index: {}]   ;;  %s9005_s17 = inlined_call_operand.vmem [shape: f32[8,1], index: 17, kind: output, shape index: {}]  }
   0x1   :  { %9062 = sst [smem:[#allocation30_spill]] %s8988_s0 }
   0x2   :  { %9063 = sst [smem:[#allocation31_spill]] %s8989_s1 }
   0x3   :  { %22 = vsyncpa [#allocation8], 0 }
   0x4   :  { %23 = vsyncpa [#allocation10], 0  ;;  %s6797_s24 = smov [#allocation7]   ;;  %s6749_s28 = scalar_lea.hbm %s8999_s11, 512 }
   0x5   :  { %s51_s25 = sshll.u32 %s6797_s24, 4  ;;  %p6750_p0 = scmp.ne.s32.totalorder %s8999_s11, %s6749_s28  ;;  %s52_s25 = int_to_ptr.vmem [resolvable:$true] %s51_s25 }
   0x6   :  { %p6753_p1 = scmp.lt.u32.totalorder %s6749_s28, %s8999_s11 }
   0x8   :  { %p6755_p2 = pnand %p6753_p1, %p6750_p0 }
   0xa   :  { %6758 = shalt.err (!%p6755_p2)
}
   0xb   :  { %s6759_s19 = scalar_lea.vmem %s52_s25, 512  ;;  %p6764_p4 = scmp.lt.s32.totalorder %s52_s25, %s52_s25 }
   0xc   :  { %p6760_p3 = scmp.ne.s32.totalorder %s52_s25, %s6759_s19  ;;  %p6765_p5 = scmp.lt.s32.totalorder %s6759_s19, %s6759_s19 }
   0xe   :  { %p6766_p6 = por %p6765_p5, %p6764_p4 }
  0x10   :  { %p6767_p7 = pnand %p6766_p6, %p6760_p3 }
  0x12   :  { %6770 = shalt.err (!%p6767_p7)
}
  0x13   :  { %s6798_s1 = smov 128   ;;  %s6799_s20 = smov 8  }
  0x14   :  { %57 = dma.hbm_to_vmem [thread:$0]  %s8999_s11, 512, %s52_s25, [#allocation8], %s6798_s1, %s6798_s1, %s6799_s20  }
  0x15   :  { %s6800_s23 = smov [#allocation9]   ;;  %s6771_s28 = scalar_lea.hbm %s9000_s12, 512 }
  0x16   :  { %s63_s24 = sshll.u32 %s6800_s23, 4  ;;  %p6772_p8 = scmp.ne.s32.totalorder %s9000_s12, %s6771_s28  ;;  %s64_s24 = int_to_ptr.vmem [resolvable:$true] %s63_s24 }
  0x17   :  { %p6775_p9 = scmp.lt.u32.totalorder %s6771_s28, %s9000_s12 }
  0x19   :  { %p6777_p10 = pnand %p6775_p9, %p6772_p8 }
  0x1b   :  { %6780 = shalt.err (!%p6777_p10)
}
  0x1c   :  { %s6781_s19 = scalar_lea.vmem %s64_s24, 512  ;;  %p6786_p12 = scmp.lt.s32.totalorder %s64_s24, %s64_s24 }
  0x1d   :  { %p6782_p11 = scmp.ne.s32.totalorder %s64_s24, %s6781_s19  ;;  %p6787_p13 = scmp.lt.s32.totalorder %s6781_s19, %s6781_s19 }
  0x1f   :  { %p6788_p0 = por %p6787_p13, %p6786_p12 }
  0x21   :  { %p6789_p1 = pnand %p6788_p0, %p6782_p11 }
  0x23   :  { %6792 = shalt.err (!%p6789_p1)
}
  0x24   :  { %69 = dma.hbm_to_vmem [thread:$0]  %s9000_s12, 512, %s64_s24, [#allocation10], %s6798_s1, %s6798_s1, %s6799_s20  }
  0x25   :  { %6793 = dma.done.wait [#allocation8], 512  }
  0x26   :  { %6794 = vsyncadd [#allocation8], 4294966784 }
  0x27   :  { %6795 = dma.done.wait [#allocation10], 512  }
  0x28   :  { %6796 = vsyncadd [#allocation10], 4294966784  ;;  %v9009_v0 = vmov 0.0   ;;  %v129_v1 = vld [vmem:[%s8994_s6 + $0x8] sm:$0xff]  ;;  %v131_v2 = vld [vmem:[%s8994_s6 + $0x18] sm:$0xff]  ;;  %s9064_s30 = sld [smem:[#allocation30_spill]]  ;;  %v9008_v41 = vlaneseq }
  0x29   :  { %237 = vmatprep.mubr.f32.mxu0 %v9009_v0  ;;  %261 = vmatprep.mubr.f32.mxu1 %v9009_v0  ;;  %v128_v3 = vld [vmem:[%s8994_s6] sm:$0xff]  ;;  %v5866_v4 = vpack.c.bf16 %v131_v2, %v129_v1  ;;  %v130_v5 = vld [vmem:[%s8994_s6 + $0x10] sm:$0xff]  ;;  %v133_v6 = vld [vmem:[%s8994_s6 + $0x28] sm:$0xff]  ;;  %vm148_vm0 = vcmask 261120   ;;  %s6802_s28 = smov 64   ;;  %s6804_s12 = smov 96  }
  0x2a   :  { %v135_v7 = vld [vmem:[%s8994_s6 + $0x38] sm:$0xff]  ;;  %v5868_v8 = vpack.c.bf16 %v130_v5, %v128_v3  ;;  %v132_v10 = vld [vmem:[%s8994_s6 + $0x20] sm:$0xff]  ;;  %v134_v11 = vld [vmem:[%s8994_s6 + $0x30] sm:$0xff]  ;;  %v139_v42 = vshrl.u32 %v9008_v41, 7  ;;  %s9065_s24 = sld [smem:[#allocation31_spill]]  ;;  %vm450_vm2 = vcmask 523264  }
  0x2b   :  { %v5870_v9 = vpack.c.bf16 %v135_v7, %v133_v6  ;;  %5867 = vmatprep.subr.bf16.mxu0 %v5866_v4  ;;  %v85_v12 = vld [vmem:[%s8996_s8 + $0x8] sm:$0xff]  ;;  %v87_v13 = vld [vmem:[%s8996_s8 + $0x18] sm:$0xff]  ;;  %6264 = vmatprep.subr.bf16.mxu1 %v5866_v4  ;;  %v5872_v14 = vpack.c.bf16 %v134_v11, %v132_v10  ;;  %v84_v16 = vld [vmem:[%s8996_s8] sm:$0xff]  ;;  %vm6806_vm9 = vmmov 0   ;;  %vm1730_vm11 = vcmask 785408  }
  0x2c   :  { %5869 = vmatpush1.bf16.msra.mxu0 %v5868_v8  ;;  %6266 = vmatpush1.bf16.msra.mxu1 %v5868_v8  ;;  %v6954_v15 = vpack.c.bf16 %v87_v13, %v85_v12  ;;  %v86_v17 = vld [vmem:[%s8996_s8 + $0x10] sm:$0xff]  ;;  %v89_v18 = vld [vmem:[%s8996_s8 + $0x28] sm:$0xff]  ;;  %v91_v19 = vld [vmem:[%s8996_s8 + $0x38] sm:$0xff]  ;;  %v140_v43 = vsub.s32 0, %v139_v42  ;;  %v144_v45 = vsub.s32 1, %v139_v42  ;;  %vm2256_vm12 = vcmask 7168  }
  0x2d   :  { %5871 = vmatprep.subr.bf16.mxu0 %v5870_v9  ;;  %6265 = vmatprep.subr.bf16.mxu1 %v5870_v9  ;;  %v6971_v21 = vpack.c.bf16 %v86_v17, %v84_v16  ;;  %v6974_v22 = vpack.c.bf16 %v91_v19, %v89_v18  ;;  %v88_v23 = vld [vmem:[%s8996_s8 + $0x20] sm:$0xff]  ;;  %v90_v24 = vld [vmem:[%s8996_s8 + $0x30] sm:$0xff]  ;;  %v93_v25 = vld [vmem:[%s8996_s8 + $0x48] sm:$0xff] }
  0x2e   :  { %v120_v20 = vld [vmem:[%s9064_s30] sm:$0xff]  ;;  %v95_v26 = vld [vmem:[%s8996_s8 + $0x58] sm:$0xff]  ;;  %v121_v27 = vld [vmem:[%s9064_s30 + $0x8] sm:$0xff]  ;;  %v6994_v28 = vpack.c.bf16 %v90_v24, %v88_v23 }
  0x2f   :  { %v6997_v29 = vpack.c.bf16 %v95_v26, %v93_v25  ;;  %v92_v30 = vld [vmem:[%s8996_s8 + $0x40] sm:$0xff]  ;;  %v94_v31 = vld [vmem:[%s8996_s8 + $0x50] sm:$0xff]  ;;  %v97_v32 = vld [vmem:[%s8996_s8 + $0x68] sm:$0xff] }
  0x30   :  { %5873 = vmatpush1.bf16.msra.mxu0 %v5872_v14  ;;  %6267 = vmatpush1.bf16.msra.mxu1 %v5872_v14  ;;  %v99_v33 = vld [vmem:[%s8996_s8 + $0x78] sm:$0xff]  ;;  %v122_v34 = vld [vmem:[%s9064_s30 + $0x10] sm:$0xff]  ;;  %v7017_v35 = vpack.c.bf16 %v94_v31, %v92_v30  ;;  %v96_v37 = vld [vmem:[%s8996_s8 + $0x60] sm:$0xff] }
  0x31   :  { %5881 = vmatprep.subr.bf16.mxu0 %v6954_v15  ;;  %v7020_v36 = vpack.c.bf16 %v99_v33, %v97_v32  ;;  %v98_v38 = vld [vmem:[%s8996_s8 + $0x70] sm:$0xff]  ;;  %v123_v39 = vld [vmem:[%s9064_s30 + $0x18] sm:$0xff]  ;;  %v136_v44 = vld [vmem:[%s8995_s7] sm:$0x3]  ;;  %s6803_s7 = smov 32  }
  0x32   :  { %v7034_v40 = vpack.c.bf16 %v98_v38, %v96_v37  ;;  %v7055_v46 = vrot.slane %v136_v44, %v140_v43  ;;  %v7057_v47 = vrot.slane %v136_v44, %v144_v45  ;;  %v7076_v16 = vld [vmem:[%s9065_s24] sm:$0xff] }
  0x33   :  { %5097 = vmatmul.mubr.msk.f32.vlgmr.msra.gmra.mrb[0].mxu0 %vm148_vm0, %v120_v20  ;;  %vm576_vm1 = vcmp.ne.f32.partialorder %v7076_v16, 0.0 }
  0x34   :  { %5883 = vmatpush1.bf16.msra.mxu0 %v6971_v21  ;;  %243 = vmatprep.mubr.f32.mxu0 %v9009_v0 }
  0x35   :  { %5885 = vmatprep.subr.bf16.mxu0 %v6974_v22 }
  0x37   :  { %5098 = vmatmul.mubr.msk.f32.gmra.mrb[2].mxu0 %vm148_vm0, %v121_v27 }
  0x38   :  { %5887 = vmatpush1.bf16.msra.mxu0 %v6994_v28  ;;  %249 = vmatprep.mubr.f32.mxu0 %v9009_v0 }
  0x39   :  { %5889 = vmatprep.subr.bf16.mxu0 %v6997_v29 }
  0x3b   :  { %5099 = vmatmul.mubr.msk.f32.gmra.mrb[4].mxu0 %vm148_vm0, %v122_v34 }
  0x3c   :  { %5891 = vmatpush1.bf16.msra.mxu0 %v7017_v35  ;;  %255 = vmatprep.mubr.f32.mxu0 %v9009_v0 }
  0x3d   :  { %5893 = vmatprep.subr.bf16.mxu0 %v7020_v36 }
  0x3f   :  { %5100 = vmatmul.mubr.msk.f32.gmra.mrb[6].mxu0 %vm148_vm0, %v123_v39 }
  0x40   :  { %5895 = vmatpush1.bf16.msra.mxu0 %v7034_v40  ;;  %518 = vmatprep.mubr.f32.mxu0 %v9009_v0 }
  0x41   :  { %5897 = vmatprep.subr.bf16.mxu0 %v6954_v15 }
  0x43   :  { %519 = vmatmul.mubr.f32.vlgmr.msra.gmra.mrb[0].mxu0 %v9009_v0 }
  0x44   :  { %5899 = vmatpush1.bf16.msra.mxu0 %v6971_v21  ;;  %672 = vmatprep.mubr.f32.mxu0 %v9009_v0 }
  0x45   :  { %5901 = vmatprep.subr.bf16.mxu0 %v6974_v22 }
  0x48   :  { %5903 = vmatpush1.bf16.msra.mxu0 %v6994_v28 }
  0x49   :  { %5905 = vmatprep.subr.bf16.mxu0 %v6997_v29 }
  0x4c   :  { %5907 = vmatpush1.bf16.msra.mxu0 %v7017_v35 }
  0x4d   :  { %5909 = vmatprep.subr.bf16.mxu0 %v7020_v36 }
  0x50   :  { %5911 = vmatpush1.bf16.msra.mxu0 %v7034_v40 }
  0x51   :  { %5913 = vmatprep.subr.bf16.mxu0 %v6954_v15 }
 0x116   :  { %v520_v48 = vpop.f32.mrb[0].mxu0 }
 0x117   :  { %v6268_v49 = vadd.f32 %v520_v48, %v7055_v46  ;;  %v522_v50 = vpop.f32.mrb[1].mxu0 }
 0x118   :  { %v6269_v51 = vadd.f32 %v522_v50, %v7057_v47 }
 0x119   :  { %6347 = vtanh.f32 %v6268_v49  ;;  %v5113_v54 = vmul.f32 -1.442695, %v6268_v49 }
 0x11a   :  { %6349 = vtanh.f32 %v6269_v51  ;;  %v5114_v55 = vmul.f32 -1.442695, %v6269_v51 }
 0x11b   :  { %6351 = vpow2.f32 %v5113_v54 }
 0x11c   :  { %6353 = vpow2.f32 %v5114_v55 }
 0x123   :  { %v6348_v52 = vpop.eup %6347 }
 0x124   :  { %543 = vrot.lane.b32.xlu0 %v6348_v52, %s6802_s28  ;;  %v6350_v53 = vpop.eup %6349 }
 0x125   :  { %v6352_v56 = vpop.eup %6351 }
 0x126   :  { %v533_v57 = vadd.f32 1.0, %v6352_v56  ;;  %v6354_v58 = vpop.eup %6353 }
 0x127   :  { %v534_v59 = vadd.f32 1.0, %v6354_v58 }
 0x128   :  { %554 = vrot.lane.b32.xlu0 %v6350_v53, %s6802_s28  ;;  %6355 = vrcp.f32 %v533_v57 }
 0x129   :  { %6357 = vrcp.f32 %v534_v59 }
 0x132   :  { %v6356_v60 = vpop.eup %6355 }
 0x133   :  { %v6358_v63 = vpop.eup %6357  ;;  %v541_v3 = vmul.f32 0.0, %v6356_v60 }
 0x134   :  { %v552_v6 = vmul.f32 0.0, %v6358_v63 }
 0x196   :  { %v544_v61 = vpop.permute.xlu0 %543 }
 0x197   :  { %v546_v62 = vmul.f32 %v6356_v60, %v544_v61 }
 0x199   :  { %548 = vrot.lane.b32.xlu1 %v546_v62, %s6803_s7 }
 0x19a   :  { %v555_v1 = vpop.permute.xlu0 %554 }
 0x19b   :  { %v557_v2 = vmul.f32 %v6358_v63, %v555_v1 }
 0x19d   :  { %559 = vrot.lane.b32.xlu1 %v557_v2, %s6803_s7 }
 0x20b   :  { %v549_v4 = vpop.permute.xlu1 %548 }
 0x20c   :  { %v551_v5 = vadd.f32 %v549_v4, %v541_v3  ;;  %v7130_v3 = vld [vmem:[%s9065_s24 + $0x8] sm:$0xff] }
 0x20d   :  { %vm735_vm3 = vcmp.ne.f32.partialorder %v7130_v3, 0.0  ;;  %v1836_v3 = vld [vmem:[%s8998_s10 + $0x10] sm:$0xff] }
 0x20e   :  { %6359 = vtanh.f32 %v551_v5 }
 0x20f   :  { %v560_v7 = vpop.permute.xlu1 %559 }
 0x210   :  { %v7065_v8 = vadd.f32 %v560_v7, %v552_v6 }
 0x212   :  { %6361 = vtanh.f32 %v7065_v8  ;;  %v7116_v53 = vsel %vm576_vm1, %v7065_v8, 0.0 }
 0x218   :  { %v6360_v9 = vpop.eup %6359 }
 0x219   :  { %565 = vrot.lane.b32.xlu0 %v6360_v9, %s6802_s28 }
 0x21c   :  { %v6362_v10 = vpop.eup %6361 }
 0x21d   :  { %571 = vrot.lane.b32.xlu1 %v6362_v10, %s6802_s28 }
 0x28b   :  { %v566_v11 = vpop.permute.xlu0 %565 }
 0x28c   :  { %v568_v12 = vmul.f32 %v6356_v60, %v566_v11 }
 0x28e   :  { %578 = vrot.lane.b32.xlu0 %v568_v12, %s6803_s7 }
 0x28f   :  { %v572_v13 = vpop.permute.xlu1 %571 }
 0x290   :  { %v574_v14 = vmul.f32 %v6358_v63, %v572_v13 }
 0x292   :  { %597 = vrot.lane.b32.xlu0 %v551_v5, %s6804_s12  ;;  %584 = vrot.lane.b32.xlu1 %v574_v14, %s6802_s28 }
 0x300   :  { %v579_v17 = vpop.permute.xlu0 %578 }
 0x301   :  { %v581_v18 = vsel %vm576_vm1, %v579_v17, 0.0 }
 0x302   :  { %582 = vst.msk [vmem:[#allocation3] sm:$0xff] %vm148_vm0, %v581_v18 }
 0x304   :  { %v7082_v19 = vpop.permute.xlu1 %584  ;;  %v598_v32 = vpop.permute.xlu0 %597 }
 0x305   :  { %v594_v20 = vsel %vm148_vm0, %v579_v17, %v7082_v19  ;;  %v7107_v33 = vsel %vm576_vm1, %v598_v32, 0.0 }
 0x306   :  { %v7088_v23 = vsel %vm576_vm1, %v594_v20, 0.0 }
 0x307   :  { %5115 = vmatmul.mubr.msk.f32.vlgmr.msra.gmra.mrb[2].mxu0 %vm450_vm2, %v7088_v23 }
 0x308   :  { %5915 = vmatpush1.bf16.msra.mxu0 %v6971_v21  ;;  %832 = vmatprep.mubr.f32.mxu0 %v9009_v0 }
 0x309   :  { %5917 = vmatprep.subr.bf16.mxu0 %v6974_v22 }
 0x30c   :  { %5919 = vmatpush1.bf16.msra.mxu0 %v6994_v28 }
 0x30d   :  { %5921 = vmatprep.subr.bf16.mxu0 %v6997_v29 }
 0x310   :  { %5923 = vmatpush1.bf16.msra.mxu0 %v7017_v35 }
 0x311   :  { %5925 = vmatprep.subr.bf16.mxu0 %v7020_v36 }
 0x314   :  { %5927 = vmatpush1.bf16.msra.mxu0 %v7034_v40 }
 0x315   :  { %5929 = vmatprep.subr.bf16.mxu0 %v6954_v15 }
 0x3da   :  { %v674_v24 = vpop.f32.mrb[2].mxu0 }
 0x3db   :  { %v6270_v25 = vadd.f32 %v674_v24, %v7055_v46  ;;  %v676_v26 = vpop.f32.mrb[3].mxu0 }
 0x3dc   :  { %v6271_v27 = vadd.f32 %v676_v26, %v7057_v47 }
 0x3dd   :  { %6363 = vtanh.f32 %v6270_v25  ;;  %v5116_v34 = vmul.f32 -1.442695, %v6270_v25 }
 0x3de   :  { %6365 = vtanh.f32 %v6271_v27  ;;  %v5117_v37 = vmul.f32 -1.442695, %v6271_v27 }
 0x3df   :  { %6367 = vpow2.f32 %v5116_v34 }
 0x3e0   :  { %6369 = vpow2.f32 %v5117_v37 }
 0x3e7   :  { %v6364_v30 = vpop.eup %6363 }
 0x3e8   :  { %v6366_v31 = vpop.eup %6365  ;;  %701 = vrot.lane.b32.xlu1 %v6364_v30, %s6802_s28 }
 0x3e9   :  { %712 = vrot.lane.b32.xlu0 %v6366_v31, %s6802_s28  ;;  %v6368_v38 = vpop.eup %6367 }
 0x3ea   :  { %v6370_v39 = vpop.eup %6369  ;;  %v687_v42 = vadd.f32 1.0, %v6368_v38 }
 0x3eb   :  { %v688_v43 = vadd.f32 1.0, %v6370_v39 }
 0x3ec   :  { %696 = vrot.lane.b32.xlu1 %v7107_v33, %s6803_s7  ;;  %6371 = vrcp.f32 %v687_v42 }
 0x3ed   :  { %6373 = vrcp.f32 %v688_v43 }
 0x3f6   :  { %v6372_v44 = vpop.eup %6371 }
 0x3f7   :  { %v6374_v48 = vpop.eup %6373 }
 0x3f8   :  { %v710_v56 = vmul.f32 %v6374_v48, %v7116_v53 }
 0x45a   :  { %v702_v45 = vpop.permute.xlu1 %701 }
 0x45b   :  { %v704_v49 = vmul.f32 %v6372_v44, %v702_v45  ;;  %v713_v50 = vpop.permute.xlu0 %712 }
 0x45c   :  { %v715_v51 = vmul.f32 %v6374_v48, %v713_v50 }
 0x45d   :  { %706 = vrot.lane.b32.xlu0 %v704_v49, %s6803_s7 }
 0x45e   :  { %717 = vrot.lane.b32.xlu1 %v715_v51, %s6803_s7  ;;  %v697_v52 = vpop.permute.xlu1 %696 }
 0x45f   :  { %v699_v54 = vmul.f32 %v6372_v44, %v697_v52 }
 0x4cf   :  { %v707_v55 = vpop.permute.xlu0 %706 }
 0x4d0   :  { %v709_v57 = vadd.f32 %v707_v55, %v699_v54  ;;  %v718_v58 = vpop.permute.xlu1 %717 }
 0x4d1   :  { %v7119_v59 = vadd.f32 %v718_v58, %v710_v56  ;;  %v7187_v56 = vld [vmem:[%s9065_s24 + $0x10] sm:$0xff] }
 0x4d2   :  { %6375 = vtanh.f32 %v709_v57  ;;  %vm895_vm4 = vcmp.ne.f32.partialorder %v7187_v56, 0.0 }
 0x4d3   :  { %6377 = vtanh.f32 %v7119_v59  ;;  %v7173_v42 = vsel %vm735_vm3, %v7119_v59, %v7116_v53 }
 0x4dc   :  { %v6376_v60 = vpop.eup %6375 }
 0x4dd   :  { %v6378_v61 = vpop.eup %6377  ;;  %723 = vrot.lane.b32.xlu0 %v6376_v60, %s6802_s28 }
 0x4de   :  { %729 = vrot.lane.b32.xlu1 %v6378_v61, %s6802_s28 }
 0x54f   :  { %v724_v62 = vpop.permute.xlu0 %723 }
 0x550   :  { %v726_v63 = vmul.f32 %v6372_v44, %v724_v62  ;;  %v730_v1 = vpop.permute.xlu1 %729 }
 0x551   :  { %v732_v2 = vmul.f32 %v6374_v48, %v730_v1 }
 0x552   :  { %737 = vrot.lane.b32.xlu0 %v726_v63, %s6803_s7 }
 0x553   :  { %744 = vrot.lane.b32.xlu1 %v732_v2, %s6802_s28 }
 0x556   :  { %757 = vrot.lane.b32.xlu0 %v709_v57, %s6804_s12 }
 0x5c4   :  { %v738_v4 = vpop.permute.xlu0 %737 }
 0x5c5   :  { %v740_v5 = vsel %vm735_vm3, %v738_v4, 0.0  ;;  %v7135_v6 = vpop.permute.xlu1 %744 }
 0x5c6   :  { %742 = vst.msk [vmem:[#allocation3 + $0x8] sm:$0xff] %vm148_vm0, %v740_v5  ;;  %v754_v7 = vsel %vm148_vm0, %v738_v4, %v7135_v6 }
 0x5c7   :  { %v7143_v8 = vsel %vm735_vm3, %v754_v7, %v7088_v23 }
 0x5c8   :  { %5119 = vmatmul.mubr.msk.f32.vlgmr.msra.gmra.mrb[4].mxu0 %vm450_vm2, %v7143_v8  ;;  %v758_v17 = vpop.permute.xlu0 %757 }
 0x5c9   :  { %5931 = vmatpush1.bf16.msra.mxu0 %v6971_v21  ;;  %992 = vmatprep.mubr.f32.mxu0 %v9009_v0  ;;  %v7163_v18 = vsel %vm735_vm3, %v758_v17, %v7107_v33 }
 0x5ca   :  { %5933 = vmatprep.subr.bf16.mxu0 %v6974_v22 }
 0x5cd   :  { %5935 = vmatpush1.bf16.msra.mxu0 %v6994_v28 }
 0x5ce   :  { %5937 = vmatprep.subr.bf16.mxu0 %v6997_v29 }
 0x5d1   :  { %5939 = vmatpush1.bf16.msra.mxu0 %v7017_v35 }
 0x5d2   :  { %5941 = vmatprep.subr.bf16.mxu0 %v7020_v36 }
 0x5d5   :  { %5943 = vmatpush1.bf16.msra.mxu0 %v7034_v40 }
 0x5d6   :  { %5945 = vmatprep.subr.bf16.mxu0 %v6954_v15 }
 0x69b   :  { %v834_v9 = vpop.f32.mrb[4].mxu0 }
 0x69c   :  { %v6272_v10 = vadd.f32 %v834_v9, %v7055_v46  ;;  %v836_v11 = vpop.f32.mrb[5].mxu0 }
 0x69d   :  { %v6273_v12 = vadd.f32 %v836_v11, %v7057_v47 }
 0x69e   :  { %6379 = vtanh.f32 %v6272_v10  ;;  %v5120_v20 = vmul.f32 -1.442695, %v6272_v10 }
 0x69f   :  { %6381 = vtanh.f32 %v6273_v12  ;;  %v5121_v23 = vmul.f32 -1.442695, %v6273_v12 }
 0x6a0   :  { %6383 = vpow2.f32 %v5120_v20 }
 0x6a1   :  { %6385 = vpow2.f32 %v5121_v23 }
 0x6a8   :  { %v6380_v13 = vpop.eup %6379 }
 0x6a9   :  { %v6382_v14 = vpop.eup %6381  ;;  %861 = vrot.lane.b32.xlu1 %v6380_v13, %s6802_s28 }
 0x6aa   :  { %872 = vrot.lane.b32.xlu0 %v6382_v14, %s6802_s28  ;;  %v6384_v24 = vpop.eup %6383 }
 0x6ab   :  { %v6386_v25 = vpop.eup %6385  ;;  %v847_v26 = vadd.f32 1.0, %v6384_v24 }
 0x6ac   :  { %v848_v27 = vadd.f32 1.0, %v6386_v25 }
 0x6ad   :  { %856 = vrot.lane.b32.xlu1 %v7163_v18, %s6803_s7  ;;  %6387 = vrcp.f32 %v847_v26 }
 0x6ae   :  { %6389 = vrcp.f32 %v848_v27 }
 0x6b7   :  { %v6388_v30 = vpop.eup %6387 }
 0x6b8   :  { %v6390_v32 = vpop.eup %6389 }
 0x6b9   :  { %v870_v44 = vmul.f32 %v6390_v32, %v7173_v42 }
 0x71b   :  { %v862_v31 = vpop.permute.xlu1 %861 }
 0x71c   :  { %v864_v34 = vmul.f32 %v6388_v30, %v862_v31  ;;  %v873_v37 = vpop.permute.xlu0 %872 }
 0x71d   :  { %v875_v33 = vmul.f32 %v6390_v32, %v873_v37 }
 0x71e   :  { %866 = vrot.lane.b32.xlu0 %v864_v34, %s6803_s7 }
 0x71f   :  { %877 = vrot.lane.b32.xlu1 %v875_v33, %s6803_s7  ;;  %v857_v38 = vpop.permute.xlu1 %856 }
 0x720   :  { %v859_v39 = vmul.f32 %v6388_v30, %v857_v38 }
 0x790   :  { %v867_v43 = vpop.permute.xlu0 %866 }
 0x791   :  { %v869_v45 = vadd.f32 %v867_v43, %v859_v39  ;;  %v878_v48 = vpop.permute.xlu1 %877 }
 0x792   :  { %v7176_v49 = vadd.f32 %v878_v48, %v870_v44 }
 0x793   :  { %6391 = vtanh.f32 %v869_v45 }
 0x794   :  { %6393 = vtanh.f32 %v7176_v49 }
 0x79d   :  { %v6392_v50 = vpop.eup %6391 }
 0x79e   :  { %v6394_v51 = vpop.eup %6393  ;;  %883 = vrot.lane.b32.xlu0 %v6392_v50, %s6802_s28 }
 0x79f   :  { %889 = vrot.lane.b32.xlu1 %v6394_v51, %s6802_s28 }
 0x810   :  { %v884_v52 = vpop.permute.xlu0 %883 }
 0x811   :  { %v886_v54 = vmul.f32 %v6388_v30, %v884_v52  ;;  %v890_v53 = vpop.permute.xlu1 %889  ;;  %v7230_v30 = vsel %vm895_vm4, %v7176_v49, %v7173_v42  ;;  %v124_v42 = vld [vmem:[%s9064_s30 + $0x20] sm:$0xff]  ;;  %v7249_v49 = vld [vmem:[%s9065_s24 + $0x18] sm:$0xff] }
 0x812   :  { %v892_v55 = vmul.f32 %v6390_v32, %v890_v53  ;;  %5101 = vmatmul.mubr.msk.f32.vlgmr.msra.gmra.mrb[0].mxu1 %vm148_vm0, %v124_v42  ;;  %vm1055_vm5 = vcmp.ne.f32.partialorder %v7249_v49, 0.0 }
 0x813   :  { %897 = vrot.lane.b32.xlu0 %v886_v54, %s6803_s7  ;;  %267 = vmatprep.mubr.f32.mxu1 %v9009_v0 }
 0x814   :  { %904 = vrot.lane.b32.xlu1 %v892_v55, %s6802_s28 }
 0x817   :  { %917 = vrot.lane.b32.xlu0 %v869_v45, %s6804_s12 }
 0x885   :  { %v898_v57 = vpop.permute.xlu0 %897 }
 0x886   :  { %v900_v58 = vsel %vm895_vm4, %v898_v57, 0.0  ;;  %v7192_v59 = vpop.permute.xlu1 %904 }
 0x887   :  { %902 = vst.msk [vmem:[#allocation3 + $0x10] sm:$0xff] %vm148_vm0, %v900_v58  ;;  %v914_v60 = vsel %vm148_vm0, %v898_v57, %v7192_v59 }
 0x888   :  { %v7200_v61 = vsel %vm895_vm4, %v914_v60, %v7143_v8 }
 0x889   :  { %5123 = vmatmul.mubr.msk.f32.vlgmr.msra.gmra.mrb[6].mxu0 %vm450_vm2, %v7200_v61  ;;  %v918_v7 = vpop.permute.xlu0 %917 }
 0x88a   :  { %5947 = vmatpush1.bf16.msra.mxu0 %v6971_v21  ;;  %1152 = vmatprep.mubr.f32.mxu0 %v9009_v0  ;;  %v7220_v8 = vsel %vm895_vm4, %v918_v7, %v7163_v18 }
 0x88b   :  { %5949 = vmatprep.subr.bf16.mxu0 %v6974_v22 }
 0x88e   :  { %5951 = vmatpush1.bf16.msra.mxu0 %v6994_v28 }
 0x88f   :  { %5953 = vmatprep.subr.bf16.mxu0 %v6997_v29 }
 0x892   :  { %5955 = vmatpush1.bf16.msra.mxu0 %v7017_v35 }
 0x893   :  { %5957 = vmatprep.subr.bf16.mxu0 %v7020_v36 }
 0x896   :  { %5959 = vmatpush1.bf16.msra.mxu0 %v7034_v40 }
 0x897   :  { %5961 = vmatprep.subr.bf16.mxu0 %v6954_v15 }
 0x8e5   :  { %v263_v55 = vpop.f32.mrb[0].mxu1 }
 0x8e6   :  { %v265_v57 = vpop.f32.mrb[1].mxu1  ;;  %v264_v58 = vadd.f32 %v263_v55, %v7055_v46 }
 0x8e7   :  { %v266_v60 = vadd.f32 %v265_v57, %v7057_v47 }
 0x95c   :  { %v994_v62 = vpop.f32.mrb[6].mxu0 }
 0x95d   :  { %v6274_v63 = vadd.f32 %v994_v62, %v7055_v46  ;;  %v996_v1 = vpop.f32.mrb[7].mxu0 }
 0x95e   :  { %v6275_v2 = vadd.f32 %v996_v1, %v7057_v47 }
 0x95f   :  { %6395 = vtanh.f32 %v6274_v63  ;;  %v5124_v9 = vmul.f32 -1.442695, %v6274_v63 }
 0x960   :  { %6397 = vtanh.f32 %v6275_v2  ;;  %v5125_v10 = vmul.f32 -1.442695, %v6275_v2 }
 0x961   :  { %6399 = vpow2.f32 %v5124_v9 }
 0x962   :  { %6401 = vpow2.f32 %v5125_v10 }
 0x969   :  { %v6396_v4 = vpop.eup %6395 }
 0x96a   :  { %v6398_v5 = vpop.eup %6397  ;;  %1021 = vrot.lane.b32.xlu1 %v6396_v4, %s6802_s28 }
 0x96b   :  { %1032 = vrot.lane.b32.xlu0 %v6398_v5, %s6802_s28  ;;  %v6400_v11 = vpop.eup %6399 }
 0x96c   :  { %v6402_v12 = vpop.eup %6401  ;;  %v1007_v13 = vadd.f32 1.0, %v6400_v11 }
 0x96d   :  { %v1008_v14 = vadd.f32 1.0, %v6402_v12 }
 0x96e   :  { %1016 = vrot.lane.b32.xlu1 %v7220_v8, %s6803_s7  ;;  %6403 = vrcp.f32 %v1007_v13 }
 0x96f   :  { %6405 = vrcp.f32 %v1008_v14 }
 0x978   :  { %v6404_v17 = vpop.eup %6403 }
 0x979   :  { %v6406_v23 = vpop.eup %6405 }
 0x97a   :  { %v1030_v32 = vmul.f32 %v6406_v23, %v7230_v30 }
 0x9dc   :  { %v1022_v20 = vpop.permute.xlu1 %1021 }
 0x9dd   :  { %v1024_v24 = vmul.f32 %v6404_v17, %v1022_v20  ;;  %v1033_v25 = vpop.permute.xlu0 %1032 }
 0x9de   :  { %v1035_v18 = vmul.f32 %v6406_v23, %v1033_v25 }
 0x9df   :  { %1026 = vrot.lane.b32.xlu0 %v1024_v24, %s6803_s7 }
 0x9e0   :  { %1037 = vrot.lane.b32.xlu1 %v1035_v18, %s6803_s7  ;;  %v1017_v26 = vpop.permute.xlu1 %1016 }
 0x9e1   :  { %v1019_v27 = vmul.f32 %v6404_v17, %v1017_v26 }
 0xa51   :  { %v1027_v31 = vpop.permute.xlu0 %1026 }
 0xa52   :  { %v1029_v34 = vadd.f32 %v1027_v31, %v1019_v27  ;;  %v1038_v37 = vpop.permute.xlu1 %1037 }
 0xa53   :  { %v7233_v33 = vadd.f32 %v1038_v37, %v1030_v32 }
 0xa54   :  { %6407 = vtanh.f32 %v1029_v34 }
 0xa55   :  { %6409 = vtanh.f32 %v7233_v33  ;;  %v7292_v27 = vsel %vm1055_vm5, %v7233_v33, %v7230_v30  ;;  %v125_v30 = vld [vmem:[%s9064_s30 + $0x28] sm:$0xff] }
 0xa56   :  { %5102 = vmatmul.mubr.msk.f32.gmra.mrb[2].mxu1 %vm148_vm0, %v125_v30 }
 0xa57   :  { %273 = vmatprep.mubr.f32.mxu1 %v9009_v0 }
 0xa5e   :  { %v6408_v38 = vpop.eup %6407 }
 0xa5f   :  { %v6410_v39 = vpop.eup %6409  ;;  %1043 = vrot.lane.b32.xlu0 %v6408_v38, %s6802_s28 }
 0xa60   :  { %1049 = vrot.lane.b32.xlu1 %v6410_v39, %s6802_s28 }
 0xad1   :  { %v1044_v43 = vpop.permute.xlu0 %1043 }
 0xad2   :  { %v1046_v44 = vmul.f32 %v6404_v17, %v1044_v43  ;;  %v1050_v45 = vpop.permute.xlu1 %1049 }
 0xad3   :  { %v1052_v48 = vmul.f32 %v6406_v23, %v1050_v45 }
 0xad4   :  { %1057 = vrot.lane.b32.xlu0 %v1046_v44, %s6803_s7 }
 0xad5   :  { %1064 = vrot.lane.b32.xlu1 %v1052_v48, %s6802_s28  ;;  %v7311_v48 = vld [vmem:[%s9065_s24 + $0x20] sm:$0xff] }
 0xad6   :  { %vm1215_vm6 = vcmp.ne.f32.partialorder %v7311_v48, 0.0 }
 0xad8   :  { %1077 = vrot.lane.b32.xlu0 %v1029_v34, %s6804_s12 }
 0xb46   :  { %v1058_v50 = vpop.permute.xlu0 %1057 }
 0xb47   :  { %v1060_v51 = vsel %vm1055_vm5, %v1058_v50, 0.0  ;;  %v7254_v52 = vpop.permute.xlu1 %1064 }
 0xb48   :  { %1062 = vst.msk [vmem:[#allocation3 + $0x18] sm:$0xff] %vm148_vm0, %v1060_v51  ;;  %v1074_v54 = vsel %vm148_vm0, %v1058_v50, %v7254_v52 }
 0xb49   :  { %v7262_v53 = vsel %vm1055_vm5, %v1074_v54, %v7200_v61 }
 0xb4a   :  { %5127 = vmatmul.mubr.msk.f32.vlgmr.msra.gmra.mrb[8].mxu0 %vm450_vm2, %v7262_v53  ;;  %v1078_v5 = vpop.permute.xlu0 %1077 }
 0xb4b   :  { %5963 = vmatpush1.bf16.msra.mxu0 %v6971_v21  ;;  %1312 = vmatprep.mubr.f32.mxu0 %v9009_v0  ;;  %v7282_v7 = vsel %vm1055_vm5, %v1078_v5, %v7220_v8 }
 0xb4c   :  { %5965 = vmatprep.subr.bf16.mxu0 %v6974_v22 }
 0xb4f   :  { %5967 = vmatpush1.bf16.msra.mxu0 %v6994_v28 }
 0xb50   :  { %5969 = vmatprep.subr.bf16.mxu0 %v6997_v29 }
 0xb53   :  { %5971 = vmatpush1.bf16.msra.mxu0 %v7017_v35 }
 0xb54   :  { %5973 = vmatprep.subr.bf16.mxu0 %v7020_v36 }
 0xb57   :  { %5975 = vmatpush1.bf16.msra.mxu0 %v7034_v40 }
 0xb58   :  { %5977 = vmatprep.subr.bf16.mxu0 %v6954_v15 }
 0xc1d   :  { %v1154_v61 = vpop.f32.mrb[8].mxu0 }
 0xc1e   :  { %v1159_v62 = vadd.f32 %v1154_v61, %v264_v58  ;;  %v1156_v63 = vpop.f32.mrb[9].mxu0 }
 0xc1f   :  { %v1160_v1 = vadd.f32 %v1156_v63, %v266_v60 }
 0xc20   :  { %6411 = vtanh.f32 %v1159_v62  ;;  %v5128_v9 = vmul.f32 -1.442695, %v1159_v62 }
 0xc21   :  { %6413 = vtanh.f32 %v1160_v1  ;;  %v5129_v10 = vmul.f32 -1.442695, %v1160_v1 }
 0xc22   :  { %6415 = vpow2.f32 %v5128_v9 }
 0xc23   :  { %6417 = vpow2.f32 %v5129_v10 }
 0xc2a   :  { %v6412_v2 = vpop.eup %6411 }
 0xc2b   :  { %v6414_v4 = vpop.eup %6413  ;;  %1181 = vrot.lane.b32.xlu1 %v6412_v2, %s6802_s28 }
 0xc2c   :  { %1192 = vrot.lane.b32.xlu0 %v6414_v4, %s6802_s28  ;;  %v6416_v11 = vpop.eup %6415 }
 0xc2d   :  { %v6418_v12 = vpop.eup %6417  ;;  %v1167_v13 = vadd.f32 1.0, %v6416_v11 }
 0xc2e   :  { %v1168_v14 = vadd.f32 1.0, %v6418_v12 }
 0xc2f   :  { %1176 = vrot.lane.b32.xlu1 %v7282_v7, %s6803_s7  ;;  %6419 = vrcp.f32 %v1167_v13 }
 0xc30   :  { %6421 = vrcp.f32 %v1168_v14 }
 0xc39   :  { %v6420_v17 = vpop.eup %6419 }
 0xc3a   :  { %v6422_v23 = vpop.eup %6421 }
 0xc3b   :  { %v1190_v32 = vmul.f32 %v6422_v23, %v7292_v27 }
 0xc9d   :  { %v1182_v20 = vpop.permute.xlu1 %1181 }
 0xc9e   :  { %v1184_v24 = vmul.f32 %v6420_v17, %v1182_v20  ;;  %v1193_v25 = vpop.permute.xlu0 %1192 }
 0xc9f   :  { %v1195_v8 = vmul.f32 %v6422_v23, %v1193_v25 }
 0xca0   :  { %1186 = vrot.lane.b32.xlu0 %v1184_v24, %s6803_s7 }
 0xca1   :  { %1197 = vrot.lane.b32.xlu1 %v1195_v8, %s6803_s7  ;;  %v1177_v18 = vpop.permute.xlu1 %1176 }
 0xca2   :  { %v1179_v26 = vmul.f32 %v6420_v17, %v1177_v18 }
 0xd12   :  { %v1187_v31 = vpop.permute.xlu0 %1186 }
 0xd13   :  { %v1189_v34 = vadd.f32 %v1187_v31, %v1179_v26  ;;  %v1198_v37 = vpop.permute.xlu1 %1197 }
 0xd14   :  { %v7295_v38 = vadd.f32 %v1198_v37, %v1190_v32 }
 0xd15   :  { %6423 = vtanh.f32 %v1189_v34 }
 0xd16   :  { %6425 = vtanh.f32 %v7295_v38  ;;  %v7354_v31 = vsel %vm1215_vm6, %v7295_v38, %v7292_v27  ;;  %v126_v27 = vld [vmem:[%s9064_s30 + $0x30] sm:$0xff] }
 0xd17   :  { %5103 = vmatmul.mubr.msk.f32.gmra.mrb[4].mxu1 %vm148_vm0, %v126_v27  ;;  %v7433_v27 = vld [vmem:[%s9065_s24 + $0x30] sm:$0xff] }
 0xd18   :  { %279 = vmatprep.mubr.f32.mxu1 %v9009_v0  ;;  %vm1535_vm8 = vcmp.ne.f32.partialorder %v7433_v27, 0.0  ;;  %v1838_v27 = vld [vmem:[#allocation7] sm:$0xff] }
 0xd1f   :  { %v6424_v39 = vpop.eup %6423 }
 0xd20   :  { %v6426_v42 = vpop.eup %6425  ;;  %1203 = vrot.lane.b32.xlu0 %v6424_v39, %s6802_s28 }
 0xd21   :  { %1209 = vrot.lane.b32.xlu1 %v6426_v42, %s6802_s28 }
 0xd92   :  { %v1204_v33 = vpop.permute.xlu0 %1203 }
 0xd93   :  { %v1206_v43 = vmul.f32 %v6420_v17, %v1204_v33  ;;  %v1210_v44 = vpop.permute.xlu1 %1209 }
 0xd94   :  { %v1212_v45 = vmul.f32 %v6422_v23, %v1210_v44 }
 0xd95   :  { %1217 = vrot.lane.b32.xlu0 %v1206_v43, %s6803_s7 }
 0xd96   :  { %1224 = vrot.lane.b32.xlu1 %v1212_v45, %s6802_s28 }
 0xd99   :  { %1237 = vrot.lane.b32.xlu0 %v1189_v34, %s6804_s12 }
 0xe07   :  { %v1218_v50 = vpop.permute.xlu0 %1217 }
 0xe08   :  { %v1220_v51 = vsel %vm1215_vm6, %v1218_v50, 0.0  ;;  %v7316_v54 = vpop.permute.xlu1 %1224 }
 0xe09   :  { %1222 = vst.msk [vmem:[#allocation3 + $0x20] sm:$0xff] %vm148_vm0, %v1220_v51  ;;  %v1234_v55 = vsel %vm148_vm0, %v1218_v50, %v7316_v54  ;;  %v7373_v50 = vld [vmem:[%s9065_s24 + $0x28] sm:$0xff] }
 0xe0a   :  { %v7324_v57 = vsel %vm1215_vm6, %v1234_v55, %v7262_v53  ;;  %v269_v53 = vpop.f32.mrb[2].mxu1  ;;  %vm1375_vm7 = vcmp.ne.f32.partialorder %v7373_v50, 0.0  ;;  %v1835_v50 = vld [vmem:[%s8998_s10 + $0x8] sm:$0xff] }
 0xe0b   :  { %5131 = vmatmul.mubr.msk.f32.vlgmr.msra.gmra.mrb[10].mxu0 %vm450_vm2, %v7324_v57  ;;  %v271_v58 = vpop.f32.mrb[3].mxu1  ;;  %v270_v60 = vadd.f32 %v269_v53, %v7055_v46  ;;  %v1238_v9 = vpop.permute.xlu0 %1237 }
 0xe0c   :  { %5979 = vmatpush1.bf16.msra.mxu0 %v6971_v21  ;;  %1472 = vmatprep.mubr.f32.mxu0 %v9009_v0  ;;  %v272_v61 = vadd.f32 %v271_v58, %v7057_v47 }
 0xe0d   :  { %5981 = vmatprep.subr.bf16.mxu0 %v6974_v22 }
 0xe10   :  { %5983 = vmatpush1.bf16.msra.mxu0 %v6994_v28 }
 0xe11   :  { %5985 = vmatprep.subr.bf16.mxu0 %v6997_v29 }
 0xe14   :  { %5987 = vmatpush1.bf16.msra.mxu0 %v7017_v35 }
 0xe15   :  { %5989 = vmatprep.subr.bf16.mxu0 %v7020_v36 }
 0xe18   :  { %5991 = vmatpush1.bf16.msra.mxu0 %v7034_v40 }
 0xe19   :  { %5993 = vmatprep.subr.bf16.mxu0 %v6954_v15  ;;  %v7344_v15 = vsel %vm1215_vm6, %v1238_v9, %v7282_v7 }
 0xede   :  { %v1314_v62 = vpop.f32.mrb[10].mxu0 }
 0xedf   :  { %v1319_v63 = vadd.f32 %v1314_v62, %v270_v60  ;;  %v1316_v1 = vpop.f32.mrb[11].mxu0 }
 0xee0   :  { %v1320_v2 = vadd.f32 %v1316_v1, %v272_v61 }
 0xee1   :  { %6427 = vtanh.f32 %v1319_v63  ;;  %v5132_v10 = vmul.f32 -1.442695, %v1319_v63 }
 0xee2   :  { %6429 = vtanh.f32 %v1320_v2  ;;  %v5133_v11 = vmul.f32 -1.442695, %v1320_v2 }
 0xee3   :  { %6431 = vpow2.f32 %v5132_v10 }
 0xee4   :  { %6433 = vpow2.f32 %v5133_v11 }
 0xeeb   :  { %v6428_v4 = vpop.eup %6427 }
 0xeec   :  { %v6430_v5 = vpop.eup %6429  ;;  %1341 = vrot.lane.b32.xlu1 %v6428_v4, %s6802_s28 }
 0xeed   :  { %1352 = vrot.lane.b32.xlu0 %v6430_v5, %s6802_s28  ;;  %v6432_v12 = vpop.eup %6431 }
 0xeee   :  { %v6434_v13 = vpop.eup %6433  ;;  %v1327_v14 = vadd.f32 1.0, %v6432_v12 }
 0xeef   :  { %v1328_v17 = vadd.f32 1.0, %v6434_v13 }
 0xef0   :  { %1336 = vrot.lane.b32.xlu1 %v7344_v15, %s6803_s7  ;;  %6435 = vrcp.f32 %v1327_v14 }
 0xef1   :  { %6437 = vrcp.f32 %v1328_v17 }
 0xefa   :  { %v6436_v20 = vpop.eup %6435 }
 0xefb   :  { %v6438_v24 = vpop.eup %6437 }
 0xefc   :  { %v1350_v34 = vmul.f32 %v6438_v24, %v7354_v31 }
 0xf5e   :  { %v1342_v23 = vpop.permute.xlu1 %1341 }
 0xf5f   :  { %v1344_v25 = vmul.f32 %v6436_v20, %v1342_v23  ;;  %v1353_v8 = vpop.permute.xlu0 %1352 }
 0xf60   :  { %v1355_v7 = vmul.f32 %v6438_v24, %v1353_v8 }
 0xf61   :  { %1346 = vrot.lane.b32.xlu0 %v1344_v25, %s6803_s7 }
 0xf62   :  { %1357 = vrot.lane.b32.xlu1 %v1355_v7, %s6803_s7  ;;  %v1337_v18 = vpop.permute.xlu1 %1336 }
 0xf63   :  { %v1339_v26 = vmul.f32 %v6436_v20, %v1337_v18 }
 0xfd3   :  { %v1347_v32 = vpop.permute.xlu0 %1346 }
 0xfd4   :  { %v1349_v37 = vadd.f32 %v1347_v32, %v1339_v26  ;;  %v1358_v39 = vpop.permute.xlu1 %1357 }
 0xfd5   :  { %v7357_v42 = vadd.f32 %v1358_v39, %v1350_v34 }
 0xfd6   :  { %6439 = vtanh.f32 %v1349_v37 }
 0xfd7   :  { %6441 = vtanh.f32 %v7357_v42  ;;  %v7415_v25 = vsel %vm1375_vm7, %v7357_v42, %v7354_v31  ;;  %v127_v31 = vld [vmem:[%s9064_s30 + $0x38] sm:$0xff] }
 0xfd8   :  { %5104 = vmatmul.mubr.msk.f32.gmra.mrb[6].mxu1 %vm148_vm0, %v127_v31  ;;  %v312_v31 = vld [vmem:[#allocation9 + $0x18] sm:$0xff] }
 0xfd9   :  { %5419 = vmatprep.mubr.msk.f32.mxu1 %vm6806_vm9, %v9009_v0 }
 0xfe0   :  { %v6440_v30 = vpop.eup %6439 }
 0xfe1   :  { %v6442_v33 = vpop.eup %6441  ;;  %1363 = vrot.lane.b32.xlu0 %v6440_v30, %s6802_s28 }
 0xfe2   :  { %1369 = vrot.lane.b32.xlu1 %v6442_v33, %s6802_s28 }
0x1053   :  { %v1364_v38 = vpop.permute.xlu0 %1363 }
0x1054   :  { %v1366_v43 = vmul.f32 %v6436_v20, %v1364_v38  ;;  %v1370_v44 = vpop.permute.xlu1 %1369 }
0x1055   :  { %v1372_v45 = vmul.f32 %v6438_v24, %v1370_v44 }
0x1056   :  { %1377 = vrot.lane.b32.xlu0 %v1366_v43, %s6803_s7 }
0x1057   :  { %1384 = vrot.lane.b32.xlu1 %v1372_v45, %s6802_s28 }
0x105a   :  { %1397 = vrot.lane.b32.xlu0 %v1349_v37, %s6804_s12 }
0x10c8   :  { %v1378_v51 = vpop.permute.xlu0 %1377 }
0x10c9   :  { %v1380_v55 = vsel %vm1375_vm7, %v1378_v51, 0.0  ;;  %v7378_v53 = vpop.permute.xlu1 %1384 }
0x10ca   :  { %1382 = vst.msk [vmem:[#allocation3 + $0x28] sm:$0xff] %vm148_vm0, %v1380_v55  ;;  %v1394_v58 = vsel %vm148_vm0, %v1378_v51, %v7378_v53 }
0x10cb   :  { %v7386_v60 = vsel %vm1375_vm7, %v1394_v58, %v7324_v57  ;;  %v275_v57 = vpop.f32.mrb[4].mxu1 }
0x10cc   :  { %5135 = vmatmul.mubr.msk.f32.vlgmr.msra.gmra.mrb[12].mxu0 %vm450_vm2, %v7386_v60  ;;  %v277_v61 = vpop.f32.mrb[5].mxu1  ;;  %v276_v62 = vadd.f32 %v275_v57, %v7055_v46  ;;  %v1398_v4 = vpop.permute.xlu0 %1397 }
0x10cd   :  { %5995 = vmatpush1.bf16.msra.mxu0 %v6971_v21  ;;  %1632 = vmatprep.mubr.f32.mxu0 %v9009_v0  ;;  %v278_v21 = vadd.f32 %v277_v61, %v7057_v47  ;;  %v281_v55 = vpop.f32.mrb[6].mxu1 }
0x10ce   :  { %5997 = vmatprep.subr.bf16.mxu0 %v6974_v22  ;;  %v283_v58 = vpop.f32.mrb[7].mxu1  ;;  %v282_v57 = vadd.f32 %v281_v55, %v7055_v46 }
0x10cf   :  { %v284_v61 = vadd.f32 %v283_v58, %v7057_v47  ;;  %v303_v58 = vld [vmem:[%s8991_s3 + $0x8] sm:$0xff] }
0x10d1   :  { %5999 = vmatpush1.bf16.msra.mxu0 %v6994_v28 }
0x10d2   :  { %6001 = vmatprep.subr.bf16.mxu0 %v6997_v29 }
0x10d5   :  { %6003 = vmatpush1.bf16.msra.mxu0 %v7017_v35  ;;  %v7405_v35 = vsel %vm1375_vm7, %v1398_v4, %v7344_v15 }
0x10d6   :  { %6005 = vmatprep.subr.bf16.mxu0 %v7020_v36 }
0x10d9   :  { %6007 = vmatpush1.bf16.msra.mxu0 %v7034_v40 }
0x119f   :  { %v1474_v63 = vpop.f32.mrb[12].mxu0 }
0x11a0   :  { %v1479_v1 = vadd.f32 %v1474_v63, %v276_v62  ;;  %v1476_v2 = vpop.f32.mrb[13].mxu0 }
0x11a1   :  { %v1480_v22 = vadd.f32 %v1476_v2, %v278_v21 }
0x11a2   :  { %6443 = vtanh.f32 %v1479_v1  ;;  %v5136_v36 = vmul.f32 -1.442695, %v1479_v1 }
0x11a3   :  { %6445 = vtanh.f32 %v1480_v22  ;;  %v5137_v40 = vmul.f32 -1.442695, %v1480_v22 }
0x11a4   :  { %6447 = vpow2.f32 %v5136_v36 }
0x11a5   :  { %6449 = vpow2.f32 %v5137_v40 }
0x11ac   :  { %v6444_v28 = vpop.eup %6443 }
0x11ad   :  { %v6446_v29 = vpop.eup %6445  ;;  %1501 = vrot.lane.b32.xlu1 %v6444_v28, %s6802_s28 }
0x11ae   :  { %1512 = vrot.lane.b32.xlu0 %v6446_v29, %s6802_s28  ;;  %v6448_v5 = vpop.eup %6447 }
0x11af   :  { %v6450_v9 = vpop.eup %6449  ;;  %v1487_v10 = vadd.f32 1.0, %v6448_v5 }
0x11b0   :  { %v1488_v11 = vadd.f32 1.0, %v6450_v9 }
0x11b1   :  { %1496 = vrot.lane.b32.xlu1 %v7405_v35, %s6803_s7  ;;  %6451 = vrcp.f32 %v1487_v10 }
0x11b2   :  { %6453 = vrcp.f32 %v1488_v11 }
0x11bb   :  { %v6452_v12 = vpop.eup %6451 }
0x11bc   :  { %v6454_v14 = vpop.eup %6453 }
0x11bd   :  { %v1510_v7 = vmul.f32 %v6454_v14, %v7415_v25 }
0x121f   :  { %v1502_v13 = vpop.permute.xlu1 %1501 }
0x1220   :  { %v1504_v17 = vmul.f32 %v6452_v12, %v1502_v13  ;;  %v1513_v20 = vpop.permute.xlu0 %1512 }
0x1221   :  { %v1515_v15 = vmul.f32 %v6454_v14, %v1513_v20 }
0x1222   :  { %1506 = vrot.lane.b32.xlu0 %v1504_v17, %s6803_s7 }
0x1223   :  { %1517 = vrot.lane.b32.xlu1 %v1515_v15, %s6803_s7  ;;  %v1497_v23 = vpop.permute.xlu1 %1496 }
0x1224   :  { %v1499_v24 = vmul.f32 %v6452_v12, %v1497_v23 }
0x1294   :  { %v1507_v8 = vpop.permute.xlu0 %1506 }
0x1295   :  { %v1509_v18 = vadd.f32 %v1507_v8, %v1499_v24  ;;  %v1518_v26 = vpop.permute.xlu1 %1517 }
0x1296   :  { %v7418_v32 = vadd.f32 %v1518_v26, %v1510_v7  ;;  %v310_v26 = vld [vmem:[#allocation9 + $0x8] sm:$0xff] }
0x1297   :  { %6455 = vtanh.f32 %v1509_v18 }
0x1298   :  { %6457 = vtanh.f32 %v7418_v32  ;;  %v7474_v17 = vsel %vm1535_vm8, %v7418_v32, %v7415_v25  ;;  %v309_v25 = vld [vmem:[#allocation9] sm:$0xff]  ;;  %v311_v32 = vld [vmem:[#allocation9 + $0x10] sm:$0xff] }
0x12a1   :  { %v6456_v34 = vpop.eup %6455 }
0x12a2   :  { %v6458_v37 = vpop.eup %6457  ;;  %1523 = vrot.lane.b32.xlu0 %v6456_v34, %s6802_s28  ;;  %v9011_v34 = vmov 0.0|0.0  }
0x12a3   :  { %1529 = vrot.lane.b32.xlu1 %v6458_v37, %s6802_s28  ;;  %5874 = vmatprep.subr.bf16.mxu1 %v9011_v34  ;;  %v5875_v37 = vpack.c.bf16 %v310_v26, %v309_v25 }
0x12a4   :  { %6120 = vmatprep.subr.bf16.mxu0 %v9011_v34 }
0x12a5   :  { %5876 = vmatpush3.bf16.msra.mxu1 %v5875_v37 }
0x12a6   :  { %5877 = vmatprep.subr.bf16.mxu1 %v9011_v34 }
0x1314   :  { %v1524_v39 = vpop.permute.xlu0 %1523 }
0x1315   :  { %v1526_v42 = vmul.f32 %v6452_v12, %v1524_v39  ;;  %v1530_v30 = vpop.permute.xlu1 %1529  ;;  %v5878_v39 = vpack.c.bf16 %v312_v31, %v311_v32 }
0x1316   :  { %v1532_v33 = vmul.f32 %v6454_v14, %v1530_v30  ;;  %v1733_v30 = vld [vmem:[%s8997_s9 + $0x8] sm:$0xff] }
0x1317   :  { %1537 = vrot.lane.b32.xlu0 %v1526_v42, %s6803_s7  ;;  %v1732_v42 = vld [vmem:[%s8997_s9] sm:$0xff]  ;;  %5879 = vmatpush3.bf16.msra.mxu1 %v5878_v39 }
0x1318   :  { %1544 = vrot.lane.b32.xlu1 %v1532_v33, %s6802_s28  ;;  %v302_v33 = vld [vmem:[%s8991_s3] sm:$0xff]  ;;  %6008 = vmatprep.subr.bf16.mxu1 %v9011_v34 }
0x131a   :  { %5420 = vmatmul.mubr.msk.f32.vlgmr.msra.gmra.mrb[8].mxu1 %vm148_vm0, %v302_v33 }
0x131b   :  { %1557 = vrot.lane.b32.xlu0 %v1509_v18, %s6804_s12  ;;  %5422 = vmatprep.mubr.msk.f32.mxu1 %vm6806_vm9, %v9009_v0 }
0x131e   :  { %5423 = vmatmul.mubr.msk.f32.gmra.mrb[10].mxu1 %vm148_vm0, %v303_v58 }
0x131f   :  { %5425 = vmatprep.mubr.msk.f32.mxu1 %vm6806_vm9, %v9009_v0 }
0x1389   :  { %v1538_v38 = vpop.permute.xlu0 %1537 }
0x138a   :  { %v1540_v43 = vsel %vm1535_vm8, %v1538_v38, 0.0  ;;  %v7438_v44 = vpop.permute.xlu1 %1544 }
0x138b   :  { %1542 = vst.msk [vmem:[#allocation3 + $0x30] sm:$0xff] %vm148_vm0, %v1540_v43  ;;  %v1554_v45 = vsel %vm148_vm0, %v1538_v38, %v7438_v44  ;;  %v6009_v38 = vpack.c.bf16 %v1733_v30, %v1732_v42  ;;  %v1734_v43 = vld [vmem:[%s8997_s9 + $0x10] sm:$0xff] }
0x138c   :  { %v7446_v51 = vsel %vm1535_vm8, %v1554_v45, %v7386_v60  ;;  %v1735_v45 = vld [vmem:[%s8997_s9 + $0x18] sm:$0xff]  ;;  %v1841_v42 = vld [vmem:[#allocation7 + $0x18] sm:$0xff] }
0x138d   :  { %5139 = vmatmul.mubr.msk.f32.vlgmr.msra.gmra.mrb[14].mxu0 %vm450_vm2, %v7446_v51  ;;  %v1558_v28 = vpop.permute.xlu0 %1557  ;;  %6010 = vmatpush3.bf16.msra.mxu1 %v6009_v38  ;;  %v6012_v55 = vpack.c.bf16 %v1735_v45, %v1734_v43  ;;  %v1387_v38 = vsel %vm1375_vm7, %v7378_v53, 0.0  ;;  %v1067_v53 = vsel %vm1055_vm5, %v7254_v52, 0.0 }
0x138e   :  { %v7457_v60 = vsel %vm1535_vm8, %v1558_v28, %v7405_v35  ;;  %5650 = vmatprep.mubr.msk.f32.mxu0 %vm6806_vm9, %v9009_v0  ;;  %6011 = vmatprep.subr.bf16.mxu1 %v9011_v34  ;;  %v1740_v28 = vld [vmem:[%s8997_s9 + $0x40] sm:$0xff] }
0x1391   :  { %6013 = vmatpush3.bf16.msra.mxu1 %v6012_v55 }
0x1392   :  { %6014 = vmatprep.subr.bf16.mxu1 %v9011_v34 }
0x1460   :  { %v1634_v62 = vpop.f32.mrb[14].mxu0 }
0x1461   :  { %v1639_v21 = vadd.f32 %v1634_v62, %v282_v57  ;;  %v1636_v63 = vpop.f32.mrb[15].mxu0  ;;  %v1736_v57 = vld [vmem:[%s8997_s9 + $0x20] sm:$0xff] }
0x1462   :  { %v1640_v1 = vadd.f32 %v1636_v63, %v284_v61  ;;  %v1737_v61 = vld [vmem:[%s8997_s9 + $0x28] sm:$0xff]  ;;  %v1738_v63 = vld [vmem:[%s8997_s9 + $0x30] sm:$0xff] }
0x1463   :  { %6459 = vtanh.f32 %v1639_v21  ;;  %v5140_v46 = vmul.f32 -1.442695, %v1639_v21  ;;  %v6015_v62 = vpack.c.bf16 %v1737_v61, %v1736_v57  ;;  %v304_v21 = vld [vmem:[%s8991_s3 + $0x10] sm:$0xff]  ;;  %v1834_v61 = vld [vmem:[%s8998_s10] sm:$0xff] }
0x1464   :  { %6461 = vtanh.f32 %v1640_v1  ;;  %v5141_v47 = vmul.f32 -1.442695, %v1640_v1  ;;  %v1739_v1 = vld [vmem:[%s8997_s9 + $0x38] sm:$0xff]  ;;  %5426 = vmatmul.mubr.msk.f32.gmra.mrb[12].mxu1 %vm148_vm0, %v304_v21  ;;  %v747_v21 = vsel %vm735_vm3, %v7135_v6, 0.0 }
0x1465   :  { %6463 = vpow2.f32 %v5140_v46  ;;  %6016 = vmatpush3.bf16.msra.mxu1 %v6015_v62  ;;  %5428 = vmatprep.mubr.msk.f32.mxu1 %vm6806_vm9, %v9009_v0  ;;  %v1741_v46 = vld [vmem:[%s8997_s9 + $0x48] sm:$0xff]  ;;  %v1837_v6 = vld [vmem:[%s8998_s10 + $0x18] sm:$0xff] }
0x1466   :  { %6465 = vpow2.f32 %v5141_v47  ;;  %6017 = vmatprep.subr.bf16.mxu1 %v9011_v34  ;;  %v6021_v47 = vpack.c.bf16 %v1741_v46, %v1740_v28  ;;  %v6044_v28 = vpack.c.bf16 %v1837_v6, %v1836_v3 }
0x146d   :  { %v6460_v2 = vpop.eup %6459 }
0x146e   :  { %v6462_v22 = vpop.eup %6461  ;;  %1661 = vrot.lane.b32.xlu1 %v6460_v2, %s6802_s28  ;;  %v6018_v2 = vpack.c.bf16 %v1739_v1, %v1738_v63 }
0x146f   :  { %1672 = vrot.lane.b32.xlu0 %v6462_v22, %s6802_s28  ;;  %v6464_v29 = vpop.eup %6463  ;;  %v305_v22 = vld [vmem:[%s8991_s3 + $0x18] sm:$0xff] }
0x1470   :  { %v6466_v4 = vpop.eup %6465  ;;  %v1647_v36 = vadd.f32 1.0, %v6464_v29  ;;  %5429 = vmatmul.mubr.msk.f32.gmra.mrb[14].mxu1 %vm148_vm0, %v305_v22  ;;  %v306_v29 = vld [vmem:[%s8991_s3 + $0x20] sm:$0xff] }
0x1471   :  { %v1648_v40 = vadd.f32 1.0, %v6466_v4  ;;  %6019 = vmatpush3.bf16.msra.mxu1 %v6018_v2  ;;  %5431 = vmatprep.mubr.msk.f32.mxu1 %vm6806_vm9, %v9009_v0  ;;  %v1742_v4 = vld [vmem:[%s8997_s9 + $0x50] sm:$0xff] }
0x1472   :  { %1656 = vrot.lane.b32.xlu1 %v7457_v60, %s6803_s7  ;;  %6467 = vrcp.f32 %v1647_v36  ;;  %6020 = vmatprep.subr.bf16.mxu1 %v9011_v34  ;;  %v1743_v36 = vld [vmem:[%s8997_s9 + $0x58] sm:$0xff] }
0x1473   :  { %6469 = vrcp.f32 %v1648_v40  ;;  %v6024_v40 = vpack.c.bf16 %v1743_v36, %v1742_v4 }
0x1474   :  { %5432 = vmatmul.mubr.msk.f32.gmra.mrb[16].mxu1 %vm148_vm0, %v306_v29 }
0x1475   :  { %6022 = vmatpush3.bf16.msra.mxu1 %v6021_v47  ;;  %5434 = vmatprep.mubr.msk.f32.mxu1 %vm6806_vm9, %v9009_v0 }
0x1476   :  { %6023 = vmatprep.subr.bf16.mxu1 %v9011_v34 }
0x1479   :  { %6025 = vmatpush3.bf16.msra.mxu1 %v6024_v40 }
0x147a   :  { %6026 = vmatprep.subr.bf16.mxu1 %v9011_v34 }
0x147c   :  { %v7461_v5 = vpop.eup %6467 }
0x147d   :  { %v7463_v10 = vpop.eup %6469 }
0x147e   :  { %v1670_v15 = vmul.f32 %v7463_v10, %v7474_v17 }
0x14e0   :  { %v1662_v9 = vpop.permute.xlu1 %1661 }
0x14e1   :  { %v1664_v35 = vmul.f32 %v7461_v5, %v1662_v9  ;;  %v1673_v11 = vpop.permute.xlu0 %1672  ;;  %v1744_v9 = vld [vmem:[%s8997_s9 + $0x60] sm:$0xff] }
0x14e2   :  { %v1675_v12 = vmul.f32 %v7463_v10, %v1673_v11  ;;  %v307_v11 = vld [vmem:[%s8991_s3 + $0x28] sm:$0xff] }
0x14e3   :  { %1666 = vrot.lane.b32.xlu0 %v1664_v35, %s6803_s7  ;;  %v1745_v35 = vld [vmem:[%s8997_s9 + $0x68] sm:$0xff]  ;;  %5435 = vmatmul.mubr.msk.f32.gmra.mrb[18].mxu1 %vm148_vm0, %v307_v11 }
0x14e4   :  { %1677 = vrot.lane.b32.xlu1 %v1675_v12, %s6803_s7  ;;  %v1657_v13 = vpop.permute.xlu1 %1656  ;;  %v6027_v12 = vpack.c.bf16 %v1745_v35, %v1744_v9  ;;  %5437 = vmatprep.mubr.msk.f32.mxu1 %vm6806_vm9, %v9009_v0  ;;  %v100_v35 = vld [vmem:[%s9002_s14] sm:$0xff]  ;;  %v101_v11 = vld [vmem:[%s9002_s14 + $0x8] sm:$0xff] }
0x14e5   :  { %v1659_v14 = vmul.f32 %v7461_v5, %v1657_v13  ;;  %v1746_v13 = vld [vmem:[%s8997_s9 + $0x70] sm:$0xff] }
0x14e6   :  { %6028 = vmatpush3.bf16.msra.mxu1 %v6027_v12 }
0x14e7   :  { %6029 = vmatprep.subr.bf16.mxu1 %v9011_v34 }
0x1555   :  { %v1667_v20 = vpop.permute.xlu0 %1666 }
0x1556   :  { %v1669_v23 = vadd.f32 %v1667_v20, %v1659_v14  ;;  %v1678_v24 = vpop.permute.xlu1 %1677  ;;  %v1747_v14 = vld [vmem:[%s8997_s9 + $0x78] sm:$0xff]  ;;  %v308_v20 = vld [vmem:[%s8991_s3 + $0x30] sm:$0xff] }
0x1557   :  { %v7478_v8 = vadd.f32 %v1678_v24, %v1670_v15  ;;  %v6030_v15 = vpack.c.bf16 %v1747_v14, %v1746_v13  ;;  %5438 = vmatmul.mubr.msk.f32.gmra.mrb[20].mxu1 %vm148_vm0, %v308_v20  ;;  %v7698_v13 = vld [vmem:[#allocation3] sm:$0xff]  ;;  %v7702_v14 = vpack.c.bf16 %v101_v11, %v100_v35  ;;  %v102_v20 = vld [vmem:[%s9002_s14 + $0x10] sm:$0xff] }
0x1558   :  { %6471 = vtanh.f32 %v1669_v23  ;;  %5472 = vmatprep.mubr.msk.f32.mxu1 %vm6806_vm9, %v9009_v0 }
0x1559   :  { %6473 = vtanh.f32 %v7478_v8  ;;  %6031 = vmatpush3.bf16.msra.mxu1 %v6030_v15  ;;  %9066 = vst [vmem:[#allocation13_spill] sm:$0xff] %v7702_v14  ;;  %v103_v15 = vld [vmem:[%s9002_s14 + $0x18] sm:$0xff] }
0x1562   :  { %v6472_v7 = vpop.eup %6471 }
0x1563   :  { %v6474_v18 = vpop.eup %6473  ;;  %1683 = vrot.lane.b32.xlu0 %v6472_v7, %s6802_s28 }
0x1564   :  { %1689 = vrot.lane.b32.xlu1 %v6474_v18, %s6802_s28 }
0x1567   :  { %1716 = vrot.lane.b32.xlu0 %v1669_v23, %s6804_s12  ;;  %v5142_v23 = vld [vmem:[%s9065_s24 + $0x38] sm:$0xff] }
0x1568   :  { %vm1695_vm10 = vcmp.ne.f32.partialorder %v5142_v23, 0.0  ;;  %v7710_v23 = vld [vmem:[#allocation3 + $0x8] sm:$0xff] }
0x1569   :  { %v1720_v37 = vsel %vm1695_vm10, %v7478_v8, %v7474_v17  ;;  %v587_v17 = vsel %vm576_vm1, %v7082_v19, 0.0  ;;  %v1840_v19 = vld [vmem:[#allocation7 + $0x10] sm:$0xff] }
0x156a   :  { %v6036_v55 = vpack.c.bf16 %v1841_v42, %v1840_v19 }
0x15d5   :  { %v1684_v24 = vpop.permute.xlu0 %1683 }
0x15d6   :  { %v1686_v7 = vmul.f32 %v7461_v5, %v1684_v24  ;;  %v1690_v18 = vpop.permute.xlu1 %1689  ;;  %v1547_v5 = vsel %vm1535_vm8, %v7438_v44, 0.0  ;;  %v1839_v44 = vld [vmem:[#allocation7 + $0x8] sm:$0xff]  ;;  %v7714_v24 = vld [vmem:[#allocation3 + $0x10] sm:$0xff] }
0x15d7   :  { %v1692_v25 = vmul.f32 %v7463_v10, %v1690_v18  ;;  %v1227_v10 = vsel %vm1215_vm6, %v7316_v54, 0.0  ;;  %v6032_v8 = vpack.c.bf16 %v1839_v44, %v1838_v27  ;;  %v104_v18 = vld [vmem:[%s9002_s14 + $0x20] sm:$0xff] }
0x15d8   :  { %1697 = vrot.lane.b32.xlu1 %v1686_v7, %s6803_s7  ;;  %v7719_v7 = vpack.c.bf16 %v103_v15, %v102_v20 }
0x15d9   :  { %v1717_v26 = vpop.permute.xlu0 %1716  ;;  %1704 = vrot.lane.b32.xlu0 %v1692_v25, %s6802_s28  ;;  %6033 = vmatprep.subr.bf16.mxu1 %v6032_v8  ;;  %v105_v25 = vld [vmem:[%s9002_s14 + $0x28] sm:$0xff] }
0x15da   :  { %v1719_v32 = vsel %vm1695_vm10, %v1717_v26, %v7457_v60  ;;  %v907_v60 = vsel %vm895_vm4, %v7192_v59, 0.0  ;;  %9067 = vst [vmem:[#allocation14_spill] sm:$0xff] %v7719_v7  ;;  %v7728_v26 = vld [vmem:[#allocation3 + $0x18] sm:$0xff] }
0x15db   :  { %v6340_v31 = vpack.i.bf16 %v1720_v37, %v1719_v32  ;;  %v7732_v32 = vld [vmem:[#allocation3 + $0x20] sm:$0xff]  ;;  %v7737_v37 = vpack.c.bf16 %v105_v25, %v104_v18 }
0x15dd   :  { %6341 = vrot.lane.b32.xlu1 %v6340_v31, %s6802_s28  ;;  %9068 = vst [vmem:[#allocation15_spill] sm:$0xff] %v7737_v37  ;;  %v106_v31 = vld [vmem:[%s9002_s14 + $0x30] sm:$0xff] }
0x15e1   :  { %1549 = vrot.lane.b32.xlu1 %v1547_v5, %s6804_s12  ;;  %v107_v5 = vld [vmem:[%s9002_s14 + $0x38] sm:$0xff] }
0x15e5   :  { %1229 = vrot.lane.b32.xlu1 %v1227_v10, %s6804_s12  ;;  %v7746_v10 = vld [vmem:[#allocation3 + $0x28] sm:$0xff] }
0x15e9   :  { %909 = vrot.lane.b32.xlu1 %v907_v60, %s6804_s12  ;;  %v7750_v60 = vld [vmem:[#allocation3 + $0x30] sm:$0xff] }
0x15ed   :  { %589 = vrot.lane.b32.xlu1 %v587_v17, %s6804_s12  ;;  %v7755_v17 = vpack.c.bf16 %v107_v5, %v106_v31 }
0x15ef   :  { %9069 = vst [vmem:[#allocation16_spill] sm:$0xff] %v7755_v17 }
0x164a   :  { %v1698_v48 = vpop.permute.xlu1 %1697 }
0x164b   :  { %v1700_v54 = vsel %vm1695_vm10, %v1698_v48, 0.0  ;;  %v1705_v39 = vpop.permute.xlu0 %1704 }
0x164c   :  { %1702 = vst.msk [vmem:[#allocation3 + $0x38] sm:$0xff] %vm148_vm0, %v1700_v54  ;;  %v1707_v56 = vsel %vm1695_vm10, %v1705_v39, 0.0  ;;  %v1713_v59 = vsel %vm148_vm0, %v1698_v48, %v1705_v39 }
0x164d   :  { %1709 = vrot.lane.b32.xlu0 %v1707_v56, %s6804_s12  ;;  %v1714_v43 = vsel %vm1695_vm10, %v1713_v59, %v7446_v51  ;;  %v6040_v51 = vpack.c.bf16 %v1835_v50, %v1834_v61 }
0x164f   :  { %v6342_v16 = vpop.permute.xlu1 %6341 }
0x1650   :  { %v6344_v30 = vunpack.i.h.bf16 %v6342_v16  ;;  %v6343_v33 = vunpack.i.l.bf16 %v6342_v16 }
0x1651   :  { %1389 = vrot.lane.b32.xlu0 %v1387_v38, %s6804_s12  ;;  %v7790_v38 = vld [vmem:[%s9001_s13] ss:$0 sm:$0xff] }
0x1652   :  { %v1729_v45 = vsel %vm450_vm2, %v1714_v43, %v6343_v33 }
0x1653   :  { %v1550_v58 = vpop.permute.xlu1 %1549  ;;  %v1731_v57 = vsel %vm1730_vm11, %v1729_v45, %v6344_v30  ;;  %v7758_v27 = vld [vmem:[#allocation3 + $0x38] sm:$0xff] }
0x1654   :  { %1553 = vst.msk [vmem:[#allocation4 + $0x8] sm:$0xff] %vm148_vm0, %v1550_v58  ;;  %5473 = vmatmul.mubr.f32.vlgmr.msra.gmra.mrb[22].mxu1 %v1731_v57 }
0x1655   :  { %1069 = vrot.lane.b32.xlu0 %v1067_v53, %s6804_s12  ;;  %6035 = vmatpush3.bf16.msra.mxu1 %v6032_v8 }
0x1656   :  { %6037 = vmatprep.subr.bf16.mxu1 %v6036_v55 }
0x1657   :  { %v1230_v62 = vpop.permute.xlu1 %1229 }
0x1658   :  { %1233 = vst.msk [vmem:[#allocation4 + $0x18] sm:$0xff] %vm148_vm0, %v1230_v62 }
0x1659   :  { %749 = vrot.lane.b32.xlu0 %v747_v21, %s6804_s12  ;;  %6039 = vmatpush3.bf16.msra.mxu1 %v6036_v55 }
0x165a   :  { %6041 = vmatprep.subr.bf16.mxu1 %v6040_v51 }
0x165b   :  { %v910_v63 = vpop.permute.xlu1 %909  ;;  %v7662_v46 = vld [vmem:[#allocation4 + $0x8] sm:$0xff] }
0x165c   :  { %913 = vst.msk [vmem:[#allocation4 + $0x28] sm:$0xff] %vm148_vm0, %v910_v63 }
0x165f   :  { %v590_v49 = vpop.permute.xlu1 %589  ;;  %v7671_v4 = vld [vmem:[#allocation4 + $0x18] sm:$0xff] }
0x1660   :  { %593 = vst.msk [vmem:[#allocation4 + $0x38] sm:$0xff] %vm148_vm0, %v590_v49 }
0x1663   :  { %v7680_v40 = vld [vmem:[#allocation4 + $0x28] sm:$0xff] }
0x1667   :  { %v7694_v12 = vld [vmem:[#allocation4 + $0x38] sm:$0xff] }
0x16bf   :  { %v1710_v52 = vpop.permute.xlu0 %1709 }
0x16c0   :  { %1712 = vst.msk [vmem:[#allocation4] sm:$0xff] %vm148_vm0, %v1710_v52 }
0x16c3   :  { %v1390_v1 = vpop.permute.xlu0 %1389 }
0x16c4   :  { %1393 = vst.msk [vmem:[#allocation4 + $0x10] sm:$0xff] %vm148_vm0, %v1390_v1 }
0x16c7   :  { %v1070_v2 = vpop.permute.xlu0 %1069  ;;  %v7657_v22 = vld [vmem:[#allocation4] sm:$0xff] }
0x16c8   :  { %1073 = vst.msk [vmem:[#allocation4 + $0x20] sm:$0xff] %vm148_vm0, %v1070_v2  ;;  %5483 = vmatprep.mubr.msk.f32.mxu1 %vm148_vm0, %v7657_v22 }
0x16c9   :  { %5484 = vmatmul.mubr.msk.f32.vlgmr.msra.gmra.mrb[24].mxu1 %vm148_vm0, %v7662_v46 }
0x16ca   :  { %6043 = vmatpush3.bf16.msra.mxu1 %v6040_v51 }
0x16cb   :  { %v750_v47 = vpop.permute.xlu0 %749  ;;  %v7666_v29 = vld [vmem:[#allocation4 + $0x10] sm:$0xff]  ;;  %6045 = vmatprep.subr.bf16.mxu1 %v6044_v28 }
0x16cc   :  { %753 = vst.msk [vmem:[#allocation4 + $0x30] sm:$0xff] %vm148_vm0, %v750_v47  ;;  %5486 = vmatprep.mubr.msk.f32.mxu1 %vm148_vm0, %v7666_v29 }
0x16cd   :  { %5487 = vmatmul.mubr.msk.f32.gmra.mrb[26].mxu1 %vm148_vm0, %v7671_v4 }
0x16ce   :  { %6047 = vmatpush3.bf16.msra.mxu1 %v6044_v28 }
0x16cf   :  { %v7675_v36 = vld [vmem:[#allocation4 + $0x20] sm:$0xff]  ;;  %6048 = vmatprep.subr.bf16.mxu1 %v9011_v34 }
0x16d0   :  { %5489 = vmatprep.mubr.msk.f32.mxu1 %vm148_vm0, %v7675_v36 }
0x16d1   :  { %5490 = vmatmul.mubr.msk.f32.gmra.mrb[28].mxu1 %vm148_vm0, %v7680_v40 }
0x16d3   :  { %v7684_v9 = vld [vmem:[#allocation4 + $0x30] sm:$0xff] }
0x16d4   :  { %5492 = vmatprep.mubr.msk.f32.mxu1 %vm148_vm0, %v7684_v9 }
0x16d5   :  { %5493 = vmatmul.mubr.msk.f32.gmra.mrb[30].mxu1 %vm148_vm0, %v7694_v12 }
0x16d6   :  { %5503 = vmatprep.mubr.msk.f32.mxu1 %vm148_vm0, %v7698_v13 }
0x16d9   :  { %5504 = vmatmul.mubr.msk.f32.vlgmr.msra.gmra.mrb[24].mxu1 %vm148_vm0, %v7710_v23 }
0x16da   :  { %5506 = vmatprep.mubr.msk.f32.mxu1 %vm148_vm0, %v7714_v24  ;;  %6050 = vmatpush3.bf16.msra.mxu1 %v7702_v14 }
0x16db   :  { %6051 = vmatprep.subr.bf16.mxu1 %v9011_v34 }
0x16dd   :  { %5507 = vmatmul.mubr.msk.f32.gmra.mrb[26].mxu1 %vm148_vm0, %v7728_v26 }
0x16de   :  { %5509 = vmatprep.mubr.msk.f32.mxu1 %vm148_vm0, %v7732_v32  ;;  %6053 = vmatpush3.bf16.msra.mxu1 %v7719_v7 }
0x16df   :  { %6054 = vmatprep.subr.bf16.mxu1 %v9011_v34 }
0x16e1   :  { %5510 = vmatmul.mubr.msk.f32.gmra.mrb[28].mxu1 %vm148_vm0, %v7746_v10 }
0x16e2   :  { %5512 = vmatprep.mubr.msk.f32.mxu1 %vm148_vm0, %v7750_v60  ;;  %6056 = vmatpush3.bf16.msra.mxu1 %v7737_v37 }
0x16e3   :  { %6057 = vmatprep.subr.bf16.mxu1 %v9011_v34 }
0x16e5   :  { %5513 = vmatmul.mubr.msk.f32.gmra.mrb[30].mxu1 %vm148_vm0, %v7758_v27 }
0x16e6   :  { %6059 = vmatpush3.bf16.msra.mxu1 %v7755_v17  ;;  %5531 = vmatprep.mubr.msk.f32.mxu1 %vm6806_vm9, %v9009_v0 }
0x16e7   :  { %6060 = vmatprep.subr.bf16.mxu1 %v9011_v34 }
0x1727   :  { %v1814_v44 = vpop.f32.mrb[22].mxu1 }
0x1728   :  { %v5474_v8 = vpop.f32.mrb[23].mxu1  ;;  %2109 = vrot.lane.b32.xlu0 %v1814_v44, %s6803_s7 }
0x179a   :  { %v2110_v48 = vpop.permute.xlu0 %2109 }
0x179b   :  { %v2112_v54 = vsel %vm148_vm0, 0.0, %v2110_v48 }
0x179c   :  { %5532 = vmatmul.mubr.msk.f32.vlgmr.msra.gmra.mrb[8].mxu1 %vm450_vm2, %v2112_v54 }
0x179d   :  { %5558 = vmatprep.mubr.msk.f32.mxu1 %vm6806_vm9, %v9009_v0 }
0x17ac   :  { %v7771_v39 = vpop.f32.mrb[24].mxu1 }
0x17ad   :  { %v7773_v56 = vpop.f32.mrb[25].mxu1 }
0x17b0   :  { %v7775_v59 = vpop.f32.mrb[26].mxu1 }
0x17b1   :  { %9070 = vst [vmem:[#allocation17_spill] sm:$0xff] %v7775_v59  ;;  %v7777_v16 = vpop.f32.mrb[27].mxu1 }
0x17b4   :  { %v7779_v19 = vpop.f32.mrb[28].mxu1 }
0x17b5   :  { %9071 = vst [vmem:[#allocation18_spill] sm:$0xff] %v7779_v19  ;;  %v7781_v42 = vpop.f32.mrb[29].mxu1 }
0x17b6   :  { %9072 = vst [vmem:[#allocation19_spill] sm:$0xff] %v7781_v42 }
0x17b8   :  { %v7783_v30 = vpop.f32.mrb[30].mxu1 }
0x17b9   :  { %9073 = vst [vmem:[#allocation20_spill] sm:$0xff] %v7783_v30  ;;  %v7785_v33 = vpop.f32.mrb[31].mxu1 }
0x17ba   :  { %9074 = vst [vmem:[#allocation21_spill] sm:$0xff] %v7785_v33 }
0x186f   :  { %v2183_v43 = vpop.f32.mrb[8].mxu1 }
0x1870   :  { %v6292_v45 = vadd.f32 %v7790_v38, %v2183_v43  ;;  %v5533_v55 = vpop.f32.mrb[9].mxu1 }
0x1872   :  { %6475 = vtanh.f32 %v6292_v45  ;;  %v5160_v57 = vmul.f32 -1.442695, %v6292_v45  ;;  %v6807_v45 = vmov 0  }
0x1873   :  { %6346 = vset.pattern.permute.xlu1 %v6807_v45  ;;  %6345 = vset.pattern.permute.xlu0 %v6807_v45 }
0x1874   :  { %6477 = vpow2.f32 %v5160_v57 }
0x187c   :  { %v6476_v58 = vpop.eup %6475 }
0x187d   :  { %2197 = vrot.lane.b32.xlu1 %v6476_v58, %s6802_s28 }
0x187e   :  { %v6478_v61 = vpop.eup %6477 }
0x187f   :  { %v2191_v50 = vadd.f32 1.0, %v6478_v61 }
0x1881   :  { %6479 = vrcp.f32 %v2191_v50  ;;  %v7822_v50 = vld [vmem:[%s8990_s2 + $0x8] sm:$0xff] }
0x188b   :  { %v6480_v53 = vpop.eup %6479 }
0x188c   :  { %v2195_v21 = vmul.f32 %v6480_v53, %v1814_v44 }
0x18ef   :  { %v2198_v51 = vpop.permute.xlu1 %2197 }
0x18f0   :  { %v2200_v62 = vmul.f32 %v6480_v53, %v2198_v51  ;;  %v7832_v51 = vld [vmem:[%s8990_s2 + $0x20] sm:$0xff] }
0x18f2   :  { %2202 = vrot.lane.b32.xlu0 %v2200_v62, %s6803_s7  ;;  %v7837_v62 = vld [vmem:[%s8990_s2 + $0x28] sm:$0xff] }
0x18f3   :  { %9076 = vst [vmem:[#allocation23_spill] sm:$0xff] %v7837_v62 }
0x1964   :  { %v2203_v63 = vpop.permute.xlu0 %2202 }
0x1965   :  { %v7795_v49 = vadd.f32 %v2203_v63, %v2195_v21  ;;  %v7842_v21 = vld [vmem:[%s8990_s2 + $0x10] sm:$0xff]  ;;  %v7847_v63 = vld [vmem:[%s8990_s2 + $0x18] sm:$0xff] }
0x1966   :  { %9077 = vst [vmem:[#allocation24_spill] sm:$0xff] %v7842_v21  ;;  %9078 = vst [vmem:[#allocation25_spill] sm:$0xff] %v7847_v63 }
0x1967   :  { %6481 = vtanh.f32 %v7795_v49 }
0x1971   :  { %v6482_v52 = vpop.eup %6481 }
0x1972   :  { %2208 = vrot.lane.b32.xlu1 %v6482_v52, %s6802_s28 }
0x19e4   :  { %v2209_v1 = vpop.permute.xlu1 %2208 }
0x19e5   :  { %v7799_v3 = vmul.f32 %v6480_v53, %v2209_v1  ;;  %v7827_v53 = vld [vmem:[%s8990_s2] sm:$0xff] }
0x19e6   :  { %9075 = vst [vmem:[#allocation22_spill] sm:$0xff] %v7827_v53 }
0x19e7   :  { %2213 = vrot.lane.b32.xlu0 %v7799_v3, %s6803_s7 }
0x1a59   :  { %v2214_v6 = vpop.permute.xlu0 %2213 }
0x1a5a   :  { %v2217_v2 = vmul.f32 %v7771_v39, %v2214_v6  ;;  %v2216_v28 = vmul.f32 %v2214_v6, %v7773_v56  ;;  %v2218_v11 = vmul.f32 %v2214_v6, %v7777_v16  ;;  %v2219_v20 = vmul.f32 %v7775_v59, %v2214_v6 }
0x1a5b   :  { %v2220_v25 = vmul.f32 %v2214_v6, %v7781_v42  ;;  %v2221_v31 = vmul.f32 %v7779_v19, %v2214_v6  ;;  %v2222_v8 = vmul.f32 %v2214_v6, %v7785_v33  ;;  %v2223_v48 = vmul.f32 %v7783_v30, %v2214_v6 }
0x1a5c   :  { %v2227_v47 = vsel %vm148_vm0, %v2217_v2, 0.0  ;;  %v2224_v35 = vsel %vm148_vm0, %v2216_v28, 0.0  ;;  %v2230_v15 = vsel %vm148_vm0, %v2218_v11, 0.0  ;;  %v2233_v18 = vsel %vm148_vm0, %v2219_v20, 0.0  ;;  %v7861_v11 = vld [vmem:[%s8990_s2 + $0x38] sm:$0xff] }
0x1a5d   :  { %2228 = vadd.xlane.f32.xlu0 %v2227_v47  ;;  %2225 = vadd.xlane.f32.xlu1 %v2224_v35  ;;  %v2236_v5 = vsel %vm148_vm0, %v2220_v25, 0.0  ;;  %v2239_v44 = vsel %vm148_vm0, %v2221_v31, 0.0  ;;  %v2242_v54 = vsel %vm148_vm0, %v2222_v8, 0.0  ;;  %v2245_v43 = vsel %vm148_vm0, %v2223_v48, 0.0  ;;  %v7856_v35 = vld [vmem:[%s8990_s2 + $0x30] sm:$0xff]  ;;  %9080 = vst [vmem:[#allocation27_spill] sm:$0xff] %v7861_v11 }
0x1a5e   :  { %9079 = vst [vmem:[#allocation26_spill] sm:$0xff] %v7856_v35 }
0x1a61   :  { %2231 = vadd.xlane.f32.xlu0 %v2230_v15  ;;  %2234 = vadd.xlane.f32.xlu1 %v2233_v18 }
0x1a65   :  { %2237 = vadd.xlane.f32.xlu0 %v2236_v5  ;;  %2240 = vadd.xlane.f32.xlu1 %v2239_v44 }
0x1a69   :  { %2243 = vadd.xlane.f32.xlu0 %v2242_v54  ;;  %2246 = vadd.xlane.f32.xlu1 %v2245_v43 }
0x1aea   :  { %v2229_v55 = vpop.xlane.xlu0 %2228  ;;  %v2226_v58 = vpop.xlane.xlu1 %2225 }
0x1aeb   :  { %v2249_v6 = vadd.f32 %v2229_v55, %v7822_v50  ;;  %v2248_v2 = vadd.f32 %v2226_v58, %v7827_v53 }
0x1aed   :  { %v2258_v44 = vsel %vm2256_vm12, %v2249_v6, -inf  ;;  %v2257_v8 = vsel %vm2256_vm12, %v2248_v2, -inf }
0x1aee   :  { %v2232_v57 = vpop.xlane.xlu0 %2231  ;;  %v2235_v61 = vpop.xlane.xlu1 %2234 }
0x1aef   :  { %v2250_v20 = vadd.f32 %v2232_v57, %v7842_v21  ;;  %v2251_v15 = vadd.f32 %v2235_v61, %v7847_v63 }
0x1af1   :  { %v2259_v55 = vsel %vm2256_vm12, %v2250_v20, -inf  ;;  %v2260_v58 = vsel %vm2256_vm12, %v2251_v15, -inf }
0x1af2   :  { %v2238_v52 = vpop.xlane.xlu0 %2237  ;;  %v2241_v1 = vpop.xlane.xlu1 %2240 }
0x1af3   :  { %v2252_v28 = vadd.f32 %v2238_v52, %v7832_v51  ;;  %v2253_v47 = vadd.f32 %v2241_v1, %v7837_v62 }
0x1af5   :  { %v2261_v18 = vsel %vm2256_vm12, %v2252_v28, -inf  ;;  %v2263_v25 = vsel %vm2256_vm12, %v2253_v47, -inf }
0x1af6   :  { %v2244_v31 = vpop.xlane.xlu0 %2243  ;;  %v2247_v5 = vpop.xlane.xlu1 %2246  ;;  %v2262_v43 = vmax.f32 %v2257_v8, %v2261_v18  ;;  %v2264_v45 = vmax.f32 %v2258_v44, %v2263_v25 }
0x1af7   :  { %v2254_v48 = vadd.f32 %v2244_v31, %v7856_v35  ;;  %v2255_v54 = vadd.f32 %v2247_v5, %v7861_v11 }
0x1af8   :  { %v2269_v41 = vmax.f32 %v2262_v43, %v2264_v45 }
0x1af9   :  { %v2265_v57 = vsel %vm2256_vm12, %v2254_v48, -inf  ;;  %v2267_v61 = vsel %vm2256_vm12, %v2255_v54, -inf }
0x1afa   :  { %v2266_v52 = vmax.f32 %v2259_v55, %v2265_v57  ;;  %v2268_v1 = vmax.f32 %v2260_v58, %v2267_v61 }
0x1afc   :  { %v2270_v0 = vmax.f32 %v2266_v52, %v2268_v1 }
0x1afe   :  { %v2271_v34 = vmax.f32 %v2269_v41, %v2270_v0 }
0x1b00   :  { %v2272_v63 = vsub.f32 %v2248_v2, %v2271_v34  ;;  %v2273_v21 = vsub.f32 %v2249_v6, %v2271_v34  ;;  %v2274_v31 = vsub.f32 %v2250_v20, %v2271_v34  ;;  %v2275_v53 = vsub.f32 %v2251_v15, %v2271_v34 }
0x1b01   :  { %v2276_v5 = vsub.f32 %v2252_v28, %v2271_v34  ;;  %v2277_v8 = vsub.f32 %v2253_v47, %v2271_v34  ;;  %v2278_v62 = vsub.f32 %v2254_v48, %v2271_v34  ;;  %v2279_v55 = vsub.f32 %v2255_v54, %v2271_v34 }
0x1b02   :  { %v2280_v18 = vmul.f32 1.442695, %v2272_v63  ;;  %v2282_v25 = vmul.f32 1.442695, %v2273_v21  ;;  %v2284_v44 = vmul.f32 1.442695, %v2274_v31 }
0x1b03   :  { %v2286_v11 = vmul.f32 1.442695, %v2275_v53  ;;  %v2288_v35 = vmul.f32 1.442695, %v2276_v5  ;;  %v2290_v43 = vmul.f32 1.442695, %v2277_v8 }
0x1b04   :  { %6483 = vpow2.f32 %v2280_v18  ;;  %v2292_v0 = vmul.f32 1.442695, %v2278_v62  ;;  %v2294_v41 = vmul.f32 1.442695, %v2279_v55 }
0x1b05   :  { %6485 = vpow2.f32 %v2282_v25 }
0x1b06   :  { %6487 = vpow2.f32 %v2284_v44 }
0x1b07   :  { %6489 = vpow2.f32 %v2286_v11 }
0x1b08   :  { %6491 = vpow2.f32 %v2288_v35 }
0x1b09   :  { %6493 = vpow2.f32 %v2290_v43 }
0x1b0a   :  { %6495 = vpow2.f32 %v2292_v0 }
0x1b0b   :  { %6497 = vpow2.f32 %v2294_v41 }
0x1b0e   :  { %v6484_v6 = vpop.eup %6483 }
0x1b0f   :  { %v6486_v2 = vpop.eup %6485  ;;  %v2296_v21 = vsel %vm2256_vm12, %v6484_v6, 0.0 }
0x1b10   :  { %v6488_v63 = vpop.eup %6487  ;;  %v2297_v53 = vsel %vm2256_vm12, %v6486_v2, 0.0 }
0x1b11   :  { %v6490_v28 = vpop.eup %6489  ;;  %v2298_v47 = vadd.f32 %v2297_v53, %v2296_v21  ;;  %v2299_v20 = vsel %vm2256_vm12, %v6488_v63, 0.0 }
0x1b12   :  { %v6492_v34 = vpop.eup %6491  ;;  %v2301_v35 = vsel %vm2256_vm12, %v6490_v28, 0.0 }
0x1b13   :  { %v2300_v11 = vadd.f32 %v2299_v20, %v2298_v47  ;;  %v6494_v62 = vpop.eup %6493  ;;  %v2303_v48 = vsel %vm2256_vm12, %v6492_v34, 0.0  ;;  %v9081_v20 = vmov 0.0|0.0  }
0x1b14   :  { %v6496_v54 = vpop.eup %6495  ;;  %v2305_v58 = vsel %vm2256_vm12, %v6494_v62, 0.0 }
0x1b15   :  { %v2302_v15 = vadd.f32 %v2301_v35, %v2300_v11  ;;  %v6498_v57 = vpop.eup %6497  ;;  %v2307_v52 = vsel %vm2256_vm12, %v6496_v54, 0.0  ;;  %v113_v11 = vld [vmem:[%s9003_s15 + $0x28] sm:$0xff] }
0x1b16   :  { %v2309_v31 = vsel %vm2256_vm12, %v6498_v57, 0.0 }
0x1b17   :  { %v2304_v45 = vadd.f32 %v2303_v48, %v2302_v15  ;;  %v115_v15 = vld [vmem:[%s9003_s15 + $0x38] sm:$0xff] }
0x1b19   :  { %v2306_v61 = vadd.f32 %v2305_v58, %v2304_v45  ;;  %v117_v45 = vld [vmem:[%s9003_s15 + $0x48] sm:$0xff] }
0x1b1b   :  { %v2308_v1 = vadd.f32 %v2307_v52, %v2306_v61  ;;  %v119_v61 = vld [vmem:[%s9003_s15 + $0x58] sm:$0xff] }
0x1b1d   :  { %v2310_v5 = vadd.f32 %v2309_v31, %v2308_v1 }
0x1b1f   :  { %6499 = vrcp.f32 %v2310_v5 }
0x1b29   :  { %v6500_v18 = vpop.eup %6499 }
0x1b2a   :  { %v2313_v25 = vmul.f32 %v6500_v18, %v6486_v2  ;;  %v2312_v44 = vmul.f32 %v6500_v18, %v6484_v6  ;;  %v2314_v8 = vmul.f32 %v6500_v18, %v6488_v63  ;;  %v2315_v55 = vmul.f32 %v6500_v18, %v6490_v28  ;;  %v108_v6 = vld [vmem:[%s9003_s15] sm:$0xff]  ;;  %v109_v2 = vld [vmem:[%s9003_s15 + $0x8] sm:$0xff]  ;;  %v110_v63 = vld [vmem:[%s9003_s15 + $0x10] sm:$0xff] }
0x1b2b   :  { %v2316_v43 = vmul.f32 %v6500_v18, %v6492_v34  ;;  %v2317_v0 = vmul.f32 %v6500_v18, %v6494_v62  ;;  %v2318_v41 = vmul.f32 %v6500_v18, %v6496_v54  ;;  %v2319_v21 = vmul.f32 %v6500_v18, %v6498_v57  ;;  %v111_v28 = vld [vmem:[%s9003_s15 + $0x18] sm:$0xff]  ;;  %v112_v34 = vld [vmem:[%s9003_s15 + $0x20] sm:$0xff]  ;;  %v114_v62 = vld [vmem:[%s9003_s15 + $0x30] sm:$0xff] }
0x1b2c   :  { %2327 = vperm.xlu1 %6346, %v2313_v25   ;;  %2322 = vperm.xlu0 %6345, %v2312_v44   ;;  %v7894_v53 = vpack.c.bf16 %v109_v2, %v108_v6  ;;  %v7900_v47 = vpack.c.bf16 %v111_v28, %v110_v63  ;;  %v7912_v35 = vpack.c.bf16 %v113_v11, %v112_v34  ;;  %v116_v54 = vld [vmem:[%s9003_s15 + $0x40] sm:$0xff]  ;;  %v118_v57 = vld [vmem:[%s9003_s15 + $0x50] sm:$0xff] }
0x1b2d   :  { %v7924_v48 = vpack.c.bf16 %v115_v15, %v114_v62  ;;  %v7936_v58 = vpack.c.bf16 %v117_v45, %v116_v54  ;;  %v7948_v52 = vpack.c.bf16 %v119_v61, %v118_v57 }
0x1b2e   :  { %6062 = vmatpush3.bf16.msra.mxu1 %v7894_v53  ;;  %6122 = vmatpush3.bf16.msra.mxu0 %v7894_v53 }
0x1b2f   :  { %6063 = vmatprep.subr.bf16.mxu1 %v9081_v20  ;;  %6123 = vmatprep.subr.bf16.mxu0 %v9081_v20 }
0x1b30   :  { %2332 = vperm.xlu1 %6346, %v2314_v8   ;;  %2410 = vrot.lane.b32.xlu0 %v7799_v3, %s6804_s12 }
0x1b32   :  { %6065 = vmatpush3.bf16.msra.mxu1 %v7900_v47  ;;  %6125 = vmatpush3.bf16.msra.mxu0 %v7900_v47 }
0x1b33   :  { %6066 = vmatprep.subr.bf16.mxu1 %v9081_v20  ;;  %6126 = vmatprep.subr.bf16.mxu0 %v9081_v20 }
0x1b34   :  { %2337 = vperm.xlu1 %6346, %v2315_v55  }
0x1b36   :  { %6068 = vmatpush3.bf16.msra.mxu1 %v7912_v35  ;;  %6128 = vmatpush3.bf16.msra.mxu0 %v7912_v35 }
0x1b37   :  { %6069 = vmatprep.subr.bf16.mxu1 %v9081_v20  ;;  %6129 = vmatprep.subr.bf16.mxu0 %v9081_v20 }
0x1b38   :  { %2342 = vperm.xlu1 %6346, %v2316_v43  }
0x1b3a   :  { %6071 = vmatpush3.bf16.msra.mxu1 %v7924_v48  ;;  %6131 = vmatpush3.bf16.msra.mxu0 %v7924_v48 }
0x1b3b   :  { %6072 = vmatprep.subr.bf16.mxu1 %v9081_v20  ;;  %6132 = vmatprep.subr.bf16.mxu0 %v9081_v20 }
0x1b3c   :  { %2347 = vperm.xlu1 %6346, %v2317_v0  }
0x1b3e   :  { %6074 = vmatpush3.bf16.msra.mxu1 %v7936_v58  ;;  %6134 = vmatpush3.bf16.msra.mxu0 %v7936_v58 }
0x1b3f   :  { %6075 = vmatprep.subr.bf16.mxu1 %v9081_v20  ;;  %6135 = vmatprep.subr.bf16.mxu0 %v9081_v20 }
0x1b40   :  { %2352 = vperm.xlu1 %6346, %v2318_v41  }
0x1b42   :  { %6077 = vmatpush3.bf16.msra.mxu1 %v7948_v52  ;;  %6137 = vmatpush3.bf16.msra.mxu0 %v7948_v52 }
0x1b43   :  { %6078 = vmatprep.subr.bf16.mxu1 %v9081_v20  ;;  %6150 = vmatprep.subr.bf16.mxu0 %v9081_v20 }
0x1b44   :  { %2357 = vperm.xlu1 %6346, %v2319_v21  }
0x1bab   :  { %v2328_v1 = vpop.permute.xlu1 %2327  ;;  %v2323_v5 = vpop.permute.xlu0 %2322 }
0x1bac   :  { %v2384_v25 = vmul.f32 %v2328_v1, %v7662_v46  ;;  %v2383_v44 = vmul.f32 %v2323_v5, %v7657_v22 }
0x1bae   :  { %v2392_v43 = vsel %vm148_vm0, %v2384_v25, 0.0  ;;  %v2391_v0 = vsel %vm148_vm0, %v2383_v44, 0.0 }
0x1baf   :  { %v2333_v31 = vpop.permute.xlu1 %2332  ;;  %v2393_v2 = vadd.f32 %v2392_v43, %v2391_v0 }
0x1bb0   :  { %v2385_v8 = vmul.f32 %v2333_v31, %v7666_v29  ;;  %v2362_v43 = vmul.f32 %v2333_v31, %v7714_v24 }
0x1bb2   :  { %v2394_v21 = vsel %vm148_vm0, %v2385_v8, 0.0  ;;  %v2361_v8 = vmul.f32 %v2328_v1, %v7710_v23 }
0x1bb3   :  { %v2338_v18 = vpop.permute.xlu1 %2337  ;;  %v2395_v22 = vadd.f32 %v2394_v21, %v2393_v2  ;;  %v2371_v21 = vsel %vm148_vm0, %v2362_v43, 0.0 }
0x1bb4   :  { %v2386_v41 = vmul.f32 %v2338_v18, %v7671_v4  ;;  %v2369_v0 = vsel %vm148_vm0, %v2361_v8, 0.0 }
0x1bb6   :  { %v2396_v28 = vsel %vm148_vm0, %v2386_v41, 0.0 }
0x1bb7   :  { %v2343_v55 = vpop.permute.xlu1 %2342  ;;  %v2397_v34 = vadd.f32 %v2396_v28, %v2395_v22 }
0x1bb8   :  { %v2387_v6 = vmul.f32 %v2343_v55, %v7675_v36 }
0x1bba   :  { %v2398_v29 = vsel %vm148_vm0, %v2387_v6, 0.0  ;;  %v2364_v6 = vmul.f32 %v2343_v55, %v7732_v32 }
0x1bbb   :  { %v2348_v63 = vpop.permute.xlu1 %2347  ;;  %v2399_v4 = vadd.f32 %v2398_v29, %v2397_v34 }
0x1bbc   :  { %v2388_v46 = vmul.f32 %v2348_v63, %v7680_v40 }
0x1bbe   :  { %v2400_v62 = vsel %vm148_vm0, %v2388_v46, 0.0 }
0x1bbf   :  { %v2353_v11 = vpop.permute.xlu1 %2352  ;;  %v2401_v45 = vadd.f32 %v2400_v62, %v2399_v4 }
0x1bc0   :  { %v2389_v15 = vmul.f32 %v2353_v11, %v7684_v9  ;;  %v2360_v9 = vmul.f32 %v2323_v5, %v7698_v13  ;;  %v2375_v13 = vsel %vm148_vm0, %v2364_v6, 0.0  ;;  %v2366_v24 = vmul.f32 %v2353_v11, %v7750_v60 }
0x1bc1   :  { %v9082_v60 = vmov 0.0  }
0x1bc2   :  { %v2402_v54 = vsel %vm148_vm0, %v2389_v15, 0.0  ;;  %v2368_v41 = vsel %vm148_vm0, %v2360_v9, 0.0 }
0x1bc3   :  { %v2358_v57 = vpop.permute.xlu1 %2357  ;;  %v2403_v25 = vadd.f32 %v2402_v54, %v2401_v45  ;;  %v2370_v2 = vadd.f32 %v2369_v0, %v2368_v41 }
0x1bc4   :  { %v2390_v61 = vmul.f32 %v2358_v57, %v7694_v12  ;;  %v2363_v12 = vmul.f32 %v2338_v18, %v7728_v26  ;;  %v2367_v5 = vmul.f32 %v2358_v57, %v7758_v27  ;;  %v2379_v18 = vsel %vm148_vm0, %v2366_v24, 0.0 }
0x1bc5   :  { %v2372_v23 = vadd.f32 %v2371_v21, %v2370_v2 }
0x1bc6   :  { %v2404_v44 = vsel %vm148_vm0, %v2390_v61, 0.0  ;;  %v2373_v28 = vsel %vm148_vm0, %v2363_v12, 0.0  ;;  %v2381_v32 = vsel %vm148_vm0, %v2367_v5, 0.0 }
0x1bc7   :  { %v2405_v40 = vadd.f32 %v2404_v44, %v2403_v25  ;;  %v2374_v1 = vadd.f32 %v2373_v28, %v2372_v23 }
0x1bc9   :  { %2407 = vrot.lane.b32.xlu1 %v2405_v40, %s6803_s7  ;;  %v2376_v26 = vadd.f32 %v2375_v13, %v2374_v1 }
0x1bcd   :  { %2490 = vrot.lane.b32.xlu1 %v7799_v3, %s6802_s28  ;;  %v2365_v3 = vmul.f32 %v2348_v63, %v7746_v10  ;;  %v2411_v63 = vpop.permute.xlu0 %2410 }
0x1bcf   :  { %v2377_v31 = vsel %vm148_vm0, %v2365_v3, 0.0 }
0x1bd0   :  { %v2378_v46 = vadd.f32 %v2377_v31, %v2376_v26 }
0x1bd2   :  { %v2380_v55 = vadd.f32 %v2379_v18, %v2378_v46 }
0x1bd4   :  { %v2382_v22 = vadd.f32 %v2381_v32, %v2380_v55 }
0x1c3b   :  { %v2408_v29 = vpop.permute.xlu1 %2407 }
0x1c3c   :  { %v2413_v34 = vsel %vm148_vm0, %v2382_v22, %v2408_v29 }
0x1c3d   :  { %v2414_v62 = vsel %vm450_vm2, %v2413_v34, %v2411_v63 }
0x1c3e   :  { %5559 = vmatmul.mubr.msk.f32.vlgmr.msra.gmra.mrb[32].mxu1 %vm1730_vm11, %v2414_v62 }
0x1c3f   :  { %6080 = vmatpush3.bf16.msra.mxu1 %v7702_v14  ;;  %5577 = vmatprep.mubr.msk.f32.mxu1 %vm6806_vm9, %v9082_v60  ;;  %v2491_v54 = vpop.permute.xlu1 %2490 }
0x1c40   :  { %6081 = vmatprep.subr.bf16.mxu1 %v9081_v20 }
0x1c43   :  { %6083 = vmatpush3.bf16.msra.mxu1 %v7719_v7 }
0x1c44   :  { %6084 = vmatprep.subr.bf16.mxu1 %v9081_v20 }
0x1c47   :  { %6086 = vmatpush3.bf16.msra.mxu1 %v7737_v37 }
0x1c48   :  { %6087 = vmatprep.subr.bf16.mxu1 %v9081_v20 }
0x1c4b   :  { %6089 = vmatpush3.bf16.msra.mxu1 %v7755_v17 }
0x1c4c   :  { %6090 = vmatprep.subr.bf16.mxu1 %v9081_v20 }
0x1d11   :  { %v2484_v11 = vpop.f32.mrb[32].mxu1 }
0x1d12   :  { %6501 = vtanh.f32 %v2484_v11  ;;  %v5560_v15 = vpop.f32.mrb[33].mxu1 }
0x1d1c   :  { %v6502_v4 = vpop.eup %6501 }
0x1d1d   :  { %2489 = vst.msk [vmem:[#allocation6] sm:$0xff] %vm148_vm0, %v6502_v4  ;;  %v2493_v45 = vsel %vm148_vm0, %v6502_v4, %v2491_v54 }
0x1d1e   :  { %5578 = vmatmul.mubr.msk.f32.vlgmr.msra.gmra.mrb[10].mxu1 %vm450_vm2, %v2493_v45 }
0x1d1f   :  { %6092 = vmatpush3.bf16.msra.mxu1 %v7894_v53  ;;  %5604 = vmatprep.mubr.msk.f32.mxu1 %vm6806_vm9, %v9082_v60 }
0x1d20   :  { %6093 = vmatprep.subr.bf16.mxu1 %v9081_v20 }
0x1d23   :  { %6095 = vmatpush3.bf16.msra.mxu1 %v7900_v47 }
0x1d24   :  { %6096 = vmatprep.subr.bf16.mxu1 %v9081_v20 }
0x1d27   :  { %6098 = vmatpush3.bf16.msra.mxu1 %v7912_v35 }
0x1d28   :  { %6099 = vmatprep.subr.bf16.mxu1 %v9081_v20 }
0x1d2b   :  { %6101 = vmatpush3.bf16.msra.mxu1 %v7924_v48 }
0x1d2c   :  { %6102 = vmatprep.subr.bf16.mxu1 %v9081_v20 }
0x1d2f   :  { %6104 = vmatpush3.bf16.msra.mxu1 %v7936_v58 }
0x1d30   :  { %6105 = vmatprep.subr.bf16.mxu1 %v9081_v20 }
0x1d33   :  { %6107 = vmatpush3.bf16.msra.mxu1 %v7948_v52 }
0x1d34   :  { %6108 = vmatprep.subr.bf16.mxu1 %v9081_v20 }
0x1df1   :  { %v2565_v57 = vpop.f32.mrb[10].mxu1 }
0x1df2   :  { %v6293_v61 = vadd.f32 %v7790_v38, %v2565_v57  ;;  %v5579_v25 = vpop.f32.mrb[11].mxu1 }
0x1df4   :  { %6503 = vtanh.f32 %v6293_v61  ;;  %v5163_v40 = vmul.f32 -1.442695, %v6293_v61 }
0x1df6   :  { %6505 = vpow2.f32 %v5163_v40 }
0x1dfe   :  { %v6504_v44 = vpop.eup %6503 }
0x1dff   :  { %2579 = vrot.lane.b32.xlu0 %v6504_v44, %s6802_s28  ;;  %v9083_v44 = vld [vmem:[#allocation26_spill] sm:$0xff] }
0x1e00   :  { %v6506_v8 = vpop.eup %6505 }
0x1e01   :  { %v2573_v9 = vadd.f32 1.0, %v6506_v8  ;;  %v9084_v8 = vld [vmem:[#allocation23_spill] sm:$0xff] }
0x1e03   :  { %6507 = vrcp.f32 %v2573_v9 }
0x1e0d   :  { %v6508_v43 = vpop.eup %6507 }
0x1e0e   :  { %v2577_v12 = vmul.f32 %v6508_v43, %v7795_v49 }
0x1e71   :  { %v2580_v0 = vpop.permute.xlu0 %2579 }
0x1e72   :  { %v2582_v41 = vmul.f32 %v6508_v43, %v2580_v0 }
0x1e74   :  { %2584 = vrot.lane.b32.xlu1 %v2582_v41, %s6803_s7  ;;  %v9086_v41 = vld [vmem:[#allocation24_spill] sm:$0xff] }
0x1ee6   :  { %v2585_v21 = vpop.permute.xlu1 %2584 }
0x1ee7   :  { %v8026_v6 = vadd.f32 %v2585_v21, %v2577_v12  ;;  %v9087_v21 = vld [vmem:[#allocation25_spill] sm:$0xff] }
0x1ee9   :  { %6509 = vtanh.f32 %v8026_v6 }
0x1ef3   :  { %v6510_v38 = vpop.eup %6509 }
0x1ef4   :  { %2590 = vrot.lane.b32.xlu0 %v6510_v38, %s6802_s28 }
0x1f66   :  { %v2591_v2 = vpop.permute.xlu0 %2590 }
0x1f67   :  { %v8030_v28 = vmul.f32 %v6508_v43, %v2591_v2  ;;  %v9085_v43 = vld [vmem:[#allocation22_spill] sm:$0xff] }
0x1f69   :  { %2595 = vrot.lane.b32.xlu1 %v8030_v28, %s6803_s7 }
0x1fdb   :  { %v2596_v3 = vpop.permute.xlu1 %2595 }
0x1fdc   :  { %v2599_v23 = vmul.f32 %v7771_v39, %v2596_v3  ;;  %v2598_v13 = vmul.f32 %v2596_v3, %v7773_v56  ;;  %v2602_v1 = vmul.f32 %v2596_v3, %v7781_v42  ;;  %v2600_v31 = vmul.f32 %v2596_v3, %v7777_v16 }
0x1fdd   :  { %v2604_v18 = vmul.f32 %v2596_v3, %v7785_v33  ;;  %v2601_v46 = vmul.f32 %v7775_v59, %v2596_v3  ;;  %v2603_v22 = vmul.f32 %v7779_v19, %v2596_v3  ;;  %v2605_v63 = vmul.f32 %v7783_v30, %v2596_v3 }
0x1fde   :  { %v2609_v49 = vsel %vm148_vm0, %v2599_v23, 0.0  ;;  %v2606_v24 = vsel %vm148_vm0, %v2598_v13, 0.0  ;;  %v2618_v5 = vsel %vm148_vm0, %v2602_v1, 0.0  ;;  %v2612_v26 = vsel %vm148_vm0, %v2600_v31, 0.0 }
0x1fdf   :  { %2610 = vadd.xlane.f32.xlu1 %v2609_v49  ;;  %2607 = vadd.xlane.f32.xlu0 %v2606_v24  ;;  %v2624_v32 = vsel %vm148_vm0, %v2604_v18, 0.0  ;;  %v2615_v55 = vsel %vm148_vm0, %v2601_v46, 0.0  ;;  %v2621_v29 = vsel %vm148_vm0, %v2603_v22, 0.0  ;;  %v2627_v34 = vsel %vm148_vm0, %v2605_v63, 0.0 }
0x1fe3   :  { %2619 = vadd.xlane.f32.xlu1 %v2618_v5  ;;  %2613 = vadd.xlane.f32.xlu0 %v2612_v26 }
0x1fe7   :  { %2625 = vadd.xlane.f32.xlu1 %v2624_v32  ;;  %2616 = vadd.xlane.f32.xlu0 %v2615_v55 }
0x1feb   :  { %2622 = vadd.xlane.f32.xlu0 %v2621_v29 }
0x1fef   :  { %2628 = vadd.xlane.f32.xlu0 %v2627_v34 }
0x206c   :  { %v2611_v62 = vpop.xlane.xlu1 %2610  ;;  %v2608_v11 = vpop.xlane.xlu0 %2607 }
0x206d   :  { %v2631_v61 = vadd.f32 %v2611_v62, %v7822_v50  ;;  %v2630_v0 = vadd.f32 %v2608_v11, %v9085_v43 }
0x206f   :  { %v2639_v23 = vsel %vm2256_vm12, %v2631_v61, -inf  ;;  %v2638_v1 = vsel %vm2256_vm12, %v2630_v0, -inf }
0x2070   :  { %v2620_v15 = vpop.xlane.xlu1 %2619  ;;  %v2614_v4 = vpop.xlane.xlu0 %2613 }
0x2071   :  { %v2634_v25 = vadd.f32 %v2620_v15, %v7832_v51  ;;  %v2632_v12 = vadd.f32 %v2614_v4, %v9086_v41  ;;  %v9088_v51 = vld [vmem:[#allocation27_spill] sm:$0xff] }
0x2073   :  { %v2642_v13 = vsel %vm2256_vm12, %v2634_v25, -inf  ;;  %v2640_v31 = vsel %vm2256_vm12, %v2632_v12, -inf }
0x2074   :  { %v2617_v54 = vpop.xlane.xlu0 %2616  ;;  %v2626_v45 = vpop.xlane.xlu1 %2625  ;;  %v2643_v18 = vmax.f32 %v2638_v1, %v2642_v13 }
0x2075   :  { %v2636_v40 = vadd.f32 %v2626_v45, %v9083_v44  ;;  %v2633_v38 = vadd.f32 %v2617_v54, %v9087_v21 }
0x2077   :  { %v2646_v50 = vsel %vm2256_vm12, %v2636_v40, -inf  ;;  %v2641_v5 = vsel %vm2256_vm12, %v2633_v38, -inf }
0x2078   :  { %v2623_v57 = vpop.xlane.xlu0 %2622  ;;  %v2647_v46 = vmax.f32 %v2640_v31, %v2646_v50 }
0x2079   :  { %v2635_v9 = vadd.f32 %v2623_v57, %v9084_v8 }
0x207b   :  { %v2644_v2 = vsel %vm2256_vm12, %v2635_v9, -inf }
0x207c   :  { %v2629_v3 = vpop.xlane.xlu0 %2628  ;;  %v2645_v24 = vmax.f32 %v2639_v23, %v2644_v2 }
0x207d   :  { %v2637_v49 = vadd.f32 %v2629_v3, %v9088_v51 }
0x207e   :  { %v2650_v55 = vmax.f32 %v2643_v18, %v2645_v24 }
0x207f   :  { %v2648_v26 = vsel %vm2256_vm12, %v2637_v49, -inf }
0x2080   :  { %v2649_v32 = vmax.f32 %v2641_v5, %v2648_v26 }
0x2082   :  { %v2651_v22 = vmax.f32 %v2647_v46, %v2649_v32 }
0x2084   :  { %v2652_v29 = vmax.f32 %v2650_v55, %v2651_v22 }
0x2086   :  { %v2653_v63 = vsub.f32 %v2630_v0, %v2652_v29  ;;  %v2654_v34 = vsub.f32 %v2631_v61, %v2652_v29  ;;  %v2655_v62 = vsub.f32 %v2632_v12, %v2652_v29  ;;  %v2656_v11 = vsub.f32 %v2633_v38, %v2652_v29 }
0x2087   :  { %v2657_v15 = vsub.f32 %v2634_v25, %v2652_v29  ;;  %v2658_v57 = vsub.f32 %v2635_v9, %v2652_v29  ;;  %v2659_v8 = vsub.f32 %v2636_v40, %v2652_v29  ;;  %v2660_v41 = vsub.f32 %v2637_v49, %v2652_v29 }
0x2088   :  { %v2661_v4 = vmul.f32 1.442695, %v2653_v63  ;;  %v2663_v54 = vmul.f32 1.442695, %v2654_v34  ;;  %v2665_v45 = vmul.f32 1.442695, %v2655_v62 }
0x2089   :  { %v2667_v44 = vmul.f32 1.442695, %v2656_v11  ;;  %v2669_v43 = vmul.f32 1.442695, %v2657_v15  ;;  %v2671_v21 = vmul.f32 1.442695, %v2658_v57 }
0x208a   :  { %6511 = vpow2.f32 %v2661_v4  ;;  %v2673_v2 = vmul.f32 1.442695, %v2659_v8  ;;  %v2675_v61 = vmul.f32 1.442695, %v2660_v41 }
0x208b   :  { %6513 = vpow2.f32 %v2663_v54 }
0x208c   :  { %6515 = vpow2.f32 %v2665_v45 }
0x208d   :  { %6517 = vpow2.f32 %v2667_v44 }
0x208e   :  { %6519 = vpow2.f32 %v2669_v43  ;;  %v8076_v43 = vld [vmem:[#allocation4 + $0x8] sm:$0xff] }
0x208f   :  { %6521 = vpow2.f32 %v2671_v21  ;;  %v8079_v21 = vld [vmem:[#allocation4] sm:$0xff] }
0x2090   :  { %6523 = vpow2.f32 %v2673_v2 }
0x2091   :  { %6525 = vpow2.f32 %v2675_v61 }
0x2094   :  { %v6512_v0 = vpop.eup %6511 }
0x2095   :  { %v6514_v25 = vpop.eup %6513  ;;  %v2677_v12 = vsel %vm2256_vm12, %v6512_v0, 0.0 }
0x2096   :  { %v6516_v9 = vpop.eup %6515  ;;  %v2678_v38 = vsel %vm2256_vm12, %v6514_v25, 0.0 }
0x2097   :  { %v6518_v40 = vpop.eup %6517  ;;  %v2679_v3 = vadd.f32 %v2678_v38, %v2677_v12  ;;  %v2680_v23 = vsel %vm2256_vm12, %v6516_v9, 0.0 }
0x2098   :  { %v6520_v13 = vpop.eup %6519  ;;  %v2682_v51 = vsel %vm2256_vm12, %v6518_v40, 0.0 }
0x2099   :  { %v2681_v50 = vadd.f32 %v2680_v23, %v2679_v3  ;;  %v6522_v49 = vpop.eup %6521  ;;  %v2684_v1 = vsel %vm2256_vm12, %v6520_v13, 0.0 }
0x209a   :  { %v6524_v31 = vpop.eup %6523  ;;  %v2686_v26 = vsel %vm2256_vm12, %v6522_v49, 0.0 }
0x209b   :  { %v2683_v24 = vadd.f32 %v2682_v51, %v2681_v50  ;;  %v6526_v18 = vpop.eup %6525  ;;  %v2688_v32 = vsel %vm2256_vm12, %v6524_v31, 0.0  ;;  %v8089_v50 = vld [vmem:[#allocation4 + $0x18] sm:$0xff] }
0x209c   :  { %v2690_v22 = vsel %vm2256_vm12, %v6526_v18, 0.0 }
0x209d   :  { %v2685_v5 = vadd.f32 %v2684_v1, %v2683_v24 }
0x209f   :  { %v2687_v46 = vadd.f32 %v2686_v26, %v2685_v5 }
0x20a1   :  { %v2689_v55 = vadd.f32 %v2688_v32, %v2687_v46  ;;  %v8097_v32 = vld [vmem:[#allocation4 + $0x28] sm:$0xff] }
0x20a3   :  { %v2691_v29 = vadd.f32 %v2690_v22, %v2689_v55 }
0x20a5   :  { %6527 = vrcp.f32 %v2691_v29 }
0x20af   :  { %v6528_v63 = vpop.eup %6527 }
0x20b0   :  { %v2694_v34 = vmul.f32 %v6528_v63, %v6514_v25  ;;  %v2693_v62 = vmul.f32 %v6528_v63, %v6512_v0  ;;  %v2697_v11 = vmul.f32 %v6528_v63, %v6520_v13  ;;  %v2695_v15 = vmul.f32 %v6528_v63, %v6516_v9  ;;  %v8084_v9 = vld [vmem:[#allocation4 + $0x10] sm:$0xff] }
0x20b1   :  { %v2699_v4 = vmul.f32 %v6528_v63, %v6524_v31  ;;  %v2696_v54 = vmul.f32 %v6528_v63, %v6518_v40  ;;  %v2698_v45 = vmul.f32 %v6528_v63, %v6522_v49  ;;  %v2700_v57 = vmul.f32 %v6528_v63, %v6526_v18  ;;  %v8094_v18 = vld [vmem:[#allocation4 + $0x30] sm:$0xff] }
0x20b2   :  { %2708 = vperm.xlu0 %6345, %v2694_v34   ;;  %2703 = vperm.xlu1 %6346, %v2693_v62   ;;  %v8102_v62 = vld [vmem:[#allocation4 + $0x38] sm:$0xff] }
0x20b6   :  { %2723 = vperm.xlu0 %6345, %v2697_v11   ;;  %2713 = vperm.xlu1 %6346, %v2695_v15  }
0x20ba   :  { %2733 = vperm.xlu0 %6345, %v2699_v4   ;;  %2718 = vperm.xlu1 %6346, %v2696_v54  }
0x20be   :  { %2728 = vperm.xlu1 %6346, %v2698_v45   ;;  %v8109_v45 = vld [vmem:[#allocation3 + $0x8] sm:$0xff] }
0x20c2   :  { %2738 = vperm.xlu1 %6346, %v2700_v57  }
0x20c6   :  { %2791 = vrot.lane.b32.xlu1 %v8030_v28, %s6804_s12 }
0x2131   :  { %v2709_v44 = vpop.permute.xlu0 %2708  ;;  %v2704_v8 = vpop.permute.xlu1 %2703 }
0x2132   :  { %v2765_v41 = vmul.f32 %v8076_v43, %v2709_v44  ;;  %v2764_v2 = vmul.f32 %v8079_v21, %v2704_v8  ;;  %v2742_v57 = vmul.f32 %v8109_v45, %v2709_v44 }
0x2134   :  { %v2773_v25 = vsel %vm148_vm0, %v2765_v41, 0.0  ;;  %v2772_v12 = vsel %vm148_vm0, %v2764_v2, 0.0  ;;  %v8112_v41 = vld [vmem:[#allocation3] sm:$0xff] }
0x2135   :  { %v2724_v61 = vpop.permute.xlu0 %2723  ;;  %v2714_v0 = vpop.permute.xlu1 %2713  ;;  %v2774_v3 = vadd.f32 %v2773_v25, %v2772_v12  ;;  %v2741_v2 = vmul.f32 %v8112_v41, %v2704_v8  ;;  %v8115_v25 = vld [vmem:[#allocation3 + $0x10] sm:$0xff] }
0x2136   :  { %v2766_v38 = vmul.f32 %v8084_v9, %v2714_v0  ;;  %v2768_v13 = vmul.f32 %v2724_v61, %v7675_v36  ;;  %v2743_v12 = vmul.f32 %v8115_v25, %v2714_v0 }
0x2138   :  { %v2775_v40 = vsel %vm148_vm0, %v2766_v38, 0.0  ;;  %v2779_v26 = vsel %vm148_vm0, %v2768_v13, 0.0  ;;  %v2750_v38 = vsel %vm148_vm0, %v2742_v57, 0.0  ;;  %v2752_v13 = vsel %vm148_vm0, %v2743_v12, 0.0 }
0x2139   :  { %v2719_v23 = vpop.permute.xlu1 %2718  ;;  %v2776_v49 = vadd.f32 %v2775_v40, %v2774_v3  ;;  %v2734_v24 = vpop.permute.xlu0 %2733  ;;  %v2749_v40 = vsel %vm148_vm0, %v2741_v2, 0.0  ;;  %v8120_v3 = vld [vmem:[#allocation3 + $0x18] sm:$0xff] }
0x213a   :  { %v2767_v51 = vmul.f32 %v8089_v50, %v2719_v23  ;;  %v2770_v46 = vmul.f32 %v8094_v18, %v2734_v24 }
0x213c   :  { %v2777_v1 = vsel %vm148_vm0, %v2767_v51, 0.0  ;;  %v2783_v34 = vsel %vm148_vm0, %v2770_v46, 0.0  ;;  %v2751_v51 = vadd.f32 %v2750_v38, %v2749_v40  ;;  %v8166_v38 = vld [vmem:[%s9001_s13] ss:$0 sm:$0xff] }
0x213d   :  { %v2778_v31 = vadd.f32 %v2777_v1, %v2776_v49  ;;  %v2729_v5 = vpop.permute.xlu1 %2728  ;;  %v8125_v1 = vld [vmem:[#allocation3 + $0x20] sm:$0xff] }
0x213e   :  { %v2769_v36 = vmul.f32 %v8097_v32, %v2729_v5  ;;  %v2753_v49 = vadd.f32 %v2752_v13, %v2751_v51  ;;  %v2745_v8 = vmul.f32 %v8125_v1, %v2724_v61  ;;  %v2746_v0 = vmul.f32 %v2729_v5, %v7746_v10 }
0x213f   :  { %v2780_v55 = vadd.f32 %v2779_v26, %v2778_v31 }
0x2140   :  { %v2781_v22 = vsel %vm148_vm0, %v2769_v36, 0.0  ;;  %v2756_v26 = vsel %vm148_vm0, %v2745_v8, 0.0  ;;  %v2758_v36 = vsel %vm148_vm0, %v2746_v0, 0.0 }
0x2141   :  { %v2782_v29 = vadd.f32 %v2781_v22, %v2780_v55  ;;  %v2739_v63 = vpop.permute.xlu1 %2738  ;;  %v8131_v55 = vld [vmem:[#allocation3 + $0x30] sm:$0xff] }
0x2142   :  { %v2771_v11 = vmul.f32 %v8102_v62, %v2739_v63 }
0x2143   :  { %v2784_v15 = vadd.f32 %v2783_v34, %v2782_v29  ;;  %v2748_v29 = vmul.f32 %v2739_v63, %v7758_v27 }
0x2144   :  { %v2785_v4 = vsel %vm148_vm0, %v2771_v11, 0.0 }
0x2145   :  { %v2786_v54 = vadd.f32 %v2785_v4, %v2784_v15  ;;  %v2762_v61 = vsel %vm148_vm0, %v2748_v29, 0.0  ;;  %v2792_v10 = vpop.permute.xlu1 %2791 }
0x2147   :  { %2788 = vrot.lane.b32.xlu0 %v2786_v54, %s6803_s7 }
0x214b   :  { %2872 = vrot.lane.b32.xlu0 %v8030_v28, %s6802_s28  ;;  %v2744_v28 = vmul.f32 %v8120_v3, %v2719_v23  ;;  %v2747_v23 = vmul.f32 %v8131_v55, %v2734_v24 }
0x214d   :  { %v2754_v44 = vsel %vm148_vm0, %v2744_v28, 0.0  ;;  %v2760_v34 = vsel %vm148_vm0, %v2747_v23, 0.0 }
0x214e   :  { %v2755_v31 = vadd.f32 %v2754_v44, %v2753_v49 }
0x2150   :  { %v2757_v46 = vadd.f32 %v2756_v26, %v2755_v31 }
0x2152   :  { %v2759_v22 = vadd.f32 %v2758_v36, %v2757_v46 }
0x2154   :  { %v2761_v11 = vadd.f32 %v2760_v34, %v2759_v22 }
0x2156   :  { %v2763_v15 = vadd.f32 %v2762_v61, %v2761_v11 }
0x21b9   :  { %v2789_v4 = vpop.permute.xlu0 %2788 }
0x21ba   :  { %v2794_v5 = vsel %vm148_vm0, %v2763_v15, %v2789_v4 }
0x21bb   :  { %v2795_v54 = vsel %vm450_vm2, %v2794_v5, %v2792_v10 }
0x21bc   :  { %5605 = vmatmul.mubr.msk.f32.vlgmr.msra.gmra.mrb[34].mxu1 %vm1730_vm11, %v2795_v54 }
0x21bd   :  { %6110 = vmatpush3.bf16.msra.mxu1 %v7702_v14  ;;  %5623 = vmatprep.mubr.msk.f32.mxu1 %vm6806_vm9, %v9082_v60  ;;  %v2873_v57 = vpop.permute.xlu0 %2872 }
0x21be   :  { %6111 = vmatprep.subr.bf16.mxu1 %v9081_v20 }
0x21c1   :  { %6113 = vmatpush3.bf16.msra.mxu1 %v7719_v7 }
0x21c2   :  { %6114 = vmatprep.subr.bf16.mxu1 %v9081_v20 }
0x21c5   :  { %6116 = vmatpush3.bf16.msra.mxu1 %v7737_v37 }
0x21c6   :  { %6117 = vmatprep.subr.bf16.mxu1 %v9081_v20 }
0x21c9   :  { %6119 = vmatpush3.bf16.msra.mxu1 %v7755_v17 }
0x21ca   :  { %6138 = vmatprep.subr.bf16.mxu1 %v9081_v20 }
0x228f   :  { %v2865_v27 = vpop.f32.mrb[34].mxu1 }
0x2290   :  { %6529 = vtanh.f32 %v2865_v27  ;;  %v5606_v24 = vpop.f32.mrb[35].mxu1 }
0x229a   :  { %v6530_v63 = vpop.eup %6529 }
0x229b   :  { %2871 = vst.msk [vmem:[#allocation6 + $0x8] sm:$0xff] %vm148_vm0, %v6530_v63  ;;  %v2875_v2 = vsel %vm148_vm0, %v6530_v63, %v2873_v57 }
0x229c   :  { %5624 = vmatmul.mubr.msk.f32.vlgmr.msra.gmra.mrb[12].mxu1 %vm450_vm2, %v2875_v2 }
0x229d   :  { %6140 = vmatpush3.bf16.msra.mxu1 %v7702_v14  ;;  %5669 = vmatprep.mubr.msk.f32.mxu1 %vm6806_vm9, %v9082_v60 }
0x229e   :  { %6141 = vmatprep.subr.bf16.mxu1 %v9081_v20 }
0x22a1   :  { %6143 = vmatpush3.bf16.msra.mxu1 %v7719_v7 }
0x22a2   :  { %6144 = vmatprep.subr.bf16.mxu1 %v9081_v20 }
0x22a5   :  { %6146 = vmatpush3.bf16.msra.mxu1 %v7737_v37 }
0x22a6   :  { %6147 = vmatprep.subr.bf16.mxu1 %v9081_v20 }
0x22a9   :  { %6149 = vmatpush3.bf16.msra.mxu1 %v7755_v17 }
0x22aa   :  { %6168 = vmatprep.subr.bf16.mxu1 %v9081_v20 }
0x236f   :  { %v2947_v12 = vpop.f32.mrb[12].mxu1 }
0x2370   :  { %v6294_v40 = vadd.f32 %v8166_v38, %v2947_v12  ;;  %v5625_v28 = vpop.f32.mrb[13].mxu1 }
0x2372   :  { %6531 = vtanh.f32 %v6294_v40  ;;  %v5166_v51 = vmul.f32 -1.442695, %v6294_v40 }
0x2374   :  { %6533 = vpow2.f32 %v5166_v51 }
0x237c   :  { %v6532_v13 = vpop.eup %6531 }
0x237d   :  { %2961 = vrot.lane.b32.xlu1 %v6532_v13, %s6802_s28 }
0x237e   :  { %v6534_v44 = vpop.eup %6533 }
0x237f   :  { %v2955_v49 = vadd.f32 1.0, %v6534_v44 }
0x2381   :  { %6535 = vrcp.f32 %v2955_v49 }
0x238b   :  { %v6536_v8 = vpop.eup %6535 }
0x238c   :  { %v2959_v26 = vmul.f32 %v6536_v8, %v8026_v6 }
0x23ef   :  { %v2962_v31 = vpop.permute.xlu1 %2961 }
0x23f0   :  { %v2964_v0 = vmul.f32 %v6536_v8, %v2962_v31 }
0x23f2   :  { %2966 = vrot.lane.b32.xlu0 %v2964_v0, %s6803_s7  ;;  %v8199_v0 = vld [vmem:[%s8990_s2 + $0x8] sm:$0xff] }
0x23f3   :  { %9089 = vst [vmem:[#allocation26_spill] sm:$0xff] %v8199_v0 }
0x2464   :  { %v2967_v46 = vpop.permute.xlu0 %2966 }
0x2465   :  { %v8172_v36 = vadd.f32 %v2967_v46, %v2959_v26  ;;  %v8205_v46 = vld [vmem:[%s8990_s2] sm:$0xff] }
0x2466   :  { %9090 = vst [vmem:[#allocation23_spill] sm:$0xff] %v8205_v46 }
0x2467   :  { %6537 = vtanh.f32 %v8172_v36 }
0x2471   :  { %v6538_v23 = vpop.eup %6537 }
0x2472   :  { %2972 = vrot.lane.b32.xlu1 %v6538_v23, %s6802_s28 }
0x24e4   :  { %v2973_v22 = vpop.permute.xlu1 %2972 }
0x24e5   :  { %v8176_v29 = vmul.f32 %v6536_v8, %v2973_v22  ;;  %v8211_v22 = vld [vmem:[%s8990_s2 + $0x20] sm:$0xff] }
0x24e6   :  { %9091 = vst [vmem:[#allocation22_spill] sm:$0xff] %v8211_v22 }
0x24e7   :  { %2977 = vrot.lane.b32.xlu0 %v8176_v29, %s6803_s7 }
0x2559   :  { %v2978_v34 = vpop.permute.xlu0 %2977 }
0x255a   :  { %v2981_v11 = vmul.f32 %v7771_v39, %v2978_v34  ;;  %v2980_v61 = vmul.f32 %v2978_v34, %v7773_v56  ;;  %v2982_v4 = vmul.f32 %v2978_v34, %v7777_v16  ;;  %v2983_v10 = vmul.f32 %v7775_v59, %v2978_v34 }
0x255b   :  { %v2984_v27 = vmul.f32 %v2978_v34, %v7781_v42  ;;  %v2985_v24 = vmul.f32 %v7779_v19, %v2978_v34  ;;  %v2986_v2 = vmul.f32 %v2978_v34, %v7785_v33  ;;  %v2987_v12 = vmul.f32 %v7783_v30, %v2978_v34 }
0x255c   :  { %v2991_v6 = vsel %vm148_vm0, %v2981_v11, 0.0  ;;  %v2988_v15 = vsel %vm148_vm0, %v2980_v61, 0.0  ;;  %v2994_v5 = vsel %vm148_vm0, %v2982_v4, 0.0  ;;  %v2997_v54 = vsel %vm148_vm0, %v2983_v10, 0.0  ;;  %v8217_v11 = vld [vmem:[%s8990_s2 + $0x28] sm:$0xff]  ;;  %v8229_v4 = vld [vmem:[%s8990_s2 + $0x18] sm:$0xff] }
0x255d   :  { %2992 = vadd.xlane.f32.xlu0 %v2991_v6  ;;  %2989 = vadd.xlane.f32.xlu1 %v2988_v15  ;;  %v3000_v63 = vsel %vm148_vm0, %v2984_v27, 0.0  ;;  %v3003_v57 = vsel %vm148_vm0, %v2985_v24, 0.0  ;;  %v3006_v40 = vsel %vm148_vm0, %v2986_v2, 0.0  ;;  %v3009_v28 = vsel %vm148_vm0, %v2987_v12, 0.0  ;;  %9092 = vst [vmem:[#allocation24_spill] sm:$0xff] %v8217_v11  ;;  %v8223_v6 = vld [vmem:[%s8990_s2 + $0x10] sm:$0xff] }
0x255e   :  { %9093 = vst [vmem:[#allocation25_spill] sm:$0xff] %v8223_v6  ;;  %9094 = vst [vmem:[#allocation27_spill] sm:$0xff] %v8229_v4  ;;  %v8239_v2 = vld [vmem:[%s8990_s2 + $0x30] sm:$0xff] }
0x255f   :  { %9095 = vst [vmem:[#allocation28_spill] sm:$0xff] %v8239_v2 }
0x2561   :  { %2995 = vadd.xlane.f32.xlu0 %v2994_v5  ;;  %2998 = vadd.xlane.f32.xlu1 %v2997_v54 }
0x2565   :  { %3001 = vadd.xlane.f32.xlu0 %v3000_v63  ;;  %3004 = vadd.xlane.f32.xlu1 %v3003_v57 }
0x2569   :  { %3007 = vadd.xlane.f32.xlu0 %v3006_v40  ;;  %3010 = vadd.xlane.f32.xlu1 %v3009_v28  ;;  %v8245_v40 = vld [vmem:[%s8990_s2 + $0x38] sm:$0xff] }
0x256a   :  { %9096 = vst [vmem:[#allocation29_spill] sm:$0xff] %v8245_v40 }
0x25ea   :  { %v2993_v13 = vpop.xlane.xlu0 %2992  ;;  %v2990_v51 = vpop.xlane.xlu1 %2989 }
0x25eb   :  { %v3013_v26 = vadd.f32 %v8199_v0, %v2993_v13  ;;  %v3012_v23 = vadd.f32 %v8205_v46, %v2990_v51 }
0x25ed   :  { %v3021_v63 = vsel %vm2256_vm12, %v3013_v26, -inf  ;;  %v3020_v57 = vsel %vm2256_vm12, %v3012_v23, -inf }
0x25ee   :  { %v2996_v44 = vpop.xlane.xlu0 %2995  ;;  %v2999_v49 = vpop.xlane.xlu1 %2998 }
0x25ef   :  { %v3014_v15 = vadd.f32 %v8223_v6, %v2996_v44  ;;  %v3015_v10 = vadd.f32 %v8229_v4, %v2999_v49 }
0x25f1   :  { %v3022_v44 = vsel %vm2256_vm12, %v3014_v15, -inf  ;;  %v3023_v49 = vsel %vm2256_vm12, %v3015_v10, -inf }
0x25f2   :  { %v3002_v8 = vpop.xlane.xlu0 %3001  ;;  %v3005_v31 = vpop.xlane.xlu1 %3004 }
0x25f3   :  { %v3016_v34 = vadd.f32 %v8211_v22, %v3002_v8  ;;  %v3017_v61 = vadd.f32 %v8217_v11, %v3005_v31 }
0x25f5   :  { %v3024_v5 = vsel %vm2256_vm12, %v3016_v34, -inf  ;;  %v3026_v54 = vsel %vm2256_vm12, %v3017_v61, -inf }
0x25f6   :  { %v3008_v27 = vpop.xlane.xlu0 %3007  ;;  %v3011_v24 = vpop.xlane.xlu1 %3010  ;;  %v3025_v13 = vmax.f32 %v3020_v57, %v3024_v5  ;;  %v3027_v51 = vmax.f32 %v3021_v63, %v3026_v54 }
0x25f7   :  { %v3018_v12 = vadd.f32 %v8239_v2, %v3008_v27  ;;  %v3019_v28 = vadd.f32 %v8245_v40, %v3011_v24 }
0x25f8   :  { %v3032_v27 = vmax.f32 %v3025_v13, %v3027_v51 }
0x25f9   :  { %v3028_v8 = vsel %vm2256_vm12, %v3018_v12, -inf  ;;  %v3030_v31 = vsel %vm2256_vm12, %v3019_v28, -inf }
0x25fa   :  { %v3029_v4 = vmax.f32 %v3022_v44, %v3028_v8  ;;  %v3031_v6 = vmax.f32 %v3023_v49, %v3030_v31 }
0x25fc   :  { %v3033_v46 = vmax.f32 %v3029_v4, %v3031_v6 }
0x25fe   :  { %v3034_v11 = vmax.f32 %v3032_v27, %v3033_v46 }
0x2600   :  { %v3035_v2 = vsub.f32 %v3012_v23, %v3034_v11  ;;  %v3036_v22 = vsub.f32 %v3013_v26, %v3034_v11  ;;  %v3037_v0 = vsub.f32 %v3014_v15, %v3034_v11  ;;  %v3038_v30 = vsub.f32 %v3015_v10, %v3034_v11 }
0x2601   :  { %v3039_v24 = vsub.f32 %v3016_v34, %v3034_v11  ;;  %v3040_v57 = vsub.f32 %v3017_v61, %v3034_v11  ;;  %v3041_v19 = vsub.f32 %v3018_v12, %v3034_v11  ;;  %v3042_v44 = vsub.f32 %v3019_v28, %v3034_v11 }
0x2602   :  { %v3043_v5 = vmul.f32 1.442695, %v3035_v2  ;;  %v3045_v54 = vmul.f32 1.442695, %v3036_v22  ;;  %v3047_v63 = vmul.f32 1.442695, %v3037_v0 }
0x2603   :  { %v3049_v40 = vmul.f32 1.442695, %v3038_v30  ;;  %v3051_v59 = vmul.f32 1.442695, %v3039_v24  ;;  %v3053_v13 = vmul.f32 1.442695, %v3040_v57 }
0x2604   :  { %6539 = vpow2.f32 %v3043_v5  ;;  %v3055_v46 = vmul.f32 1.442695, %v3041_v19  ;;  %v3057_v26 = vmul.f32 1.442695, %v3042_v44 }
0x2605   :  { %6541 = vpow2.f32 %v3045_v54 }
0x2606   :  { %6543 = vpow2.f32 %v3047_v63 }
0x2607   :  { %6545 = vpow2.f32 %v3049_v40 }
0x2608   :  { %6547 = vpow2.f32 %v3051_v59 }
0x2609   :  { %6549 = vpow2.f32 %v3053_v13 }
0x260a   :  { %6551 = vpow2.f32 %v3055_v46 }
0x260b   :  { %6553 = vpow2.f32 %v3057_v26 }
0x260e   :  { %v6540_v23 = vpop.eup %6539 }
0x260f   :  { %v6542_v34 = vpop.eup %6541  ;;  %v3059_v0 = vsel %vm2256_vm12, %v6540_v23, 0.0 }
0x2610   :  { %v6544_v22 = vpop.eup %6543  ;;  %v3060_v30 = vsel %vm2256_vm12, %v6542_v34, 0.0 }
0x2611   :  { %v6546_v61 = vpop.eup %6545  ;;  %v3061_v6 = vadd.f32 %v3060_v30, %v3059_v0  ;;  %v3062_v15 = vsel %vm2256_vm12, %v6544_v22, 0.0 }
0x2612   :  { %v6548_v11 = vpop.eup %6547  ;;  %v3064_v59 = vsel %vm2256_vm12, %v6546_v61, 0.0 }
0x2613   :  { %v3063_v4 = vadd.f32 %v3062_v15, %v3061_v6  ;;  %v6550_v19 = vpop.eup %6549  ;;  %v3066_v2 = vsel %vm2256_vm12, %v6548_v11, 0.0 }
0x2614   :  { %v6552_v12 = vpop.eup %6551  ;;  %v3068_v28 = vsel %vm2256_vm12, %v6550_v19, 0.0 }
0x2615   :  { %v3065_v10 = vadd.f32 %v3064_v59, %v3063_v4  ;;  %v6554_v51 = vpop.eup %6553  ;;  %v3070_v8 = vsel %vm2256_vm12, %v6552_v12, 0.0 }
0x2616   :  { %v3072_v27 = vsel %vm2256_vm12, %v6554_v51, 0.0 }
0x2617   :  { %v3067_v40 = vadd.f32 %v3066_v2, %v3065_v10 }
0x2619   :  { %v3069_v49 = vadd.f32 %v3068_v28, %v3067_v40 }
0x261b   :  { %v3071_v31 = vadd.f32 %v3070_v8, %v3069_v49 }
0x261d   :  { %v3073_v24 = vadd.f32 %v3072_v27, %v3071_v31 }
0x261f   :  { %6555 = vrcp.f32 %v3073_v24 }
0x2629   :  { %v6556_v5 = vpop.eup %6555 }
0x262a   :  { %v3076_v54 = vmul.f32 %v6556_v5, %v6542_v34  ;;  %v3075_v63 = vmul.f32 %v6556_v5, %v6540_v23  ;;  %v3077_v57 = vmul.f32 %v6556_v5, %v6544_v22  ;;  %v3078_v44 = vmul.f32 %v6556_v5, %v6546_v61 }
0x262b   :  { %v3079_v13 = vmul.f32 %v6556_v5, %v6548_v11  ;;  %v3080_v46 = vmul.f32 %v6556_v5, %v6550_v19  ;;  %v3081_v26 = vmul.f32 %v6556_v5, %v6552_v12  ;;  %v3082_v0 = vmul.f32 %v6556_v5, %v6554_v51  ;;  %v8270_v51 = vld [vmem:[#allocation4 + $0x20] sm:$0xff] }
0x262c   :  { %3090 = vperm.xlu1 %6346, %v3076_v54   ;;  %3085 = vperm.xlu0 %6345, %v3075_v63  }
0x2630   :  { %3095 = vperm.xlu1 %6346, %v3077_v57   ;;  %3100 = vperm.xlu0 %6345, %v3078_v44  }
0x2634   :  { %3105 = vperm.xlu1 %6346, %v3079_v13   ;;  %3110 = vperm.xlu0 %6345, %v3080_v46  }
0x2638   :  { %3115 = vperm.xlu1 %6346, %v3081_v26   ;;  %3120 = vperm.xlu0 %6345, %v3082_v0  }
0x263c   :  { %3173 = vrot.lane.b32.xlu0 %v8176_v29, %s6804_s12 }
0x26ab   :  { %v3091_v30 = vpop.permute.xlu1 %3090  ;;  %v3086_v34 = vpop.permute.xlu0 %3085 }
0x26ac   :  { %v3147_v23 = vmul.f32 %v8076_v43, %v3091_v30  ;;  %v3146_v22 = vmul.f32 %v8079_v21, %v3086_v34 }
0x26ae   :  { %v3155_v61 = vsel %vm148_vm0, %v3147_v23, 0.0  ;;  %v3154_v6 = vsel %vm148_vm0, %v3146_v22, 0.0  ;;  %v3124_v22 = vmul.f32 %v8109_v45, %v3091_v30 }
0x26af   :  { %v3096_v15 = vpop.permute.xlu1 %3095  ;;  %v3101_v11 = vpop.permute.xlu0 %3100  ;;  %v3156_v19 = vadd.f32 %v3155_v61, %v3154_v6  ;;  %v3123_v61 = vmul.f32 %v8112_v41, %v3086_v34  ;;  %v8293_v34 = vld [vmem:[#allocation3 + $0x28] sm:$0xff] }
0x26b0   :  { %v3148_v4 = vmul.f32 %v8084_v9, %v3096_v15  ;;  %v3149_v59 = vmul.f32 %v8089_v50, %v3101_v11  ;;  %v3125_v6 = vmul.f32 %v8115_v25, %v3096_v15 }
0x26b2   :  { %v3157_v10 = vsel %vm148_vm0, %v3148_v4, 0.0  ;;  %v3159_v28 = vsel %vm148_vm0, %v3149_v59, 0.0  ;;  %v3132_v4 = vsel %vm148_vm0, %v3124_v22, 0.0  ;;  %v3131_v59 = vsel %vm148_vm0, %v3123_v61, 0.0 }
0x26b3   :  { %v3158_v2 = vadd.f32 %v3157_v10, %v3156_v19  ;;  %v3106_v12 = vpop.permute.xlu1 %3105  ;;  %v3111_v40 = vpop.permute.xlu0 %3110  ;;  %v3134_v19 = vsel %vm148_vm0, %v3125_v6, 0.0  ;;  %v3133_v10 = vadd.f32 %v3132_v4, %v3131_v59 }
0x26b4   :  { %v3150_v49 = vmul.f32 %v8270_v51, %v3106_v12  ;;  %v3151_v8 = vmul.f32 %v8097_v32, %v3111_v40  ;;  %v3128_v15 = vmul.f32 %v8293_v34, %v3111_v40 }
0x26b5   :  { %v3160_v31 = vadd.f32 %v3159_v28, %v3158_v2  ;;  %v3126_v2 = vmul.f32 %v8120_v3, %v3101_v11  ;;  %v3135_v28 = vadd.f32 %v3134_v19, %v3133_v10 }
0x26b6   :  { %v3161_v27 = vsel %vm148_vm0, %v3150_v49, 0.0  ;;  %v3163_v63 = vsel %vm148_vm0, %v3151_v8, 0.0  ;;  %v3127_v49 = vmul.f32 %v8125_v1, %v3106_v12 }
0x26b7   :  { %v3162_v24 = vadd.f32 %v3161_v27, %v3160_v31  ;;  %v3116_v5 = vpop.permute.xlu1 %3115  ;;  %v3121_v54 = vpop.permute.xlu0 %3120 }
0x26b8   :  { %v3152_v57 = vmul.f32 %v8094_v18, %v3116_v5  ;;  %v3153_v44 = vmul.f32 %v8102_v62, %v3121_v54  ;;  %v3138_v30 = vsel %vm148_vm0, %v3127_v49, 0.0  ;;  %v3129_v27 = vmul.f32 %v8131_v55, %v3116_v5 }
0x26b9   :  { %v3164_v13 = vadd.f32 %v3163_v63, %v3162_v24  ;;  %v3140_v24 = vsel %vm148_vm0, %v3128_v15, 0.0 }
0x26ba   :  { %v3165_v46 = vsel %vm148_vm0, %v3152_v57, 0.0  ;;  %v3167_v0 = vsel %vm148_vm0, %v3153_v44, 0.0  ;;  %v3142_v11 = vsel %vm148_vm0, %v3129_v27, 0.0  ;;  %v8299_v57 = vld [vmem:[#allocation3 + $0x38] sm:$0xff] }
0x26bb   :  { %v3166_v26 = vadd.f32 %v3165_v46, %v3164_v13  ;;  %v3130_v12 = vmul.f32 %v8299_v57, %v3121_v54 }
0x26bd   :  { %v3168_v23 = vadd.f32 %v3167_v0, %v3166_v26  ;;  %v3144_v13 = vsel %vm148_vm0, %v3130_v12, 0.0  ;;  %v3174_v0 = vpop.permute.xlu0 %3173 }
0x26bf   :  { %3170 = vrot.lane.b32.xlu1 %v3168_v23, %s6803_s7 }
0x26c3   :  { %3254 = vrot.lane.b32.xlu1 %v8176_v29, %s6802_s28  ;;  %v3136_v29 = vsel %vm148_vm0, %v3126_v2, 0.0 }
0x26c4   :  { %v3137_v8 = vadd.f32 %v3136_v29, %v3135_v28 }
0x26c6   :  { %v3139_v31 = vadd.f32 %v3138_v30, %v3137_v8 }
0x26c8   :  { %v3141_v63 = vadd.f32 %v3140_v24, %v3139_v31 }
0x26ca   :  { %v3143_v44 = vadd.f32 %v3142_v11, %v3141_v63 }
0x26cc   :  { %v3145_v46 = vadd.f32 %v3144_v13, %v3143_v44 }
0x2731   :  { %v3171_v26 = vpop.permute.xlu1 %3170 }
0x2732   :  { %v3176_v40 = vsel %vm148_vm0, %v3145_v46, %v3171_v26 }
0x2733   :  { %v3177_v23 = vsel %vm450_vm2, %v3176_v40, %v3174_v0 }
0x2734   :  { %5651 = vmatmul.mubr.msk.f32.vlgmr.msra.gmra.mrb[16].mxu0 %vm1730_vm11, %v3177_v23 }
0x2735   :  { %6152 = vmatpush3.bf16.msra.mxu0 %v7894_v53  ;;  %5696 = vmatprep.mubr.msk.f32.mxu0 %vm6806_vm9, %v9082_v60  ;;  %v3255_v61 = vpop.permute.xlu1 %3254 }
0x2736   :  { %6153 = vmatprep.subr.bf16.mxu0 %v9081_v20 }
0x2739   :  { %6155 = vmatpush3.bf16.msra.mxu0 %v7900_v47 }
0x273a   :  { %6156 = vmatprep.subr.bf16.mxu0 %v9081_v20 }
0x273d   :  { %6158 = vmatpush3.bf16.msra.mxu0 %v7912_v35 }
0x273e   :  { %6159 = vmatprep.subr.bf16.mxu0 %v9081_v20 }
0x2741   :  { %6161 = vmatpush3.bf16.msra.mxu0 %v7924_v48 }
0x2742   :  { %6162 = vmatprep.subr.bf16.mxu0 %v9081_v20 }
0x2745   :  { %6164 = vmatpush3.bf16.msra.mxu0 %v7936_v58 }
0x2746   :  { %6165 = vmatprep.subr.bf16.mxu0 %v9081_v20 }
0x2749   :  { %6167 = vmatpush3.bf16.msra.mxu0 %v7948_v52 }
0x274a   :  { %6210 = vmatprep.subr.bf16.mxu0 %v9081_v20 }
0x2807   :  { %v3247_v5 = vpop.f32.mrb[16].mxu0 }
0x2808   :  { %6557 = vtanh.f32 %v3247_v5  ;;  %v5652_v54 = vpop.f32.mrb[17].mxu0 }
0x2809   :  { %v9097_v54 = vld [vmem:[#allocation17_spill] sm:$0xff] }
0x2812   :  { %v6558_v22 = vpop.eup %6557 }
0x2813   :  { %3253 = vst.msk [vmem:[#allocation6 + $0x10] sm:$0xff] %vm148_vm0, %v6558_v22  ;;  %v3257_v6 = vsel %vm148_vm0, %v6558_v22, %v3255_v61 }
0x2814   :  { %5670 = vmatmul.mubr.msk.f32.vlgmr.msra.gmra.mrb[14].mxu1 %vm450_vm2, %v3257_v6 }
0x2815   :  { %6170 = vmatpush3.bf16.msra.mxu1 %v7702_v14  ;;  %5715 = vmatprep.mubr.msk.f32.mxu1 %vm6806_vm9, %v9082_v60 }
0x2816   :  { %6171 = vmatprep.subr.bf16.mxu1 %v9081_v20 }
0x2819   :  { %6173 = vmatpush3.bf16.msra.mxu1 %v7719_v7 }
0x281a   :  { %6174 = vmatprep.subr.bf16.mxu1 %v9081_v20 }
0x281d   :  { %6176 = vmatpush3.bf16.msra.mxu1 %v7737_v37 }
0x281e   :  { %6177 = vmatprep.subr.bf16.mxu1 %v9081_v20 }
0x2821   :  { %6179 = vmatpush3.bf16.msra.mxu1 %v7755_v17 }
0x2822   :  { %6180 = vmatprep.subr.bf16.mxu1 %v9081_v20 }
0x28e7   :  { %v3329_v4 = vpop.f32.mrb[14].mxu1 }
0x28e8   :  { %v6295_v59 = vadd.f32 %v8166_v38, %v3329_v4  ;;  %v5671_v19 = vpop.f32.mrb[15].mxu1  ;;  %v9098_v4 = vld [vmem:[#allocation18_spill] sm:$0xff] }
0x28ea   :  { %6559 = vtanh.f32 %v6295_v59  ;;  %v5169_v2 = vmul.f32 -1.442695, %v6295_v59 }
0x28ec   :  { %6561 = vpow2.f32 %v5169_v2 }
0x28f4   :  { %v6560_v10 = vpop.eup %6559 }
0x28f5   :  { %3343 = vrot.lane.b32.xlu0 %v6560_v10, %s6802_s28  ;;  %v9099_v10 = vld [vmem:[#allocation20_spill] sm:$0xff] }
0x28f6   :  { %v6562_v28 = vpop.eup %6561 }
0x28f7   :  { %v3337_v49 = vadd.f32 1.0, %v6562_v28 }
0x28f9   :  { %6563 = vrcp.f32 %v3337_v49 }
0x2903   :  { %v6564_v29 = vpop.eup %6563 }
0x2904   :  { %v3341_v15 = vmul.f32 %v6564_v29, %v8172_v36 }
0x2967   :  { %v3344_v8 = vpop.permute.xlu0 %3343 }
0x2968   :  { %v3346_v30 = vmul.f32 %v6564_v29, %v3344_v8 }
0x296a   :  { %3348 = vrot.lane.b32.xlu1 %v3346_v30, %s6803_s7 }
0x29dc   :  { %v3349_v31 = vpop.permute.xlu1 %3348 }
0x29dd   :  { %v8337_v27 = vadd.f32 %v3349_v31, %v3341_v15 }
0x29df   :  { %6565 = vtanh.f32 %v8337_v27 }
0x29e9   :  { %v6566_v24 = vpop.eup %6565 }
0x29ea   :  { %3354 = vrot.lane.b32.xlu0 %v6566_v24, %s6802_s28 }
0x2a5c   :  { %v3355_v63 = vpop.permute.xlu0 %3354 }
0x2a5d   :  { %v8341_v11 = vmul.f32 %v6564_v29, %v3355_v63  ;;  %v9100_v63 = vld [vmem:[#allocation26_spill] sm:$0xff] }
0x2a5f   :  { %3359 = vrot.lane.b32.xlu1 %v8341_v11, %s6803_s7 }
0x2ad1   :  { %v3360_v12 = vpop.permute.xlu1 %3359 }
0x2ad2   :  { %v3363_v44 = vmul.f32 %v7771_v39, %v3360_v12  ;;  %v3362_v13 = vmul.f32 %v3360_v12, %v7773_v56  ;;  %v3366_v26 = vmul.f32 %v3360_v12, %v7781_v42  ;;  %v3364_v0 = vmul.f32 %v3360_v12, %v7777_v16 }
0x2ad3   :  { %v3368_v5 = vmul.f32 %v3360_v12, %v7785_v33  ;;  %v3365_v22 = vmul.f32 %v9097_v54, %v3360_v12  ;;  %v3367_v59 = vmul.f32 %v9098_v4, %v3360_v12  ;;  %v3369_v2 = vmul.f32 %v9099_v10, %v3360_v12  ;;  %v9104_v12 = vld [vmem:[#allocation23_spill] sm:$0xff] }
0x2ad4   :  { %v3373_v36 = vsel %vm148_vm0, %v3363_v44, 0.0  ;;  %v3370_v46 = vsel %vm148_vm0, %v3362_v13, 0.0  ;;  %v3382_v40 = vsel %vm148_vm0, %v3366_v26, 0.0  ;;  %v3376_v23 = vsel %vm148_vm0, %v3364_v0, 0.0  ;;  %v9101_v13 = vld [vmem:[#allocation22_spill] sm:$0xff]  ;;  %v9103_v0 = vld [vmem:[#allocation24_spill] sm:$0xff] }
0x2ad5   :  { %3374 = vadd.xlane.f32.xlu1 %v3373_v36  ;;  %3371 = vadd.xlane.f32.xlu0 %v3370_v46  ;;  %v3388_v61 = vsel %vm148_vm0, %v3368_v5, 0.0  ;;  %v3379_v6 = vsel %vm148_vm0, %v3365_v22, 0.0  ;;  %v3385_v19 = vsel %vm148_vm0, %v3367_v59, 0.0  ;;  %v3391_v28 = vsel %vm148_vm0, %v3369_v2, 0.0  ;;  %v9102_v46 = vld [vmem:[#allocation28_spill] sm:$0xff]  ;;  %v9105_v5 = vld [vmem:[#allocation25_spill] sm:$0xff] }
0x2ad9   :  { %3383 = vadd.xlane.f32.xlu1 %v3382_v40  ;;  %3377 = vadd.xlane.f32.xlu0 %v3376_v23 }
0x2add   :  { %3389 = vadd.xlane.f32.xlu1 %v3388_v61  ;;  %3380 = vadd.xlane.f32.xlu0 %v3379_v6  ;;  %v9106_v61 = vld [vmem:[#allocation27_spill] sm:$0xff] }
0x2ae1   :  { %3386 = vadd.xlane.f32.xlu0 %v3385_v19 }
0x2ae5   :  { %3392 = vadd.xlane.f32.xlu0 %v3391_v28 }
0x2b62   :  { %v3375_v49 = vpop.xlane.xlu1 %3374  ;;  %v3372_v29 = vpop.xlane.xlu0 %3371 }
0x2b63   :  { %v3395_v44 = vadd.f32 %v9100_v63, %v3375_v49  ;;  %v3394_v23 = vadd.f32 %v9104_v12, %v3372_v29 }
0x2b65   :  { %v3403_v2 = vsel %vm2256_vm12, %v3395_v44, -inf }
0x2b66   :  { %v3384_v8 = vpop.xlane.xlu1 %3383  ;;  %v3378_v30 = vpop.xlane.xlu0 %3377 }
0x2b67   :  { %v3398_v36 = vadd.f32 %v9101_v13, %v3384_v8  ;;  %v3396_v22 = vadd.f32 %v9105_v5, %v3378_v30  ;;  %v9107_v8 = vld [vmem:[#allocation29_spill] sm:$0xff] }
0x2b69   :  { %v3406_v28 = vsel %vm2256_vm12, %v3398_v36, -inf  ;;  %v3404_v29 = vsel %vm2256_vm12, %v3396_v22, -inf }
0x2b6a   :  { %v3381_v15 = vpop.xlane.xlu0 %3380  ;;  %v3390_v31 = vpop.xlane.xlu1 %3389 }
0x2b6b   :  { %v3400_v26 = vadd.f32 %v9102_v46, %v3390_v31  ;;  %v3397_v6 = vadd.f32 %v9106_v61, %v3381_v15 }
0x2b6d   :  { %v3410_v49 = vsel %vm2256_vm12, %v3400_v26, -inf  ;;  %v3405_v30 = vsel %vm2256_vm12, %v3397_v6, -inf }
0x2b6e   :  { %v3387_v24 = vpop.xlane.xlu0 %3386  ;;  %v3411_v7 = vmax.f32 %v3404_v29, %v3410_v49 }
0x2b6f   :  { %v3399_v40 = vadd.f32 %v9103_v0, %v3387_v24  ;;  %v3402_v24 = vsel %vm2256_vm12, %v3394_v23, -inf }
0x2b70   :  { %v3407_v37 = vmax.f32 %v3402_v24, %v3406_v28 }
0x2b71   :  { %v3408_v59 = vsel %vm2256_vm12, %v3399_v40, -inf }
0x2b72   :  { %v3393_v19 = vpop.xlane.xlu0 %3392  ;;  %v3409_v31 = vmax.f32 %v3403_v2, %v3408_v59 }
0x2b73   :  { %v3401_v17 = vadd.f32 %v9107_v8, %v3393_v19 }
0x2b74   :  { %v3414_v46 = vmax.f32 %v3407_v37, %v3409_v31 }
0x2b75   :  { %v3412_v15 = vsel %vm2256_vm12, %v3401_v17, -inf }
0x2b76   :  { %v3413_v14 = vmax.f32 %v3405_v30, %v3412_v15 }
0x2b78   :  { %v3415_v61 = vmax.f32 %v3411_v7, %v3413_v14 }
0x2b7a   :  { %v3416_v5 = vmax.f32 %v3414_v46, %v3415_v61 }
0x2b7c   :  { %v3417_v0 = vsub.f32 %v3394_v23, %v3416_v5  ;;  %v3418_v13 = vsub.f32 %v3395_v44, %v3416_v5  ;;  %v3419_v12 = vsub.f32 %v3396_v22, %v3416_v5  ;;  %v3420_v63 = vsub.f32 %v3397_v6, %v3416_v5 }
0x2b7d   :  { %v3421_v19 = vsub.f32 %v3398_v36, %v3416_v5  ;;  %v3422_v10 = vsub.f32 %v3399_v40, %v3416_v5  ;;  %v3423_v4 = vsub.f32 %v3400_v26, %v3416_v5  ;;  %v3424_v28 = vsub.f32 %v3401_v17, %v3416_v5 }
0x2b7e   :  { %v3425_v59 = vmul.f32 1.442695, %v3417_v0  ;;  %v3427_v2 = vmul.f32 1.442695, %v3418_v13  ;;  %v3429_v8 = vmul.f32 1.442695, %v3419_v12 }
0x2b7f   :  { %v3431_v33 = vmul.f32 1.442695, %v3420_v63  ;;  %v3433_v42 = vmul.f32 1.442695, %v3421_v19  ;;  %v3435_v37 = vmul.f32 1.442695, %v3422_v10 }
0x2b80   :  { %6567 = vpow2.f32 %v3425_v59  ;;  %v3437_v14 = vmul.f32 1.442695, %v3423_v4  ;;  %v3439_v7 = vmul.f32 1.442695, %v3424_v28 }
0x2b81   :  { %6569 = vpow2.f32 %v3427_v2 }
0x2b82   :  { %6571 = vpow2.f32 %v3429_v8 }
0x2b83   :  { %6573 = vpow2.f32 %v3431_v33 }
0x2b84   :  { %6575 = vpow2.f32 %v3433_v42 }
0x2b85   :  { %6577 = vpow2.f32 %v3435_v37 }
0x2b86   :  { %6579 = vpow2.f32 %v3437_v14 }
0x2b87   :  { %6581 = vpow2.f32 %v3439_v7 }
0x2b8a   :  { %v6568_v44 = vpop.eup %6567 }
0x2b8b   :  { %v6570_v36 = vpop.eup %6569  ;;  %v3441_v13 = vsel %vm2256_vm12, %v6568_v44, 0.0 }
0x2b8c   :  { %v6572_v46 = vpop.eup %6571  ;;  %v3442_v63 = vsel %vm2256_vm12, %v6570_v36, 0.0 }
0x2b8d   :  { %v6574_v26 = vpop.eup %6573  ;;  %v3443_v0 = vadd.f32 %v3442_v63, %v3441_v13  ;;  %v3444_v40 = vsel %vm2256_vm12, %v6572_v46, 0.0 }
0x2b8e   :  { %v6576_v17 = vpop.eup %6575  ;;  %v3446_v42 = vsel %vm2256_vm12, %v6574_v26, 0.0 }
0x2b8f   :  { %v3445_v33 = vadd.f32 %v3444_v40, %v3443_v0  ;;  %v6578_v4 = vpop.eup %6577  ;;  %v3448_v12 = vsel %vm2256_vm12, %v6576_v17, 0.0 }
0x2b90   :  { %v6580_v23 = vpop.eup %6579  ;;  %v3450_v22 = vsel %vm2256_vm12, %v6578_v4, 0.0 }
0x2b91   :  { %v3447_v10 = vadd.f32 %v3446_v42, %v3445_v33  ;;  %v6582_v61 = vpop.eup %6581  ;;  %v3452_v49 = vsel %vm2256_vm12, %v6580_v23, 0.0 }
0x2b92   :  { %v3454_v31 = vsel %vm2256_vm12, %v6582_v61, 0.0 }
0x2b93   :  { %v3449_v5 = vadd.f32 %v3448_v12, %v3447_v10 }
0x2b95   :  { %v3451_v6 = vadd.f32 %v3450_v22, %v3449_v5 }
0x2b97   :  { %v3453_v8 = vadd.f32 %v3452_v49, %v3451_v6 }
0x2b99   :  { %v3455_v24 = vadd.f32 %v3454_v31, %v3453_v8 }
0x2b9b   :  { %6583 = vrcp.f32 %v3455_v24 }
0x2ba5   :  { %v6584_v29 = vpop.eup %6583 }
0x2ba6   :  { %v3458_v30 = vmul.f32 %v6584_v29, %v6570_v36  ;;  %v3457_v15 = vmul.f32 %v6584_v29, %v6568_v44  ;;  %v3461_v19 = vmul.f32 %v6584_v29, %v6576_v17  ;;  %v3459_v59 = vmul.f32 %v6584_v29, %v6572_v46 }
0x2ba7   :  { %v3463_v2 = vmul.f32 %v6584_v29, %v6580_v23  ;;  %v3460_v28 = vmul.f32 %v6584_v29, %v6574_v26  ;;  %v3462_v37 = vmul.f32 %v6584_v29, %v6578_v4  ;;  %v3464_v14 = vmul.f32 %v6584_v29, %v6582_v61 }
0x2ba8   :  { %3472 = vperm.xlu0 %6345, %v3458_v30   ;;  %3467 = vperm.xlu1 %6346, %v3457_v15  }
0x2bac   :  { %3487 = vperm.xlu0 %6345, %v3461_v19   ;;  %3477 = vperm.xlu1 %6346, %v3459_v59  }
0x2bb0   :  { %3497 = vperm.xlu0 %6345, %v3463_v2   ;;  %3482 = vperm.xlu1 %6346, %v3460_v28  }
0x2bb4   :  { %3492 = vperm.xlu1 %6346, %v3462_v37  }
0x2bb8   :  { %3502 = vperm.xlu1 %6346, %v3464_v14  }
0x2bbc   :  { %3555 = vrot.lane.b32.xlu1 %v8341_v11, %s6804_s12 }
0x2c27   :  { %v3473_v7 = vpop.permute.xlu0 %3472  ;;  %v3468_v36 = vpop.permute.xlu1 %3467 }
0x2c28   :  { %v3529_v44 = vmul.f32 %v8076_v43, %v3473_v7  ;;  %v3528_v13 = vmul.f32 %v8079_v21, %v3468_v36 }
0x2c2a   :  { %v3537_v0 = vsel %vm148_vm0, %v3529_v44, 0.0  ;;  %v3536_v26 = vsel %vm148_vm0, %v3528_v13, 0.0 }
0x2c2b   :  { %v3488_v46 = vpop.permute.xlu0 %3487  ;;  %v3478_v63 = vpop.permute.xlu1 %3477  ;;  %v3538_v33 = vadd.f32 %v3537_v0, %v3536_v26 }
0x2c2c   :  { %v3530_v40 = vmul.f32 %v8084_v9, %v3478_v63  ;;  %v3532_v4 = vmul.f32 %v8270_v51, %v3488_v46  ;;  %v3507_v19 = vmul.f32 %v8115_v25, %v3478_v63 }
0x2c2e   :  { %v3539_v17 = vsel %vm148_vm0, %v3530_v40, 0.0  ;;  %v3543_v22 = vsel %vm148_vm0, %v3532_v4, 0.0  ;;  %v3516_v28 = vsel %vm148_vm0, %v3507_v19, 0.0 }
0x2c2f   :  { %v3483_v42 = vpop.permute.xlu1 %3482  ;;  %v3540_v12 = vadd.f32 %v3539_v17, %v3538_v33  ;;  %v3498_v43 = vpop.permute.xlu0 %3497 }
0x2c30   :  { %v3531_v10 = vmul.f32 %v8089_v50, %v3483_v42  ;;  %v3534_v61 = vmul.f32 %v8094_v18, %v3498_v43  ;;  %v3506_v18 = vmul.f32 %v8109_v45, %v3473_v7 }
0x2c32   :  { %v3541_v21 = vsel %vm148_vm0, %v3531_v10, 0.0  ;;  %v3547_v24 = vsel %vm148_vm0, %v3534_v61, 0.0  ;;  %v3514_v59 = vsel %vm148_vm0, %v3506_v18, 0.0 }
0x2c33   :  { %v3542_v23 = vadd.f32 %v3541_v21, %v3540_v12  ;;  %v3493_v5 = vpop.permute.xlu1 %3492 }
0x2c34   :  { %v3533_v9 = vmul.f32 %v8097_v32, %v3493_v5  ;;  %v3505_v32 = vmul.f32 %v8112_v41, %v3468_v36  ;;  %v3510_v45 = vmul.f32 %v8293_v34, %v3493_v5  ;;  %v3511_v36 = vmul.f32 %v8131_v55, %v3498_v43 }
0x2c35   :  { %v3544_v6 = vadd.f32 %v3543_v22, %v3542_v23 }
0x2c36   :  { %v3545_v49 = vsel %vm148_vm0, %v3533_v9, 0.0  ;;  %v3513_v2 = vsel %vm148_vm0, %v3505_v32, 0.0  ;;  %v3522_v7 = vsel %vm148_vm0, %v3510_v45, 0.0  ;;  %v3524_v0 = vsel %vm148_vm0, %v3511_v36, 0.0  ;;  %v9111_v36 = vld [vmem:[#allocation20_spill] sm:$0xff] }
0x2c37   :  { %v3546_v8 = vadd.f32 %v3545_v49, %v3544_v6  ;;  %v3503_v31 = vpop.permute.xlu1 %3502  ;;  %v3515_v37 = vadd.f32 %v3514_v59, %v3513_v2 }
0x2c38   :  { %v3535_v50 = vmul.f32 %v8102_v62, %v3503_v31  ;;  %v3508_v62 = vmul.f32 %v8120_v3, %v3483_v42  ;;  %v3512_v3 = vmul.f32 %v8299_v57, %v3503_v31 }
0x2c39   :  { %v3548_v29 = vadd.f32 %v3547_v24, %v3546_v8  ;;  %v3517_v44 = vadd.f32 %v3516_v28, %v3515_v37 }
0x2c3a   :  { %v3549_v30 = vsel %vm148_vm0, %v3535_v50, 0.0  ;;  %v3518_v14 = vsel %vm148_vm0, %v3508_v62, 0.0  ;;  %v3526_v40 = vsel %vm148_vm0, %v3512_v3, 0.0 }
0x2c3b   :  { %v3550_v15 = vadd.f32 %v3549_v30, %v3548_v29  ;;  %v3519_v13 = vadd.f32 %v3518_v14, %v3517_v44  ;;  %v9108_v14 = vld [vmem:[#allocation19_spill] sm:$0xff] }
0x2c3d   :  { %3552 = vrot.lane.b32.xlu0 %v3550_v15, %s6803_s7 }
0x2c41   :  { %3636 = vrot.lane.b32.xlu0 %v8341_v11, %s6802_s28  ;;  %v3509_v11 = vmul.f32 %v8125_v1, %v3488_v46  ;;  %v3556_v46 = vpop.permute.xlu1 %3555 }
0x2c43   :  { %v3520_v41 = vsel %vm148_vm0, %v3509_v11, 0.0  ;;  %v9109_v11 = vld [vmem:[#allocation18_spill] sm:$0xff] }
0x2c44   :  { %v3521_v25 = vadd.f32 %v3520_v41, %v3519_v13 }
0x2c46   :  { %v3523_v63 = vadd.f32 %v3522_v7, %v3521_v25  ;;  %v9110_v25 = vld [vmem:[#allocation21_spill] sm:$0xff] }
0x2c48   :  { %v3525_v26 = vadd.f32 %v3524_v0, %v3523_v63 }
0x2c4a   :  { %v3527_v17 = vadd.f32 %v3526_v40, %v3525_v26 }
0x2caf   :  { %v3553_v1 = vpop.permute.xlu0 %3552 }
0x2cb0   :  { %v3558_v33 = vsel %vm148_vm0, %v3527_v17, %v3553_v1 }
0x2cb1   :  { %v3559_v42 = vsel %vm450_vm2, %v3558_v33, %v3556_v46 }
0x2cb2   :  { %5697 = vmatmul.mubr.msk.f32.vlgmr.msra.gmra.mrb[18].mxu0 %vm1730_vm11, %v3559_v42  ;;  %v9112_v42 = vld [vmem:[#allocation26_spill] sm:$0xff] }
0x2cb3   :  { %6212 = vmatpush3.bf16.msra.mxu0 %v7894_v53  ;;  %5788 = vmatprep.mubr.msk.f32.mxu0 %vm6806_vm9, %v9082_v60  ;;  %v3637_v12 = vpop.permute.xlu0 %3636 }
0x2cb4   :  { %6213 = vmatprep.subr.bf16.mxu0 %v9081_v20 }
0x2cb7   :  { %6215 = vmatpush3.bf16.msra.mxu0 %v7900_v47 }
0x2cb8   :  { %6216 = vmatprep.subr.bf16.mxu0 %v9081_v20 }
0x2cbb   :  { %6218 = vmatpush3.bf16.msra.mxu0 %v7912_v35 }
0x2cbc   :  { %6219 = vmatprep.subr.bf16.mxu0 %v9081_v20 }
0x2cbf   :  { %6221 = vmatpush3.bf16.msra.mxu0 %v7924_v48 }
0x2cc0   :  { %6222 = vmatprep.subr.bf16.mxu0 %v9081_v20 }
0x2cc3   :  { %6224 = vmatpush3.bf16.msra.mxu0 %v7936_v58 }
0x2cc4   :  { %6225 = vmatprep.subr.bf16.mxu0 %v9081_v20 }
0x2cc7   :  { %6227 = vmatpush3.bf16.msra.mxu0 %v7948_v52 }
0x2cc8   :  { %6240 = vmatprep.subr.bf16.mxu0 %v9081_v20 }
0x2d85   :  { %v3629_v55 = vpop.f32.mrb[18].mxu0 }
0x2d86   :  { %6585 = vtanh.f32 %v3629_v55  ;;  %v5698_v4 = vpop.f32.mrb[19].mxu0 }
0x2d87   :  { %v9113_v4 = vld [vmem:[#allocation23_spill] sm:$0xff] }
0x2d90   :  { %v6586_v10 = vpop.eup %6585 }
0x2d91   :  { %3635 = vst.msk [vmem:[#allocation6 + $0x18] sm:$0xff] %vm148_vm0, %v6586_v10  ;;  %v3639_v43 = vsel %vm148_vm0, %v6586_v10, %v3637_v12  ;;  %v9114_v12 = vld [vmem:[#allocation22_spill] sm:$0xff] }
0x2d92   :  { %5716 = vmatmul.mubr.msk.f32.vlgmr.msra.gmra.mrb[16].mxu1 %vm450_vm2, %v3639_v43 }
0x2d93   :  { %6182 = vmatpush3.bf16.msra.mxu1 %v7894_v53  ;;  %5742 = vmatprep.mubr.msk.f32.mxu1 %vm6806_vm9, %v9082_v60 }
0x2d94   :  { %6183 = vmatprep.subr.bf16.mxu1 %v9081_v20 }
0x2d97   :  { %6185 = vmatpush3.bf16.msra.mxu1 %v7900_v47 }
0x2d98   :  { %6186 = vmatprep.subr.bf16.mxu1 %v9081_v20 }
0x2d9b   :  { %6188 = vmatpush3.bf16.msra.mxu1 %v7912_v35 }
0x2d9c   :  { %6189 = vmatprep.subr.bf16.mxu1 %v9081_v20 }
0x2d9f   :  { %6191 = vmatpush3.bf16.msra.mxu1 %v7924_v48 }
0x2da0   :  { %6192 = vmatprep.subr.bf16.mxu1 %v9081_v20 }
0x2da3   :  { %6194 = vmatpush3.bf16.msra.mxu1 %v7936_v58 }
0x2da4   :  { %6195 = vmatprep.subr.bf16.mxu1 %v9081_v20 }
0x2da7   :  { %6197 = vmatpush3.bf16.msra.mxu1 %v7948_v52 }
0x2da8   :  { %6198 = vmatprep.subr.bf16.mxu1 %v9081_v20 }
0x2e65   :  { %v3711_v21 = vpop.f32.mrb[16].mxu1 }
0x2e66   :  { %v6296_v23 = vadd.f32 %v8166_v38, %v3711_v21  ;;  %v5717_v5 = vpop.f32.mrb[17].mxu1  ;;  %v9115_v21 = vld [vmem:[#allocation24_spill] sm:$0xff] }
0x2e67   :  { %v9116_v5 = vld [vmem:[#allocation25_spill] sm:$0xff] }
0x2e68   :  { %6587 = vtanh.f32 %v6296_v23  ;;  %v5172_v61 = vmul.f32 -1.442695, %v6296_v23 }
0x2e6a   :  { %6589 = vpow2.f32 %v5172_v61  ;;  %v9117_v61 = vld [vmem:[#allocation27_spill] sm:$0xff] }
0x2e72   :  { %v6588_v22 = vpop.eup %6587 }
0x2e73   :  { %3725 = vrot.lane.b32.xlu1 %v6588_v22, %s6802_s28 }
0x2e74   :  { %v6590_v9 = vpop.eup %6589 }
0x2e75   :  { %v3719_v6 = vadd.f32 1.0, %v6590_v9 }
0x2e77   :  { %6591 = vrcp.f32 %v3719_v6 }
0x2e81   :  { %v6592_v49 = vpop.eup %6591 }
0x2e82   :  { %v3723_v24 = vmul.f32 %v6592_v49, %v8337_v27 }
0x2ee5   :  { %v3726_v8 = vpop.permute.xlu1 %3725 }
0x2ee6   :  { %v3728_v31 = vmul.f32 %v6592_v49, %v3726_v8 }
0x2ee8   :  { %3730 = vrot.lane.b32.xlu0 %v3728_v31, %s6803_s7 }
0x2f5a   :  { %v3731_v50 = vpop.permute.xlu0 %3730 }
0x2f5b   :  { %v8460_v29 = vadd.f32 %v3731_v50, %v3723_v24 }
0x2f5d   :  { %6593 = vtanh.f32 %v8460_v29 }
0x2f67   :  { %v6594_v38 = vpop.eup %6593 }
0x2f68   :  { %3736 = vrot.lane.b32.xlu1 %v6594_v38, %s6802_s28  ;;  %v9118_v38 = vld [vmem:[#allocation28_spill] sm:$0xff] }
0x2fda   :  { %v3737_v30 = vpop.permute.xlu1 %3736 }
0x2fdb   :  { %v8464_v15 = vmul.f32 %v6592_v49, %v3737_v30 }
0x2fdd   :  { %3741 = vrot.lane.b32.xlu0 %v8464_v15, %s6803_s7 }
0x304f   :  { %v3742_v18 = vpop.permute.xlu0 %3741 }
0x3050   :  { %v3745_v32 = vmul.f32 %v7771_v39, %v3742_v18  ;;  %v3744_v19 = vmul.f32 %v3742_v18, %v7773_v56  ;;  %v3746_v2 = vmul.f32 %v3742_v18, %v7777_v16  ;;  %v3747_v62 = vmul.f32 %v9097_v54, %v3742_v18 }
0x3051   :  { %v3748_v44 = vmul.f32 %v3742_v18, %v9108_v14  ;;  %v3749_v13 = vmul.f32 %v9109_v11, %v3742_v18  ;;  %v3750_v7 = vmul.f32 %v3742_v18, %v9110_v25  ;;  %v3751_v63 = vmul.f32 %v9111_v36, %v3742_v18  ;;  %v9119_v18 = vld [vmem:[#allocation29_spill] sm:$0xff] }
0x3052   :  { %v3755_v27 = vsel %vm148_vm0, %v3745_v32, 0.0  ;;  %v3752_v59 = vsel %vm148_vm0, %v3744_v19, 0.0  ;;  %v3758_v28 = vsel %vm148_vm0, %v3746_v2, 0.0  ;;  %v3761_v37 = vsel %vm148_vm0, %v3747_v62, 0.0 }
0x3053   :  { %3756 = vadd.xlane.f32.xlu0 %v3755_v27  ;;  %3753 = vadd.xlane.f32.xlu1 %v3752_v59  ;;  %v3764_v45 = vsel %vm148_vm0, %v3748_v44, 0.0  ;;  %v3767_v41 = vsel %vm148_vm0, %v3749_v13, 0.0  ;;  %v3770_v3 = vsel %vm148_vm0, %v3750_v7, 0.0  ;;  %v3773_v0 = vsel %vm148_vm0, %v3751_v63, 0.0 }
0x3057   :  { %3759 = vadd.xlane.f32.xlu0 %v3758_v28  ;;  %3762 = vadd.xlane.f32.xlu1 %v3761_v37 }
0x305b   :  { %3765 = vadd.xlane.f32.xlu0 %v3764_v45  ;;  %3768 = vadd.xlane.f32.xlu1 %v3767_v41 }
0x305f   :  { %3771 = vadd.xlane.f32.xlu0 %v3770_v3  ;;  %3774 = vadd.xlane.f32.xlu1 %v3773_v0 }
0x30e0   :  { %v3757_v26 = vpop.xlane.xlu0 %3756  ;;  %v3754_v40 = vpop.xlane.xlu1 %3753 }
0x30e1   :  { %v3777_v55 = vadd.f32 %v9112_v42, %v3757_v26  ;;  %v3776_v10 = vadd.f32 %v9113_v4, %v3754_v40 }
0x30e3   :  { %v3785_v24 = vsel %vm2256_vm12, %v3777_v55, -inf  ;;  %v3784_v50 = vsel %vm2256_vm12, %v3776_v10, -inf }
0x30e4   :  { %v3760_v17 = vpop.xlane.xlu0 %3759  ;;  %v3763_v1 = vpop.xlane.xlu1 %3762 }
0x30e5   :  { %v3778_v22 = vadd.f32 %v9116_v5, %v3760_v17  ;;  %v3779_v9 = vadd.f32 %v9117_v61, %v3763_v1 }
0x30e7   :  { %v3786_v59 = vsel %vm2256_vm12, %v3778_v22, -inf  ;;  %v3787_v2 = vsel %vm2256_vm12, %v3779_v9, -inf }
0x30e8   :  { %v3766_v46 = vpop.xlane.xlu0 %3765  ;;  %v3769_v33 = vpop.xlane.xlu1 %3768 }
0x30e9   :  { %v3780_v43 = vadd.f32 %v9114_v12, %v3766_v46  ;;  %v3781_v23 = vadd.f32 %v9115_v21, %v3769_v33 }
0x30eb   :  { %v3788_v6 = vsel %vm2256_vm12, %v3780_v43, -inf  ;;  %v3790_v49 = vsel %vm2256_vm12, %v3781_v23, -inf }
0x30ec   :  { %v3772_v8 = vpop.xlane.xlu0 %3771  ;;  %v3775_v31 = vpop.xlane.xlu1 %3774  ;;  %v3789_v19 = vmax.f32 %v3784_v50, %v3788_v6  ;;  %v3791_v27 = vmax.f32 %v3785_v24, %v3790_v49 }
0x30ed   :  { %v3782_v30 = vadd.f32 %v9118_v38, %v3772_v8  ;;  %v3783_v32 = vadd.f32 %v9119_v18, %v3775_v31 }
0x30ee   :  { %v3796_v13 = vmax.f32 %v3789_v19, %v3791_v27 }
0x30ef   :  { %v3792_v62 = vsel %vm2256_vm12, %v3782_v30, -inf  ;;  %v3794_v28 = vsel %vm2256_vm12, %v3783_v32, -inf }
0x30f0   :  { %v3793_v37 = vmax.f32 %v3786_v59, %v3792_v62  ;;  %v3795_v44 = vmax.f32 %v3787_v2, %v3794_v28 }
0x30f2   :  { %v3797_v45 = vmax.f32 %v3793_v37, %v3795_v44 }
0x30f4   :  { %v3798_v41 = vmax.f32 %v3796_v13, %v3797_v45 }
0x30f6   :  { %v3799_v7 = vsub.f32 %v3776_v10, %v3798_v41  ;;  %v3800_v63 = vsub.f32 %v3777_v55, %v3798_v41  ;;  %v3801_v3 = vsub.f32 %v3778_v22, %v3798_v41  ;;  %v3802_v0 = vsub.f32 %v3779_v9, %v3798_v41 }
0x30f7   :  { %v3803_v26 = vsub.f32 %v3780_v43, %v3798_v41  ;;  %v3804_v46 = vsub.f32 %v3781_v23, %v3798_v41  ;;  %v3805_v42 = vsub.f32 %v3782_v30, %v3798_v41  ;;  %v3806_v12 = vsub.f32 %v3783_v32, %v3798_v41 }
0x30f8   :  { %v3807_v40 = vmul.f32 1.442695, %v3799_v7  ;;  %v3809_v17 = vmul.f32 1.442695, %v3800_v63  ;;  %v3811_v1 = vmul.f32 1.442695, %v3801_v3 }
0x30f9   :  { %v3813_v33 = vmul.f32 1.442695, %v3802_v0  ;;  %v3815_v4 = vmul.f32 1.442695, %v3803_v26  ;;  %v3817_v21 = vmul.f32 1.442695, %v3804_v46 }
0x30fa   :  { %6595 = vpow2.f32 %v3807_v40  ;;  %v3819_v5 = vmul.f32 1.442695, %v3805_v42  ;;  %v3821_v55 = vmul.f32 1.442695, %v3806_v12 }
0x30fb   :  { %6597 = vpow2.f32 %v3809_v17 }
0x30fc   :  { %6599 = vpow2.f32 %v3811_v1  ;;  %v8510_v1 = vld [vmem:[#allocation3 + $0x8] sm:$0xff] }
0x30fd   :  { %6601 = vpow2.f32 %v3813_v33  ;;  %v8513_v33 = vld [vmem:[#allocation4 + $0x8] sm:$0xff] }
0x30fe   :  { %6603 = vpow2.f32 %v3815_v4  ;;  %v8516_v4 = vld [vmem:[#allocation3] sm:$0xff] }
0x30ff   :  { %6605 = vpow2.f32 %v3817_v21  ;;  %v8519_v21 = vld [vmem:[#allocation4] sm:$0xff] }
0x3100   :  { %6607 = vpow2.f32 %v3819_v5 }
0x3101   :  { %6609 = vpow2.f32 %v3821_v55 }
0x3104   :  { %v6596_v10 = vpop.eup %6595 }
0x3105   :  { %v6598_v43 = vpop.eup %6597  ;;  %v3823_v22 = vsel %vm2256_vm12, %v6596_v10, 0.0 }
0x3106   :  { %v6600_v23 = vpop.eup %6599  ;;  %v3824_v61 = vsel %vm2256_vm12, %v6598_v43, 0.0 }
0x3107   :  { %v6602_v9 = vpop.eup %6601  ;;  %v3825_v6 = vadd.f32 %v3824_v61, %v3823_v22  ;;  %v3826_v49 = vsel %vm2256_vm12, %v6600_v23, 0.0 }
0x3108   :  { %v6604_v8 = vpop.eup %6603  ;;  %v3828_v24 = vsel %vm2256_vm12, %v6602_v9, 0.0 }
0x3109   :  { %v3827_v31 = vadd.f32 %v3826_v49, %v3825_v6  ;;  %v6606_v50 = vpop.eup %6605  ;;  %v3830_v30 = vsel %vm2256_vm12, %v6604_v8, 0.0  ;;  %v8526_v6 = vld [vmem:[#allocation3 + $0x10] sm:$0xff] }
0x310a   :  { %v6608_v18 = vpop.eup %6607  ;;  %v3832_v19 = vsel %vm2256_vm12, %v6606_v50, 0.0 }
0x310b   :  { %v3829_v38 = vadd.f32 %v3828_v24, %v3827_v31  ;;  %v6610_v27 = vpop.eup %6609  ;;  %v3834_v2 = vsel %vm2256_vm12, %v6608_v18, 0.0  ;;  %v8532_v24 = vld [vmem:[#allocation3 + $0x18] sm:$0xff] }
0x310c   :  { %v3836_v28 = vsel %vm2256_vm12, %v6610_v27, 0.0 }
0x310d   :  { %v3831_v32 = vadd.f32 %v3830_v30, %v3829_v38  ;;  %v8535_v38 = vld [vmem:[#allocation4 + $0x18] sm:$0xff] }
0x310f   :  { %v3833_v59 = vadd.f32 %v3832_v19, %v3831_v32 }
0x3111   :  { %v3835_v62 = vadd.f32 %v3834_v2, %v3833_v59 }
0x3113   :  { %v3837_v37 = vadd.f32 %v3836_v28, %v3835_v62 }
0x3115   :  { %6611 = vrcp.f32 %v3837_v37 }
0x311f   :  { %v6612_v44 = vpop.eup %6611 }
0x3120   :  { %v3840_v13 = vmul.f32 %v6612_v44, %v6598_v43  ;;  %v3839_v45 = vmul.f32 %v6612_v44, %v6596_v10  ;;  %v3841_v41 = vmul.f32 %v6612_v44, %v6600_v23  ;;  %v3842_v7 = vmul.f32 %v6612_v44, %v6602_v9 }
0x3121   :  { %v3843_v63 = vmul.f32 %v6612_v44, %v6604_v8  ;;  %v3844_v3 = vmul.f32 %v6612_v44, %v6606_v50  ;;  %v3845_v0 = vmul.f32 %v6612_v44, %v6608_v18  ;;  %v3846_v26 = vmul.f32 %v6612_v44, %v6610_v27  ;;  %v8529_v8 = vld [vmem:[#allocation4 + $0x10] sm:$0xff]  ;;  %v8542_v44 = vld [vmem:[#allocation3 + $0x20] sm:$0xff] }
0x3122   :  { %3854 = vperm.xlu1 %6346, %v3840_v13   ;;  %3849 = vperm.xlu0 %6345, %v3839_v45  }
0x3126   :  { %3859 = vperm.xlu1 %6346, %v3841_v41   ;;  %3864 = vperm.xlu0 %6345, %v3842_v7   ;;  %v8547_v7 = vld [vmem:[#allocation4 + $0x28] sm:$0xff] }
0x312a   :  { %3869 = vperm.xlu1 %6346, %v3843_v63   ;;  %3874 = vperm.xlu0 %6345, %v3844_v3  }
0x312e   :  { %3879 = vperm.xlu1 %6346, %v3845_v0   ;;  %3884 = vperm.xlu0 %6345, %v3846_v26  }
0x3132   :  { %3937 = vrot.lane.b32.xlu0 %v8464_v15, %s6804_s12 }
0x31a1   :  { %v3855_v40 = vpop.permute.xlu1 %3854  ;;  %v3850_v17 = vpop.permute.xlu0 %3849 }
0x31a2   :  { %v3888_v46 = vmul.f32 %v8510_v1, %v3855_v40  ;;  %v3911_v42 = vmul.f32 %v8513_v33, %v3855_v40  ;;  %v3887_v12 = vmul.f32 %v8516_v4, %v3850_v17  ;;  %v3910_v5 = vmul.f32 %v8519_v21, %v3850_v17 }
0x31a4   :  { %v3896_v55 = vsel %vm148_vm0, %v3888_v46, 0.0  ;;  %v3919_v10 = vsel %vm148_vm0, %v3911_v42, 0.0  ;;  %v3895_v43 = vsel %vm148_vm0, %v3887_v12, 0.0  ;;  %v3918_v22 = vsel %vm148_vm0, %v3910_v5, 0.0 }
0x31a5   :  { %v3897_v23 = vadd.f32 %v3896_v55, %v3895_v43  ;;  %v3860_v61 = vpop.permute.xlu1 %3859  ;;  %v3865_v9 = vpop.permute.xlu0 %3864  ;;  %v3920_v18 = vadd.f32 %v3919_v10, %v3918_v22  ;;  %v8554_v55 = vld [vmem:[#allocation3 + $0x30] sm:$0xff] }
0x31a6   :  { %v3889_v49 = vmul.f32 %v8526_v6, %v3860_v61  ;;  %v3912_v31 = vmul.f32 %v8529_v8, %v3860_v61  ;;  %v3890_v50 = vmul.f32 %v8532_v24, %v3865_v9  ;;  %v3913_v30 = vmul.f32 %v8535_v38, %v3865_v9  ;;  %v8557_v10 = vld [vmem:[#allocation4 + $0x30] sm:$0xff] }
0x31a8   :  { %v3898_v32 = vsel %vm148_vm0, %v3889_v49, 0.0  ;;  %v3921_v19 = vsel %vm148_vm0, %v3912_v31, 0.0  ;;  %v3900_v2 = vsel %vm148_vm0, %v3890_v50, 0.0  ;;  %v3923_v62 = vsel %vm148_vm0, %v3913_v30, 0.0 }
0x31a9   :  { %v3899_v27 = vadd.f32 %v3898_v32, %v3897_v23  ;;  %v3922_v59 = vadd.f32 %v3921_v19, %v3920_v18  ;;  %v3870_v28 = vpop.permute.xlu1 %3869  ;;  %v3875_v37 = vpop.permute.xlu0 %3874  ;;  %v8561_v23 = vld [vmem:[#allocation4 + $0x38] sm:$0xff] }
0x31aa   :  { %v3891_v13 = vmul.f32 %v8542_v44, %v3870_v28  ;;  %v3914_v45 = vmul.f32 %v8270_v51, %v3870_v28  ;;  %v3892_v41 = vmul.f32 %v8293_v34, %v3875_v37  ;;  %v3915_v63 = vmul.f32 %v8547_v7, %v3875_v37  ;;  %v9120_v37 = vld [vmem:[#allocation13_spill] sm:$0xff] }
0x31ab   :  { %v3901_v3 = vadd.f32 %v3900_v2, %v3899_v27  ;;  %v3924_v0 = vadd.f32 %v3923_v62, %v3922_v59 }
0x31ac   :  { %v3902_v26 = vsel %vm148_vm0, %v3891_v13, 0.0  ;;  %v3925_v40 = vsel %vm148_vm0, %v3914_v45, 0.0  ;;  %v3904_v42 = vsel %vm148_vm0, %v3892_v41, 0.0  ;;  %v3927_v12 = vsel %vm148_vm0, %v3915_v63, 0.0  ;;  %v9121_v13 = vld [vmem:[#allocation14_spill] sm:$0xff]  ;;  %v9123_v45 = vld [vmem:[#allocation16_spill] sm:$0xff] }
0x31ad   :  { %v3903_v17 = vadd.f32 %v3902_v26, %v3901_v3  ;;  %v3926_v46 = vadd.f32 %v3925_v40, %v3924_v0  ;;  %v3880_v5 = vpop.permute.xlu1 %3879  ;;  %v3885_v51 = vpop.permute.xlu0 %3884 }
0x31ae   :  { %v3893_v34 = vmul.f32 %v8554_v55, %v3880_v5  ;;  %v3916_v43 = vmul.f32 %v8557_v10, %v3880_v5  ;;  %v3894_v22 = vmul.f32 %v8299_v57, %v3885_v51  ;;  %v3917_v61 = vmul.f32 %v8561_v23, %v3885_v51 }
0x31af   :  { %v3905_v9 = vadd.f32 %v3904_v42, %v3903_v17  ;;  %v3928_v49 = vadd.f32 %v3927_v12, %v3926_v46  ;;  %v8599_v17 = vld [vmem:[%s9001_s13] ss:$0 sm:$0xff] }
0x31b0   :  { %v3906_v31 = vsel %vm148_vm0, %v3893_v34, 0.0  ;;  %v3929_v50 = vsel %vm148_vm0, %v3916_v43, 0.0  ;;  %v3908_v32 = vsel %vm148_vm0, %v3894_v22, 0.0  ;;  %v3931_v19 = vsel %vm148_vm0, %v3917_v61, 0.0 }
0x31b1   :  { %v3907_v30 = vadd.f32 %v3906_v31, %v3905_v9  ;;  %v3930_v18 = vadd.f32 %v3929_v50, %v3928_v49  ;;  %v3938_v2 = vpop.permute.xlu0 %3937 }
0x31b3   :  { %v3909_v27 = vadd.f32 %v3908_v32, %v3907_v30  ;;  %v3932_v59 = vadd.f32 %v3931_v19, %v3930_v18 }
0x31b5   :  { %3934 = vrot.lane.b32.xlu1 %v3932_v59, %s6803_s7 }
0x31b9   :  { %4018 = vrot.lane.b32.xlu1 %v8464_v15, %s6802_s28  ;;  %v9122_v15 = vld [vmem:[#allocation15_spill] sm:$0xff] }
0x3227   :  { %v3935_v57 = vpop.permute.xlu1 %3934 }
0x3228   :  { %v3940_v62 = vsel %vm148_vm0, %v3909_v27, %v3935_v57 }
0x3229   :  { %v3941_v28 = vsel %vm450_vm2, %v3940_v62, %v3938_v2 }
0x322a   :  { %5743 = vmatmul.mubr.msk.f32.vlgmr.msra.gmra.mrb[36].mxu1 %vm1730_vm11, %v3941_v28 }
0x322b   :  { %6200 = vmatpush3.bf16.msra.mxu1 %v9120_v37  ;;  %5761 = vmatprep.mubr.msk.f32.mxu1 %vm6806_vm9, %v9082_v60  ;;  %v4019_v0 = vpop.permute.xlu1 %4018 }
0x322c   :  { %6201 = vmatprep.subr.bf16.mxu1 %v9081_v20 }
0x322f   :  { %6203 = vmatpush3.bf16.msra.mxu1 %v9121_v13 }
0x3230   :  { %6204 = vmatprep.subr.bf16.mxu1 %v9081_v20 }
0x3233   :  { %6206 = vmatpush3.bf16.msra.mxu1 %v9122_v15 }
0x3234   :  { %6207 = vmatprep.subr.bf16.mxu1 %v9081_v20 }
0x3237   :  { %6209 = vmatpush3.bf16.msra.mxu1 %v9123_v45 }
0x3238   :  { %6228 = vmatprep.subr.bf16.mxu1 %v9081_v20 }
0x32fd   :  { %v4011_v41 = vpop.f32.mrb[36].mxu1 }
0x32fe   :  { %6613 = vtanh.f32 %v4011_v41  ;;  %v5744_v63 = vpop.f32.mrb[37].mxu1 }
0x3308   :  { %v6614_v3 = vpop.eup %6613 }
0x3309   :  { %4017 = vst.msk [vmem:[#allocation6 + $0x20] sm:$0xff] %vm148_vm0, %v6614_v3  ;;  %v4021_v26 = vsel %vm148_vm0, %v6614_v3, %v4019_v0 }
0x330a   :  { %5762 = vmatmul.mubr.msk.f32.vlgmr.msra.gmra.mrb[18].mxu1 %vm450_vm2, %v4021_v26 }
0x330b   :  { %6230 = vmatpush3.bf16.msra.mxu1 %v9120_v37  ;;  %5807 = vmatprep.mubr.msk.f32.mxu1 %vm6806_vm9, %v9082_v60 }
0x330c   :  { %6231 = vmatprep.subr.bf16.mxu1 %v9081_v20 }
0x330f   :  { %6233 = vmatpush3.bf16.msra.mxu1 %v9121_v13 }
0x3310   :  { %6234 = vmatprep.subr.bf16.mxu1 %v9081_v20 }
0x3313   :  { %6236 = vmatpush3.bf16.msra.mxu1 %v9122_v15 }
0x3314   :  { %6237 = vmatprep.subr.bf16.mxu1 %v9081_v20 }
0x3317   :  { %6239 = vmatpush3.bf16.msra.mxu1 %v9123_v45 }
0x33dd   :  { %v4093_v40 = vpop.f32.mrb[18].mxu1 }
0x33de   :  { %v6297_v46 = vadd.f32 %v8599_v17, %v4093_v40  ;;  %v5763_v42 = vpop.f32.mrb[19].mxu1 }
0x33e0   :  { %6615 = vtanh.f32 %v6297_v46  ;;  %v5175_v5 = vmul.f32 -1.442695, %v6297_v46 }
0x33e2   :  { %6617 = vpow2.f32 %v5175_v5 }
0x33ea   :  { %v6616_v12 = vpop.eup %6615 }
0x33eb   :  { %4107 = vrot.lane.b32.xlu0 %v6616_v12, %s6802_s28 }
0x33ec   :  { %v6618_v51 = vpop.eup %6617 }
0x33ed   :  { %v4101_v34 = vadd.f32 1.0, %v6618_v51 }
0x33ef   :  { %6619 = vrcp.f32 %v4101_v34  ;;  %v8632_v34 = vld [vmem:[%s8990_s2 + $0x8] sm:$0xff] }
0x33f0   :  { %9124 = vst [vmem:[#allocation17_spill] sm:$0xff] %v8632_v34 }
0x33f9   :  { %v6620_v43 = vpop.eup %6619 }
0x33fa   :  { %v4105_v9 = vmul.f32 %v6620_v43, %v8460_v29 }
0x345d   :  { %v4108_v22 = vpop.permute.xlu0 %4107 }
0x345e   :  { %v4110_v61 = vmul.f32 %v6620_v43, %v4108_v22  ;;  %v8638_v22 = vld [vmem:[%s8990_s2 + $0x20] sm:$0xff] }
0x345f   :  { %9125 = vst [vmem:[#allocation19_spill] sm:$0xff] %v8638_v22 }
0x3460   :  { %4112 = vrot.lane.b32.xlu1 %v4110_v61, %s6803_s7 }
0x34d2   :  { %v4113_v49 = vpop.permute.xlu1 %4112 }
0x34d3   :  { %v8605_v31 = vadd.f32 %v4113_v49, %v4105_v9  ;;  %v8644_v9 = vld [vmem:[%s8990_s2 + $0x30] sm:$0xff] }
0x34d4   :  { %9126 = vst [vmem:[#allocation18_spill] sm:$0xff] %v8644_v9 }
0x34d5   :  { %6621 = vtanh.f32 %v8605_v31 }
0x34df   :  { %v6622_v50 = vpop.eup %6621 }
0x34e0   :  { %4118 = vrot.lane.b32.xlu0 %v6622_v50, %s6802_s28  ;;  %v8650_v50 = vld [vmem:[%s8990_s2 + $0x28] sm:$0xff] }
0x34e1   :  { %9127 = vst [vmem:[#allocation21_spill] sm:$0xff] %v8650_v50 }
0x3552   :  { %v4119_v30 = vpop.permute.xlu0 %4118 }
0x3553   :  { %v8609_v18 = vmul.f32 %v6620_v43, %v4119_v30 }
0x3555   :  { %4123 = vrot.lane.b32.xlu1 %v8609_v18, %s6803_s7 }
0x35c7   :  { %v4124_v32 = vpop.permute.xlu1 %4123 }
0x35c8   :  { %v4127_v19 = vmul.f32 %v7771_v39, %v4124_v32  ;;  %v4126_v27 = vmul.f32 %v4124_v32, %v7773_v56  ;;  %v4130_v57 = vmul.f32 %v4124_v32, %v9108_v14  ;;  %v4128_v2 = vmul.f32 %v4124_v32, %v7777_v16 }
0x35c9   :  { %v4132_v37 = vmul.f32 %v4124_v32, %v9110_v25  ;;  %v4129_v13 = vmul.f32 %v9097_v54, %v4124_v32  ;;  %v4131_v41 = vmul.f32 %v9109_v11, %v4124_v32  ;;  %v4133_v3 = vmul.f32 %v9111_v36, %v4124_v32  ;;  %v8656_v32 = vld [vmem:[%s8990_s2] sm:$0xff] }
0x35ca   :  { %v4137_v29 = vsel %vm148_vm0, %v4127_v19, 0.0  ;;  %v4134_v59 = vsel %vm148_vm0, %v4126_v27, 0.0  ;;  %v4146_v62 = vsel %vm148_vm0, %v4130_v57, 0.0  ;;  %v4140_v28 = vsel %vm148_vm0, %v4128_v2, 0.0  ;;  %9128 = vst [vmem:[#allocation26_spill] sm:$0xff] %v8656_v32  ;;  %v8662_v27 = vld [vmem:[%s8990_s2 + $0x10] sm:$0xff] }
0x35cb   :  { %4138 = vadd.xlane.f32.xlu1 %v4137_v29  ;;  %4135 = vadd.xlane.f32.xlu0 %v4134_v59  ;;  %v4152_v15 = vsel %vm148_vm0, %v4132_v37, 0.0  ;;  %v4143_v45 = vsel %vm148_vm0, %v4129_v13, 0.0  ;;  %v4149_v63 = vsel %vm148_vm0, %v4131_v41, 0.0  ;;  %v4155_v0 = vsel %vm148_vm0, %v4133_v3, 0.0  ;;  %9129 = vst [vmem:[#allocation23_spill] sm:$0xff] %v8662_v27  ;;  %v8668_v59 = vld [vmem:[%s8990_s2 + $0x18] sm:$0xff] }
0x35cc   :  { %9130 = vst [vmem:[#allocation22_spill] sm:$0xff] %v8668_v59 }
0x35cf   :  { %4147 = vadd.xlane.f32.xlu1 %v4146_v62  ;;  %4141 = vadd.xlane.f32.xlu0 %v4140_v28 }
0x35d3   :  { %4153 = vadd.xlane.f32.xlu1 %v4152_v15  ;;  %4144 = vadd.xlane.f32.xlu0 %v4143_v45  ;;  %v8678_v15 = vld [vmem:[%s8990_s2 + $0x38] sm:$0xff] }
0x35d4   :  { %9131 = vst [vmem:[#allocation24_spill] sm:$0xff] %v8678_v15 }
0x35d7   :  { %4150 = vadd.xlane.f32.xlu0 %v4149_v63 }
0x35db   :  { %4156 = vadd.xlane.f32.xlu0 %v4155_v0 }
0x3658   :  { %v4139_v26 = vpop.xlane.xlu1 %4138  ;;  %v4136_v40 = vpop.xlane.xlu0 %4135 }
0x3659   :  { %v4159_v43 = vadd.f32 %v8632_v34, %v4139_v26  ;;  %v4158_v19 = vadd.f32 %v8656_v32, %v4136_v40 }
0x365b   :  { %v4167_v28 = vsel %vm2256_vm12, %v4159_v43, -inf  ;;  %v4166_v63 = vsel %vm2256_vm12, %v4158_v19, -inf }
0x365c   :  { %v4148_v46 = vpop.xlane.xlu1 %4147  ;;  %v4142_v42 = vpop.xlane.xlu0 %4141 }
0x365d   :  { %v4162_v61 = vadd.f32 %v8638_v22, %v4148_v46  ;;  %v4160_v29 = vadd.f32 %v8662_v27, %v4142_v42 }
0x365f   :  { %v4170_v37 = vsel %vm2256_vm12, %v4162_v61, -inf  ;;  %v4168_v3 = vsel %vm2256_vm12, %v4160_v29, -inf }
0x3660   :  { %v4145_v12 = vpop.xlane.xlu0 %4144  ;;  %v4154_v5 = vpop.xlane.xlu1 %4153  ;;  %v4171_v40 = vmax.f32 %v4166_v63, %v4170_v37 }
0x3661   :  { %v4164_v49 = vadd.f32 %v8644_v9, %v4154_v5  ;;  %v4161_v57 = vadd.f32 %v8668_v59, %v4145_v12 }
0x3663   :  { %v4174_v13 = vsel %vm2256_vm12, %v4164_v49, -inf  ;;  %v4169_v0 = vsel %vm2256_vm12, %v4161_v57, -inf }
0x3664   :  { %v4151_v51 = vpop.xlane.xlu0 %4150  ;;  %v4175_v46 = vmax.f32 %v4168_v3, %v4174_v13 }
0x3665   :  { %v4163_v30 = vadd.f32 %v8650_v50, %v4151_v51 }
0x3667   :  { %v4172_v2 = vsel %vm2256_vm12, %v4163_v30, -inf }
0x3668   :  { %v4157_v62 = vpop.xlane.xlu0 %4156  ;;  %v4173_v41 = vmax.f32 %v4167_v28, %v4172_v2 }
0x3669   :  { %v4165_v45 = vadd.f32 %v8678_v15, %v4157_v62 }
0x366a   :  { %v4178_v12 = vmax.f32 %v4171_v40, %v4173_v41 }
0x366b   :  { %v4176_v26 = vsel %vm2256_vm12, %v4165_v45, -inf }
0x366c   :  { %v4177_v42 = vmax.f32 %v4169_v0, %v4176_v26 }
0x366e   :  { %v4179_v5 = vmax.f32 %v4175_v46, %v4177_v42 }
0x3670   :  { %v4180_v51 = vmax.f32 %v4178_v12, %v4179_v5 }
0x3672   :  { %v4181_v9 = vsub.f32 %v4158_v19, %v4180_v51  ;;  %v4182_v59 = vsub.f32 %v4159_v43, %v4180_v51  ;;  %v4183_v27 = vsub.f32 %v4160_v29, %v4180_v51  ;;  %v4184_v50 = vsub.f32 %v4161_v57, %v4180_v51 }
0x3673   :  { %v4185_v62 = vsub.f32 %v4162_v61, %v4180_v51  ;;  %v4186_v22 = vsub.f32 %v4163_v30, %v4180_v51  ;;  %v4187_v34 = vsub.f32 %v4164_v49, %v4180_v51  ;;  %v4188_v37 = vsub.f32 %v4165_v45, %v4180_v51 }
0x3674   :  { %v4189_v2 = vmul.f32 1.442695, %v4181_v9  ;;  %v4191_v28 = vmul.f32 1.442695, %v4182_v59  ;;  %v4193_v15 = vmul.f32 1.442695, %v4183_v27 }
0x3675   :  { %v4195_v32 = vmul.f32 1.442695, %v4184_v50  ;;  %v4197_v36 = vmul.f32 1.442695, %v4185_v62  ;;  %v4199_v13 = vmul.f32 1.442695, %v4186_v22 }
0x3676   :  { %6623 = vpow2.f32 %v4189_v2  ;;  %v4201_v41 = vmul.f32 1.442695, %v4187_v34  ;;  %v4203_v43 = vmul.f32 1.442695, %v4188_v37 }
0x3677   :  { %6625 = vpow2.f32 %v4191_v28 }
0x3678   :  { %6627 = vpow2.f32 %v4193_v15 }
0x3679   :  { %6629 = vpow2.f32 %v4195_v32 }
0x367a   :  { %6631 = vpow2.f32 %v4197_v36 }
0x367b   :  { %6633 = vpow2.f32 %v4199_v13 }
0x367c   :  { %6635 = vpow2.f32 %v4201_v41 }
0x367d   :  { %6637 = vpow2.f32 %v4203_v43 }
0x3680   :  { %v6624_v19 = vpop.eup %6623 }
0x3681   :  { %v6626_v61 = vpop.eup %6625  ;;  %v4205_v9 = vsel %vm2256_vm12, %v6624_v19, 0.0 }
0x3682   :  { %v6628_v30 = vpop.eup %6627  ;;  %v4206_v50 = vsel %vm2256_vm12, %v6626_v61, 0.0 }
0x3683   :  { %v6630_v49 = vpop.eup %6629  ;;  %v4207_v27 = vadd.f32 %v4206_v50, %v4205_v9  ;;  %v4208_v29 = vsel %vm2256_vm12, %v6628_v30, 0.0 }
0x3684   :  { %v6632_v59 = vpop.eup %6631  ;;  %v4210_v36 = vsel %vm2256_vm12, %v6630_v49, 0.0 }
0x3685   :  { %v4209_v32 = vadd.f32 %v4208_v29, %v4207_v27  ;;  %v6634_v34 = vpop.eup %6633  ;;  %v4212_v57 = vsel %vm2256_vm12, %v6632_v59, 0.0 }
0x3686   :  { %v6636_v15 = vpop.eup %6635  ;;  %v4214_v63 = vsel %vm2256_vm12, %v6634_v34, 0.0 }
0x3687   :  { %v4211_v22 = vadd.f32 %v4210_v36, %v4209_v32  ;;  %v6638_v3 = vpop.eup %6637  ;;  %v4216_v26 = vsel %vm2256_vm12, %v6636_v15, 0.0 }
0x3688   :  { %v4218_v46 = vsel %vm2256_vm12, %v6638_v3, 0.0 }
0x3689   :  { %v4213_v45 = vadd.f32 %v4212_v57, %v4211_v22 }
0x368b   :  { %v4215_v0 = vadd.f32 %v4214_v63, %v4213_v45 }
0x368d   :  { %v4217_v40 = vadd.f32 %v4216_v26, %v4215_v0  ;;  %v8708_v0 = vld [vmem:[#allocation4 + $0x20] sm:$0xff] }
0x368f   :  { %v4219_v42 = vadd.f32 %v4218_v46, %v4217_v40 }
0x3691   :  { %6639 = vrcp.f32 %v4219_v42 }
0x369b   :  { %v6640_v12 = vpop.eup %6639 }
0x369c   :  { %v4222_v5 = vmul.f32 %v6640_v12, %v6626_v61  ;;  %v4221_v51 = vmul.f32 %v6640_v12, %v6624_v19  ;;  %v4225_v62 = vmul.f32 %v6640_v12, %v6632_v59  ;;  %v4223_v2 = vmul.f32 %v6640_v12, %v6628_v30 }
0x369d   :  { %v4227_v28 = vmul.f32 %v6640_v12, %v6636_v15  ;;  %v4224_v37 = vmul.f32 %v6640_v12, %v6630_v49  ;;  %v4226_v13 = vmul.f32 %v6640_v12, %v6634_v34  ;;  %v4228_v41 = vmul.f32 %v6640_v12, %v6638_v3 }
0x369e   :  { %4236 = vperm.xlu0 %6345, %v4222_v5   ;;  %4231 = vperm.xlu1 %6346, %v4221_v51  }
0x36a2   :  { %4251 = vperm.xlu0 %6345, %v4225_v62   ;;  %4241 = vperm.xlu1 %6346, %v4223_v2  }
0x36a6   :  { %4261 = vperm.xlu0 %6345, %v4227_v28   ;;  %4246 = vperm.xlu1 %6346, %v4224_v37  }
0x36aa   :  { %4256 = vperm.xlu1 %6346, %v4226_v13  }
0x36ae   :  { %4266 = vperm.xlu1 %6346, %v4228_v41  }
0x36b2   :  { %4319 = vrot.lane.b32.xlu1 %v8609_v18, %s6804_s12 }
0x371d   :  { %v4237_v43 = vpop.permute.xlu0 %4236  ;;  %v4232_v61 = vpop.permute.xlu1 %4231 }
0x371e   :  { %v4270_v19 = vmul.f32 %v8510_v1, %v4237_v43  ;;  %v4293_v9 = vmul.f32 %v8513_v33, %v4237_v43  ;;  %v4269_v30 = vmul.f32 %v8516_v4, %v4232_v61  ;;  %v4292_v50 = vmul.f32 %v8519_v21, %v4232_v61 }
0x3720   :  { %v4278_v49 = vsel %vm148_vm0, %v4270_v19, 0.0  ;;  %v4277_v27 = vsel %vm148_vm0, %v4269_v30, 0.0  ;;  %v4301_v36 = vsel %vm148_vm0, %v4293_v9, 0.0  ;;  %v4300_v34 = vsel %vm148_vm0, %v4292_v50, 0.0  ;;  %v8719_v9 = vld [vmem:[#allocation3 + $0x28] sm:$0xff] }
0x3721   :  { %v4279_v29 = vadd.f32 %v4278_v49, %v4277_v27  ;;  %v4252_v59 = vpop.permute.xlu0 %4251  ;;  %v4242_v32 = vpop.permute.xlu1 %4241  ;;  %v4302_v63 = vadd.f32 %v4301_v36, %v4300_v34 }
0x3722   :  { %v4271_v22 = vmul.f32 %v8526_v6, %v4242_v32  ;;  %v4294_v57 = vmul.f32 %v8529_v8, %v4242_v32  ;;  %v4273_v3 = vmul.f32 %v8542_v44, %v4252_v59  ;;  %v4296_v26 = vmul.f32 %v8708_v0, %v4252_v59 }
0x3724   :  { %v4280_v15 = vsel %vm148_vm0, %v4271_v22, 0.0  ;;  %v4303_v45 = vsel %vm148_vm0, %v4294_v57, 0.0  ;;  %v4284_v28 = vsel %vm148_vm0, %v4273_v3, 0.0  ;;  %v4307_v37 = vsel %vm148_vm0, %v4296_v26, 0.0 }
0x3725   :  { %v4281_v40 = vadd.f32 %v4280_v15, %v4279_v29  ;;  %v4247_v46 = vpop.permute.xlu1 %4246  ;;  %v4304_v5 = vadd.f32 %v4303_v45, %v4302_v63  ;;  %v4262_v51 = vpop.permute.xlu0 %4261  ;;  %v8727_v15 = vld [vmem:[#allocation3 + $0x38] sm:$0xff] }
0x3726   :  { %v4272_v42 = vmul.f32 %v8532_v24, %v4247_v46  ;;  %v4295_v12 = vmul.f32 %v8535_v38, %v4247_v46  ;;  %v4275_v61 = vmul.f32 %v8554_v55, %v4262_v51  ;;  %v4298_v19 = vmul.f32 %v8557_v10, %v4262_v51 }
0x3728   :  { %v4282_v62 = vsel %vm148_vm0, %v4272_v42, 0.0  ;;  %v4305_v2 = vsel %vm148_vm0, %v4295_v12, 0.0  ;;  %v4288_v22 = vsel %vm148_vm0, %v4275_v61, 0.0  ;;  %v4311_v57 = vsel %vm148_vm0, %v4298_v19, 0.0 }
0x3729   :  { %v4283_v13 = vadd.f32 %v4282_v62, %v4281_v40  ;;  %v4306_v41 = vadd.f32 %v4305_v2, %v4304_v5  ;;  %v4257_v43 = vpop.permute.xlu1 %4256 }
0x372a   :  { %v4274_v30 = vmul.f32 %v8719_v9, %v4257_v43  ;;  %v4297_v50 = vmul.f32 %v8547_v7, %v4257_v43 }
0x372b   :  { %v4285_v49 = vadd.f32 %v4284_v28, %v4283_v13  ;;  %v4308_v27 = vadd.f32 %v4307_v37, %v4306_v41 }
0x372c   :  { %v4286_v29 = vsel %vm148_vm0, %v4274_v30, 0.0  ;;  %v4309_v59 = vsel %vm148_vm0, %v4297_v50, 0.0 }
0x372d   :  { %v4287_v32 = vadd.f32 %v4286_v29, %v4285_v49  ;;  %v4310_v36 = vadd.f32 %v4309_v59, %v4308_v27  ;;  %v4267_v34 = vpop.permute.xlu1 %4266 }
0x372e   :  { %v4276_v45 = vmul.f32 %v8727_v15, %v4267_v34  ;;  %v4299_v63 = vmul.f32 %v8561_v23, %v4267_v34 }
0x372f   :  { %v4289_v3 = vadd.f32 %v4288_v22, %v4287_v32  ;;  %v4312_v26 = vadd.f32 %v4311_v57, %v4310_v36 }
0x3730   :  { %v4290_v40 = vsel %vm148_vm0, %v4276_v45, 0.0  ;;  %v4313_v46 = vsel %vm148_vm0, %v4299_v63, 0.0 }
0x3731   :  { %v4291_v42 = vadd.f32 %v4290_v40, %v4289_v3  ;;  %v4314_v12 = vadd.f32 %v4313_v46, %v4312_v26  ;;  %v4320_v51 = vpop.permute.xlu1 %4319  ;;  %v9132_v46 = vld [vmem:[#allocation20_spill] sm:$0xff] }
0x3733   :  { %4316 = vrot.lane.b32.xlu0 %v4314_v12, %s6803_s7 }
0x3737   :  { %4400 = vrot.lane.b32.xlu0 %v8609_v18, %s6802_s28 }
0x37a5   :  { %v4317_v5 = vpop.permute.xlu0 %4316 }
0x37a6   :  { %v4322_v62 = vsel %vm148_vm0, %v4291_v42, %v4317_v5 }
0x37a7   :  { %v4323_v2 = vsel %vm450_vm2, %v4322_v62, %v4320_v51 }
0x37a8   :  { %5789 = vmatmul.mubr.msk.f32.vlgmr.msra.gmra.mrb[20].mxu0 %vm1730_vm11, %v4323_v2 }
0x37a9   :  { %6242 = vmatpush3.bf16.msra.mxu0 %v7894_v53  ;;  %5834 = vmatprep.mubr.msk.f32.mxu0 %vm6806_vm9, %v9082_v60  ;;  %v4401_v28 = vpop.permute.xlu0 %4400 }
0x37aa   :  { %6243 = vmatprep.subr.bf16.mxu0 %v9081_v20 }
0x37ad   :  { %6245 = vmatpush3.bf16.msra.mxu0 %v7900_v47 }
0x37ae   :  { %6246 = vmatprep.subr.bf16.mxu0 %v9081_v20 }
0x37b1   :  { %6248 = vmatpush3.bf16.msra.mxu0 %v7912_v35 }
0x37b2   :  { %6249 = vmatprep.subr.bf16.mxu0 %v9081_v20 }
0x37b5   :  { %6251 = vmatpush3.bf16.msra.mxu0 %v7924_v48 }
0x37b6   :  { %6252 = vmatprep.subr.bf16.mxu0 %v9081_v20 }
0x37b9   :  { %6254 = vmatpush3.bf16.msra.mxu0 %v7936_v58 }
0x37ba   :  { %6255 = vmatprep.subr.bf16.mxu0 %v9081_v20 }
0x37bd   :  { %6257 = vmatpush3.bf16.msra.mxu0 %v7948_v52 }
0x37be   :  { %6258 = vmatprep.subr.bf16.mxu0 %v9081_v20 }
0x387b   :  { %v4393_v53 = vpop.f32.mrb[20].mxu0 }
0x387c   :  { %6641 = vtanh.f32 %v4393_v53  ;;  %v5790_v47 = vpop.f32.mrb[21].mxu0  ;;  %v9133_v53 = vld [vmem:[#allocation17_spill] sm:$0xff] }
0x3886   :  { %v6642_v18 = vpop.eup %6641 }
0x3887   :  { %4399 = vst.msk [vmem:[#allocation6 + $0x28] sm:$0xff] %vm148_vm0, %v6642_v18  ;;  %v4403_v35 = vsel %vm148_vm0, %v6642_v18, %v4401_v28  ;;  %v9134_v18 = vld [vmem:[#allocation26_spill] sm:$0xff]  ;;  %v9135_v28 = vld [vmem:[#allocation19_spill] sm:$0xff] }
0x3888   :  { %5808 = vmatmul.mubr.msk.f32.vlgmr.msra.gmra.mrb[20].mxu1 %vm450_vm2, %v4403_v35 }
0x395b   :  { %v4475_v48 = vpop.f32.mrb[20].mxu1 }
0x395c   :  { %v6298_v58 = vadd.f32 %v8599_v17, %v4475_v48  ;;  %v5809_v37 = vpop.f32.mrb[21].mxu1  ;;  %v9136_v48 = vld [vmem:[#allocation21_spill] sm:$0xff] }
0x395d   :  { %v9137_v37 = vld [vmem:[#allocation23_spill] sm:$0xff] }
0x395e   :  { %6643 = vtanh.f32 %v6298_v58  ;;  %v5178_v52 = vmul.f32 -1.442695, %v6298_v58 }
0x3960   :  { %6645 = vpow2.f32 %v5178_v52  ;;  %v9138_v52 = vld [vmem:[#allocation22_spill] sm:$0xff] }
0x3968   :  { %v6644_v13 = vpop.eup %6643 }
0x3969   :  { %4489 = vrot.lane.b32.xlu1 %v6644_v13, %s6802_s28 }
0x396a   :  { %v6646_v41 = vpop.eup %6645 }
0x396b   :  { %v4483_v43 = vadd.f32 1.0, %v6646_v41 }
0x396d   :  { %6647 = vrcp.f32 %v4483_v43 }
0x3977   :  { %v6648_v61 = vpop.eup %6647 }
0x3978   :  { %v4487_v50 = vmul.f32 %v6648_v61, %v8605_v31 }
0x39db   :  { %v4490_v19 = vpop.permute.xlu1 %4489 }
0x39dc   :  { %v4492_v30 = vmul.f32 %v6648_v61, %v4490_v19 }
0x39de   :  { %4494 = vrot.lane.b32.xlu0 %v4492_v30, %s6803_s7 }
0x3a50   :  { %v4495_v49 = vpop.permute.xlu0 %4494 }
0x3a51   :  { %v4497_v27 = vadd.f32 %v4495_v49, %v4487_v50 }
0x3a53   :  { %6649 = vtanh.f32 %v4497_v27  ;;  %v9139_v27 = vld [vmem:[#allocation18_spill] sm:$0xff] }
0x3a5d   :  { %v6650_v17 = vpop.eup %6649 }
0x3a5e   :  { %4500 = vrot.lane.b32.xlu1 %v6650_v17, %s6802_s28 }
0x3ad0   :  { %v4501_v29 = vpop.permute.xlu1 %4500 }
0x3ad1   :  { %v8761_v59 = vmul.f32 %v6648_v61, %v4501_v29  ;;  %v9140_v29 = vld [vmem:[#allocation24_spill] sm:$0xff] }
0x3ad3   :  { %4505 = vrot.lane.b32.xlu0 %v8761_v59, %s6803_s7 }
0x3b45   :  { %v4506_v32 = vpop.permute.xlu0 %4505 }
0x3b46   :  { %v4509_v36 = vmul.f32 %v7771_v39, %v4506_v32  ;;  %v4508_v34 = vmul.f32 %v4506_v32, %v7773_v56  ;;  %v4510_v57 = vmul.f32 %v4506_v32, %v7777_v16  ;;  %v4511_v45 = vmul.f32 %v9097_v54, %v4506_v32 }
0x3b47   :  { %v4512_v26 = vmul.f32 %v4506_v32, %v9108_v14  ;;  %v4513_v39 = vmul.f32 %v9109_v11, %v4506_v32  ;;  %v4514_v16 = vmul.f32 %v4506_v32, %v9110_v25  ;;  %v4515_v54 = vmul.f32 %v9132_v46, %v4506_v32 }
0x3b48   :  { %v4519_v22 = vsel %vm148_vm0, %v4509_v36, 0.0  ;;  %v4516_v31 = vsel %vm148_vm0, %v4508_v34, 0.0  ;;  %v4522_v63 = vsel %vm148_vm0, %v4510_v57, 0.0  ;;  %v4525_v3 = vsel %vm148_vm0, %v4511_v45, 0.0 }
0x3b49   :  { %4520 = vadd.xlane.f32.xlu0 %v4519_v22  ;;  %4517 = vadd.xlane.f32.xlu1 %v4516_v31  ;;  %v4528_v56 = vsel %vm148_vm0, %v4512_v26, 0.0  ;;  %v4531_v40 = vsel %vm148_vm0, %v4513_v39, 0.0  ;;  %v4534_v42 = vsel %vm148_vm0, %v4514_v16, 0.0  ;;  %v4537_v12 = vsel %vm148_vm0, %v4515_v54, 0.0 }
0x3b4d   :  { %4523 = vadd.xlane.f32.xlu0 %v4522_v63  ;;  %4526 = vadd.xlane.f32.xlu1 %v4525_v3 }
0x3b51   :  { %4529 = vadd.xlane.f32.xlu0 %v4528_v56  ;;  %4532 = vadd.xlane.f32.xlu1 %v4531_v40 }
0x3b55   :  { %4535 = vadd.xlane.f32.xlu0 %v4534_v42  ;;  %4538 = vadd.xlane.f32.xlu1 %v4537_v12 }
0x3bd6   :  { %v4521_v14 = vpop.xlane.xlu0 %4520  ;;  %v4518_v11 = vpop.xlane.xlu1 %4517 }
0x3bd7   :  { %v4541_v47 = vadd.f32 %v9133_v53, %v4521_v14  ;;  %v4540_v25 = vadd.f32 %v9134_v18, %v4518_v11 }
0x3bd9   :  { %v4549_v50 = vsel %vm2256_vm12, %v4541_v47, -inf  ;;  %v4548_v49 = vsel %vm2256_vm12, %v4540_v25, -inf }
0x3bda   :  { %v4524_v5 = vpop.xlane.xlu0 %4523  ;;  %v4527_v51 = vpop.xlane.xlu1 %4526 }
0x3bdb   :  { %v4542_v13 = vadd.f32 %v9137_v37, %v4524_v5  ;;  %v4543_v41 = vadd.f32 %v9138_v52, %v4527_v51 }
0x3bdd   :  { %v4550_v22 = vsel %vm2256_vm12, %v4542_v13, -inf  ;;  %v4551_v31 = vsel %vm2256_vm12, %v4543_v41, -inf }
0x3bde   :  { %v4530_v62 = vpop.xlane.xlu0 %4529  ;;  %v4533_v2 = vpop.xlane.xlu1 %4532 }
0x3bdf   :  { %v4544_v35 = vadd.f32 %v9135_v28, %v4530_v62  ;;  %v4545_v58 = vadd.f32 %v9136_v48, %v4533_v2 }
0x3be1   :  { %v4552_v43 = vsel %vm2256_vm12, %v4544_v35, -inf  ;;  %v4554_v61 = vsel %vm2256_vm12, %v4545_v58, -inf }
0x3be2   :  { %v4536_v19 = vpop.xlane.xlu0 %4535  ;;  %v4539_v30 = vpop.xlane.xlu1 %4538  ;;  %v4553_v36 = vmax.f32 %v4548_v49, %v4552_v43  ;;  %v4555_v34 = vmax.f32 %v4549_v50, %v4554_v61 }
0x3be3   :  { %v4546_v17 = vadd.f32 %v9139_v27, %v4536_v19  ;;  %v4547_v32 = vadd.f32 %v9140_v29, %v4539_v30 }
0x3be4   :  { %v4560_v26 = vmax.f32 %v4553_v36, %v4555_v34 }
0x3be5   :  { %v4556_v57 = vsel %vm2256_vm12, %v4546_v17, -inf  ;;  %v4558_v45 = vsel %vm2256_vm12, %v4547_v32, -inf }
0x3be6   :  { %v4557_v63 = vmax.f32 %v4550_v22, %v4556_v57  ;;  %v4559_v3 = vmax.f32 %v4551_v31, %v4558_v45 }
0x3be8   :  { %v4561_v39 = vmax.f32 %v4557_v63, %v4559_v3 }
0x3bea   :  { %v4562_v56 = vmax.f32 %v4560_v26, %v4561_v39 }
0x3bec   :  { %v4563_v40 = vsub.f32 %v4540_v25, %v4562_v56  ;;  %v4564_v16 = vsub.f32 %v4541_v47, %v4562_v56  ;;  %v4565_v46 = vsub.f32 %v4542_v13, %v4562_v56  ;;  %v4566_v54 = vsub.f32 %v4543_v41, %v4562_v56 }
0x3bed   :  { %v4567_v42 = vsub.f32 %v4544_v35, %v4562_v56  ;;  %v4568_v5 = vsub.f32 %v4545_v58, %v4562_v56  ;;  %v4569_v62 = vsub.f32 %v4546_v17, %v4562_v56  ;;  %v4570_v53 = vsub.f32 %v4547_v32, %v4562_v56 }
0x3bee   :  { %v4571_v12 = vmul.f32 1.442695, %v4563_v40  ;;  %v4573_v14 = vmul.f32 1.442695, %v4564_v16  ;;  %v4575_v11 = vmul.f32 1.442695, %v4565_v46 }
0x3bef   :  { %v4577_v51 = vmul.f32 1.442695, %v4566_v54  ;;  %v4579_v2 = vmul.f32 1.442695, %v4567_v42  ;;  %v4581_v18 = vmul.f32 1.442695, %v4568_v5 }
0x3bf0   :  { %6651 = vpow2.f32 %v4571_v12  ;;  %v4583_v28 = vmul.f32 1.442695, %v4569_v62  ;;  %v4585_v47 = vmul.f32 1.442695, %v4570_v53  ;;  %v4987_v54 = vld [vmem:[%s8992_s4 + $0x8] sm:$0xff]  ;;  %v4990_v42 = vld [vmem:[%s8992_s4 + $0x20] sm:$0xff] }
0x3bf1   :  { %6653 = vpow2.f32 %v4573_v14 }
0x3bf2   :  { %6655 = vpow2.f32 %v4575_v11 }
0x3bf3   :  { %6657 = vpow2.f32 %v4577_v51 }
0x3bf4   :  { %6659 = vpow2.f32 %v4579_v2 }
0x3bf5   :  { %6661 = vpow2.f32 %v4581_v18 }
0x3bf6   :  { %6663 = vpow2.f32 %v4583_v28 }
0x3bf7   :  { %6665 = vpow2.f32 %v4585_v47 }
0x3bfa   :  { %v6652_v25 = vpop.eup %6651 }
0x3bfb   :  { %v6654_v35 = vpop.eup %6653  ;;  %v4587_v48 = vsel %vm2256_vm12, %v6652_v25, 0.0 }
0x3bfc   :  { %v6656_v58 = vpop.eup %6655  ;;  %v4588_v37 = vsel %vm2256_vm12, %v6654_v35, 0.0 }
0x3bfd   :  { %v6658_v13 = vpop.eup %6657  ;;  %v4589_v52 = vadd.f32 %v4588_v37, %v4587_v48  ;;  %v4590_v41 = vsel %vm2256_vm12, %v6656_v58, 0.0 }
0x3bfe   :  { %v6660_v43 = vpop.eup %6659  ;;  %v4592_v19 = vsel %vm2256_vm12, %v6658_v13, 0.0 }
0x3bff   :  { %v4591_v61 = vadd.f32 %v4590_v41, %v4589_v52  ;;  %v6662_v30 = vpop.eup %6661  ;;  %v4594_v49 = vsel %vm2256_vm12, %v6660_v43, 0.0 }
0x3c00   :  { %v6664_v27 = vpop.eup %6663  ;;  %v4596_v29 = vsel %vm2256_vm12, %v6662_v30, 0.0 }
0x3c01   :  { %v4593_v50 = vadd.f32 %v4592_v19, %v4591_v61  ;;  %v6666_v32 = vpop.eup %6665  ;;  %v4598_v34 = vsel %vm2256_vm12, %v6664_v27, 0.0 }
0x3c02   :  { %v4600_v31 = vsel %vm2256_vm12, %v6666_v32, 0.0 }
0x3c03   :  { %v4595_v17 = vadd.f32 %v4594_v49, %v4593_v50 }
0x3c05   :  { %v4597_v36 = vadd.f32 %v4596_v29, %v4595_v17 }
0x3c07   :  { %v4599_v22 = vadd.f32 %v4598_v34, %v4597_v36 }
0x3c09   :  { %v4601_v57 = vadd.f32 %v4600_v31, %v4599_v22 }
0x3c0b   :  { %6667 = vrcp.f32 %v4601_v57 }
0x3c15   :  { %v6668_v45 = vpop.eup %6667 }
0x3c16   :  { %v4604_v63 = vmul.f32 %v6668_v45, %v6654_v35  ;;  %v4603_v3 = vmul.f32 %v6668_v45, %v6652_v25  ;;  %v4605_v26 = vmul.f32 %v6668_v45, %v6656_v58  ;;  %v4606_v39 = vmul.f32 %v6668_v45, %v6658_v13 }
0x3c17   :  { %v4607_v56 = vmul.f32 %v6668_v45, %v6660_v43  ;;  %v4608_v40 = vmul.f32 %v6668_v45, %v6662_v30  ;;  %v4609_v16 = vmul.f32 %v6668_v45, %v6664_v27  ;;  %v4610_v46 = vmul.f32 %v6668_v45, %v6666_v32 }
0x3c18   :  { %4618 = vperm.xlu1 %6346, %v4604_v63   ;;  %4613 = vperm.xlu0 %6345, %v4603_v3  }
0x3c1c   :  { %4623 = vperm.xlu1 %6346, %v4605_v26   ;;  %4628 = vperm.xlu0 %6345, %v4606_v39  }
0x3c20   :  { %4633 = vperm.xlu1 %6346, %v4607_v56   ;;  %4638 = vperm.xlu0 %6345, %v4608_v40   ;;  %v4789_v40 = vld [vmem:[%s9004_s16] sm:$0xff] }
0x3c24   :  { %4643 = vperm.xlu1 %6346, %v4609_v16   ;;  %4648 = vperm.xlu0 %6345, %v4610_v46   ;;  %v4790_v16 = vld [vmem:[%s9004_s16 + $0x8] sm:$0xff] }
0x3c28   :  { %4701 = vrot.lane.b32.xlu0 %v8761_v59, %s6804_s12 }
0x3c2c   :  { %4997 = vperm.xlu0 %6345, %v4987_v54   ;;  %v6259_v54 = vpack.c.bf16 %v4790_v16, %v4789_v40 }
0x3c30   :  { %5006 = vperm.xlu0 %6345, %v4990_v42  }
0x3c97   :  { %v4619_v12 = vpop.permute.xlu1 %4618  ;;  %v4614_v14 = vpop.permute.xlu0 %4613 }
0x3c98   :  { %v4652_v11 = vmul.f32 %v8510_v1, %v4619_v12  ;;  %v4675_v5 = vmul.f32 %v8513_v33, %v4619_v12  ;;  %v4651_v51 = vmul.f32 %v8516_v4, %v4614_v14  ;;  %v4674_v59 = vmul.f32 %v8519_v21, %v4614_v14  ;;  %v4791_v14 = vld [vmem:[%s9004_s16 + $0x10] sm:$0xff] }
0x3c9a   :  { %v4660_v62 = vsel %vm148_vm0, %v4652_v11, 0.0  ;;  %v4683_v2 = vsel %vm148_vm0, %v4675_v5, 0.0  ;;  %v4659_v53 = vsel %vm148_vm0, %v4651_v51, 0.0  ;;  %v4682_v18 = vsel %vm148_vm0, %v4674_v59, 0.0  ;;  %v4792_v11 = vld [vmem:[%s9004_s16 + $0x18] sm:$0xff]  ;;  %v4782_v59 = vld [vmem:[#allocation6] sm:$0xff] }
0x3c9b   :  { %v4661_v28 = vadd.f32 %v4660_v62, %v4659_v53  ;;  %v4624_v47 = vpop.permute.xlu1 %4623  ;;  %v4629_v25 = vpop.permute.xlu0 %4628  ;;  %v4684_v21 = vadd.f32 %v4683_v2, %v4682_v18  ;;  %v6262_v51 = vpack.c.bf16 %v4792_v11, %v4791_v14  ;;  %v4783_v62 = vld [vmem:[#allocation6 + $0x8] sm:$0xff]  ;;  %v4784_v2 = vld [vmem:[#allocation6 + $0x10] sm:$0xff]  ;;  %v4786_v53 = vld [vmem:[#allocation6 + $0x20] sm:$0xff] }
0x3c9c   :  { %v4653_v35 = vmul.f32 %v8526_v6, %v4624_v47  ;;  %v4676_v1 = vmul.f32 %v8529_v8, %v4624_v47  ;;  %v4654_v33 = vmul.f32 %v8532_v24, %v4629_v25  ;;  %v4677_v4 = vmul.f32 %v8535_v38, %v4629_v25  ;;  %v4787_v18 = vld [vmem:[#allocation6 + $0x28] sm:$0xff] }
0x3c9d   :  { %v9141_v25 = vlaneseq }
0x3c9e   :  { %v4662_v48 = vsel %vm148_vm0, %v4653_v35, 0.0  ;;  %v4685_v58 = vsel %vm148_vm0, %v4676_v1, 0.0  ;;  %v4664_v52 = vsel %vm148_vm0, %v4654_v33, 0.0  ;;  %v4687_v41 = vsel %vm148_vm0, %v4677_v4, 0.0 }
0x3c9f   :  { %v4663_v37 = vadd.f32 %v4662_v48, %v4661_v28  ;;  %v4686_v13 = vadd.f32 %v4685_v58, %v4684_v21  ;;  %v4634_v43 = vpop.permute.xlu1 %4633  ;;  %v4639_v61 = vpop.permute.xlu0 %4638  ;;  %v8892_v35 = vand.u32 127, %v9141_v25 }
0x3ca0   :  { %v4655_v6 = vmul.f32 %v8542_v44, %v4634_v43  ;;  %v4678_v8 = vmul.f32 %v8708_v0, %v4634_v43  ;;  %v4656_v24 = vmul.f32 %v8719_v9, %v4639_v61  ;;  %v4679_v38 = vmul.f32 %v8547_v7, %v4639_v61 }
0x3ca1   :  { %v4665_v19 = vadd.f32 %v4664_v52, %v4663_v37  ;;  %v4688_v30 = vadd.f32 %v4687_v41, %v4686_v13 }
0x3ca2   :  { %v4666_v50 = vsel %vm148_vm0, %v4655_v6, 0.0  ;;  %v4689_v49 = vsel %vm148_vm0, %v4678_v8, 0.0  ;;  %v4668_v29 = vsel %vm148_vm0, %v4656_v24, 0.0  ;;  %v4691_v32 = vsel %vm148_vm0, %v4679_v38, 0.0 }
0x3ca3   :  { %v4667_v27 = vadd.f32 %v4666_v50, %v4665_v19  ;;  %v4690_v17 = vadd.f32 %v4689_v49, %v4688_v30  ;;  %v4644_v36 = vpop.permute.xlu1 %4643  ;;  %v4649_v44 = vpop.permute.xlu0 %4648  ;;  %v4991_v30 = vld [vmem:[%s8992_s4 + $0x28] sm:$0xff] }
0x3ca4   :  { %v4657_v0 = vmul.f32 %v8554_v55, %v4644_v36  ;;  %v4680_v9 = vmul.f32 %v8557_v10, %v4644_v36  ;;  %v4658_v7 = vmul.f32 %v8727_v15, %v4649_v44  ;;  %v4681_v34 = vmul.f32 %v8561_v23, %v4649_v44  ;;  %v4986_v10 = vld [vmem:[%s8992_s4] sm:$0xff]  ;;  %v4988_v23 = vld [vmem:[%s8992_s4 + $0x10] sm:$0xff]  ;;  %v4989_v15 = vld [vmem:[%s8992_s4 + $0x18] sm:$0xff] }
0x3ca5   :  { %v4669_v22 = vadd.f32 %v4668_v29, %v4667_v27  ;;  %v4692_v31 = vadd.f32 %v4691_v32, %v4690_v17 }
0x3ca6   :  { %v4670_v57 = vsel %vm148_vm0, %v4657_v0, 0.0  ;;  %v4693_v45 = vsel %vm148_vm0, %v4680_v9, 0.0  ;;  %v4672_v26 = vsel %vm148_vm0, %v4658_v7, 0.0  ;;  %v4695_v39 = vsel %vm148_vm0, %v4681_v34, 0.0 }
0x3ca7   :  { %v4671_v63 = vadd.f32 %v4670_v57, %v4669_v22  ;;  %v4694_v3 = vadd.f32 %v4693_v45, %v4692_v31  ;;  %v4702_v42 = vpop.permute.xlu0 %4701 }
0x3ca9   :  { %v4673_v56 = vadd.f32 %v4672_v26, %v4671_v63  ;;  %v4696_v55 = vadd.f32 %v4695_v39, %v4694_v3 }
0x3cab   :  { %4698 = vrot.lane.b32.xlu1 %v4696_v55, %s6803_s7  ;;  %v4998_v1 = vpop.permute.xlu0 %4997 }
0x3cac   :  { %vm5015_vm13 = vcmp.eq.s32.totalorder %v8892_v35, %v4998_v1 }
0x3cad   :  { %v5188_v48 = vsel %vm5015_vm13, 1.0, %v9082_v60 }
0x3caf   :  { %4994 = vperm.xlu1 %6346, %v4986_v10   ;;  %v5007_v3 = vpop.permute.xlu0 %5006 }
0x3cb3   :  { %5000 = vperm.xlu1 %6346, %v4988_v23  }
0x3cb7   :  { %5003 = vperm.xlu1 %6346, %v4989_v15   ;;  %v4992_v15 = vld [vmem:[%s8992_s4 + $0x30] sm:$0xff] }
0x3d1d   :  { %v4699_v46 = vpop.permute.xlu1 %4698 }
0x3d1e   :  { %v4704_v12 = vsel %vm148_vm0, %v4673_v56, %v4699_v46 }
0x3d1f   :  { %v4705_v5 = vsel %vm450_vm2, %v4704_v12, %v4702_v42 }
0x3d20   :  { %5835 = vmatmul.mubr.msk.f32.vlgmr.msra.gmra.mrb[22].mxu0 %vm1730_vm11, %v4705_v5 }
0x3d21   :  { %6260 = vmatpush3.bf16.msra.mxu0 %v6259_v54  ;;  %5845 = vmatprep.mubr.msk.f32.mxu0 %vm6806_vm9, %v9082_v60 }
0x3d22   :  { %6261 = vmatprep.subr.bf16.mxu0 %v9081_v20  ;;  %v4785_v20 = vld [vmem:[#allocation6 + $0x18] sm:$0xff] }
0x3d25   :  { %6263 = vmatpush3.bf16.msra.mxu0 %v6262_v51 }
0x3d28   :  { %5846 = vmatmul.mubr.msk.f32.vlgmr.msra.gmra.mrb[24].mxu0 %vm148_vm0, %v4782_v59 }
0x3d29   :  { %5848 = vmatprep.mubr.msk.f32.mxu0 %vm6806_vm9, %v9082_v60 }
0x3d2c   :  { %5849 = vmatmul.mubr.msk.f32.gmra.mrb[26].mxu0 %vm148_vm0, %v4783_v62 }
0x3d2d   :  { %5851 = vmatprep.mubr.msk.f32.mxu0 %vm6806_vm9, %v9082_v60 }
0x3d2e   :  { %v4995_v50 = vpop.permute.xlu1 %4994 }
0x3d2f   :  { %vm5014_vm14 = vcmp.eq.s32.totalorder %v8892_v35, %v4995_v50 }
0x3d30   :  { %5852 = vmatmul.mubr.msk.f32.gmra.mrb[28].mxu0 %vm148_vm0, %v4784_v2  ;;  %v5187_v45 = vsel %vm5014_vm14, 1.0, %v9082_v60 }
0x3d31   :  { %5854 = vmatprep.mubr.msk.f32.mxu0 %vm6806_vm9, %v9082_v60 }
0x3d32   :  { %v5001_v49 = vpop.permute.xlu1 %5000 }
0x3d33   :  { %vm5016_vm15 = vcmp.eq.s32.totalorder %v8892_v35, %v5001_v49 }
0x3d34   :  { %5855 = vmatmul.mubr.msk.f32.gmra.mrb[30].mxu0 %vm148_vm0, %v4785_v20  ;;  %v5189_v26 = vsel %vm5016_vm15, 1.0, %v9082_v60 }
0x3d35   :  { %5857 = vmatprep.mubr.msk.f32.mxu0 %vm6806_vm9, %v9082_v60 }
0x3d36   :  { %v8909_v27 = vpop.permute.xlu1 %5003 }
0x3d37   :  { %vm5017_vm2 = vcmp.eq.s32.totalorder %v8892_v35, %v8909_v27 }
0x3d38   :  { %5858 = vmatmul.mubr.msk.f32.gmra.mrb[32].mxu0 %vm148_vm0, %v4786_v53 }
0x3d39   :  { %5860 = vmatprep.mubr.msk.f32.mxu0 %vm6806_vm9, %v9082_v60 }
0x3d3c   :  { %5861 = vmatmul.mubr.msk.f32.gmra.mrb[34].mxu0 %vm148_vm0, %v4787_v18 }
0x3d3d   :  { %5863 = vmatprep.mubr.msk.f32.mxu0 %vm6806_vm9, %v9082_v60 }
0x3df3   :  { %v4775_v28 = vpop.f32.mrb[22].mxu0 }
0x3df4   :  { %6669 = vtanh.f32 %v4775_v28  ;;  %v5836_v47 = vpop.f32.mrb[23].mxu0 }
0x3dfb   :  { %v4880_v33 = vpop.f32.mrb[24].mxu0 }
0x3dfc   :  { %4914 = vmax.xlane.f32.xlu1 %v4880_v33  ;;  %v5847_v4 = vpop.f32.mrb[25].mxu0  ;;  %v5035_v63 = vmul.f32 %v5187_v45, %v4880_v33  ;;  %v5064_v45 = vld [vmem:[%s8993_s5 + $0x8] sm:$0xff] }
0x3dfe   :  { %v6670_v21 = vpop.eup %6669 }
0x3dff   :  { %4781 = vst.msk [vmem:[#allocation6 + $0x30] sm:$0xff] %vm148_vm0, %v6670_v21  ;;  %v4885_v58 = vpop.f32.mrb[26].mxu0 }
0x3e00   :  { %v8897_v37 = vmul.f32 %v5188_v48, %v4885_v58  ;;  %4916 = vmax.xlane.f32.xlu0 %v4885_v58  ;;  %v5850_v13 = vpop.f32.mrb[27].mxu0 }
0x3e03   :  { %v4890_v52 = vpop.f32.mrb[28].mxu0 }
0x3e04   :  { %4918 = vmax.xlane.f32.xlu0 %v4890_v52  ;;  %v5853_v41 = vpop.f32.mrb[29].mxu0  ;;  %v5037_v39 = vmul.f32 %v5189_v26, %v4890_v52 }
0x3e06   :  { %v4788_v43 = vld [vmem:[#allocation6 + $0x30] sm:$0xff] }
0x3e07   :  { %v8899_v61 = vpop.f32.mrb[30].mxu0  ;;  %5864 = vmatmul.mubr.msk.f32.gmra.mrb[36].mxu0 %vm148_vm0, %v4788_v43  ;;  %vm5018_vm0 = vcmp.eq.s32.totalorder %v8892_v35, %v5007_v3 }
0x3e08   :  { %4920 = vmax.xlane.f32.xlu1 %v8899_v61  ;;  %v5856_v6 = vpop.f32.mrb[31].mxu0  ;;  %v5191_v56 = vsel %vm5018_vm0, 1.0, %v9082_v60 }
0x3e0b   :  { %v4900_v8 = vpop.f32.mrb[32].mxu0 }
0x3e0c   :  { %4922 = vmax.xlane.f32.xlu0 %v4900_v8  ;;  %v5859_v24 = vpop.f32.mrb[33].mxu0  ;;  %v5039_v55 = vmul.f32 %v5191_v56, %v4900_v8 }
0x3e0f   :  { %v8903_v38 = vpop.f32.mrb[34].mxu0 }
0x3e10   :  { %4924 = vmax.xlane.f32.xlu1 %v8903_v38  ;;  %v5862_v19 = vpop.f32.mrb[35].mxu0 }
0x3e21   :  { %5009 = vperm.xlu1 %6346, %v4991_v30  }
0x3e89   :  { %v8911_v17 = vpop.xlane.xlu1 %4914 }
0x3e8a   :  { %v4928_v29 = vsub.f32 %v4880_v33, %v8911_v17  ;;  %v5190_v33 = vsel %vm5017_vm2, 1.0, %v9082_v60 }
0x3e8b   :  { %v5038_v4 = vmul.f32 %v5190_v33, %v8899_v61 }
0x3e8c   :  { %v4935_v32 = vmul.f32 1.442695, %v4928_v29 }
0x3e8d   :  { %v8931_v40 = vpop.xlane.xlu0 %4916 }
0x3e8e   :  { %6671 = vpow2.f32 %v4935_v32  ;;  %v4929_v16 = vsub.f32 %v4885_v58, %v8931_v40 }
0x3e90   :  { %v4937_v54 = vmul.f32 1.442695, %v4929_v16  ;;  %v5066_v16 = vld [vmem:[%s8993_s5 + $0x18] sm:$0xff] }
0x3e91   :  { %v4919_v46 = vpop.xlane.xlu0 %4918 }
0x3e92   :  { %v4930_v42 = vsub.f32 %v4890_v52, %v4919_v46 }
0x3e94   :  { %v4939_v14 = vmul.f32 1.442695, %v4930_v42 }
0x3e95   :  { %v8914_v36 = vpop.xlane.xlu1 %4920 }
0x3e96   :  { %v4931_v44 = vsub.f32 %v8899_v61, %v8914_v36 }
0x3e98   :  { %v6672_v0 = vpop.eup %6671  ;;  %v4941_v9 = vmul.f32 1.442695, %v4931_v44 }
0x3e99   :  { %4949 = vadd.xlane.f32.xlu1 %v6672_v0  ;;  %v8934_v12 = vpop.xlane.xlu0 %4922 }
0x3e9a   :  { %6673 = vpow2.f32 %v4941_v9  ;;  %v4932_v11 = vsub.f32 %v4900_v8, %v8934_v12  ;;  %v5063_v9 = vld [vmem:[%s8993_s5] sm:$0xff] }
0x3e9c   :  { %v4943_v5 = vmul.f32 1.442695, %v4932_v11 }
0x3e9d   :  { %v8918_v7 = vpop.xlane.xlu1 %4924 }
0x3e9e   :  { %v4933_v34 = vsub.f32 %v8903_v38, %v8918_v7 }
0x3ea0   :  { %v4945_v22 = vmul.f32 1.442695, %v4933_v34 }
0x3ea1   :  { %v5010_v1 = vpop.permute.xlu1 %5009 }
0x3ea2   :  { %6675 = vpow2.f32 %v4945_v22  ;;  %vm5019_vm3 = vcmp.eq.s32.totalorder %v8892_v35, %v5010_v1 }
0x3ea3   :  { %6677 = vpow2.f32 %v4937_v54  ;;  %v5192_v21 = vsel %vm5019_vm3, 1.0, %v9082_v60 }
0x3ea4   :  { %v6674_v31 = vpop.eup %6673  ;;  %6679 = vpow2.f32 %v4939_v14  ;;  %v5040_v48 = vmul.f32 %v5192_v21, %v8903_v38 }
0x3ea5   :  { %4955 = vadd.xlane.f32.xlu1 %v6674_v31  ;;  %6681 = vpow2.f32 %v4943_v5 }
0x3eac   :  { %v6676_v57 = vpop.eup %6675 }
0x3ead   :  { %4959 = vadd.xlane.f32.xlu1 %v6676_v57  ;;  %v6678_v51 = vpop.eup %6677 }
0x3eae   :  { %v6680_v59 = vpop.eup %6679 }
0x3eaf   :  { %v6682_v62 = vpop.eup %6681 }
0x3eb1   :  { %5042 = vadd.xlane.f32.xlu1 %v5035_v63 }
0x3eb5   :  { %5046 = vadd.xlane.f32.xlu1 %v5037_v39 }
0x3eb9   :  { %5050 = vadd.xlane.f32.xlu1 %v5039_v55 }
0x3eda   :  { %v4910_v10 = vpop.f32.mrb[36].mxu0 }
0x3edb   :  { %4926 = vmax.xlane.f32.xlu0 %v4910_v10  ;;  %v5865_v23 = vpop.f32.mrb[37].mxu0 }
0x3ef1   :  { %5012 = vperm.xlu0 %6345, %v4992_v15  }
0x3f10   :  { %4951 = vadd.xlane.f32.xlu0 %v6678_v51 }
0x3f14   :  { %4953 = vadd.xlane.f32.xlu0 %v6680_v59 }
0x3f18   :  { %4957 = vadd.xlane.f32.xlu0 %v6682_v62 }
0x3f26   :  { %v4950_v52 = vpop.xlane.xlu1 %4949 }
0x3f32   :  { %v4956_v43 = vpop.xlane.xlu1 %4955 }
0x3f68   :  { %v8937_v2 = vpop.xlane.xlu0 %4926 }
0x3f69   :  { %v4934_v20 = vsub.f32 %v4910_v10, %v8937_v2 }
0x3f6b   :  { %v4947_v53 = vmul.f32 1.442695, %v4934_v20 }
0x3f6d   :  { %6683 = vpow2.f32 %v4947_v53  ;;  %v5068_v53 = vld [vmem:[%s8993_s5 + $0x28] sm:$0xff] }
0x3f6e   :  { %6685 = vlog2.f32 %v4950_v52 }
0x3f70   :  { %v5013_v18 = vpop.permute.xlu0 %5012 }
0x3f71   :  { %vm5020_vm1 = vcmp.eq.s32.totalorder %v8892_v35, %v5013_v18  ;;  %v4960_v35 = vpop.xlane.xlu1 %4959 }
0x3f72   :  { %v5193_v28 = vsel %vm5020_vm1, 1.0, %v9082_v60 }
0x3f73   :  { %v5041_v47 = vmul.f32 %v5193_v28, %v4910_v10 }
0x3f75   :  { %5054 = vadd.xlane.f32.xlu1 %v5041_v47  ;;  %v5043_v61 = vpop.xlane.xlu1 %5042 }
0x3f77   :  { %v6684_v25 = vpop.eup %6683 }
0x3f78   :  { %4961 = vadd.xlane.f32.xlu0 %v6684_v25 }
0x3f79   :  { %v5047_v29 = vpop.xlane.xlu1 %5046 }
0x3f7c   :  { %5044 = vadd.xlane.f32.xlu0 %v8897_v37  ;;  %v6686_v37 = vpop.eup %6685 }
0x3f7d   :  { %v4964_v8 = vmul.f32 0.6931472, %v6686_v37  ;;  %v5051_v39 = vpop.xlane.xlu1 %5050 }
0x3f7f   :  { %v4977_v30 = vadd.f32 %v4964_v8, %v8911_v17  ;;  %v5065_v17 = vld [vmem:[%s8993_s5 + $0x10] sm:$0xff] }
0x3f80   :  { %5048 = vadd.xlane.f32.xlu0 %v5038_v4  ;;  %v5069_v4 = vld [vmem:[%s8993_s5 + $0x30] sm:$0xff] }
0x3f81   :  { %v5056_v44 = vsub.f32 %v5043_v61, %v4977_v30 }
0x3f83   :  { %v5070_v3 = vmul.f32 %v5063_v9, %v5056_v44 }
0x3f84   :  { %5052 = vadd.xlane.f32.xlu0 %v5040_v48 }
0x3f85   :  { %v5077_v54 = vsel %vm2256_vm12, %v5070_v3, 0.0 }
0x3f9d   :  { %v4952_v58 = vpop.xlane.xlu0 %4951 }
0x3fa1   :  { %v4954_v13 = vpop.xlane.xlu0 %4953 }
0x3fa2   :  { %6687 = vlog2.f32 %v4954_v13 }
0x3fa3   :  { %6689 = vlog2.f32 %v4952_v58 }
0x3fa5   :  { %v4958_v41 = vpop.xlane.xlu0 %4957 }
0x3fa6   :  { %6691 = vlog2.f32 %v4958_v41 }
0x3fa7   :  { %6693 = vlog2.f32 %v4956_v43 }
0x3fa8   :  { %6695 = vlog2.f32 %v4960_v35 }
0x3fac   :  { %v6688_v6 = vpop.eup %6687 }
0x3fad   :  { %v6690_v60 = vpop.eup %6689  ;;  %v4968_v24 = vmul.f32 0.6931472, %v6688_v6 }
0x3fae   :  { %v4966_v50 = vmul.f32 0.6931472, %v6690_v60 }
0x3faf   :  { %v4979_v49 = vadd.f32 %v4968_v24, %v4919_v46 }
0x3fb0   :  { %v6692_v38 = vpop.eup %6691  ;;  %v4978_v31 = vadd.f32 %v4966_v50, %v8931_v40  ;;  %v5067_v40 = vld [vmem:[%s8993_s5 + $0x20] sm:$0xff] }
0x3fb1   :  { %v6694_v19 = vpop.eup %6693  ;;  %v4972_v27 = vmul.f32 0.6931472, %v6692_v38  ;;  %v5058_v34 = vsub.f32 %v5047_v29, %v4979_v49 }
0x3fb2   :  { %v4970_v0 = vmul.f32 0.6931472, %v6694_v19  ;;  %v6696_v57 = vpop.eup %6695 }
0x3fb3   :  { %v4981_v22 = vadd.f32 %v4972_v27, %v8934_v12  ;;  %v4974_v55 = vmul.f32 0.6931472, %v6696_v57  ;;  %v5072_v10 = vmul.f32 %v5065_v17, %v5058_v34 }
0x3fb4   :  { %v4980_v56 = vadd.f32 %v4970_v0, %v8914_v36 }
0x3fb5   :  { %v5060_v23 = vsub.f32 %v5051_v39, %v4981_v22  ;;  %v5080_v5 = vsel %vm2256_vm12, %v5072_v10, 0.0  ;;  %v4982_v59 = vadd.f32 %v4974_v55, %v8918_v7 }
0x3fb7   :  { %v5074_v11 = vmul.f32 %v5067_v40, %v5060_v23 }
0x3fb9   :  { %v5084_v7 = vsel %vm2256_vm12, %v5074_v11, 0.0 }
0x4002   :  { %v5055_v33 = vpop.xlane.xlu1 %5054 }
0x4005   :  { %v4962_v32 = vpop.xlane.xlu0 %4961 }
0x4006   :  { %6697 = vlog2.f32 %v4962_v32 }
0x4009   :  { %v5045_v63 = vpop.xlane.xlu0 %5044 }
0x400a   :  { %v5057_v26 = vsub.f32 %v5045_v63, %v4978_v31 }
0x400c   :  { %v5071_v15 = vmul.f32 %v5064_v45, %v5057_v26 }
0x400d   :  { %v5049_v46 = vpop.xlane.xlu0 %5048 }
0x400e   :  { %v5078_v42 = vsel %vm2256_vm12, %v5071_v15, 0.0  ;;  %v5059_v12 = vsub.f32 %v5049_v46, %v4980_v56 }
0x400f   :  { %v5079_v14 = vadd.f32 %v5078_v42, %v5077_v54 }
0x4010   :  { %v6698_v36 = vpop.eup %6697  ;;  %v5073_v51 = vmul.f32 %v5066_v16, %v5059_v12 }
0x4011   :  { %v4976_v62 = vmul.f32 0.6931472, %v6698_v36  ;;  %v5081_v20 = vadd.f32 %v5080_v5, %v5079_v14  ;;  %v5053_v18 = vpop.xlane.xlu0 %5052 }
0x4012   :  { %v5082_v28 = vsel %vm2256_vm12, %v5073_v51, 0.0  ;;  %v5061_v47 = vsub.f32 %v5053_v18, %v4982_v59 }
0x4013   :  { %v4983_v25 = vadd.f32 %v4976_v62, %v8937_v2  ;;  %v5083_v1 = vadd.f32 %v5082_v28, %v5081_v20 }
0x4014   :  { %v5075_v21 = vmul.f32 %v5068_v53, %v5061_v47 }
0x4015   :  { %v5062_v48 = vsub.f32 %v5055_v33, %v4983_v25  ;;  %v5085_v58 = vadd.f32 %v5084_v7, %v5083_v1 }
0x4016   :  { %v5086_v13 = vsel %vm2256_vm12, %v5075_v21, 0.0 }
0x4017   :  { %v5076_v52 = vmul.f32 %v5069_v4, %v5062_v48  ;;  %v5087_v41 = vadd.f32 %v5086_v13, %v5085_v58 }
0x4019   :  { %v5088_v43 = vsel %vm2256_vm12, %v5076_v52, 0.0 }
0x401a   :  { %v5089_v35 = vadd.f32 %v5088_v43, %v5087_v41 }
0x401c   :  { %5090 = vst.msk [vmem:[%s9005_s17] sm:$0xff] %vm2256_vm12, %v5089_v35 }
0x401d   :  { %5095 = vsyncpa [#allocation8], 1 }
0x401e   :  { %5096 = vsyncpa [#allocation10], 1 }

</bundles_post_ra>
